<compile_context>
chip_gen: v7x
topology: tpu7x:2x2x1
jax: 0.10.0
libtpu: 0.0.40
codegen_flags: <defaults>
</compile_context>

<pallas_src>
import jax
import jax.numpy as jnp
from jax.experimental import pallas as pl
from jax.experimental.pallas import tpu as pltpu


MATMUL_DTYPE = jnp.bfloat16   # MXU operand dtype; accumulation is always f32.


# ----------------------------------------------------------------------------- #
# tiling helper
# ----------------------------------------------------------------------------- #
def _row_tile(m, row_bytes, budget_bytes=2 << 20):
    """Largest row tile that divides m and keeps one block under ~2 MiB."""
    for cand in (4096, 2048, 1024, 512, 256, 128, 64, 32, 16, 8):
        if cand <= m and m % cand == 0 and cand * row_bytes <= budget_bytes:
            assert m % cand == 0
            return cand
    return m  # tiny m: single full-size block (block == full dim is always legal)


# ----------------------------------------------------------------------------- #
# Pallas kernels
# ----------------------------------------------------------------------------- #
def _conv3x3_stats_kernel(xp_ref, w_ref, b_ref, y_ref, s_ref, q_ref):
    """3x3 conv (stride 1, input already zero-padded) + bias, fused with the
    per-channel sum / sum-of-squares needed by BatchNorm.

    xp_ref: (1, H+2, W+2, cin)  padded input image (one batch element), f32
    w_ref : (9, cin, cout)      taps ordered ky*3+kx, bf16
    b_ref : (1, cout)           bias, f32
    y_ref : (1, H, W, cout)     conv output (pre-BN), f32
    s_ref : (1, cout)           per-channel sum    (resident across batch grid)
    q_ref : (1, cout)           per-channel sum^2  (resident across batch grid)
    """
    H, W, cout = y_ref.shape[1], y_ref.shape[2], y_ref.shape[3]

    @pl.when(pl.program_id(0) == 0)
    def _():
        s_ref[...] = jnp.zeros_like(s_ref)
        q_ref[...] = jnp.zeros_like(q_ref)

    bias = b_ref[...]                              # (1, cout) f32
    taps = [w_ref[t] for t in range(9)]            # hoist small weight tiles

    def row_body(y, carry):
        ts, tq = carry
        acc = jnp.zeros((W, cout), jnp.float32)
        for ky in range(3):
            for kx in range(3):
                xwin = xp_ref[0, y + ky, pl.ds(kx, W), :].astype(MATMUL_DTYPE)
                acc = acc + jnp.dot(xwin, taps[ky * 3 + kx],
                                    preferred_element_type=jnp.float32)
        acc = acc + bias
        y_ref[0, y, :, :] = acc
        ts = ts + jnp.sum(acc, axis=0, keepdims=True)
        tq = tq + jnp.sum(acc * acc, axis=0, keepdims=True)
        return ts, tq

    zero = jnp.zeros((1, cout), jnp.float32)
    ts, tq = jax.lax.fori_loop(0, H, row_body, (zero, zero))
    s_ref[...] += ts
    q_ref[...] += tq


def _scale_shift_relu_kernel(x_ref, s_ref, t_ref, o_ref):
    # lane-dense BatchNorm(scale/shift) + ReLU
    o_ref[...] = jnp.maximum(x_ref[...] * s_ref[...] + t_ref[...], 0.0)


def _maxpool2x2_kernel(z_ref, o_ref):
    """2x2 max pool, stride 2.

    z_ref: (1, H, W/2, 2*c)  NHWC image with adjacent column pairs packed into
                             lanes (free reshape done by the caller)
    o_ref: (1, H/2, W/2, c)
    """
    hh, c = o_ref.shape[1], o_ref.shape[3]

    def row_body(oy, _):
        r0 = z_ref[0, 2 * oy, :, :]
        r1 = z_ref[0, 2 * oy + 1, :, :]
        m = jnp.maximum(r0, r1)                               # max over row pair
        m = jnp.maximum(m, pltpu.roll(m, shift=c, axis=1))    # max over col pair
        o_ref[0, oy, :, :] = m[:, :c]
        return 0

    jax.lax.fori_loop(0, hh, row_body, 0)


def _conv_transpose2x2_kernel(x_ref, w_ref, b_ref, o_ref):
    """ConvTranspose2d(kernel_size=2, stride=2), interleaved output.

    x_ref: (1, H, W, cin)        f32
    w_ref: (2, cin, 2*cout)      indexed [dy, ci, dx*cout + co], bf16
    b_ref: (1, 2*cout)           bias replicated over dx, f32
    o_ref: (1, H, 2, W, 2*cout)  element [n, y, dy, x, dx*cout+co]
    """
    H = x_ref.shape[1]
    bias = b_ref[...]
    w0 = w_ref[0]
    w1 = w_ref[1]

    def row_body(y, _):
        xrow = x_ref[0, y, :, :].astype(MATMUL_DTYPE)         # (W, cin)
        o_ref[0, y, 0, :, :] = (
            jnp.dot(xrow, w0, preferred_element_type=jnp.float32) + bias)
        o_ref[0, y, 1, :, :] = (
            jnp.dot(xrow, w1, preferred_element_type=jnp.float32) + bias)
        return 0

    jax.lax.fori_loop(0, H, row_body, 0)


def _matmul_bias_kernel(x_ref, w_ref, b_ref, o_ref):
    # 1x1 conv as row-tiled matmul: o = x @ w + b  (MXU, f32 accumulation)
    o_ref[...] = (
        jnp.dot(x_ref[...].astype(MATMUL_DTYPE), w_ref[...],
                preferred_element_type=jnp.float32)
        + b_ref[...]
    )


# ----------------------------------------------------------------------------- #
# layer wrappers
# ----------------------------------------------------------------------------- #
def conv3x3_with_stats(x_nhwc, w, b):
    """Conv2d(k=3, s=1, p=1) + bias, returning (y, channel_sum, channel_sumsq)."""
    n, h, wd, cin = x_nhwc.shape
    cout = w.shape[0]
    xp = jnp.pad(x_nhwc, ((0, 0), (1, 1), (1, 1), (0, 0)))
    wk = jnp.transpose(w, (2, 3, 1, 0)).reshape(9, cin, cout).astype(MATMUL_DTYPE)
    y, csum, csq = pl.pallas_call(
        _conv3x3_stats_kernel,
        out_shape=(
            jax.ShapeDtypeStruct((n, h, wd, cout), jnp.float32),
            jax.ShapeDtypeStruct((1, cout), jnp.float32),
            jax.ShapeDtypeStruct((1, cout), jnp.float32),
        ),
        grid=(n,),
        in_specs=[
            pl.BlockSpec((1, h + 2, wd + 2, cin), lambda i: (i, 0, 0, 0)),
            pl.BlockSpec((9, cin, cout), lambda i: (0, 0, 0)),
            pl.BlockSpec((1, cout), lambda i: (0, 0)),
        ],
        out_specs=(
            pl.BlockSpec((1, h, wd, cout), lambda i: (i, 0, 0, 0)),
            pl.BlockSpec((1, cout), lambda i: (0, 0)),
            pl.BlockSpec((1, cout), lambda i: (0, 0)),
        ),
        compiler_params=pltpu.CompilerParams(dimension_semantics=("arbitrary",)),
    )(xp, wk, b.reshape(1, cout))
    return y, csum, csq


def bn_relu_from_stats(y_nhwc, csum, csq, gamma, beta, eps=1e-5):
    """BatchNorm2d (training-mode batch stats from the fused conv) + ReLU."""
    n, h, wd, c = y_nhwc.shape
    m = n * h * wd
    mean = csum / m
    var = jnp.maximum(csq / m - mean * mean, 0.0)      # clamp: never negative
    scale = gamma.reshape(1, c) * jax.lax.rsqrt(var + eps)
    shift = beta.reshape(1, c) - mean * scale

    # lane-dense fold: (m, c) -> (m//r, r*c) with r*c a multiple of 128 (free reshape)
    r = 1
    for target in (512, 256, 128):
        if target % c == 0 and m % (target // c) == 0:
            r = target // c
            break
    mf = m // r
    xf = y_nhwc.reshape(mf, r * c)
    sf = jnp.tile(scale, (1, r))
    tf = jnp.tile(shift, (1, r))
    tm = _row_tile(mf, r * c * 4)
    out = pl.pallas_call(
        _scale_shift_relu_kernel,
        out_shape=jax.ShapeDtypeStruct((mf, r * c), jnp.float32),
        grid=(mf // tm,),
        in_specs=[
            pl.BlockSpec((tm, r * c), lambda i: (i, 0)),
            pl.BlockSpec((1, r * c), lambda i: (0, 0)),
            pl.BlockSpec((1, r * c), lambda i: (0, 0)),
        ],
        out_specs=pl.BlockSpec((tm, r * c), lambda i: (i, 0)),
        compiler_params=pltpu.CompilerParams(dimension_semantics=("parallel",)),
    )(xf, sf, tf)
    return out.reshape(n, h, wd, c)


def conv3x3_bn_relu(x_nhwc, w, b, gamma, beta):
    y, csum, csq = conv3x3_with_stats(x_nhwc, w, b)
    return bn_relu_from_stats(y, csum, csq, gamma, beta)


def maxpool2x2(x_nhwc):
    n, h, wd, c = x_nhwc.shape
    hh, wh = h // 2, wd // 2
    z = x_nhwc.reshape(n, h, wh, 2 * c)               # free contiguous reshape
    return pl.pallas_call(
        _maxpool2x2_kernel,
        out_shape=jax.ShapeDtypeStruct((n, hh, wh, c), jnp.float32),
        grid=(n,),
        in_specs=[pl.BlockSpec((1, h, wh, 2 * c), lambda i: (i, 0, 0, 0))],
        out_specs=pl.BlockSpec((1, hh, wh, c), lambda i: (i, 0, 0, 0)),
        compiler_params=pltpu.CompilerParams(dimension_semantics=("parallel",)),
    )(z)


def conv_transpose2x2(x_nhwc, w, b):
    """ConvTranspose2d(k=2, s=2).  w: (cin, cout, 2, 2) in PyTorch layout."""
    n, h, wd, cin = x_nhwc.shape
    cout = w.shape[1]
    wk = jnp.transpose(w, (2, 0, 3, 1)).reshape(2, cin, 2 * cout).astype(MATMUL_DTYPE)
    bk = jnp.tile(b.reshape(1, cout), (1, 2))         # (1, 2*cout) ordered (dx, co)
    y6 = pl.pallas_call(
        _conv_transpose2x2_kernel,
        out_shape=jax.ShapeDtypeStruct((n, h, 2, wd, 2 * cout), jnp.float32),
        grid=(n,),
        in_specs=[
            pl.BlockSpec((1, h, wd, cin), lambda i: (i, 0, 0, 0)),
            pl.BlockSpec((2, cin, 2 * cout), lambda i: (0, 0, 0)),
            pl.BlockSpec((1, 2 * cout), lambda i: (0, 0)),
        ],
        out_specs=pl.BlockSpec((1, h, 2, wd, 2 * cout), lambda i: (i, 0, 0, 0, 0)),
        compiler_params=pltpu.CompilerParams(dimension_semantics=("parallel",)),
    )(x_nhwc, wk, bk)
    # (n, h, 2, w, 2, cout) -> (n, 2h, 2w, cout): contiguous -> free reshape
    return y6.reshape(n, 2 * h, 2 * wd, cout)


def conv1x1(x_nhwc, w, b):
    """Conv2d(k=1).  w: (cout, cin, 1, 1)."""
    n, h, wd, cin = x_nhwc.shape
    cout = w.shape[0]
    m = n * h * wd
    xf = x_nhwc.reshape(m, cin)
    wmat = w.reshape(cout, cin).T.astype(MATMUL_DTYPE)
    tm = _row_tile(m, max(cin, cout) * 4)
    y = pl.pallas_call(
        _matmul_bias_kernel,
        out_shape=jax.ShapeDtypeStruct((m, cout), jnp.float32),
        grid=(m // tm,),
        in_specs=[
            pl.BlockSpec((tm, cin), lambda i: (i, 0)),
            pl.BlockSpec((cin, cout), lambda i: (0, 0)),
            pl.BlockSpec((1, cout), lambda i: (0, 0)),
        ],
        out_specs=pl.BlockSpec((tm, cout), lambda i: (i, 0)),
        compiler_params=pltpu.CompilerParams(dimension_semantics=("parallel",)),
    )(xf, wmat, b.reshape(1, cout))
    return y.reshape(n, h, wd, cout)


# ----------------------------------------------------------------------------- #
# parameter construction (deterministic, mirrors nn.Module __init__ shapes)
# ----------------------------------------------------------------------------- #
def _init_conv(key, cout, cin, kh, kw):
    k_w, k_b = jax.random.split(key)
    bound = float((cin * kh * kw) ** -0.5)
    w = jax.random.uniform(k_w, (cout, cin, kh, kw), jnp.float32, -bound, bound)
    b = jax.random.uniform(k_b, (cout,), jnp.float32, -bound, bound)
    return w, b


def _init_conv3x3_block(key, cin, cout):
    k1, k2 = jax.random.split(key)
    w1, b1 = _init_conv(k1, cout, cin, 3, 3)
    w2, b2 = _init_conv(k2, cout, cout, 3, 3)
    ones = jnp.ones((cout,), jnp.float32)
    zeros = jnp.zeros((cout,), jnp.float32)
    return dict(
        l1=dict(w=w1, b=b1, gamma=ones, beta=zeros),
        l2=dict(w=w2, b=b2, gamma=ones, beta=zeros),
    )


def init_unet_block(key, outer_nc, inner_nc, input_nc=None,
                    outermost=False, innermost=False):
    if input_nc is None:
        input_nc = outer_nc
    keys = jax.random.split(key, 4)
    p = dict(outermost=outermost, innermost=innermost)
    p["conv1"] = _init_conv3x3_block(keys[0], input_nc, inner_nc)
    if not innermost:
        p["conv2"] = _init_conv3x3_block(keys[1], inner_nc * 2, inner_nc)
    if outermost:
        w, b = _init_conv(keys[2], outer_nc, inner_nc, 1, 1)
        p["conv_out"] = dict(w=w, b=b)
    else:
        k_w, k_b = jax.random.split(keys[3])
        bound = float((inner_nc * 4) ** -0.5)
        wT = jax.random.uniform(k_w, (inner_nc, outer_nc, 2, 2), jnp.float32,
                                -bound, bound)
        bT = jax.random.uniform(k_b, (outer_nc,), jnp.float32, -bound, bound)
        p["up_conv"] = dict(w=wT, b=bT)
    return p


def _apply_conv3x3_block(p, x):
    x = conv3x3_bn_relu(x, p["l1"]["w"], p["l1"]["b"], p["l1"]["gamma"], p["l1"]["beta"])
    x = conv3x3_bn_relu(x, p["l2"]["w"], p["l2"]["b"], p["l2"]["gamma"], p["l2"]["beta"])
    return x


def apply_unet_block(p, x_nhwc, submodule=None):
    """Forward of UnetSkipConnectionBlock on NHWC tensors."""
    h = x_nhwc
    if not p["outermost"]:
        h = maxpool2x2(h)                    # down_maxpool
    h = _apply_conv3x3_block(p["conv1"], h)  # conv1
    if not p["innermost"]:
        h = submodule(h)                     # nested block
    if p["innermost"]:
        h = conv_transpose2x2(h, p["up_conv"]["w"], p["up_conv"]["b"])
    elif p["outermost"]:
        h = _apply_conv3x3_block(p["conv2"], h)
        h = conv1x1(h, p["conv_out"]["w"], p["conv_out"]["b"])
    else:
        h = _apply_conv3x3_block(p["conv2"], h)
        h = conv_transpose2x2(h, p["up_conv"]["w"], p["up_conv"]["b"])
    if not p["outermost"]:
        # torch.cat([input, output], dim=1) in NCHW == concat on last axis in NHWC
        h = jnp.concatenate([x_nhwc, h], axis=-1)
    return h


def unet_forward_nchw(p_outer, p_mid, p_inner, x_nchw):
    x_nhwc = jnp.transpose(x_nchw, (0, 2, 3, 1))
    inner_fn = lambda t: apply_unet_block(p_inner, t)
    mid_fn = lambda t: apply_unet_block(p_mid, t, submodule=inner_fn)
    out_nhwc = apply_unet_block(p_outer, x_nhwc, submodule=mid_fn)
    return jnp.transpose(out_nhwc, (0, 3, 1, 2))


# ----------------------------------------------------------------------------- #
if __name__ == "__main__":
    key = jax.random.PRNGKey(0)
    kx, k1, k2, k3 = jax.random.split(key, 4)

    # NCHW input, as in PyTorch: batch=2, channels=4, 16x16 spatial
    x = jax.random.normal(kx, (2, 4, 16, 16), jnp.float32)

    # 3-level U-Net: outermost(4->8) -> middle(8->16) -> innermost(16->32)
    p_inner = init_unet_block(k1, outer_nc=16, inner_nc=32, innermost=True)
    p_mid = init_unet_block(k2, outer_nc=8, inner_nc=16)
    p_outer = init_unet_block(k3, outer_nc=4, inner_nc=8, input_nc=4, outermost=True)

    fwd = jax.jit(lambda inp: unet_forward_nchw(p_outer, p_mid, p_inner, inp))
    out = fwd(x)
    jax.block_until_ready(out)
    assert out.shape == (2, 4, 16, 16), out.shape
    assert out.dtype == jnp.float32
    assert bool(jnp.isfinite(out).all())
    print("KERNEL_OK")
</pallas_src>

<mosaic_0001>
module attributes {stable_mosaic.version = 11 : i64} {
  func.func @_conv3x3_stats_kernel(%arg0: i32, %arg1: memref<1x18x18x4xf32, #tpu.memory_space<vmem>>, %arg2: memref<9x4x8xbf16, #tpu.memory_space<vmem>>, %arg3: memref<1x8xf32, #tpu.memory_space<vmem>>, %arg4: memref<1x16x16x8xf32, #tpu.memory_space<vmem>>, %arg5: memref<1x8xf32, #tpu.memory_space<vmem>>, %arg6: memref<1x8xf32, #tpu.memory_space<vmem>>) attributes {dimension_semantics = [#tpu.dimension_semantics<arbitrary>], iteration_bounds = array<i64: 2>, scalar_prefetch = 0 : i64, scratch_operands = 0 : i64, tpu.core_type = #tpu.core_type<tc>, window_params = [{transform_indices = @transform_0, window_bounds = array<i64: 1, 18, 18, 4>}, {pipeline_mode = #tpu.pipeline_mode<synchronous>, transform_indices = @transform_1, window_bounds = array<i64: 9, 4, 8>}, {pipeline_mode = #tpu.pipeline_mode<synchronous>, transform_indices = @transform_2, window_bounds = array<i64: 1, 8>}, {transform_indices = @transform_3, window_bounds = array<i64: 1, 16, 16, 8>}, {pipeline_mode = #tpu.pipeline_mode<synchronous>, transform_indices = @transform_4, window_bounds = array<i64: 1, 8>}, {pipeline_mode = #tpu.pipeline_mode<synchronous>, transform_indices = @transform_5, window_bounds = array<i64: 1, 8>}]} {
    %c0_i32 = arith.constant 0 : i32
    %0 = arith.cmpi eq, %arg0, %c0_i32 : i32
    %1 = arith.extui %0 : i1 to i32
    %c0_i32_0 = arith.constant 0 : i32
    %2 = arith.cmpi ne, %1, %c0_i32_0 : i32
    scf.if %2 {
      %cst_31 = arith.constant 0.000000e+00 : f32
      %31 = vector.broadcast %cst_31 : f32 to vector<1x8xf32>
      %c0_32 = arith.constant 0 : index
      %c0_33 = arith.constant 0 : index
      %32 = vector.load %arg5[%c0_32, %c0_33] : memref<1x8xf32, #tpu.memory_space<vmem>>, vector<1x8xf32>
      tpu.vector_store %arg5[%c0_32, %c0_33], %31 {strides = array<i32>} : memref<1x8xf32, #tpu.memory_space<vmem>>, vector<1x8xf32>,
      %cst_34 = arith.constant 0.000000e+00 : f32
      %33 = vector.broadcast %cst_34 : f32 to vector<1x8xf32>
      %c0_35 = arith.constant 0 : index
      %c0_36 = arith.constant 0 : index
      %34 = vector.load %arg6[%c0_35, %c0_36] : memref<1x8xf32, #tpu.memory_space<vmem>>, vector<1x8xf32>
      tpu.vector_store %arg6[%c0_35, %c0_36], %33 {strides = array<i32>} : memref<1x8xf32, #tpu.memory_space<vmem>>, vector<1x8xf32>,
    } else {
    }
    %c0 = arith.constant 0 : index
    %c0_1 = arith.constant 0 : index
    %3 = vector.load %arg3[%c0, %c0_1] : memref<1x8xf32, #tpu.memory_space<vmem>>, vector<1x8xf32>
    %c0_2 = arith.constant 0 : index
    %c0_3 = arith.constant 0 : index
    %c0_4 = arith.constant 0 : index
    %4 = vector.load %arg2[%c0_2, %c0_3, %c0_4] : memref<9x4x8xbf16, #tpu.memory_space<vmem>>, vector<1x4x8xbf16>
    %5 = vector.shape_cast %4 : vector<1x4x8xbf16> to vector<4x8xbf16>
    %c1 = arith.constant 1 : index
    %c0_5 = arith.constant 0 : index
    %c0_6 = arith.constant 0 : index
    %6 = vector.load %arg2[%c1, %c0_5, %c0_6] : memref<9x4x8xbf16, #tpu.memory_space<vmem>>, vector<1x4x8xbf16>
    %7 = vector.shape_cast %6 : vector<1x4x8xbf16> to vector<4x8xbf16>
    %c2 = arith.constant 2 : index
    %c0_7 = arith.constant 0 : index
    %c0_8 = arith.constant 0 : index
    %8 = vector.load %arg2[%c2, %c0_7, %c0_8] : memref<9x4x8xbf16, #tpu.memory_space<vmem>>, vector<1x4x8xbf16>
    %9 = vector.shape_cast %8 : vector<1x4x8xbf16> to vector<4x8xbf16>
    %c3 = arith.constant 3 : index
    %c0_9 = arith.constant 0 : index
    %c0_10 = arith.constant 0 : index
    %10 = vector.load %arg2[%c3, %c0_9, %c0_10] : memref<9x4x8xbf16, #tpu.memory_space<vmem>>, vector<1x4x8xbf16>
    %11 = vector.shape_cast %10 : vector<1x4x8xbf16> to vector<4x8xbf16>
    %c4 = arith.constant 4 : index
    %c0_11 = arith.constant 0 : index
    %c0_12 = arith.constant 0 : index
    %12 = vector.load %arg2[%c4, %c0_11, %c0_12] : memref<9x4x8xbf16, #tpu.memory_space<vmem>>, vector<1x4x8xbf16>
    %13 = vector.shape_cast %12 : vector<1x4x8xbf16> to vector<4x8xbf16>
    %c5 = arith.constant 5 : index
    %c0_13 = arith.constant 0 : index
    %c0_14 = arith.constant 0 : index
    %14 = vector.load %arg2[%c5, %c0_13, %c0_14] : memref<9x4x8xbf16, #tpu.memory_space<vmem>>, vector<1x4x8xbf16>
    %15 = vector.shape_cast %14 : vector<1x4x8xbf16> to vector<4x8xbf16>
    %c6 = arith.constant 6 : index
    %c0_15 = arith.constant 0 : index
    %c0_16 = arith.constant 0 : index
    %16 = vector.load %arg2[%c6, %c0_15, %c0_16] : memref<9x4x8xbf16, #tpu.memory_space<vmem>>, vector<1x4x8xbf16>
    %17 = vector.shape_cast %16 : vector<1x4x8xbf16> to vector<4x8xbf16>
    %c7 = arith.constant 7 : index
    %c0_17 = arith.constant 0 : index
    %c0_18 = arith.constant 0 : index
    %18 = vector.load %arg2[%c7, %c0_17, %c0_18] : memref<9x4x8xbf16, #tpu.memory_space<vmem>>, vector<1x4x8xbf16>
    %19 = vector.shape_cast %18 : vector<1x4x8xbf16> to vector<4x8xbf16>
    %c8 = arith.constant 8 : index
    %c0_19 = arith.constant 0 : index
    %c0_20 = arith.constant 0 : index
    %20 = vector.load %arg2[%c8, %c0_19, %c0_20] : memref<9x4x8xbf16, #tpu.memory_space<vmem>>, vector<1x4x8xbf16>
    %21 = vector.shape_cast %20 : vector<1x4x8xbf16> to vector<4x8xbf16>
    %cst = arith.constant 0.000000e+00 : f32
    %22 = vector.broadcast %cst : f32 to vector<1x8xf32>
    %c0_i32_21 = arith.constant 0 : i32
    %c16_i32 = arith.constant 16 : i32
    %23 = arith.addi %c0_i32_21, %c16_i32 : i32
    %c1_i32 = arith.constant 1 : i32
    %24:2 = scf.for %arg7 = %c0_i32_21 to %23 step %c1_i32 iter_args(%arg8 = %22, %arg9 = %22) -> (vector<1x8xf32>, vector<1x8xf32>)  : i32 {
      %cst_31 = arith.constant 0.000000e+00 : f32
      %31 = vector.broadcast %cst_31 : f32 to vector<16x8xf32>
      %c0_i32_32 = arith.constant 0 : i32
      %32 = arith.addi %arg7, %c0_i32_32 : i32
      %c0_33 = arith.constant 0 : index
      %33 = arith.index_cast %32 : i32 to index
      %c0_34 = arith.constant 0 : index
      %c0_35 = arith.constant 0 : index
      %34 = vector.load %arg1[%c0_33, %33, %c0_34, %c0_35] : memref<1x18x18x4xf32, #tpu.memory_space<vmem>>, vector<1x1x16x4xf32>
      %35 = vector.shape_cast %34 : vector<1x1x16x4xf32> to vector<16x4xf32>
      %36 = arith.truncf %35 : vector<16x4xf32> to vector<16x4xbf16>
      %cst_36 = arith.constant dense<0.000000e+00> : vector<16x8xf32>
      %37 = tpu.matmul %36, %5, %cst_36 {dimension_numbers = #tpu.dot_dimension_numbers<[1], [0], [0], [1], [0, 0, 1, 1], [], []>} : vector<16x4xbf16>, vector<4x8xbf16>, vector<16x8xf32> -> vector<16x8xf32>
      %38 = arith.addf %31, %37 : vector<16x8xf32>
      %c0_i32_37 = arith.constant 0 : i32
      %39 = arith.addi %arg7, %c0_i32_37 : i32
      %c0_38 = arith.constant 0 : index
      %40 = arith.index_cast %39 : i32 to index
      %c1_39 = arith.constant 1 : index
      %c0_40 = arith.constant 0 : index
      %41 = vector.load %arg1[%c0_38, %40, %c1_39, %c0_40] : memref<1x18x18x4xf32, #tpu.memory_space<vmem>>, vector<1x1x16x4xf32>
      %42 = vector.shape_cast %41 : vector<1x1x16x4xf32> to vector<16x4xf32>
      %43 = arith.truncf %42 : vector<16x4xf32> to vector<16x4xbf16>
      %cst_41 = arith.constant dense<0.000000e+00> : vector<16x8xf32>
      %44 = tpu.matmul %43, %7, %cst_41 {dimension_numbers = #tpu.dot_dimension_numbers<[1], [0], [0], [1], [0, 0, 1, 1], [], []>} : vector<16x4xbf16>, vector<4x8xbf16>, vector<16x8xf32> -> vector<16x8xf32>
      %45 = arith.addf %38, %44 : vector<16x8xf32>
      %c0_i32_42 = arith.constant 0 : i32
      %46 = arith.addi %arg7, %c0_i32_42 : i32
      %c0_43 = arith.constant 0 : index
      %47 = arith.index_cast %46 : i32 to index
      %c2_44 = arith.constant 2 : index
      %c0_45 = arith.constant 0 : index
      %48 = vector.load %arg1[%c0_43, %47, %c2_44, %c0_45] : memref<1x18x18x4xf32, #tpu.memory_space<vmem>>, vector<1x1x16x4xf32>
      %49 = vector.shape_cast %48 : vector<1x1x16x4xf32> to vector<16x4xf32>
      %50 = arith.truncf %49 : vector<16x4xf32> to vector<16x4xbf16>
      %cst_46 = arith.constant dense<0.000000e+00> : vector<16x8xf32>
      %51 = tpu.matmul %50, %9, %cst_46 {dimension_numbers = #tpu.dot_dimension_numbers<[1], [0], [0], [1], [0, 0, 1, 1], [], []>} : vector<16x4xbf16>, vector<4x8xbf16>, vector<16x8xf32> -> vector<16x8xf32>
      %52 = arith.addf %45, %51 : vector<16x8xf32>
      %c1_i32_47 = arith.constant 1 : i32
      %53 = arith.addi %arg7, %c1_i32_47 : i32
      %c0_48 = arith.constant 0 : index
      %54 = arith.index_cast %53 : i32 to index
      %c0_49 = arith.constant 0 : index
      %c0_50 = arith.constant 0 : index
      %55 = vector.load %arg1[%c0_48, %54, %c0_49, %c0_50] : memref<1x18x18x4xf32, #tpu.memory_space<vmem>>, vector<1x1x16x4xf32>
      %56 = vector.shape_cast %55 : vector<1x1x16x4xf32> to vector<16x4xf32>
      %57 = arith.truncf %56 : vector<16x4xf32> to vector<16x4xbf16>
      %cst_51 = arith.constant dense<0.000000e+00> : vector<16x8xf32>
      %58 = tpu.matmul %57, %11, %cst_51 {dimension_numbers = #tpu.dot_dimension_numbers<[1], [0], [0], [1], [0, 0, 1, 1], [], []>} : vector<16x4xbf16>, vector<4x8xbf16>, vector<16x8xf32> -> vector<16x8xf32>
      %59 = arith.addf %52, %58 : vector<16x8xf32>
      %c1_i32_52 = arith.constant 1 : i32
      %60 = arith.addi %arg7, %c1_i32_52 : i32
      %c0_53 = arith.constant 0 : index
      %61 = arith.index_cast %60 : i32 to index
      %c1_54 = arith.constant 1 : index
      %c0_55 = arith.constant 0 : index
      %62 = vector.load %arg1[%c0_53, %61, %c1_54, %c0_55] : memref<1x18x18x4xf32, #tpu.memory_space<vmem>>, vector<1x1x16x4xf32>
      %63 = vector.shape_cast %62 : vector<1x1x16x4xf32> to vector<16x4xf32>
      %64 = arith.truncf %63 : vector<16x4xf32> to vector<16x4xbf16>
      %cst_56 = arith.constant dense<0.000000e+00> : vector<16x8xf32>
      %65 = tpu.matmul %64, %13, %cst_56 {dimension_numbers = #tpu.dot_dimension_numbers<[1], [0], [0], [1], [0, 0, 1, 1], [], []>} : vector<16x4xbf16>, vector<4x8xbf16>, vector<16x8xf32> -> vector<16x8xf32>
      %66 = arith.addf %59, %65 : vector<16x8xf32>
      %c1_i32_57 = arith.constant 1 : i32
      %67 = arith.addi %arg7, %c1_i32_57 : i32
      %c0_58 = arith.constant 0 : index
      %68 = arith.index_cast %67 : i32 to index
      %c2_59 = arith.constant 2 : index
      %c0_60 = arith.constant 0 : index
      %69 = vector.load %arg1[%c0_58, %68, %c2_59, %c0_60] : memref<1x18x18x4xf32, #tpu.memory_space<vmem>>, vector<1x1x16x4xf32>
      %70 = vector.shape_cast %69 : vector<1x1x16x4xf32> to vector<16x4xf32>
      %71 = arith.truncf %70 : vector<16x4xf32> to vector<16x4xbf16>
      %cst_61 = arith.constant dense<0.000000e+00> : vector<16x8xf32>
      %72 = tpu.matmul %71, %15, %cst_61 {dimension_numbers = #tpu.dot_dimension_numbers<[1], [0], [0], [1], [0, 0, 1, 1], [], []>} : vector<16x4xbf16>, vector<4x8xbf16>, vector<16x8xf32> -> vector<16x8xf32>
      %73 = arith.addf %66, %72 : vector<16x8xf32>
      %c2_i32 = arith.constant 2 : i32
      %74 = arith.addi %arg7, %c2_i32 : i32
      %c0_62 = arith.constant 0 : index
      %75 = arith.index_cast %74 : i32 to index
      %c0_63 = arith.constant 0 : index
      %c0_64 = arith.constant 0 : index
      %76 = vector.load %arg1[%c0_62, %75, %c0_63, %c0_64] : memref<1x18x18x4xf32, #tpu.memory_space<vmem>>, vector<1x1x16x4xf32>
      %77 = vector.shape_cast %76 : vector<1x1x16x4xf32> to vector<16x4xf32>
      %78 = arith.truncf %77 : vector<16x4xf32> to vector<16x4xbf16>
      %cst_65 = arith.constant dense<0.000000e+00> : vector<16x8xf32>
      %79 = tpu.matmul %78, %17, %cst_65 {dimension_numbers = #tpu.dot_dimension_numbers<[1], [0], [0], [1], [0, 0, 1, 1], [], []>} : vector<16x4xbf16>, vector<4x8xbf16>, vector<16x8xf32> -> vector<16x8xf32>
      %80 = arith.addf %73, %79 : vector<16x8xf32>
      %c2_i32_66 = arith.constant 2 : i32
      %81 = arith.addi %arg7, %c2_i32_66 : i32
      %c0_67 = arith.constant 0 : index
      %82 = arith.index_cast %81 : i32 to index
      %c1_68 = arith.constant 1 : index
      %c0_69 = arith.constant 0 : index
      %83 = vector.load %arg1[%c0_67, %82, %c1_68, %c0_69] : memref<1x18x18x4xf32, #tpu.memory_space<vmem>>, vector<1x1x16x4xf32>
      %84 = vector.shape_cast %83 : vector<1x1x16x4xf32> to vector<16x4xf32>
      %85 = arith.truncf %84 : vector<16x4xf32> to vector<16x4xbf16>
      %cst_70 = arith.constant dense<0.000000e+00> : vector<16x8xf32>
      %86 = tpu.matmul %85, %19, %cst_70 {dimension_numbers = #tpu.dot_dimension_numbers<[1], [0], [0], [1], [0, 0, 1, 1], [], []>} : vector<16x4xbf16>, vector<4x8xbf16>, vector<16x8xf32> -> vector<16x8xf32>
      %87 = arith.addf %80, %86 : vector<16x8xf32>
      %c2_i32_71 = arith.constant 2 : i32
      %88 = arith.addi %arg7, %c2_i32_71 : i32
      %c0_72 = arith.constant 0 : index
      %89 = arith.index_cast %88 : i32 to index
      %c2_73 = arith.constant 2 : index
      %c0_74 = arith.constant 0 : index
      %90 = vector.load %arg1[%c0_72, %89, %c2_73, %c0_74] : memref<1x18x18x4xf32, #tpu.memory_space<vmem>>, vector<1x1x16x4xf32>
      %91 = vector.shape_cast %90 : vector<1x1x16x4xf32> to vector<16x4xf32>
      %92 = arith.truncf %91 : vector<16x4xf32> to vector<16x4xbf16>
      %cst_75 = arith.constant dense<0.000000e+00> : vector<16x8xf32>
      %93 = tpu.matmul %92, %21, %cst_75 {dimension_numbers = #tpu.dot_dimension_numbers<[1], [0], [0], [1], [0, 0, 1, 1], [], []>} : vector<16x4xbf16>, vector<4x8xbf16>, vector<16x8xf32> -> vector<16x8xf32>
      %94 = arith.addf %87, %93 : vector<16x8xf32>
      %95 = vector.broadcast %3 : vector<1x8xf32> to vector<16x8xf32>
      %96 = arith.addf %94, %95 : vector<16x8xf32>
      %c0_76 = arith.constant 0 : index
      %97 = arith.index_cast %arg7 : i32 to index
      %c0_77 = arith.constant 0 : index
      %c0_78 = arith.constant 0 : index
      %98 = vector.load %arg4[%c0_76, %97, %c0_77, %c0_78] : memref<1x16x16x8xf32, #tpu.memory_space<vmem>>, vector<1x1x16x8xf32>
      %99 = vector.shape_cast %98 : vector<1x1x16x8xf32> to vector<16x8xf32>
      %100 = vector.shape_cast %96 : vector<16x8xf32> to vector<1x1x16x8xf32>
      tpu.vector_store %arg4[%c0_76, %97, %c0_77, %c0_78], %100 {strides = array<i32>} : memref<1x16x16x8xf32, #tpu.memory_space<vmem>>, vector<1x1x16x8xf32>,
      %cst_79 = arith.constant dense<0.000000e+00> : vector<8xf32>
      %101 = vector.multi_reduction <add>, %96, %cst_79 [0] : vector<16x8xf32> to vector<8xf32>
      %102 = vector.shape_cast %101 : vector<8xf32> to vector<1x8xf32>
      %103 = arith.addf %arg8, %102 : vector<1x8xf32>
      %104 = arith.mulf %96, %96 : vector<16x8xf32>
      %cst_80 = arith.constant dense<0.000000e+00> : vector<8xf32>
      %105 = vector.multi_reduction <add>, %104, %cst_80 [0] : vector<16x8xf32> to vector<8xf32>
      %106 = vector.shape_cast %105 : vector<8xf32> to vector<1x8xf32>
      %107 = arith.addf %arg9, %106 : vector<1x8xf32>
      scf.yield %103, %107 : vector<1x8xf32>, vector<1x8xf32>
    }
    %c16_i32_22 = arith.constant 16 : i32
    %c0_23 = arith.constant 0 : index
    %c0_24 = arith.constant 0 : index
    %25 = vector.load %arg5[%c0_23, %c0_24] : memref<1x8xf32, #tpu.memory_space<vmem>>, vector<1x8xf32>
    %26 = arith.addf %25, %24#0 : vector<1x8xf32>
    %c0_25 = arith.constant 0 : index
    %c0_26 = arith.constant 0 : index
    %27 = vector.load %arg5[%c0_25, %c0_26] : memref<1x8xf32, #tpu.memory_space<vmem>>, vector<1x8xf32>
    tpu.vector_store %arg5[%c0_25, %c0_26], %26 {strides = array<i32>} : memref<1x8xf32, #tpu.memory_space<vmem>>, vector<1x8xf32>,
    %c0_27 = arith.constant 0 : index
    %c0_28 = arith.constant 0 : index
    %28 = vector.load %arg6[%c0_27, %c0_28] : memref<1x8xf32, #tpu.memory_space<vmem>>, vector<1x8xf32>
    %29 = arith.addf %28, %24#1 : vector<1x8xf32>
    %c0_29 = arith.constant 0 : index
    %c0_30 = arith.constant 0 : index
    %30 = vector.load %arg6[%c0_29, %c0_30] : memref<1x8xf32, #tpu.memory_space<vmem>>, vector<1x8xf32>
    tpu.vector_store %arg6[%c0_29, %c0_30], %29 {strides = array<i32>} : memref<1x8xf32, #tpu.memory_space<vmem>>, vector<1x8xf32>,
    return
  }
  func.func @transform_0(%arg0: i32) -> (i32, i32, i32, i32) {
    %c0_i32 = arith.constant 0 : i32
    %c0_i32_0 = arith.constant 0 : i32
    %c0_i32_1 = arith.constant 0 : i32
    %c0_i32_2 = arith.constant 0 : i32
    return %arg0, %c0_i32, %c0_i32_0, %c0_i32_1 : i32, i32, i32, i32
  }
  func.func @transform_1(%arg0: i32) -> (i32, i32, i32) {
    %c0_i32 = arith.constant 0 : i32
    %c0_i32_0 = arith.constant 0 : i32
    %c0_i32_1 = arith.constant 0 : i32
    %c0_i32_2 = arith.constant 0 : i32
    return %c0_i32, %c0_i32_0, %c0_i32_1 : i32, i32, i32
  }
  func.func @transform_2(%arg0: i32) -> (i32, i32) {
    %c0_i32 = arith.constant 0 : i32
    %c0_i32_0 = arith.constant 0 : i32
    %c0_i32_1 = arith.constant 0 : i32
    return %c0_i32, %c0_i32_0 : i32, i32
  }
  func.func @transform_3(%arg0: i32) -> (i32, i32, i32, i32) {
    %c0_i32 = arith.constant 0 : i32
    %c0_i32_0 = arith.constant 0 : i32
    %c0_i32_1 = arith.constant 0 : i32
    %c0_i32_2 = arith.constant 0 : i32
    return %arg0, %c0_i32, %c0_i32_0, %c0_i32_1 : i32, i32, i32, i32
  }
  func.func @transform_4(%arg0: i32) -> (i32, i32) {
    %c0_i32 = arith.constant 0 : i32
    %c0_i32_0 = arith.constant 0 : i32
    %c0_i32_1 = arith.constant 0 : i32
    return %c0_i32, %c0_i32_0 : i32, i32
  }
  func.func @transform_5(%arg0: i32) -> (i32, i32) {
    %c0_i32 = arith.constant 0 : i32
    %c0_i32_0 = arith.constant 0 : i32
    %c0_i32_1 = arith.constant 0 : i32
    return %c0_i32, %c0_i32_0 : i32, i32
  }
}

module attributes {stable_mosaic.version = 11 : i64} {
  func.func @_scale_shift_relu_kernel(%arg0: i32, %arg1: memref<8x512xf32, #tpu.memory_space<vmem>>, %arg2: memref<1x512xf32, #tpu.memory_space<vmem>>, %arg3: memref<1x512xf32, #tpu.memory_space<vmem>>, %arg4: memref<8x512xf32, #tpu.memory_space<vmem>>) attributes {dimension_semantics = [#tpu.dimension_semantics<parallel>], iteration_bounds = array<i64: 1>, scalar_prefetch = 0 : i64, scratch_operands = 0 : i64, tpu.core_type = #tpu.core_type<tc>, window_params = [{transform_indices = @transform_0, window_bounds = array<i64: 8, 512>}, {pipeline_mode = #tpu.pipeline_mode<synchronous>, transform_indices = @transform_1, window_bounds = array<i64: 1, 512>}, {pipeline_mode = #tpu.pipeline_mode<synchronous>, transform_indices = @transform_2, window_bounds = array<i64: 1, 512>}, {transform_indices = @transform_3, window_bounds = array<i64: 8, 512>}]} {
    %c0 = arith.constant 0 : index
    %c0_0 = arith.constant 0 : index
    %0 = vector.load %arg1[%c0, %c0_0] : memref<8x512xf32, #tpu.memory_space<vmem>>, vector<8x512xf32>
    %c0_1 = arith.constant 0 : index
    %c0_2 = arith.constant 0 : index
    %1 = vector.load %arg2[%c0_1, %c0_2] : memref<1x512xf32, #tpu.memory_space<vmem>>, vector<1x512xf32>
    %2 = vector.broadcast %1 : vector<1x512xf32> to vector<8x512xf32>
    %3 = arith.mulf %0, %2 : vector<8x512xf32>
    %c0_3 = arith.constant 0 : index
    %c0_4 = arith.constant 0 : index
    %4 = vector.load %arg3[%c0_3, %c0_4] : memref<1x512xf32, #tpu.memory_space<vmem>>, vector<1x512xf32>
    %5 = vector.broadcast %4 : vector<1x512xf32> to vector<8x512xf32>
    %6 = arith.addf %3, %5 : vector<8x512xf32>
    %cst = arith.constant 0.000000e+00 : f32
    %7 = vector.broadcast %cst : f32 to vector<8x512xf32>
    %8 = arith.maximumf %6, %7 : vector<8x512xf32>
    %c0_5 = arith.constant 0 : index
    %c0_6 = arith.constant 0 : index
    %9 = vector.load %arg4[%c0_5, %c0_6] : memref<8x512xf32, #tpu.memory_space<vmem>>, vector<8x512xf32>
    tpu.vector_store %arg4[%c0_5, %c0_6], %8 {strides = array<i32>} : memref<8x512xf32, #tpu.memory_space<vmem>>, vector<8x512xf32>,
    return
  }
  func.func @transform_0(%arg0: i32) -> (i32, i32) {
    %c0_i32 = arith.constant 0 : i32
    %c0_i32_0 = arith.constant 0 : i32
    return %arg0, %c0_i32 : i32, i32
  }
  func.func @transform_1(%arg0: i32) -> (i32, i32) {
    %c0_i32 = arith.constant 0 : i32
    %c0_i32_0 = arith.constant 0 : i32
    %c0_i32_1 = arith.constant 0 : i32
    return %c0_i32, %c0_i32_0 : i32, i32
  }
  func.func @transform_2(%arg0: i32) -> (i32, i32) {
    %c0_i32 = arith.constant 0 : i32
    %c0_i32_0 = arith.constant 0 : i32
    %c0_i32_1 = arith.constant 0 : i32
    return %c0_i32, %c0_i32_0 : i32, i32
  }
  func.func @transform_3(%arg0: i32) -> (i32, i32) {
    %c0_i32 = arith.constant 0 : i32
    %c0_i32_0 = arith.constant 0 : i32
    return %arg0, %c0_i32 : i32, i32
  }
}

module attributes {stable_mosaic.version = 11 : i64} {
  func.func @_conv3x3_stats_kernel(%arg0: i32, %arg1: memref<1x18x18x8xf32, #tpu.memory_space<vmem>>, %arg2: memref<9x8x8xbf16, #tpu.memory_space<vmem>>, %arg3: memref<1x8xf32, #tpu.memory_space<vmem>>, %arg4: memref<1x16x16x8xf32, #tpu.memory_space<vmem>>, %arg5: memref<1x8xf32, #tpu.memory_space<vmem>>, %arg6: memref<1x8xf32, #tpu.memory_space<vmem>>) attributes {dimension_semantics = [#tpu.dimension_semantics<arbitrary>], iteration_bounds = array<i64: 2>, scalar_prefetch = 0 : i64, scratch_operands = 0 : i64, tpu.core_type = #tpu.core_type<tc>, window_params = [{transform_indices = @transform_0, window_bounds = array<i64: 1, 18, 18, 8>}, {pipeline_mode = #tpu.pipeline_mode<synchronous>, transform_indices = @transform_1, window_bounds = array<i64: 9, 8, 8>}, {pipeline_mode = #tpu.pipeline_mode<synchronous>, transform_indices = @transform_2, window_bounds = array<i64: 1, 8>}, {transform_indices = @transform_3, window_bounds = array<i64: 1, 16, 16, 8>}, {pipeline_mode = #tpu.pipeline_mode<synchronous>, transform_indices = @transform_4, window_bounds = array<i64: 1, 8>}, {pipeline_mode = #tpu.pipeline_mode<synchronous>, transform_indices = @transform_5, window_bounds = array<i64: 1, 8>}]} {
    %c0_i32 = arith.constant 0 : i32
    %0 = arith.cmpi eq, %arg0, %c0_i32 : i32
    %1 = arith.extui %0 : i1 to i32
    %c0_i32_0 = arith.constant 0 : i32
    %2 = arith.cmpi ne, %1, %c0_i32_0 : i32
    scf.if %2 {
      %cst_31 = arith.constant 0.000000e+00 : f32
      %31 = vector.broadcast %cst_31 : f32 to vector<1x8xf32>
      %c0_32 = arith.constant 0 : index
      %c0_33 = arith.constant 0 : index
      %32 = vector.load %arg5[%c0_32, %c0_33] : memref<1x8xf32, #tpu.memory_space<vmem>>, vector<1x8xf32>
      tpu.vector_store %arg5[%c0_32, %c0_33], %31 {strides = array<i32>} : memref<1x8xf32, #tpu.memory_space<vmem>>, vector<1x8xf32>,
      %cst_34 = arith.constant 0.000000e+00 : f32
      %33 = vector.broadcast %cst_34 : f32 to vector<1x8xf32>
      %c0_35 = arith.constant 0 : index
      %c0_36 = arith.constant 0 : index
      %34 = vector.load %arg6[%c0_35, %c0_36] : memref<1x8xf32, #tpu.memory_space<vmem>>, vector<1x8xf32>
      tpu.vector_store %arg6[%c0_35, %c0_36], %33 {strides = array<i32>} : memref<1x8xf32, #tpu.memory_space<vmem>>, vector<1x8xf32>,
    } else {
    }
    %c0 = arith.constant 0 : index
    %c0_1 = arith.constant 0 : index
    %3 = vector.load %arg3[%c0, %c0_1] : memref<1x8xf32, #tpu.memory_space<vmem>>, vector<1x8xf32>
    %c0_2 = arith.constant 0 : index
    %c0_3 = arith.constant 0 : index
    %c0_4 = arith.constant 0 : index
    %4 = vector.load %arg2[%c0_2, %c0_3, %c0_4] : memref<9x8x8xbf16, #tpu.memory_space<vmem>>, vector<1x8x8xbf16>
    %5 = vector.shape_cast %4 : vector<1x8x8xbf16> to vector<8x8xbf16>
    %c1 = arith.constant 1 : index
    %c0_5 = arith.constant 0 : index
    %c0_6 = arith.constant 0 : index
    %6 = vector.load %arg2[%c1, %c0_5, %c0_6] : memref<9x8x8xbf16, #tpu.memory_space<vmem>>, vector<1x8x8xbf16>
    %7 = vector.shape_cast %6 : vector<1x8x8xbf16> to vector<8x8xbf16>
    %c2 = arith.constant 2 : index
    %c0_7 = arith.constant 0 : index
    %c0_8 = arith.constant 0 : index
    %8 = vector.load %arg2[%c2, %c0_7, %c0_8] : memref<9x8x8xbf16, #tpu.memory_space<vmem>>, vector<1x8x8xbf16>
    %9 = vector.shape_cast %8 : vector<1x8x8xbf16> to vector<8x8xbf16>
    %c3 = arith.constant 3 : index
    %c0_9 = arith.constant 0 : index
    %c0_10 = arith.constant 0 : index
    %10 = vector.load %arg2[%c3, %c0_9, %c0_10] : memref<9x8x8xbf16, #tpu.memory_space<vmem>>, vector<1x8x8xbf16>
    %11 = vector.shape_cast %10 : vector<1x8x8xbf16> to vector<8x8xbf16>
    %c4 = arith.constant 4 : index
    %c0_11 = arith.constant 0 : index
    %c0_12 = arith.constant 0 : index
    %12 = vector.load %arg2[%c4, %c0_11, %c0_12] : memref<9x8x8xbf16, #tpu.memory_space<vmem>>, vector<1x8x8xbf16>
    %13 = vector.shape_cast %12 : vector<1x8x8xbf16> to vector<8x8xbf16>
    %c5 = arith.constant 5 : index
    %c0_13 = arith.constant 0 : index
    %c0_14 = arith.constant 0 : index
    %14 = vector.load %arg2[%c5, %c0_13, %c0_14] : memref<9x8x8xbf16, #tpu.memory_space<vmem>>, vector<1x8x8xbf16>
    %15 = vector.shape_cast %14 : vector<1x8x8xbf16> to vector<8x8xbf16>
    %c6 = arith.constant 6 : index
    %c0_15 = arith.constant 0 : index
    %c0_16 = arith.constant 0 : index
    %16 = vector.load %arg2[%c6, %c0_15, %c0_16] : memref<9x8x8xbf16, #tpu.memory_space<vmem>>, vector<1x8x8xbf16>
    %17 = vector.shape_cast %16 : vector<1x8x8xbf16> to vector<8x8xbf16>
    %c7 = arith.constant 7 : index
    %c0_17 = arith.constant 0 : index
    %c0_18 = arith.constant 0 : index
    %18 = vector.load %arg2[%c7, %c0_17, %c0_18] : memref<9x8x8xbf16, #tpu.memory_space<vmem>>, vector<1x8x8xbf16>
    %19 = vector.shape_cast %18 : vector<1x8x8xbf16> to vector<8x8xbf16>
    %c8 = arith.constant 8 : index
    %c0_19 = arith.constant 0 : index
    %c0_20 = arith.constant 0 : index
    %20 = vector.load %arg2[%c8, %c0_19, %c0_20] : memref<9x8x8xbf16, #tpu.memory_space<vmem>>, vector<1x8x8xbf16>
    %21 = vector.shape_cast %20 : vector<1x8x8xbf16> to vector<8x8xbf16>
    %cst = arith.constant 0.000000e+00 : f32
    %22 = vector.broadcast %cst : f32 to vector<1x8xf32>
    %c0_i32_21 = arith.constant 0 : i32
    %c16_i32 = arith.constant 16 : i32
    %23 = arith.addi %c0_i32_21, %c16_i32 : i32
    %c1_i32 = arith.constant 1 : i32
    %24:2 = scf.for %arg7 = %c0_i32_21 to %23 step %c1_i32 iter_args(%arg8 = %22, %arg9 = %22) -> (vector<1x8xf32>, vector<1x8xf32>)  : i32 {
      %cst_31 = arith.constant 0.000000e+00 : f32
      %31 = vector.broadcast %cst_31 : f32 to vector<16x8xf32>
      %c0_i32_32 = arith.constant 0 : i32
      %32 = arith.addi %arg7, %c0_i32_32 : i32
      %c0_33 = arith.constant 0 : index
      %33 = arith.index_cast %32 : i32 to index
      %c0_34 = arith.constant 0 : index
      %c0_35 = arith.constant 0 : index
      %34 = vector.load %arg1[%c0_33, %33, %c0_34, %c0_35] : memref<1x18x18x8xf32, #tpu.memory_space<vmem>>, vector<1x1x16x8xf32>
      %35 = vector.shape_cast %34 : vector<1x1x16x8xf32> to vector<16x8xf32>
      %36 = arith.truncf %35 : vector<16x8xf32> to vector<16x8xbf16>
      %cst_36 = arith.constant dense<0.000000e+00> : vector<16x8xf32>
      %37 = tpu.matmul %36, %5, %cst_36 {dimension_numbers = #tpu.dot_dimension_numbers<[1], [0], [0], [1], [0, 0, 1, 1], [], []>} : vector<16x8xbf16>, vector<8x8xbf16>, vector<16x8xf32> -> vector<16x8xf32>
      %38 = arith.addf %31, %37 : vector<16x8xf32>
      %c0_i32_37 = arith.constant 0 : i32
      %39 = arith.addi %arg7, %c0_i32_37 : i32
      %c0_38 = arith.constant 0 : index
      %40 = arith.index_cast %39 : i32 to index
      %c1_39 = arith.constant 1 : index
      %c0_40 = arith.constant 0 : index
      %41 = vector.load %arg1[%c0_38, %40, %c1_39, %c0_40] : memref<1x18x18x8xf32, #tpu.memory_space<vmem>>, vector<1x1x16x8xf32>
      %42 = vector.shape_cast %41 : vector<1x1x16x8xf32> to vector<16x8xf32>
      %43 = arith.truncf %42 : vector<16x8xf32> to vector<16x8xbf16>
      %cst_41 = arith.constant dense<0.000000e+00> : vector<16x8xf32>
      %44 = tpu.matmul %43, %7, %cst_41 {dimension_numbers = #tpu.dot_dimension_numbers<[1], [0], [0], [1], [0, 0, 1, 1], [], []>} : vector<16x8xbf16>, vector<8x8xbf16>, vector<16x8xf32> -> vector<16x8xf32>
      %45 = arith.addf %38, %44 : vector<16x8xf32>
      %c0_i32_42 = arith.constant 0 : i32
      %46 = arith.addi %arg7, %c0_i32_42 : i32
      %c0_43 = arith.constant 0 : index
      %47 = arith.index_cast %46 : i32 to index
      %c2_44 = arith.constant 2 : index
      %c0_45 = arith.constant 0 : index
      %48 = vector.load %arg1[%c0_43, %47, %c2_44, %c0_45] : memref<1x18x18x8xf32, #tpu.memory_space<vmem>>, vector<1x1x16x8xf32>
      %49 = vector.shape_cast %48 : vector<1x1x16x8xf32> to vector<16x8xf32>
      %50 = arith.truncf %49 : vector<16x8xf32> to vector<16x8xbf16>
      %cst_46 = arith.constant dense<0.000000e+00> : vector<16x8xf32>
      %51 = tpu.matmul %50, %9, %cst_46 {dimension_numbers = #tpu.dot_dimension_numbers<[1], [0], [0], [1], [0, 0, 1, 1], [], []>} : vector<16x8xbf16>, vector<8x8xbf16>, vector<16x8xf32> -> vector<16x8xf32>
      %52 = arith.addf %45, %51 : vector<16x8xf32>
      %c1_i32_47 = arith.constant 1 : i32
      %53 = arith.addi %arg7, %c1_i32_47 : i32
      %c0_48 = arith.constant 0 : index
      %54 = arith.index_cast %53 : i32 to index
      %c0_49 = arith.constant 0 : index
      %c0_50 = arith.constant 0 : index
      %55 = vector.load %arg1[%c0_48, %54, %c0_49, %c0_50] : memref<1x18x18x8xf32, #tpu.memory_space<vmem>>, vector<1x1x16x8xf32>
      %56 = vector.shape_cast %55 : vector<1x1x16x8xf32> to vector<16x8xf32>
      %57 = arith.truncf %56 : vector<16x8xf32> to vector<16x8xbf16>
      %cst_51 = arith.constant dense<0.000000e+00> : vector<16x8xf32>
      %58 = tpu.matmul %57, %11, %cst_51 {dimension_numbers = #tpu.dot_dimension_numbers<[1], [0], [0], [1], [0, 0, 1, 1], [], []>} : vector<16x8xbf16>, vector<8x8xbf16>, vector<16x8xf32> -> vector<16x8xf32>
      %59 = arith.addf %52, %58 : vector<16x8xf32>
      %c1_i32_52 = arith.constant 1 : i32
      %60 = arith.addi %arg7, %c1_i32_52 : i32
      %c0_53 = arith.constant 0 : index
      %61 = arith.index_cast %60 : i32 to index
      %c1_54 = arith.constant 1 : index
      %c0_55 = arith.constant 0 : index
      %62 = vector.load %arg1[%c0_53, %61, %c1_54, %c0_55] : memref<1x18x18x8xf32, #tpu.memory_space<vmem>>, vector<1x1x16x8xf32>
      %63 = vector.shape_cast %62 : vector<1x1x16x8xf32> to vector<16x8xf32>
      %64 = arith.truncf %63 : vector<16x8xf32> to vector<16x8xbf16>
      %cst_56 = arith.constant dense<0.000000e+00> : vector<16x8xf32>
      %65 = tpu.matmul %64, %13, %cst_56 {dimension_numbers = #tpu.dot_dimension_numbers<[1], [0], [0], [1], [0, 0, 1, 1], [], []>} : vector<16x8xbf16>, vector<8x8xbf16>, vector<16x8xf32> -> vector<16x8xf32>
      %66 = arith.addf %59, %65 : vector<16x8xf32>
      %c1_i32_57 = arith.constant 1 : i32
      %67 = arith.addi %arg7, %c1_i32_57 : i32
      %c0_58 = arith.constant 0 : index
      %68 = arith.index_cast %67 : i32 to index
      %c2_59 = arith.constant 2 : index
      %c0_60 = arith.constant 0 : index
      %69 = vector.load %arg1[%c0_58, %68, %c2_59, %c0_60] : memref<1x18x18x8xf32, #tpu.memory_space<vmem>>, vector<1x1x16x8xf32>
      %70 = vector.shape_cast %69 : vector<1x1x16x8xf32> to vector<16x8xf32>
      %71 = arith.truncf %70 : vector<16x8xf32> to vector<16x8xbf16>
      %cst_61 = arith.constant dense<0.000000e+00> : vector<16x8xf32>
      %72 = tpu.matmul %71, %15, %cst_61 {dimension_numbers = #tpu.dot_dimension_numbers<[1], [0], [0], [1], [0, 0, 1, 1], [], []>} : vector<16x8xbf16>, vector<8x8xbf16>, vector<16x8xf32> -> vector<16x8xf32>
      %73 = arith.addf %66, %72 : vector<16x8xf32>
      %c2_i32 = arith.constant 2 : i32
      %74 = arith.addi %arg7, %c2_i32 : i32
      %c0_62 = arith.constant 0 : index
      %75 = arith.index_cast %74 : i32 to index
      %c0_63 = arith.constant 0 : index
      %c0_64 = arith.constant 0 : index
      %76 = vector.load %arg1[%c0_62, %75, %c0_63, %c0_64] : memref<1x18x18x8xf32, #tpu.memory_space<vmem>>, vector<1x1x16x8xf32>
      %77 = vector.shape_cast %76 : vector<1x1x16x8xf32> to vector<16x8xf32>
      %78 = arith.truncf %77 : vector<16x8xf32> to vector<16x8xbf16>
      %cst_65 = arith.constant dense<0.000000e+00> : vector<16x8xf32>
      %79 = tpu.matmul %78, %17, %cst_65 {dimension_numbers = #tpu.dot_dimension_numbers<[1], [0], [0], [1], [0, 0, 1, 1], [], []>} : vector<16x8xbf16>, vector<8x8xbf16>, vector<16x8xf32> -> vector<16x8xf32>
      %80 = arith.addf %73, %79 : vector<16x8xf32>
      %c2_i32_66 = arith.constant 2 : i32
      %81 = arith.addi %arg7, %c2_i32_66 : i32
      %c0_67 = arith.constant 0 : index
      %82 = arith.index_cast %81 : i32 to index
      %c1_68 = arith.constant 1 : index
      %c0_69 = arith.constant 0 : index
      %83 = vector.load %arg1[%c0_67, %82, %c1_68, %c0_69] : memref<1x18x18x8xf32, #tpu.memory_space<vmem>>, vector<1x1x16x8xf32>
      %84 = vector.shape_cast %83 : vector<1x1x16x8xf32> to vector<16x8xf32>
      %85 = arith.truncf %84 : vector<16x8xf32> to vector<16x8xbf16>
      %cst_70 = arith.constant dense<0.000000e+00> : vector<16x8xf32>
      %86 = tpu.matmul %85, %19, %cst_70 {dimension_numbers = #tpu.dot_dimension_numbers<[1], [0], [0], [1], [0, 0, 1, 1], [], []>} : vector<16x8xbf16>, vector<8x8xbf16>, vector<16x8xf32> -> vector<16x8xf32>
      %87 = arith.addf %80, %86 : vector<16x8xf32>
      %c2_i32_71 = arith.constant 2 : i32
      %88 = arith.addi %arg7, %c2_i32_71 : i32
      %c0_72 = arith.constant 0 : index
      %89 = arith.index_cast %88 : i32 to index
      %c2_73 = arith.constant 2 : index
      %c0_74 = arith.constant 0 : index
      %90 = vector.load %arg1[%c0_72, %89, %c2_73, %c0_74] : memref<1x18x18x8xf32, #tpu.memory_space<vmem>>, vector<1x1x16x8xf32>
      %91 = vector.shape_cast %90 : vector<1x1x16x8xf32> to vector<16x8xf32>
      %92 = arith.truncf %91 : vector<16x8xf32> to vector<16x8xbf16>
      %cst_75 = arith.constant dense<0.000000e+00> : vector<16x8xf32>
      %93 = tpu.matmul %92, %21, %cst_75 {dimension_numbers = #tpu.dot_dimension_numbers<[1], [0], [0], [1], [0, 0, 1, 1], [], []>} : vector<16x8xbf16>, vector<8x8xbf16>, vector<16x8xf32> -> vector<16x8xf32>
      %94 = arith.addf %87, %93 : vector<16x8xf32>
      %95 = vector.broadcast %3 : vector<1x8xf32> to vector<16x8xf32>
      %96 = arith.addf %94, %95 : vector<16x8xf32>
      %c0_76 = arith.constant 0 : index
      %97 = arith.index_cast %arg7 : i32 to index
      %c0_77 = arith.constant 0 : index
      %c0_78 = arith.constant 0 : index
      %98 = vector.load %arg4[%c0_76, %97, %c0_77, %c0_78] : memref<1x16x16x8xf32, #tpu.memory_space<vmem>>, vector<1x1x16x8xf32>
      %99 = vector.shape_cast %98 : vector<1x1x16x8xf32> to vector<16x8xf32>
      %100 = vector.shape_cast %96 : vector<16x8xf32> to vector<1x1x16x8xf32>
      tpu.vector_store %arg4[%c0_76, %97, %c0_77, %c0_78], %100 {strides = array<i32>} : memref<1x16x16x8xf32, #tpu.memory_space<vmem>>, vector<1x1x16x8xf32>,
      %cst_79 = arith.constant dense<0.000000e+00> : vector<8xf32>
      %101 = vector.multi_reduction <add>, %96, %cst_79 [0] : vector<16x8xf32> to vector<8xf32>
      %102 = vector.shape_cast %101 : vector<8xf32> to vector<1x8xf32>
      %103 = arith.addf %arg8, %102 : vector<1x8xf32>
      %104 = arith.mulf %96, %96 : vector<16x8xf32>
      %cst_80 = arith.constant dense<0.000000e+00> : vector<8xf32>
      %105 = vector.multi_reduction <add>, %104, %cst_80 [0] : vector<16x8xf32> to vector<8xf32>
      %106 = vector.shape_cast %105 : vector<8xf32> to vector<1x8xf32>
      %107 = arith.addf %arg9, %106 : vector<1x8xf32>
      scf.yield %103, %107 : vector<1x8xf32>, vector<1x8xf32>
    }
    %c16_i32_22 = arith.constant 16 : i32
    %c0_23 = arith.constant 0 : index
    %c0_24 = arith.constant 0 : index
    %25 = vector.load %arg5[%c0_23, %c0_24] : memref<1x8xf32, #tpu.memory_space<vmem>>, vector<1x8xf32>
    %26 = arith.addf %25, %24#0 : vector<1x8xf32>
    %c0_25 = arith.constant 0 : index
    %c0_26 = arith.constant 0 : index
    %27 = vector.load %arg5[%c0_25, %c0_26] : memref<1x8xf32, #tpu.memory_space<vmem>>, vector<1x8xf32>
    tpu.vector_store %arg5[%c0_25, %c0_26], %26 {strides = array<i32>} : memref<1x8xf32, #tpu.memory_space<vmem>>, vector<1x8xf32>,
    %c0_27 = arith.constant 0 : index
    %c0_28 = arith.constant 0 : index
    %28 = vector.load %arg6[%c0_27, %c0_28] : memref<1x8xf32, #tpu.memory_space<vmem>>, vector<1x8xf32>
    %29 = arith.addf %28, %24#1 : vector<1x8xf32>
    %c0_29 = arith.constant 0 : index
    %c0_30 = arith.constant 0 : index
    %30 = vector.load %arg6[%c0_29, %c0_30] : memref<1x8xf32, #tpu.memory_space<vmem>>, vector<1x8xf32>
    tpu.vector_store %arg6[%c0_29, %c0_30], %29 {strides = array<i32>} : memref<1x8xf32, #tpu.memory_space<vmem>>, vector<1x8xf32>,
    return
  }
  func.func @transform_0(%arg0: i32) -> (i32, i32, i32, i32) {
    %c0_i32 = arith.constant 0 : i32
    %c0_i32_0 = arith.constant 0 : i32
    %c0_i32_1 = arith.constant 0 : i32
    %c0_i32_2 = arith.constant 0 : i32
    return %arg0, %c0_i32, %c0_i32_0, %c0_i32_1 : i32, i32, i32, i32
  }
  func.func @transform_1(%arg0: i32) -> (i32, i32, i32) {
    %c0_i32 = arith.constant 0 : i32
    %c0_i32_0 = arith.constant 0 : i32
    %c0_i32_1 = arith.constant 0 : i32
    %c0_i32_2 = arith.constant 0 : i32
    return %c0_i32, %c0_i32_0, %c0_i32_1 : i32, i32, i32
  }
  func.func @transform_2(%arg0: i32) -> (i32, i32) {
    %c0_i32 = arith.constant 0 : i32
    %c0_i32_0 = arith.constant 0 : i32
    %c0_i32_1 = arith.constant 0 : i32
    return %c0_i32, %c0_i32_0 : i32, i32
  }
  func.func @transform_3(%arg0: i32) -> (i32, i32, i32, i32) {
    %c0_i32 = arith.constant 0 : i32
    %c0_i32_0 = arith.constant 0 : i32
    %c0_i32_1 = arith.constant 0 : i32
    %c0_i32_2 = arith.constant 0 : i32
    return %arg0, %c0_i32, %c0_i32_0, %c0_i32_1 : i32, i32, i32, i32
  }
  func.func @transform_4(%arg0: i32) -> (i32, i32) {
    %c0_i32 = arith.constant 0 : i32
    %c0_i32_0 = arith.constant 0 : i32
    %c0_i32_1 = arith.constant 0 : i32
    return %c0_i32, %c0_i32_0 : i32, i32
  }
  func.func @transform_5(%arg0: i32) -> (i32, i32) {
    %c0_i32 = arith.constant 0 : i32
    %c0_i32_0 = arith.constant 0 : i32
    %c0_i32_1 = arith.constant 0 : i32
    return %c0_i32, %c0_i32_0 : i32, i32
  }
}

module attributes {stable_mosaic.version = 11 : i64} {
  func.func @_maxpool2x2_kernel(%arg0: i32, %arg1: memref<1x16x8x16xf32, #tpu.memory_space<vmem>>, %arg2: memref<1x8x8x8xf32, #tpu.memory_space<vmem>>) attributes {dimension_semantics = [#tpu.dimension_semantics<parallel>], iteration_bounds = array<i64: 2>, scalar_prefetch = 0 : i64, scratch_operands = 0 : i64, tpu.core_type = #tpu.core_type<tc>, window_params = [{transform_indices = @transform_0, window_bounds = array<i64: 1, 16, 8, 16>}, {transform_indices = @transform_1, window_bounds = array<i64: 1, 8, 8, 8>}]} {
    %c0_i32 = arith.constant 0 : i32
    %c8_i32 = arith.constant 8 : i32
    %0 = arith.addi %c0_i32, %c8_i32 : i32
    %c1_i32 = arith.constant 1 : i32
    scf.for %arg3 = %c0_i32 to %0 step %c1_i32  : i32 {
      %c2_i32 = arith.constant 2 : i32
      %1 = arith.muli %c2_i32, %arg3 : i32
      %c0 = arith.constant 0 : index
      %2 = arith.index_cast %1 : i32 to index
      %c0_1 = arith.constant 0 : index
      %c0_2 = arith.constant 0 : index
      %3 = vector.load %arg1[%c0, %2, %c0_1, %c0_2] : memref<1x16x8x16xf32, #tpu.memory_space<vmem>>, vector<1x1x8x16xf32>
      %4 = vector.shape_cast %3 : vector<1x1x8x16xf32> to vector<8x16xf32>
      %c2_i32_3 = arith.constant 2 : i32
      %5 = arith.muli %c2_i32_3, %arg3 : i32
      %c1_i32_4 = arith.constant 1 : i32
      %6 = arith.addi %5, %c1_i32_4 : i32
      %c0_5 = arith.constant 0 : index
      %7 = arith.index_cast %6 : i32 to index
      %c0_6 = arith.constant 0 : index
      %c0_7 = arith.constant 0 : index
      %8 = vector.load %arg1[%c0_5, %7, %c0_6, %c0_7] : memref<1x16x8x16xf32, #tpu.memory_space<vmem>>, vector<1x1x8x16xf32>
      %9 = vector.shape_cast %8 : vector<1x1x8x16xf32> to vector<8x16xf32>
      %10 = arith.maximumf %4, %9 : vector<8x16xf32>
      %c8_i32_8 = arith.constant 8 : i32
      %11 = tpu.dynamic_rotate %10 by %c8_i32_8 dim 1 : vector<8x16xf32>, i32 -> vector<8x16xf32>
      %12 = arith.maximumf %10, %11 : vector<8x16xf32>
      %13 = vector.extract_strided_slice %12 {offsets = [0, 0], sizes = [8, 8], strides = [1, 1]} : vector<8x16xf32> to vector<8x8xf32>
      %c0_9 = arith.constant 0 : index
      %14 = arith.index_cast %arg3 : i32 to index
      %c0_10 = arith.constant 0 : index
      %c0_11 = arith.constant 0 : index
      %15 = vector.load %arg2[%c0_9, %14, %c0_10, %c0_11] : memref<1x8x8x8xf32, #tpu.memory_space<vmem>>, vector<1x1x8x8xf32>
      %16 = vector.shape_cast %15 : vector<1x1x8x8xf32> to vector<8x8xf32>
      %17 = vector.shape_cast %13 : vector<8x8xf32> to vector<1x1x8x8xf32>
      tpu.vector_store %arg2[%c0_9, %14, %c0_10, %c0_11], %17 {strides = array<i32>} : memref<1x8x8x8xf32, #tpu.memory_space<vmem>>, vector<1x1x8x8xf32>,
    }
    %c8_i32_0 = arith.constant 8 : i32
    return
  }
  func.func @transform_0(%arg0: i32) -> (i32, i32, i32, i32) {
    %c0_i32 = arith.constant 0 : i32
    %c0_i32_0 = arith.constant 0 : i32
    %c0_i32_1 = arith.constant 0 : i32
    %c0_i32_2 = arith.constant 0 : i32
    return %arg0, %c0_i32, %c0_i32_0, %c0_i32_1 : i32, i32, i32, i32
  }
  func.func @transform_1(%arg0: i32) -> (i32, i32, i32, i32) {
    %c0_i32 = arith.constant 0 : i32
    %c0_i32_0 = arith.constant 0 : i32
    %c0_i32_1 = arith.constant 0 : i32
    %c0_i32_2 = arith.constant 0 : i32
    return %arg0, %c0_i32, %c0_i32_0, %c0_i32_1 : i32, i32, i32, i32
  }
}

module attributes {stable_mosaic.version = 11 : i64} {
  func.func @_conv3x3_stats_kernel(%arg0: i32, %arg1: memref<1x10x10x8xf32, #tpu.memory_space<vmem>>, %arg2: memref<9x8x16xbf16, #tpu.memory_space<vmem>>, %arg3: memref<1x16xf32, #tpu.memory_space<vmem>>, %arg4: memref<1x8x8x16xf32, #tpu.memory_space<vmem>>, %arg5: memref<1x16xf32, #tpu.memory_space<vmem>>, %arg6: memref<1x16xf32, #tpu.memory_space<vmem>>) attributes {dimension_semantics = [#tpu.dimension_semantics<arbitrary>], iteration_bounds = array<i64: 2>, scalar_prefetch = 0 : i64, scratch_operands = 0 : i64, tpu.core_type = #tpu.core_type<tc>, window_params = [{transform_indices = @transform_0, window_bounds = array<i64: 1, 10, 10, 8>}, {pipeline_mode = #tpu.pipeline_mode<synchronous>, transform_indices = @transform_1, window_bounds = array<i64: 9, 8, 16>}, {pipeline_mode = #tpu.pipeline_mode<synchronous>, transform_indices = @transform_2, window_bounds = array<i64: 1, 16>}, {transform_indices = @transform_3, window_bounds = array<i64: 1, 8, 8, 16>}, {pipeline_mode = #tpu.pipeline_mode<synchronous>, transform_indices = @transform_4, window_bounds = array<i64: 1, 16>}, {pipeline_mode = #tpu.pipeline_mode<synchronous>, transform_indices = @transform_5, window_bounds = array<i64: 1, 16>}]} {
    %c0_i32 = arith.constant 0 : i32
    %0 = arith.cmpi eq, %arg0, %c0_i32 : i32
    %1 = arith.extui %0 : i1 to i32
    %c0_i32_0 = arith.constant 0 : i32
    %2 = arith.cmpi ne, %1, %c0_i32_0 : i32
    scf.if %2 {
      %cst_31 = arith.constant 0.000000e+00 : f32
      %31 = vector.broadcast %cst_31 : f32 to vector<1x16xf32>
      %c0_32 = arith.constant 0 : index
      %c0_33 = arith.constant 0 : index
      %32 = vector.load %arg5[%c0_32, %c0_33] : memref<1x16xf32, #tpu.memory_space<vmem>>, vector<1x16xf32>
      tpu.vector_store %arg5[%c0_32, %c0_33], %31 {strides = array<i32>} : memref<1x16xf32, #tpu.memory_space<vmem>>, vector<1x16xf32>,
      %cst_34 = arith.constant 0.000000e+00 : f32
      %33 = vector.broadcast %cst_34 : f32 to vector<1x16xf32>
      %c0_35 = arith.constant 0 : index
      %c0_36 = arith.constant 0 : index
      %34 = vector.load %arg6[%c0_35, %c0_36] : memref<1x16xf32, #tpu.memory_space<vmem>>, vector<1x16xf32>
      tpu.vector_store %arg6[%c0_35, %c0_36], %33 {strides = array<i32>} : memref<1x16xf32, #tpu.memory_space<vmem>>, vector<1x16xf32>,
    } else {
    }
    %c0 = arith.constant 0 : index
    %c0_1 = arith.constant 0 : index
    %3 = vector.load %arg3[%c0, %c0_1] : memref<1x16xf32, #tpu.memory_space<vmem>>, vector<1x16xf32>
    %c0_2 = arith.constant 0 : index
    %c0_3 = arith.constant 0 : index
    %c0_4 = arith.constant 0 : index
    %4 = vector.load %arg2[%c0_2, %c0_3, %c0_4] : memref<9x8x16xbf16, #tpu.memory_space<vmem>>, vector<1x8x16xbf16>
    %5 = vector.shape_cast %4 : vector<1x8x16xbf16> to vector<8x16xbf16>
    %c1 = arith.constant 1 : index
    %c0_5 = arith.constant 0 : index
    %c0_6 = arith.constant 0 : index
    %6 = vector.load %arg2[%c1, %c0_5, %c0_6] : memref<9x8x16xbf16, #tpu.memory_space<vmem>>, vector<1x8x16xbf16>
    %7 = vector.shape_cast %6 : vector<1x8x16xbf16> to vector<8x16xbf16>
    %c2 = arith.constant 2 : index
    %c0_7 = arith.constant 0 : index
    %c0_8 = arith.constant 0 : index
    %8 = vector.load %arg2[%c2, %c0_7, %c0_8] : memref<9x8x16xbf16, #tpu.memory_space<vmem>>, vector<1x8x16xbf16>
    %9 = vector.shape_cast %8 : vector<1x8x16xbf16> to vector<8x16xbf16>
    %c3 = arith.constant 3 : index
    %c0_9 = arith.constant 0 : index
    %c0_10 = arith.constant 0 : index
    %10 = vector.load %arg2[%c3, %c0_9, %c0_10] : memref<9x8x16xbf16, #tpu.memory_space<vmem>>, vector<1x8x16xbf16>
    %11 = vector.shape_cast %10 : vector<1x8x16xbf16> to vector<8x16xbf16>
    %c4 = arith.constant 4 : index
    %c0_11 = arith.constant 0 : index
    %c0_12 = arith.constant 0 : index
    %12 = vector.load %arg2[%c4, %c0_11, %c0_12] : memref<9x8x16xbf16, #tpu.memory_space<vmem>>, vector<1x8x16xbf16>
    %13 = vector.shape_cast %12 : vector<1x8x16xbf16> to vector<8x16xbf16>
    %c5 = arith.constant 5 : index
    %c0_13 = arith.constant 0 : index
    %c0_14 = arith.constant 0 : index
    %14 = vector.load %arg2[%c5, %c0_13, %c0_14] : memref<9x8x16xbf16, #tpu.memory_space<vmem>>, vector<1x8x16xbf16>
    %15 = vector.shape_cast %14 : vector<1x8x16xbf16> to vector<8x16xbf16>
    %c6 = arith.constant 6 : index
    %c0_15 = arith.constant 0 : index
    %c0_16 = arith.constant 0 : index
    %16 = vector.load %arg2[%c6, %c0_15, %c0_16] : memref<9x8x16xbf16, #tpu.memory_space<vmem>>, vector<1x8x16xbf16>
    %17 = vector.shape_cast %16 : vector<1x8x16xbf16> to vector<8x16xbf16>
    %c7 = arith.constant 7 : index
    %c0_17 = arith.constant 0 : index
    %c0_18 = arith.constant 0 : index
    %18 = vector.load %arg2[%c7, %c0_17, %c0_18] : memref<9x8x16xbf16, #tpu.memory_space<vmem>>, vector<1x8x16xbf16>
    %19 = vector.shape_cast %18 : vector<1x8x16xbf16> to vector<8x16xbf16>
    %c8 = arith.constant 8 : index
    %c0_19 = arith.constant 0 : index
    %c0_20 = arith.constant 0 : index
    %20 = vector.load %arg2[%c8, %c0_19, %c0_20] : memref<9x8x16xbf16, #tpu.memory_space<vmem>>, vector<1x8x16xbf16>
    %21 = vector.shape_cast %20 : vector<1x8x16xbf16> to vector<8x16xbf16>
    %cst = arith.constant 0.000000e+00 : f32
    %22 = vector.broadcast %cst : f32 to vector<1x16xf32>
    %c0_i32_21 = arith.constant 0 : i32
    %c8_i32 = arith.constant 8 : i32
    %23 = arith.addi %c0_i32_21, %c8_i32 : i32
    %c1_i32 = arith.constant 1 : i32
    %24:2 = scf.for %arg7 = %c0_i32_21 to %23 step %c1_i32 iter_args(%arg8 = %22, %arg9 = %22) -> (vector<1x16xf32>, vector<1x16xf32>)  : i32 {
      %cst_31 = arith.constant 0.000000e+00 : f32
      %31 = vector.broadcast %cst_31 : f32 to vector<8x16xf32>
      %c0_i32_32 = arith.constant 0 : i32
      %32 = arith.addi %arg7, %c0_i32_32 : i32
      %c0_33 = arith.constant 0 : index
      %33 = arith.index_cast %32 : i32 to index
      %c0_34 = arith.constant 0 : index
      %c0_35 = arith.constant 0 : index
      %34 = vector.load %arg1[%c0_33, %33, %c0_34, %c0_35] : memref<1x10x10x8xf32, #tpu.memory_space<vmem>>, vector<1x1x8x8xf32>
      %35 = vector.shape_cast %34 : vector<1x1x8x8xf32> to vector<8x8xf32>
      %36 = arith.truncf %35 : vector<8x8xf32> to vector<8x8xbf16>
      %cst_36 = arith.constant dense<0.000000e+00> : vector<8x16xf32>
      %37 = tpu.matmul %36, %5, %cst_36 {dimension_numbers = #tpu.dot_dimension_numbers<[1], [0], [0], [1], [0, 0, 1, 1], [], []>} : vector<8x8xbf16>, vector<8x16xbf16>, vector<8x16xf32> -> vector<8x16xf32>
      %38 = arith.addf %31, %37 : vector<8x16xf32>
      %c0_i32_37 = arith.constant 0 : i32
      %39 = arith.addi %arg7, %c0_i32_37 : i32
      %c0_38 = arith.constant 0 : index
      %40 = arith.index_cast %39 : i32 to index
      %c1_39 = arith.constant 1 : index
      %c0_40 = arith.constant 0 : index
      %41 = vector.load %arg1[%c0_38, %40, %c1_39, %c0_40] : memref<1x10x10x8xf32, #tpu.memory_space<vmem>>, vector<1x1x8x8xf32>
      %42 = vector.shape_cast %41 : vector<1x1x8x8xf32> to vector<8x8xf32>
      %43 = arith.truncf %42 : vector<8x8xf32> to vector<8x8xbf16>
      %cst_41 = arith.constant dense<0.000000e+00> : vector<8x16xf32>
      %44 = tpu.matmul %43, %7, %cst_41 {dimension_numbers = #tpu.dot_dimension_numbers<[1], [0], [0], [1], [0, 0, 1, 1], [], []>} : vector<8x8xbf16>, vector<8x16xbf16>, vector<8x16xf32> -> vector<8x16xf32>
      %45 = arith.addf %38, %44 : vector<8x16xf32>
      %c0_i32_42 = arith.constant 0 : i32
      %46 = arith.addi %arg7, %c0_i32_42 : i32
      %c0_43 = arith.constant 0 : index
      %47 = arith.index_cast %46 : i32 to index
      %c2_44 = arith.constant 2 : index
      %c0_45 = arith.constant 0 : index
      %48 = vector.load %arg1[%c0_43, %47, %c2_44, %c0_45] : memref<1x10x10x8xf32, #tpu.memory_space<vmem>>, vector<1x1x8x8xf32>
      %49 = vector.shape_cast %48 : vector<1x1x8x8xf32> to vector<8x8xf32>
      %50 = arith.truncf %49 : vector<8x8xf32> to vector<8x8xbf16>
      %cst_46 = arith.constant dense<0.000000e+00> : vector<8x16xf32>
      %51 = tpu.matmul %50, %9, %cst_46 {dimension_numbers = #tpu.dot_dimension_numbers<[1], [0], [0], [1], [0, 0, 1, 1], [], []>} : vector<8x8xbf16>, vector<8x16xbf16>, vector<8x16xf32> -> vector<8x16xf32>
      %52 = arith.addf %45, %51 : vector<8x16xf32>
      %c1_i32_47 = arith.constant 1 : i32
      %53 = arith.addi %arg7, %c1_i32_47 : i32
      %c0_48 = arith.constant 0 : index
      %54 = arith.index_cast %53 : i32 to index
      %c0_49 = arith.constant 0 : index
      %c0_50 = arith.constant 0 : index
      %55 = vector.load %arg1[%c0_48, %54, %c0_49, %c0_50] : memref<1x10x10x8xf32, #tpu.memory_space<vmem>>, vector<1x1x8x8xf32>
      %56 = vector.shape_cast %55 : vector<1x1x8x8xf32> to vector<8x8xf32>
      %57 = arith.truncf %56 : vector<8x8xf32> to vector<8x8xbf16>
      %cst_51 = arith.constant dense<0.000000e+00> : vector<8x16xf32>
      %58 = tpu.matmul %57, %11, %cst_51 {dimension_numbers = #tpu.dot_dimension_numbers<[1], [0], [0], [1], [0, 0, 1, 1], [], []>} : vector<8x8xbf16>, vector<8x16xbf16>, vector<8x16xf32> -> vector<8x16xf32>
      %59 = arith.addf %52, %58 : vector<8x16xf32>
      %c1_i32_52 = arith.constant 1 : i32
      %60 = arith.addi %arg7, %c1_i32_52 : i32
      %c0_53 = arith.constant 0 : index
      %61 = arith.index_cast %60 : i32 to index
      %c1_54 = arith.constant 1 : index
      %c0_55 = arith.constant 0 : index
      %62 = vector.load %arg1[%c0_53, %61, %c1_54, %c0_55] : memref<1x10x10x8xf32, #tpu.memory_space<vmem>>, vector<1x1x8x8xf32>
      %63 = vector.shape_cast %62 : vector<1x1x8x8xf32> to vector<8x8xf32>
      %64 = arith.truncf %63 : vector<8x8xf32> to vector<8x8xbf16>
      %cst_56 = arith.constant dense<0.000000e+00> : vector<8x16xf32>
      %65 = tpu.matmul %64, %13, %cst_56 {dimension_numbers = #tpu.dot_dimension_numbers<[1], [0], [0], [1], [0, 0, 1, 1], [], []>} : vector<8x8xbf16>, vector<8x16xbf16>, vector<8x16xf32> -> vector<8x16xf32>
      %66 = arith.addf %59, %65 : vector<8x16xf32>
      %c1_i32_57 = arith.constant 1 : i32
      %67 = arith.addi %arg7, %c1_i32_57 : i32
      %c0_58 = arith.constant 0 : index
      %68 = arith.index_cast %67 : i32 to index
      %c2_59 = arith.constant 2 : index
      %c0_60 = arith.constant 0 : index
      %69 = vector.load %arg1[%c0_58, %68, %c2_59, %c0_60] : memref<1x10x10x8xf32, #tpu.memory_space<vmem>>, vector<1x1x8x8xf32>
      %70 = vector.shape_cast %69 : vector<1x1x8x8xf32> to vector<8x8xf32>
      %71 = arith.truncf %70 : vector<8x8xf32> to vector<8x8xbf16>
      %cst_61 = arith.constant dense<0.000000e+00> : vector<8x16xf32>
      %72 = tpu.matmul %71, %15, %cst_61 {dimension_numbers = #tpu.dot_dimension_numbers<[1], [0], [0], [1], [0, 0, 1, 1], [], []>} : vector<8x8xbf16>, vector<8x16xbf16>, vector<8x16xf32> -> vector<8x16xf32>
      %73 = arith.addf %66, %72 : vector<8x16xf32>
      %c2_i32 = arith.constant 2 : i32
      %74 = arith.addi %arg7, %c2_i32 : i32
      %c0_62 = arith.constant 0 : index
      %75 = arith.index_cast %74 : i32 to index
      %c0_63 = arith.constant 0 : index
      %c0_64 = arith.constant 0 : index
      %76 = vector.load %arg1[%c0_62, %75, %c0_63, %c0_64] : memref<1x10x10x8xf32, #tpu.memory_space<vmem>>, vector<1x1x8x8xf32>
      %77 = vector.shape_cast %76 : vector<1x1x8x8xf32> to vector<8x8xf32>
      %78 = arith.truncf %77 : vector<8x8xf32> to vector<8x8xbf16>
      %cst_65 = arith.constant dense<0.000000e+00> : vector<8x16xf32>
      %79 = tpu.matmul %78, %17, %cst_65 {dimension_numbers = #tpu.dot_dimension_numbers<[1], [0], [0], [1], [0, 0, 1, 1], [], []>} : vector<8x8xbf16>, vector<8x16xbf16>, vector<8x16xf32> -> vector<8x16xf32>
      %80 = arith.addf %73, %79 : vector<8x16xf32>
      %c2_i32_66 = arith.constant 2 : i32
      %81 = arith.addi %arg7, %c2_i32_66 : i32
      %c0_67 = arith.constant 0 : index
      %82 = arith.index_cast %81 : i32 to index
      %c1_68 = arith.constant 1 : index
      %c0_69 = arith.constant 0 : index
      %83 = vector.load %arg1[%c0_67, %82, %c1_68, %c0_69] : memref<1x10x10x8xf32, #tpu.memory_space<vmem>>, vector<1x1x8x8xf32>
      %84 = vector.shape_cast %83 : vector<1x1x8x8xf32> to vector<8x8xf32>
      %85 = arith.truncf %84 : vector<8x8xf32> to vector<8x8xbf16>
      %cst_70 = arith.constant dense<0.000000e+00> : vector<8x16xf32>
      %86 = tpu.matmul %85, %19, %cst_70 {dimension_numbers = #tpu.dot_dimension_numbers<[1], [0], [0], [1], [0, 0, 1, 1], [], []>} : vector<8x8xbf16>, vector<8x16xbf16>, vector<8x16xf32> -> vector<8x16xf32>
      %87 = arith.addf %80, %86 : vector<8x16xf32>
      %c2_i32_71 = arith.constant 2 : i32
      %88 = arith.addi %arg7, %c2_i32_71 : i32
      %c0_72 = arith.constant 0 : index
      %89 = arith.index_cast %88 : i32 to index
      %c2_73 = arith.constant 2 : index
      %c0_74 = arith.constant 0 : index
      %90 = vector.load %arg1[%c0_72, %89, %c2_73, %c0_74] : memref<1x10x10x8xf32, #tpu.memory_space<vmem>>, vector<1x1x8x8xf32>
      %91 = vector.shape_cast %90 : vector<1x1x8x8xf32> to vector<8x8xf32>
      %92 = arith.truncf %91 : vector<8x8xf32> to vector<8x8xbf16>
      %cst_75 = arith.constant dense<0.000000e+00> : vector<8x16xf32>
      %93 = tpu.matmul %92, %21, %cst_75 {dimension_numbers = #tpu.dot_dimension_numbers<[1], [0], [0], [1], [0, 0, 1, 1], [], []>} : vector<8x8xbf16>, vector<8x16xbf16>, vector<8x16xf32> -> vector<8x16xf32>
      %94 = arith.addf %87, %93 : vector<8x16xf32>
      %95 = vector.broadcast %3 : vector<1x16xf32> to vector<8x16xf32>
      %96 = arith.addf %94, %95 : vector<8x16xf32>
      %c0_76 = arith.constant 0 : index
      %97 = arith.index_cast %arg7 : i32 to index
      %c0_77 = arith.constant 0 : index
      %c0_78 = arith.constant 0 : index
      %98 = vector.load %arg4[%c0_76, %97, %c0_77, %c0_78] : memref<1x8x8x16xf32, #tpu.memory_space<vmem>>, vector<1x1x8x16xf32>
      %99 = vector.shape_cast %98 : vector<1x1x8x16xf32> to vector<8x16xf32>
      %100 = vector.shape_cast %96 : vector<8x16xf32> to vector<1x1x8x16xf32>
      tpu.vector_store %arg4[%c0_76, %97, %c0_77, %c0_78], %100 {strides = array<i32>} : memref<1x8x8x16xf32, #tpu.memory_space<vmem>>, vector<1x1x8x16xf32>,
      %cst_79 = arith.constant dense<0.000000e+00> : vector<16xf32>
      %101 = vector.multi_reduction <add>, %96, %cst_79 [0] : vector<8x16xf32> to vector<16xf32>
      %102 = vector.shape_cast %101 : vector<16xf32> to vector<1x16xf32>
      %103 = arith.addf %arg8, %102 : vector<1x16xf32>
      %104 = arith.mulf %96, %96 : vector<8x16xf32>
      %cst_80 = arith.constant dense<0.000000e+00> : vector<16xf32>
      %105 = vector.multi_reduction <add>, %104, %cst_80 [0] : vector<8x16xf32> to vector<16xf32>
      %106 = vector.shape_cast %105 : vector<16xf32> to vector<1x16xf32>
      %107 = arith.addf %arg9, %106 : vector<1x16xf32>
      scf.yield %103, %107 : vector<1x16xf32>, vector<1x16xf32>
    }
    %c8_i32_22 = arith.constant 8 : i32
    %c0_23 = arith.constant 0 : index
    %c0_24 = arith.constant 0 : index
    %25 = vector.load %arg5[%c0_23, %c0_24] : memref<1x16xf32, #tpu.memory_space<vmem>>, vector<1x16xf32>
    %26 = arith.addf %25, %24#0 : vector<1x16xf32>
    %c0_25 = arith.constant 0 : index
    %c0_26 = arith.constant 0 : index
    %27 = vector.load %arg5[%c0_25, %c0_26] : memref<1x16xf32, #tpu.memory_space<vmem>>, vector<1x16xf32>
    tpu.vector_store %arg5[%c0_25, %c0_26], %26 {strides = array<i32>} : memref<1x16xf32, #tpu.memory_space<vmem>>, vector<1x16xf32>,
    %c0_27 = arith.constant 0 : index
    %c0_28 = arith.constant 0 : index
    %28 = vector.load %arg6[%c0_27, %c0_28] : memref<1x16xf32, #tpu.memory_space<vmem>>, vector<1x16xf32>
    %29 = arith.addf %28, %24#1 : vector<1x16xf32>
    %c0_29 = arith.constant 0 : index
    %c0_30 = arith.constant 0 : index
    %30 = vector.load %arg6[%c0_29, %c0_30] : memref<1x16xf32, #tpu.memory_space<vmem>>, vector<1x16xf32>
    tpu.vector_store %arg6[%c0_29, %c0_30], %29 {strides = array<i32>} : memref<1x16xf32, #tpu.memory_space<vmem>>, vector<1x16xf32>,
    return
  }
  func.func @transform_0(%arg0: i32) -> (i32, i32, i32, i32) {
    %c0_i32 = arith.constant 0 : i32
    %c0_i32_0 = arith.constant 0 : i32
    %c0_i32_1 = arith.constant 0 : i32
    %c0_i32_2 = arith.constant 0 : i32
    return %arg0, %c0_i32, %c0_i32_0, %c0_i32_1 : i32, i32, i32, i32
  }
  func.func @transform_1(%arg0: i32) -> (i32, i32, i32) {
    %c0_i32 = arith.constant 0 : i32
    %c0_i32_0 = arith.constant 0 : i32
    %c0_i32_1 = arith.constant 0 : i32
    %c0_i32_2 = arith.constant 0 : i32
    return %c0_i32, %c0_i32_0, %c0_i32_1 : i32, i32, i32
  }
  func.func @transform_2(%arg0: i32) -> (i32, i32) {
    %c0_i32 = arith.constant 0 : i32
    %c0_i32_0 = arith.constant 0 : i32
    %c0_i32_1 = arith.constant 0 : i32
    return %c0_i32, %c0_i32_0 : i32, i32
  }
  func.func @transform_3(%arg0: i32) -> (i32, i32, i32, i32) {
    %c0_i32 = arith.constant 0 : i32
    %c0_i32_0 = arith.constant 0 : i32
    %c0_i32_1 = arith.constant 0 : i32
    %c0_i32_2 = arith.constant 0 : i32
    return %arg0, %c0_i32, %c0_i32_0, %c0_i32_1 : i32, i32, i32, i32
  }
  func.func @transform_4(%arg0: i32) -> (i32, i32) {
    %c0_i32 = arith.constant 0 : i32
    %c0_i32_0 = arith.constant 0 : i32
    %c0_i32_1 = arith.constant 0 : i32
    return %c0_i32, %c0_i32_0 : i32, i32
  }
  func.func @transform_5(%arg0: i32) -> (i32, i32) {
    %c0_i32 = arith.constant 0 : i32
    %c0_i32_0 = arith.constant 0 : i32
    %c0_i32_1 = arith.constant 0 : i32
    return %c0_i32, %c0_i32_0 : i32, i32
  }
}

module attributes {stable_mosaic.version = 11 : i64} {
  func.func @_scale_shift_relu_kernel(%arg0: i32, %arg1: memref<4x512xf32, #tpu.memory_space<vmem>>, %arg2: memref<1x512xf32, #tpu.memory_space<vmem>>, %arg3: memref<1x512xf32, #tpu.memory_space<vmem>>, %arg4: memref<4x512xf32, #tpu.memory_space<vmem>>) attributes {dimension_semantics = [#tpu.dimension_semantics<parallel>], iteration_bounds = array<i64: 1>, scalar_prefetch = 0 : i64, scratch_operands = 0 : i64, tpu.core_type = #tpu.core_type<tc>, window_params = [{transform_indices = @transform_0, window_bounds = array<i64: 4, 512>}, {pipeline_mode = #tpu.pipeline_mode<synchronous>, transform_indices = @transform_1, window_bounds = array<i64: 1, 512>}, {pipeline_mode = #tpu.pipeline_mode<synchronous>, transform_indices = @transform_2, window_bounds = array<i64: 1, 512>}, {transform_indices = @transform_3, window_bounds = array<i64: 4, 512>}]} {
    %c0 = arith.constant 0 : index
    %c0_0 = arith.constant 0 : index
    %0 = vector.load %arg1[%c0, %c0_0] : memref<4x512xf32, #tpu.memory_space<vmem>>, vector<4x512xf32>
    %c0_1 = arith.constant 0 : index
    %c0_2 = arith.constant 0 : index
    %1 = vector.load %arg2[%c0_1, %c0_2] : memref<1x512xf32, #tpu.memory_space<vmem>>, vector<1x512xf32>
    %2 = vector.broadcast %1 : vector<1x512xf32> to vector<4x512xf32>
    %3 = arith.mulf %0, %2 : vector<4x512xf32>
    %c0_3 = arith.constant 0 : index
    %c0_4 = arith.constant 0 : index
    %4 = vector.load %arg3[%c0_3, %c0_4] : memref<1x512xf32, #tpu.memory_space<vmem>>, vector<1x512xf32>
    %5 = vector.broadcast %4 : vector<1x512xf32> to vector<4x512xf32>
    %6 = arith.addf %3, %5 : vector<4x512xf32>
    %cst = arith.constant 0.000000e+00 : f32
    %7 = vector.broadcast %cst : f32 to vector<4x512xf32>
    %8 = arith.maximumf %6, %7 : vector<4x512xf32>
    %c0_5 = arith.constant 0 : index
    %c0_6 = arith.constant 0 : index
    %9 = vector.load %arg4[%c0_5, %c0_6] : memref<4x512xf32, #tpu.memory_space<vmem>>, vector<4x512xf32>
    tpu.vector_store %arg4[%c0_5, %c0_6], %8 {strides = array<i32>} : memref<4x512xf32, #tpu.memory_space<vmem>>, vector<4x512xf32>,
    return
  }
  func.func @transform_0(%arg0: i32) -> (i32, i32) {
    %c0_i32 = arith.constant 0 : i32
    %c0_i32_0 = arith.constant 0 : i32
    return %arg0, %c0_i32 : i32, i32
  }
  func.func @transform_1(%arg0: i32) -> (i32, i32) {
    %c0_i32 = arith.constant 0 : i32
    %c0_i32_0 = arith.constant 0 : i32
    %c0_i32_1 = arith.constant 0 : i32
    return %c0_i32, %c0_i32_0 : i32, i32
  }
  func.func @transform_2(%arg0: i32) -> (i32, i32) {
    %c0_i32 = arith.constant 0 : i32
    %c0_i32_0 = arith.constant 0 : i32
    %c0_i32_1 = arith.constant 0 : i32
    return %c0_i32, %c0_i32_0 : i32, i32
  }
  func.func @transform_3(%arg0: i32) -> (i32, i32) {
    %c0_i32 = arith.constant 0 : i32
    %c0_i32_0 = arith.constant 0 : i32
    return %arg0, %c0_i32 : i32, i32
  }
}

module attributes {stable_mosaic.version = 11 : i64} {
  func.func @_maxpool2x2_kernel(%arg0: i32, %arg1: memref<1x8x4x32xf32, #tpu.memory_space<vmem>>, %arg2: memref<1x4x4x16xf32, #tpu.memory_space<vmem>>) attributes {dimension_semantics = [#tpu.dimension_semantics<parallel>], iteration_bounds = array<i64: 2>, scalar_prefetch = 0 : i64, scratch_operands = 0 : i64, tpu.core_type = #tpu.core_type<tc>, window_params = [{transform_indices = @transform_0, window_bounds = array<i64: 1, 8, 4, 32>}, {transform_indices = @transform_1, window_bounds = array<i64: 1, 4, 4, 16>}]} {
    %c0_i32 = arith.constant 0 : i32
    %c4_i32 = arith.constant 4 : i32
    %0 = arith.addi %c0_i32, %c4_i32 : i32
    %c1_i32 = arith.constant 1 : i32
    scf.for %arg3 = %c0_i32 to %0 step %c1_i32  : i32 {
      %c2_i32 = arith.constant 2 : i32
      %1 = arith.muli %c2_i32, %arg3 : i32
      %c0 = arith.constant 0 : index
      %2 = arith.index_cast %1 : i32 to index
      %c0_1 = arith.constant 0 : index
      %c0_2 = arith.constant 0 : index
      %3 = vector.load %arg1[%c0, %2, %c0_1, %c0_2] : memref<1x8x4x32xf32, #tpu.memory_space<vmem>>, vector<1x1x4x32xf32>
      %4 = vector.shape_cast %3 : vector<1x1x4x32xf32> to vector<4x32xf32>
      %c2_i32_3 = arith.constant 2 : i32
      %5 = arith.muli %c2_i32_3, %arg3 : i32
      %c1_i32_4 = arith.constant 1 : i32
      %6 = arith.addi %5, %c1_i32_4 : i32
      %c0_5 = arith.constant 0 : index
      %7 = arith.index_cast %6 : i32 to index
      %c0_6 = arith.constant 0 : index
      %c0_7 = arith.constant 0 : index
      %8 = vector.load %arg1[%c0_5, %7, %c0_6, %c0_7] : memref<1x8x4x32xf32, #tpu.memory_space<vmem>>, vector<1x1x4x32xf32>
      %9 = vector.shape_cast %8 : vector<1x1x4x32xf32> to vector<4x32xf32>
      %10 = arith.maximumf %4, %9 : vector<4x32xf32>
      %c16_i32 = arith.constant 16 : i32
      %11 = tpu.dynamic_rotate %10 by %c16_i32 dim 1 : vector<4x32xf32>, i32 -> vector<4x32xf32>
      %12 = arith.maximumf %10, %11 : vector<4x32xf32>
      %13 = vector.extract_strided_slice %12 {offsets = [0, 0], sizes = [4, 16], strides = [1, 1]} : vector<4x32xf32> to vector<4x16xf32>
      %c0_8 = arith.constant 0 : index
      %14 = arith.index_cast %arg3 : i32 to index
      %c0_9 = arith.constant 0 : index
      %c0_10 = arith.constant 0 : index
      %15 = vector.load %arg2[%c0_8, %14, %c0_9, %c0_10] : memref<1x4x4x16xf32, #tpu.memory_space<vmem>>, vector<1x1x4x16xf32>
      %16 = vector.shape_cast %15 : vector<1x1x4x16xf32> to vector<4x16xf32>
      %17 = vector.shape_cast %13 : vector<4x16xf32> to vector<1x1x4x16xf32>
      tpu.vector_store %arg2[%c0_8, %14, %c0_9, %c0_10], %17 {strides = array<i32>} : memref<1x4x4x16xf32, #tpu.memory_space<vmem>>, vector<1x1x4x16xf32>,
    }
    %c4_i32_0 = arith.constant 4 : i32
    return
  }
  func.func @transform_0(%arg0: i32) -> (i32, i32, i32, i32) {
    %c0_i32 = arith.constant 0 : i32
    %c0_i32_0 = arith.constant 0 : i32
    %c0_i32_1 = arith.constant 0 : i32
    %c0_i32_2 = arith.constant 0 : i32
    return %arg0, %c0_i32, %c0_i32_0, %c0_i32_1 : i32, i32, i32, i32
  }
  func.func @transform_1(%arg0: i32) -> (i32, i32, i32, i32) {
    %c0_i32 = arith.constant 0 : i32
    %c0_i32_0 = arith.constant 0 : i32
    %c0_i32_1 = arith.constant 0 : i32
    %c0_i32_2 = arith.constant 0 : i32
    return %arg0, %c0_i32, %c0_i32_0, %c0_i32_1 : i32, i32, i32, i32
  }
}

module attributes {stable_mosaic.version = 11 : i64} {
  func.func @_conv3x3_stats_kernel(%arg0: i32, %arg1: memref<1x10x10x16xf32, #tpu.memory_space<vmem>>, %arg2: memref<9x16x16xbf16, #tpu.memory_space<vmem>>, %arg3: memref<1x16xf32, #tpu.memory_space<vmem>>, %arg4: memref<1x8x8x16xf32, #tpu.memory_space<vmem>>, %arg5: memref<1x16xf32, #tpu.memory_space<vmem>>, %arg6: memref<1x16xf32, #tpu.memory_space<vmem>>) attributes {dimension_semantics = [#tpu.dimension_semantics<arbitrary>], iteration_bounds = array<i64: 2>, scalar_prefetch = 0 : i64, scratch_operands = 0 : i64, tpu.core_type = #tpu.core_type<tc>, window_params = [{transform_indices = @transform_0, window_bounds = array<i64: 1, 10, 10, 16>}, {pipeline_mode = #tpu.pipeline_mode<synchronous>, transform_indices = @transform_1, window_bounds = array<i64: 9, 16, 16>}, {pipeline_mode = #tpu.pipeline_mode<synchronous>, transform_indices = @transform_2, window_bounds = array<i64: 1, 16>}, {transform_indices = @transform_3, window_bounds = array<i64: 1, 8, 8, 16>}, {pipeline_mode = #tpu.pipeline_mode<synchronous>, transform_indices = @transform_4, window_bounds = array<i64: 1, 16>}, {pipeline_mode = #tpu.pipeline_mode<synchronous>, transform_indices = @transform_5, window_bounds = array<i64: 1, 16>}]} {
    %c0_i32 = arith.constant 0 : i32
    %0 = arith.cmpi eq, %arg0, %c0_i32 : i32
    %1 = arith.extui %0 : i1 to i32
    %c0_i32_0 = arith.constant 0 : i32
    %2 = arith.cmpi ne, %1, %c0_i32_0 : i32
    scf.if %2 {
      %cst_31 = arith.constant 0.000000e+00 : f32
      %31 = vector.broadcast %cst_31 : f32 to vector<1x16xf32>
      %c0_32 = arith.constant 0 : index
      %c0_33 = arith.constant 0 : index
      %32 = vector.load %arg5[%c0_32, %c0_33] : memref<1x16xf32, #tpu.memory_space<vmem>>, vector<1x16xf32>
      tpu.vector_store %arg5[%c0_32, %c0_33], %31 {strides = array<i32>} : memref<1x16xf32, #tpu.memory_space<vmem>>, vector<1x16xf32>,
      %cst_34 = arith.constant 0.000000e+00 : f32
      %33 = vector.broadcast %cst_34 : f32 to vector<1x16xf32>
      %c0_35 = arith.constant 0 : index
      %c0_36 = arith.constant 0 : index
      %34 = vector.load %arg6[%c0_35, %c0_36] : memref<1x16xf32, #tpu.memory_space<vmem>>, vector<1x16xf32>
      tpu.vector_store %arg6[%c0_35, %c0_36], %33 {strides = array<i32>} : memref<1x16xf32, #tpu.memory_space<vmem>>, vector<1x16xf32>,
    } else {
    }
    %c0 = arith.constant 0 : index
    %c0_1 = arith.constant 0 : index
    %3 = vector.load %arg3[%c0, %c0_1] : memref<1x16xf32, #tpu.memory_space<vmem>>, vector<1x16xf32>
    %c0_2 = arith.constant 0 : index
    %c0_3 = arith.constant 0 : index
    %c0_4 = arith.constant 0 : index
    %4 = vector.load %arg2[%c0_2, %c0_3, %c0_4] : memref<9x16x16xbf16, #tpu.memory_space<vmem>>, vector<1x16x16xbf16>
    %5 = vector.shape_cast %4 : vector<1x16x16xbf16> to vector<16x16xbf16>
    %c1 = arith.constant 1 : index
    %c0_5 = arith.constant 0 : index
    %c0_6 = arith.constant 0 : index
    %6 = vector.load %arg2[%c1, %c0_5, %c0_6] : memref<9x16x16xbf16, #tpu.memory_space<vmem>>, vector<1x16x16xbf16>
    %7 = vector.shape_cast %6 : vector<1x16x16xbf16> to vector<16x16xbf16>
    %c2 = arith.constant 2 : index
    %c0_7 = arith.constant 0 : index
    %c0_8 = arith.constant 0 : index
    %8 = vector.load %arg2[%c2, %c0_7, %c0_8] : memref<9x16x16xbf16, #tpu.memory_space<vmem>>, vector<1x16x16xbf16>
    %9 = vector.shape_cast %8 : vector<1x16x16xbf16> to vector<16x16xbf16>
    %c3 = arith.constant 3 : index
    %c0_9 = arith.constant 0 : index
    %c0_10 = arith.constant 0 : index
    %10 = vector.load %arg2[%c3, %c0_9, %c0_10] : memref<9x16x16xbf16, #tpu.memory_space<vmem>>, vector<1x16x16xbf16>
    %11 = vector.shape_cast %10 : vector<1x16x16xbf16> to vector<16x16xbf16>
    %c4 = arith.constant 4 : index
    %c0_11 = arith.constant 0 : index
    %c0_12 = arith.constant 0 : index
    %12 = vector.load %arg2[%c4, %c0_11, %c0_12] : memref<9x16x16xbf16, #tpu.memory_space<vmem>>, vector<1x16x16xbf16>
    %13 = vector.shape_cast %12 : vector<1x16x16xbf16> to vector<16x16xbf16>
    %c5 = arith.constant 5 : index
    %c0_13 = arith.constant 0 : index
    %c0_14 = arith.constant 0 : index
    %14 = vector.load %arg2[%c5, %c0_13, %c0_14] : memref<9x16x16xbf16, #tpu.memory_space<vmem>>, vector<1x16x16xbf16>
    %15 = vector.shape_cast %14 : vector<1x16x16xbf16> to vector<16x16xbf16>
    %c6 = arith.constant 6 : index
    %c0_15 = arith.constant 0 : index
    %c0_16 = arith.constant 0 : index
    %16 = vector.load %arg2[%c6, %c0_15, %c0_16] : memref<9x16x16xbf16, #tpu.memory_space<vmem>>, vector<1x16x16xbf16>
    %17 = vector.shape_cast %16 : vector<1x16x16xbf16> to vector<16x16xbf16>
    %c7 = arith.constant 7 : index
    %c0_17 = arith.constant 0 : index
    %c0_18 = arith.constant 0 : index
    %18 = vector.load %arg2[%c7, %c0_17, %c0_18] : memref<9x16x16xbf16, #tpu.memory_space<vmem>>, vector<1x16x16xbf16>
    %19 = vector.shape_cast %18 : vector<1x16x16xbf16> to vector<16x16xbf16>
    %c8 = arith.constant 8 : index
    %c0_19 = arith.constant 0 : index
    %c0_20 = arith.constant 0 : index
    %20 = vector.load %arg2[%c8, %c0_19, %c0_20] : memref<9x16x16xbf16, #tpu.memory_space<vmem>>, vector<1x16x16xbf16>
    %21 = vector.shape_cast %20 : vector<1x16x16xbf16> to vector<16x16xbf16>
    %cst = arith.constant 0.000000e+00 : f32
    %22 = vector.broadcast %cst : f32 to vector<1x16xf32>
    %c0_i32_21 = arith.constant 0 : i32
    %c8_i32 = arith.constant 8 : i32
    %23 = arith.addi %c0_i32_21, %c8_i32 : i32
    %c1_i32 = arith.constant 1 : i32
    %24:2 = scf.for %arg7 = %c0_i32_21 to %23 step %c1_i32 iter_args(%arg8 = %22, %arg9 = %22) -> (vector<1x16xf32>, vector<1x16xf32>)  : i32 {
      %cst_31 = arith.constant 0.000000e+00 : f32
      %31 = vector.broadcast %cst_31 : f32 to vector<8x16xf32>
      %c0_i32_32 = arith.constant 0 : i32
      %32 = arith.addi %arg7, %c0_i32_32 : i32
      %c0_33 = arith.constant 0 : index
      %33 = arith.index_cast %32 : i32 to index
      %c0_34 = arith.constant 0 : index
      %c0_35 = arith.constant 0 : index
      %34 = vector.load %arg1[%c0_33, %33, %c0_34, %c0_35] : memref<1x10x10x16xf32, #tpu.memory_space<vmem>>, vector<1x1x8x16xf32>
      %35 = vector.shape_cast %34 : vector<1x1x8x16xf32> to vector<8x16xf32>
      %36 = arith.truncf %35 : vector<8x16xf32> to vector<8x16xbf16>
      %cst_36 = arith.constant dense<0.000000e+00> : vector<8x16xf32>
      %37 = tpu.matmul %36, %5, %cst_36 {dimension_numbers = #tpu.dot_dimension_numbers<[1], [0], [0], [1], [0, 0, 1, 1], [], []>} : vector<8x16xbf16>, vector<16x16xbf16>, vector<8x16xf32> -> vector<8x16xf32>
      %38 = arith.addf %31, %37 : vector<8x16xf32>
      %c0_i32_37 = arith.constant 0 : i32
      %39 = arith.addi %arg7, %c0_i32_37 : i32
      %c0_38 = arith.constant 0 : index
      %40 = arith.index_cast %39 : i32 to index
      %c1_39 = arith.constant 1 : index
      %c0_40 = arith.constant 0 : index
      %41 = vector.load %arg1[%c0_38, %40, %c1_39, %c0_40] : memref<1x10x10x16xf32, #tpu.memory_space<vmem>>, vector<1x1x8x16xf32>
      %42 = vector.shape_cast %41 : vector<1x1x8x16xf32> to vector<8x16xf32>
      %43 = arith.truncf %42 : vector<8x16xf32> to vector<8x16xbf16>
      %cst_41 = arith.constant dense<0.000000e+00> : vector<8x16xf32>
      %44 = tpu.matmul %43, %7, %cst_41 {dimension_numbers = #tpu.dot_dimension_numbers<[1], [0], [0], [1], [0, 0, 1, 1], [], []>} : vector<8x16xbf16>, vector<16x16xbf16>, vector<8x16xf32> -> vector<8x16xf32>
      %45 = arith.addf %38, %44 : vector<8x16xf32>
      %c0_i32_42 = arith.constant 0 : i32
      %46 = arith.addi %arg7, %c0_i32_42 : i32
      %c0_43 = arith.constant 0 : index
      %47 = arith.index_cast %46 : i32 to index
      %c2_44 = arith.constant 2 : index
      %c0_45 = arith.constant 0 : index
      %48 = vector.load %arg1[%c0_43, %47, %c2_44, %c0_45] : memref<1x10x10x16xf32, #tpu.memory_space<vmem>>, vector<1x1x8x16xf32>
      %49 = vector.shape_cast %48 : vector<1x1x8x16xf32> to vector<8x16xf32>
      %50 = arith.truncf %49 : vector<8x16xf32> to vector<8x16xbf16>
      %cst_46 = arith.constant dense<0.000000e+00> : vector<8x16xf32>
      %51 = tpu.matmul %50, %9, %cst_46 {dimension_numbers = #tpu.dot_dimension_numbers<[1], [0], [0], [1], [0, 0, 1, 1], [], []>} : vector<8x16xbf16>, vector<16x16xbf16>, vector<8x16xf32> -> vector<8x16xf32>
      %52 = arith.addf %45, %51 : vector<8x16xf32>
      %c1_i32_47 = arith.constant 1 : i32
      %53 = arith.addi %arg7, %c1_i32_47 : i32
      %c0_48 = arith.constant 0 : index
      %54 = arith.index_cast %53 : i32 to index
      %c0_49 = arith.constant 0 : index
      %c0_50 = arith.constant 0 : index
      %55 = vector.load %arg1[%c0_48, %54, %c0_49, %c0_50] : memref<1x10x10x16xf32, #tpu.memory_space<vmem>>, vector<1x1x8x16xf32>
      %56 = vector.shape_cast %55 : vector<1x1x8x16xf32> to vector<8x16xf32>
      %57 = arith.truncf %56 : vector<8x16xf32> to vector<8x16xbf16>
      %cst_51 = arith.constant dense<0.000000e+00> : vector<8x16xf32>
      %58 = tpu.matmul %57, %11, %cst_51 {dimension_numbers = #tpu.dot_dimension_numbers<[1], [0], [0], [1], [0, 0, 1, 1], [], []>} : vector<8x16xbf16>, vector<16x16xbf16>, vector<8x16xf32> -> vector<8x16xf32>
      %59 = arith.addf %52, %58 : vector<8x16xf32>
      %c1_i32_52 = arith.constant 1 : i32
      %60 = arith.addi %arg7, %c1_i32_52 : i32
      %c0_53 = arith.constant 0 : index
      %61 = arith.index_cast %60 : i32 to index
      %c1_54 = arith.constant 1 : index
      %c0_55 = arith.constant 0 : index
      %62 = vector.load %arg1[%c0_53, %61, %c1_54, %c0_55] : memref<1x10x10x16xf32, #tpu.memory_space<vmem>>, vector<1x1x8x16xf32>
      %63 = vector.shape_cast %62 : vector<1x1x8x16xf32> to vector<8x16xf32>
      %64 = arith.truncf %63 : vector<8x16xf32> to vector<8x16xbf16>
      %cst_56 = arith.constant dense<0.000000e+00> : vector<8x16xf32>
      %65 = tpu.matmul %64, %13, %cst_56 {dimension_numbers = #tpu.dot_dimension_numbers<[1], [0], [0], [1], [0, 0, 1, 1], [], []>} : vector<8x16xbf16>, vector<16x16xbf16>, vector<8x16xf32> -> vector<8x16xf32>
      %66 = arith.addf %59, %65 : vector<8x16xf32>
      %c1_i32_57 = arith.constant 1 : i32
      %67 = arith.addi %arg7, %c1_i32_57 : i32
      %c0_58 = arith.constant 0 : index
      %68 = arith.index_cast %67 : i32 to index
      %c2_59 = arith.constant 2 : index
      %c0_60 = arith.constant 0 : index
      %69 = vector.load %arg1[%c0_58, %68, %c2_59, %c0_60] : memref<1x10x10x16xf32, #tpu.memory_space<vmem>>, vector<1x1x8x16xf32>
      %70 = vector.shape_cast %69 : vector<1x1x8x16xf32> to vector<8x16xf32>
      %71 = arith.truncf %70 : vector<8x16xf32> to vector<8x16xbf16>
      %cst_61 = arith.constant dense<0.000000e+00> : vector<8x16xf32>
      %72 = tpu.matmul %71, %15, %cst_61 {dimension_numbers = #tpu.dot_dimension_numbers<[1], [0], [0], [1], [0, 0, 1, 1], [], []>} : vector<8x16xbf16>, vector<16x16xbf16>, vector<8x16xf32> -> vector<8x16xf32>
      %73 = arith.addf %66, %72 : vector<8x16xf32>
      %c2_i32 = arith.constant 2 : i32
      %74 = arith.addi %arg7, %c2_i32 : i32
      %c0_62 = arith.constant 0 : index
      %75 = arith.index_cast %74 : i32 to index
      %c0_63 = arith.constant 0 : index
      %c0_64 = arith.constant 0 : index
      %76 = vector.load %arg1[%c0_62, %75, %c0_63, %c0_64] : memref<1x10x10x16xf32, #tpu.memory_space<vmem>>, vector<1x1x8x16xf32>
      %77 = vector.shape_cast %76 : vector<1x1x8x16xf32> to vector<8x16xf32>
      %78 = arith.truncf %77 : vector<8x16xf32> to vector<8x16xbf16>
      %cst_65 = arith.constant dense<0.000000e+00> : vector<8x16xf32>
      %79 = tpu.matmul %78, %17, %cst_65 {dimension_numbers = #tpu.dot_dimension_numbers<[1], [0], [0], [1], [0, 0, 1, 1], [], []>} : vector<8x16xbf16>, vector<16x16xbf16>, vector<8x16xf32> -> vector<8x16xf32>
      %80 = arith.addf %73, %79 : vector<8x16xf32>
      %c2_i32_66 = arith.constant 2 : i32
      %81 = arith.addi %arg7, %c2_i32_66 : i32
      %c0_67 = arith.constant 0 : index
      %82 = arith.index_cast %81 : i32 to index
      %c1_68 = arith.constant 1 : index
      %c0_69 = arith.constant 0 : index
      %83 = vector.load %arg1[%c0_67, %82, %c1_68, %c0_69] : memref<1x10x10x16xf32, #tpu.memory_space<vmem>>, vector<1x1x8x16xf32>
      %84 = vector.shape_cast %83 : vector<1x1x8x16xf32> to vector<8x16xf32>
      %85 = arith.truncf %84 : vector<8x16xf32> to vector<8x16xbf16>
      %cst_70 = arith.constant dense<0.000000e+00> : vector<8x16xf32>
      %86 = tpu.matmul %85, %19, %cst_70 {dimension_numbers = #tpu.dot_dimension_numbers<[1], [0], [0], [1], [0, 0, 1, 1], [], []>} : vector<8x16xbf16>, vector<16x16xbf16>, vector<8x16xf32> -> vector<8x16xf32>
      %87 = arith.addf %80, %86 : vector<8x16xf32>
      %c2_i32_71 = arith.constant 2 : i32
      %88 = arith.addi %arg7, %c2_i32_71 : i32
      %c0_72 = arith.constant 0 : index
      %89 = arith.index_cast %88 : i32 to index
      %c2_73 = arith.constant 2 : index
      %c0_74 = arith.constant 0 : index
      %90 = vector.load %arg1[%c0_72, %89, %c2_73, %c0_74] : memref<1x10x10x16xf32, #tpu.memory_space<vmem>>, vector<1x1x8x16xf32>
      %91 = vector.shape_cast %90 : vector<1x1x8x16xf32> to vector<8x16xf32>
      %92 = arith.truncf %91 : vector<8x16xf32> to vector<8x16xbf16>
      %cst_75 = arith.constant dense<0.000000e+00> : vector<8x16xf32>
      %93 = tpu.matmul %92, %21, %cst_75 {dimension_numbers = #tpu.dot_dimension_numbers<[1], [0], [0], [1], [0, 0, 1, 1], [], []>} : vector<8x16xbf16>, vector<16x16xbf16>, vector<8x16xf32> -> vector<8x16xf32>
      %94 = arith.addf %87, %93 : vector<8x16xf32>
      %95 = vector.broadcast %3 : vector<1x16xf32> to vector<8x16xf32>
      %96 = arith.addf %94, %95 : vector<8x16xf32>
      %c0_76 = arith.constant 0 : index
      %97 = arith.index_cast %arg7 : i32 to index
      %c0_77 = arith.constant 0 : index
      %c0_78 = arith.constant 0 : index
      %98 = vector.load %arg4[%c0_76, %97, %c0_77, %c0_78] : memref<1x8x8x16xf32, #tpu.memory_space<vmem>>, vector<1x1x8x16xf32>
      %99 = vector.shape_cast %98 : vector<1x1x8x16xf32> to vector<8x16xf32>
      %100 = vector.shape_cast %96 : vector<8x16xf32> to vector<1x1x8x16xf32>
      tpu.vector_store %arg4[%c0_76, %97, %c0_77, %c0_78], %100 {strides = array<i32>} : memref<1x8x8x16xf32, #tpu.memory_space<vmem>>, vector<1x1x8x16xf32>,
      %cst_79 = arith.constant dense<0.000000e+00> : vector<16xf32>
      %101 = vector.multi_reduction <add>, %96, %cst_79 [0] : vector<8x16xf32> to vector<16xf32>
      %102 = vector.shape_cast %101 : vector<16xf32> to vector<1x16xf32>
      %103 = arith.addf %arg8, %102 : vector<1x16xf32>
      %104 = arith.mulf %96, %96 : vector<8x16xf32>
      %cst_80 = arith.constant dense<0.000000e+00> : vector<16xf32>
      %105 = vector.multi_reduction <add>, %104, %cst_80 [0] : vector<8x16xf32> to vector<16xf32>
      %106 = vector.shape_cast %105 : vector<16xf32> to vector<1x16xf32>
      %107 = arith.addf %arg9, %106 : vector<1x16xf32>
      scf.yield %103, %107 : vector<1x16xf32>, vector<1x16xf32>
    }
    %c8_i32_22 = arith.constant 8 : i32
    %c0_23 = arith.constant 0 : index
    %c0_24 = arith.constant 0 : index
    %25 = vector.load %arg5[%c0_23, %c0_24] : memref<1x16xf32, #tpu.memory_space<vmem>>, vector<1x16xf32>
    %26 = arith.addf %25, %24#0 : vector<1x16xf32>
    %c0_25 = arith.constant 0 : index
    %c0_26 = arith.constant 0 : index
    %27 = vector.load %arg5[%c0_25, %c0_26] : memref<1x16xf32, #tpu.memory_space<vmem>>, vector<1x16xf32>
    tpu.vector_store %arg5[%c0_25, %c0_26], %26 {strides = array<i32>} : memref<1x16xf32, #tpu.memory_space<vmem>>, vector<1x16xf32>,
    %c0_27 = arith.constant 0 : index
    %c0_28 = arith.constant 0 : index
    %28 = vector.load %arg6[%c0_27, %c0_28] : memref<1x16xf32, #tpu.memory_space<vmem>>, vector<1x16xf32>
    %29 = arith.addf %28, %24#1 : vector<1x16xf32>
    %c0_29 = arith.constant 0 : index
    %c0_30 = arith.constant 0 : index
    %30 = vector.load %arg6[%c0_29, %c0_30] : memref<1x16xf32, #tpu.memory_space<vmem>>, vector<1x16xf32>
    tpu.vector_store %arg6[%c0_29, %c0_30], %29 {strides = array<i32>} : memref<1x16xf32, #tpu.memory_space<vmem>>, vector<1x16xf32>,
    return
  }
  func.func @transform_0(%arg0: i32) -> (i32, i32, i32, i32) {
    %c0_i32 = arith.constant 0 : i32
    %c0_i32_0 = arith.constant 0 : i32
    %c0_i32_1 = arith.constant 0 : i32
    %c0_i32_2 = arith.constant 0 : i32
    return %arg0, %c0_i32, %c0_i32_0, %c0_i32_1 : i32, i32, i32, i32
  }
  func.func @transform_1(%arg0: i32) -> (i32, i32, i32) {
    %c0_i32 = arith.constant 0 : i32
    %c0_i32_0 = arith.constant 0 : i32
    %c0_i32_1 = arith.constant 0 : i32
    %c0_i32_2 = arith.constant 0 : i32
    return %c0_i32, %c0_i32_0, %c0_i32_1 : i32, i32, i32
  }
  func.func @transform_2(%arg0: i32) -> (i32, i32) {
    %c0_i32 = arith.constant 0 : i32
    %c0_i32_0 = arith.constant 0 : i32
    %c0_i32_1 = arith.constant 0 : i32
    return %c0_i32, %c0_i32_0 : i32, i32
  }
  func.func @transform_3(%arg0: i32) -> (i32, i32, i32, i32) {
    %c0_i32 = arith.constant 0 : i32
    %c0_i32_0 = arith.constant 0 : i32
    %c0_i32_1 = arith.constant 0 : i32
    %c0_i32_2 = arith.constant 0 : i32
    return %arg0, %c0_i32, %c0_i32_0, %c0_i32_1 : i32, i32, i32, i32
  }
  func.func @transform_4(%arg0: i32) -> (i32, i32) {
    %c0_i32 = arith.constant 0 : i32
    %c0_i32_0 = arith.constant 0 : i32
    %c0_i32_1 = arith.constant 0 : i32
    return %c0_i32, %c0_i32_0 : i32, i32
  }
  func.func @transform_5(%arg0: i32) -> (i32, i32) {
    %c0_i32 = arith.constant 0 : i32
    %c0_i32_0 = arith.constant 0 : i32
    %c0_i32_1 = arith.constant 0 : i32
    return %c0_i32, %c0_i32_0 : i32, i32
  }
}

module attributes {stable_mosaic.version = 11 : i64} {
  func.func @_conv3x3_stats_kernel(%arg0: i32, %arg1: memref<1x6x6x16xf32, #tpu.memory_space<vmem>>, %arg2: memref<9x16x32xbf16, #tpu.memory_space<vmem>>, %arg3: memref<1x32xf32, #tpu.memory_space<vmem>>, %arg4: memref<1x4x4x32xf32, #tpu.memory_space<vmem>>, %arg5: memref<1x32xf32, #tpu.memory_space<vmem>>, %arg6: memref<1x32xf32, #tpu.memory_space<vmem>>) attributes {dimension_semantics = [#tpu.dimension_semantics<arbitrary>], iteration_bounds = array<i64: 2>, scalar_prefetch = 0 : i64, scratch_operands = 0 : i64, tpu.core_type = #tpu.core_type<tc>, window_params = [{transform_indices = @transform_0, window_bounds = array<i64: 1, 6, 6, 16>}, {pipeline_mode = #tpu.pipeline_mode<synchronous>, transform_indices = @transform_1, window_bounds = array<i64: 9, 16, 32>}, {pipeline_mode = #tpu.pipeline_mode<synchronous>, transform_indices = @transform_2, window_bounds = array<i64: 1, 32>}, {transform_indices = @transform_3, window_bounds = array<i64: 1, 4, 4, 32>}, {pipeline_mode = #tpu.pipeline_mode<synchronous>, transform_indices = @transform_4, window_bounds = array<i64: 1, 32>}, {pipeline_mode = #tpu.pipeline_mode<synchronous>, transform_indices = @transform_5, window_bounds = array<i64: 1, 32>}]} {
    %c0_i32 = arith.constant 0 : i32
    %0 = arith.cmpi eq, %arg0, %c0_i32 : i32
    %1 = arith.extui %0 : i1 to i32
    %c0_i32_0 = arith.constant 0 : i32
    %2 = arith.cmpi ne, %1, %c0_i32_0 : i32
    scf.if %2 {
      %cst_31 = arith.constant 0.000000e+00 : f32
      %31 = vector.broadcast %cst_31 : f32 to vector<1x32xf32>
      %c0_32 = arith.constant 0 : index
      %c0_33 = arith.constant 0 : index
      %32 = vector.load %arg5[%c0_32, %c0_33] : memref<1x32xf32, #tpu.memory_space<vmem>>, vector<1x32xf32>
      tpu.vector_store %arg5[%c0_32, %c0_33], %31 {strides = array<i32>} : memref<1x32xf32, #tpu.memory_space<vmem>>, vector<1x32xf32>,
      %cst_34 = arith.constant 0.000000e+00 : f32
      %33 = vector.broadcast %cst_34 : f32 to vector<1x32xf32>
      %c0_35 = arith.constant 0 : index
      %c0_36 = arith.constant 0 : index
      %34 = vector.load %arg6[%c0_35, %c0_36] : memref<1x32xf32, #tpu.memory_space<vmem>>, vector<1x32xf32>
      tpu.vector_store %arg6[%c0_35, %c0_36], %33 {strides = array<i32>} : memref<1x32xf32, #tpu.memory_space<vmem>>, vector<1x32xf32>,
    } else {
    }
    %c0 = arith.constant 0 : index
    %c0_1 = arith.constant 0 : index
    %3 = vector.load %arg3[%c0, %c0_1] : memref<1x32xf32, #tpu.memory_space<vmem>>, vector<1x32xf32>
    %c0_2 = arith.constant 0 : index
    %c0_3 = arith.constant 0 : index
    %c0_4 = arith.constant 0 : index
    %4 = vector.load %arg2[%c0_2, %c0_3, %c0_4] : memref<9x16x32xbf16, #tpu.memory_space<vmem>>, vector<1x16x32xbf16>
    %5 = vector.shape_cast %4 : vector<1x16x32xbf16> to vector<16x32xbf16>
    %c1 = arith.constant 1 : index
    %c0_5 = arith.constant 0 : index
    %c0_6 = arith.constant 0 : index
    %6 = vector.load %arg2[%c1, %c0_5, %c0_6] : memref<9x16x32xbf16, #tpu.memory_space<vmem>>, vector<1x16x32xbf16>
    %7 = vector.shape_cast %6 : vector<1x16x32xbf16> to vector<16x32xbf16>
    %c2 = arith.constant 2 : index
    %c0_7 = arith.constant 0 : index
    %c0_8 = arith.constant 0 : index
    %8 = vector.load %arg2[%c2, %c0_7, %c0_8] : memref<9x16x32xbf16, #tpu.memory_space<vmem>>, vector<1x16x32xbf16>
    %9 = vector.shape_cast %8 : vector<1x16x32xbf16> to vector<16x32xbf16>
    %c3 = arith.constant 3 : index
    %c0_9 = arith.constant 0 : index
    %c0_10 = arith.constant 0 : index
    %10 = vector.load %arg2[%c3, %c0_9, %c0_10] : memref<9x16x32xbf16, #tpu.memory_space<vmem>>, vector<1x16x32xbf16>
    %11 = vector.shape_cast %10 : vector<1x16x32xbf16> to vector<16x32xbf16>
    %c4 = arith.constant 4 : index
    %c0_11 = arith.constant 0 : index
    %c0_12 = arith.constant 0 : index
    %12 = vector.load %arg2[%c4, %c0_11, %c0_12] : memref<9x16x32xbf16, #tpu.memory_space<vmem>>, vector<1x16x32xbf16>
    %13 = vector.shape_cast %12 : vector<1x16x32xbf16> to vector<16x32xbf16>
    %c5 = arith.constant 5 : index
    %c0_13 = arith.constant 0 : index
    %c0_14 = arith.constant 0 : index
    %14 = vector.load %arg2[%c5, %c0_13, %c0_14] : memref<9x16x32xbf16, #tpu.memory_space<vmem>>, vector<1x16x32xbf16>
    %15 = vector.shape_cast %14 : vector<1x16x32xbf16> to vector<16x32xbf16>
    %c6 = arith.constant 6 : index
    %c0_15 = arith.constant 0 : index
    %c0_16 = arith.constant 0 : index
    %16 = vector.load %arg2[%c6, %c0_15, %c0_16] : memref<9x16x32xbf16, #tpu.memory_space<vmem>>, vector<1x16x32xbf16>
    %17 = vector.shape_cast %16 : vector<1x16x32xbf16> to vector<16x32xbf16>
    %c7 = arith.constant 7 : index
    %c0_17 = arith.constant 0 : index
    %c0_18 = arith.constant 0 : index
    %18 = vector.load %arg2[%c7, %c0_17, %c0_18] : memref<9x16x32xbf16, #tpu.memory_space<vmem>>, vector<1x16x32xbf16>
    %19 = vector.shape_cast %18 : vector<1x16x32xbf16> to vector<16x32xbf16>
    %c8 = arith.constant 8 : index
    %c0_19 = arith.constant 0 : index
    %c0_20 = arith.constant 0 : index
    %20 = vector.load %arg2[%c8, %c0_19, %c0_20] : memref<9x16x32xbf16, #tpu.memory_space<vmem>>, vector<1x16x32xbf16>
    %21 = vector.shape_cast %20 : vector<1x16x32xbf16> to vector<16x32xbf16>
    %cst = arith.constant 0.000000e+00 : f32
    %22 = vector.broadcast %cst : f32 to vector<1x32xf32>
    %c0_i32_21 = arith.constant 0 : i32
    %c4_i32 = arith.constant 4 : i32
    %23 = arith.addi %c0_i32_21, %c4_i32 : i32
    %c1_i32 = arith.constant 1 : i32
    %24:2 = scf.for %arg7 = %c0_i32_21 to %23 step %c1_i32 iter_args(%arg8 = %22, %arg9 = %22) -> (vector<1x32xf32>, vector<1x32xf32>)  : i32 {
      %cst_31 = arith.constant 0.000000e+00 : f32
      %31 = vector.broadcast %cst_31 : f32 to vector<4x32xf32>
      %c0_i32_32 = arith.constant 0 : i32
      %32 = arith.addi %arg7, %c0_i32_32 : i32
      %c0_33 = arith.constant 0 : index
      %33 = arith.index_cast %32 : i32 to index
      %c0_34 = arith.constant 0 : index
      %c0_35 = arith.constant 0 : index
      %34 = vector.load %arg1[%c0_33, %33, %c0_34, %c0_35] : memref<1x6x6x16xf32, #tpu.memory_space<vmem>>, vector<1x1x4x16xf32>
      %35 = vector.shape_cast %34 : vector<1x1x4x16xf32> to vector<4x16xf32>
      %36 = arith.truncf %35 : vector<4x16xf32> to vector<4x16xbf16>
      %cst_36 = arith.constant dense<0.000000e+00> : vector<4x32xf32>
      %37 = tpu.matmul %36, %5, %cst_36 {dimension_numbers = #tpu.dot_dimension_numbers<[1], [0], [0], [1], [0, 0, 1, 1], [], []>} : vector<4x16xbf16>, vector<16x32xbf16>, vector<4x32xf32> -> vector<4x32xf32>
      %38 = arith.addf %31, %37 : vector<4x32xf32>
      %c0_i32_37 = arith.constant 0 : i32
      %39 = arith.addi %arg7, %c0_i32_37 : i32
      %c0_38 = arith.constant 0 : index
      %40 = arith.index_cast %39 : i32 to index
      %c1_39 = arith.constant 1 : index
      %c0_40 = arith.constant 0 : index
      %41 = vector.load %arg1[%c0_38, %40, %c1_39, %c0_40] : memref<1x6x6x16xf32, #tpu.memory_space<vmem>>, vector<1x1x4x16xf32>
      %42 = vector.shape_cast %41 : vector<1x1x4x16xf32> to vector<4x16xf32>
      %43 = arith.truncf %42 : vector<4x16xf32> to vector<4x16xbf16>
      %cst_41 = arith.constant dense<0.000000e+00> : vector<4x32xf32>
      %44 = tpu.matmul %43, %7, %cst_41 {dimension_numbers = #tpu.dot_dimension_numbers<[1], [0], [0], [1], [0, 0, 1, 1], [], []>} : vector<4x16xbf16>, vector<16x32xbf16>, vector<4x32xf32> -> vector<4x32xf32>
      %45 = arith.addf %38, %44 : vector<4x32xf32>
      %c0_i32_42 = arith.constant 0 : i32
      %46 = arith.addi %arg7, %c0_i32_42 : i32
      %c0_43 = arith.constant 0 : index
      %47 = arith.index_cast %46 : i32 to index
      %c2_44 = arith.constant 2 : index
      %c0_45 = arith.constant 0 : index
      %48 = vector.load %arg1[%c0_43, %47, %c2_44, %c0_45] : memref<1x6x6x16xf32, #tpu.memory_space<vmem>>, vector<1x1x4x16xf32>
      %49 = vector.shape_cast %48 : vector<1x1x4x16xf32> to vector<4x16xf32>
      %50 = arith.truncf %49 : vector<4x16xf32> to vector<4x16xbf16>
      %cst_46 = arith.constant dense<0.000000e+00> : vector<4x32xf32>
      %51 = tpu.matmul %50, %9, %cst_46 {dimension_numbers = #tpu.dot_dimension_numbers<[1], [0], [0], [1], [0, 0, 1, 1], [], []>} : vector<4x16xbf16>, vector<16x32xbf16>, vector<4x32xf32> -> vector<4x32xf32>
      %52 = arith.addf %45, %51 : vector<4x32xf32>
      %c1_i32_47 = arith.constant 1 : i32
      %53 = arith.addi %arg7, %c1_i32_47 : i32
      %c0_48 = arith.constant 0 : index
      %54 = arith.index_cast %53 : i32 to index
      %c0_49 = arith.constant 0 : index
      %c0_50 = arith.constant 0 : index
      %55 = vector.load %arg1[%c0_48, %54, %c0_49, %c0_50] : memref<1x6x6x16xf32, #tpu.memory_space<vmem>>, vector<1x1x4x16xf32>
      %56 = vector.shape_cast %55 : vector<1x1x4x16xf32> to vector<4x16xf32>
      %57 = arith.truncf %56 : vector<4x16xf32> to vector<4x16xbf16>
      %cst_51 = arith.constant dense<0.000000e+00> : vector<4x32xf32>
      %58 = tpu.matmul %57, %11, %cst_51 {dimension_numbers = #tpu.dot_dimension_numbers<[1], [0], [0], [1], [0, 0, 1, 1], [], []>} : vector<4x16xbf16>, vector<16x32xbf16>, vector<4x32xf32> -> vector<4x32xf32>
      %59 = arith.addf %52, %58 : vector<4x32xf32>
      %c1_i32_52 = arith.constant 1 : i32
      %60 = arith.addi %arg7, %c1_i32_52 : i32
      %c0_53 = arith.constant 0 : index
      %61 = arith.index_cast %60 : i32 to index
      %c1_54 = arith.constant 1 : index
      %c0_55 = arith.constant 0 : index
      %62 = vector.load %arg1[%c0_53, %61, %c1_54, %c0_55] : memref<1x6x6x16xf32, #tpu.memory_space<vmem>>, vector<1x1x4x16xf32>
      %63 = vector.shape_cast %62 : vector<1x1x4x16xf32> to vector<4x16xf32>
      %64 = arith.truncf %63 : vector<4x16xf32> to vector<4x16xbf16>
      %cst_56 = arith.constant dense<0.000000e+00> : vector<4x32xf32>
      %65 = tpu.matmul %64, %13, %cst_56 {dimension_numbers = #tpu.dot_dimension_numbers<[1], [0], [0], [1], [0, 0, 1, 1], [], []>} : vector<4x16xbf16>, vector<16x32xbf16>, vector<4x32xf32> -> vector<4x32xf32>
      %66 = arith.addf %59, %65 : vector<4x32xf32>
      %c1_i32_57 = arith.constant 1 : i32
      %67 = arith.addi %arg7, %c1_i32_57 : i32
      %c0_58 = arith.constant 0 : index
      %68 = arith.index_cast %67 : i32 to index
      %c2_59 = arith.constant 2 : index
      %c0_60 = arith.constant 0 : index
      %69 = vector.load %arg1[%c0_58, %68, %c2_59, %c0_60] : memref<1x6x6x16xf32, #tpu.memory_space<vmem>>, vector<1x1x4x16xf32>
      %70 = vector.shape_cast %69 : vector<1x1x4x16xf32> to vector<4x16xf32>
      %71 = arith.truncf %70 : vector<4x16xf32> to vector<4x16xbf16>
      %cst_61 = arith.constant dense<0.000000e+00> : vector<4x32xf32>
      %72 = tpu.matmul %71, %15, %cst_61 {dimension_numbers = #tpu.dot_dimension_numbers<[1], [0], [0], [1], [0, 0, 1, 1], [], []>} : vector<4x16xbf16>, vector<16x32xbf16>, vector<4x32xf32> -> vector<4x32xf32>
      %73 = arith.addf %66, %72 : vector<4x32xf32>
      %c2_i32 = arith.constant 2 : i32
      %74 = arith.addi %arg7, %c2_i32 : i32
      %c0_62 = arith.constant 0 : index
      %75 = arith.index_cast %74 : i32 to index
      %c0_63 = arith.constant 0 : index
      %c0_64 = arith.constant 0 : index
      %76 = vector.load %arg1[%c0_62, %75, %c0_63, %c0_64] : memref<1x6x6x16xf32, #tpu.memory_space<vmem>>, vector<1x1x4x16xf32>
      %77 = vector.shape_cast %76 : vector<1x1x4x16xf32> to vector<4x16xf32>
      %78 = arith.truncf %77 : vector<4x16xf32> to vector<4x16xbf16>
      %cst_65 = arith.constant dense<0.000000e+00> : vector<4x32xf32>
      %79 = tpu.matmul %78, %17, %cst_65 {dimension_numbers = #tpu.dot_dimension_numbers<[1], [0], [0], [1], [0, 0, 1, 1], [], []>} : vector<4x16xbf16>, vector<16x32xbf16>, vector<4x32xf32> -> vector<4x32xf32>
      %80 = arith.addf %73, %79 : vector<4x32xf32>
      %c2_i32_66 = arith.constant 2 : i32
      %81 = arith.addi %arg7, %c2_i32_66 : i32
      %c0_67 = arith.constant 0 : index
      %82 = arith.index_cast %81 : i32 to index
      %c1_68 = arith.constant 1 : index
      %c0_69 = arith.constant 0 : index
      %83 = vector.load %arg1[%c0_67, %82, %c1_68, %c0_69] : memref<1x6x6x16xf32, #tpu.memory_space<vmem>>, vector<1x1x4x16xf32>
      %84 = vector.shape_cast %83 : vector<1x1x4x16xf32> to vector<4x16xf32>
      %85 = arith.truncf %84 : vector<4x16xf32> to vector<4x16xbf16>
      %cst_70 = arith.constant dense<0.000000e+00> : vector<4x32xf32>
      %86 = tpu.matmul %85, %19, %cst_70 {dimension_numbers = #tpu.dot_dimension_numbers<[1], [0], [0], [1], [0, 0, 1, 1], [], []>} : vector<4x16xbf16>, vector<16x32xbf16>, vector<4x32xf32> -> vector<4x32xf32>
      %87 = arith.addf %80, %86 : vector<4x32xf32>
      %c2_i32_71 = arith.constant 2 : i32
      %88 = arith.addi %arg7, %c2_i32_71 : i32
      %c0_72 = arith.constant 0 : index
      %89 = arith.index_cast %88 : i32 to index
      %c2_73 = arith.constant 2 : index
      %c0_74 = arith.constant 0 : index
      %90 = vector.load %arg1[%c0_72, %89, %c2_73, %c0_74] : memref<1x6x6x16xf32, #tpu.memory_space<vmem>>, vector<1x1x4x16xf32>
      %91 = vector.shape_cast %90 : vector<1x1x4x16xf32> to vector<4x16xf32>
      %92 = arith.truncf %91 : vector<4x16xf32> to vector<4x16xbf16>
      %cst_75 = arith.constant dense<0.000000e+00> : vector<4x32xf32>
      %93 = tpu.matmul %92, %21, %cst_75 {dimension_numbers = #tpu.dot_dimension_numbers<[1], [0], [0], [1], [0, 0, 1, 1], [], []>} : vector<4x16xbf16>, vector<16x32xbf16>, vector<4x32xf32> -> vector<4x32xf32>
      %94 = arith.addf %87, %93 : vector<4x32xf32>
      %95 = vector.broadcast %3 : vector<1x32xf32> to vector<4x32xf32>
      %96 = arith.addf %94, %95 : vector<4x32xf32>
      %c0_76 = arith.constant 0 : index
      %97 = arith.index_cast %arg7 : i32 to index
      %c0_77 = arith.constant 0 : index
      %c0_78 = arith.constant 0 : index
      %98 = vector.load %arg4[%c0_76, %97, %c0_77, %c0_78] : memref<1x4x4x32xf32, #tpu.memory_space<vmem>>, vector<1x1x4x32xf32>
      %99 = vector.shape_cast %98 : vector<1x1x4x32xf32> to vector<4x32xf32>
      %100 = vector.shape_cast %96 : vector<4x32xf32> to vector<1x1x4x32xf32>
      tpu.vector_store %arg4[%c0_76, %97, %c0_77, %c0_78], %100 {strides = array<i32>} : memref<1x4x4x32xf32, #tpu.memory_space<vmem>>, vector<1x1x4x32xf32>,
      %cst_79 = arith.constant dense<0.000000e+00> : vector<32xf32>
      %101 = vector.multi_reduction <add>, %96, %cst_79 [0] : vector<4x32xf32> to vector<32xf32>
      %102 = vector.shape_cast %101 : vector<32xf32> to vector<1x32xf32>
      %103 = arith.addf %arg8, %102 : vector<1x32xf32>
      %104 = arith.mulf %96, %96 : vector<4x32xf32>
      %cst_80 = arith.constant dense<0.000000e+00> : vector<32xf32>
      %105 = vector.multi_reduction <add>, %104, %cst_80 [0] : vector<4x32xf32> to vector<32xf32>
      %106 = vector.shape_cast %105 : vector<32xf32> to vector<1x32xf32>
      %107 = arith.addf %arg9, %106 : vector<1x32xf32>
      scf.yield %103, %107 : vector<1x32xf32>, vector<1x32xf32>
    }
    %c4_i32_22 = arith.constant 4 : i32
    %c0_23 = arith.constant 0 : index
    %c0_24 = arith.constant 0 : index
    %25 = vector.load %arg5[%c0_23, %c0_24] : memref<1x32xf32, #tpu.memory_space<vmem>>, vector<1x32xf32>
    %26 = arith.addf %25, %24#0 : vector<1x32xf32>
    %c0_25 = arith.constant 0 : index
    %c0_26 = arith.constant 0 : index
    %27 = vector.load %arg5[%c0_25, %c0_26] : memref<1x32xf32, #tpu.memory_space<vmem>>, vector<1x32xf32>
    tpu.vector_store %arg5[%c0_25, %c0_26], %26 {strides = array<i32>} : memref<1x32xf32, #tpu.memory_space<vmem>>, vector<1x32xf32>,
    %c0_27 = arith.constant 0 : index
    %c0_28 = arith.constant 0 : index
    %28 = vector.load %arg6[%c0_27, %c0_28] : memref<1x32xf32, #tpu.memory_space<vmem>>, vector<1x32xf32>
    %29 = arith.addf %28, %24#1 : vector<1x32xf32>
    %c0_29 = arith.constant 0 : index
    %c0_30 = arith.constant 0 : index
    %30 = vector.load %arg6[%c0_29, %c0_30] : memref<1x32xf32, #tpu.memory_space<vmem>>, vector<1x32xf32>
    tpu.vector_store %arg6[%c0_29, %c0_30], %29 {strides = array<i32>} : memref<1x32xf32, #tpu.memory_space<vmem>>, vector<1x32xf32>,
    return
  }
  func.func @transform_0(%arg0: i32) -> (i32, i32, i32, i32) {
    %c0_i32 = arith.constant 0 : i32
    %c0_i32_0 = arith.constant 0 : i32
    %c0_i32_1 = arith.constant 0 : i32
    %c0_i32_2 = arith.constant 0 : i32
    return %arg0, %c0_i32, %c0_i32_0, %c0_i32_1 : i32, i32, i32, i32
  }
  func.func @transform_1(%arg0: i32) -> (i32, i32, i32) {
    %c0_i32 = arith.constant 0 : i32
    %c0_i32_0 = arith.constant 0 : i32
    %c0_i32_1 = arith.constant 0 : i32
    %c0_i32_2 = arith.constant 0 : i32
    return %c0_i32, %c0_i32_0, %c0_i32_1 : i32, i32, i32
  }
  func.func @transform_2(%arg0: i32) -> (i32, i32) {
    %c0_i32 = arith.constant 0 : i32
    %c0_i32_0 = arith.constant 0 : i32
    %c0_i32_1 = arith.constant 0 : i32
    return %c0_i32, %c0_i32_0 : i32, i32
  }
  func.func @transform_3(%arg0: i32) -> (i32, i32, i32, i32) {
    %c0_i32 = arith.constant 0 : i32
    %c0_i32_0 = arith.constant 0 : i32
    %c0_i32_1 = arith.constant 0 : i32
    %c0_i32_2 = arith.constant 0 : i32
    return %arg0, %c0_i32, %c0_i32_0, %c0_i32_1 : i32, i32, i32, i32
  }
  func.func @transform_4(%arg0: i32) -> (i32, i32) {
    %c0_i32 = arith.constant 0 : i32
    %c0_i32_0 = arith.constant 0 : i32
    %c0_i32_1 = arith.constant 0 : i32
    return %c0_i32, %c0_i32_0 : i32, i32
  }
  func.func @transform_5(%arg0: i32) -> (i32, i32) {
    %c0_i32 = arith.constant 0 : i32
    %c0_i32_0 = arith.constant 0 : i32
    %c0_i32_1 = arith.constant 0 : i32
    return %c0_i32, %c0_i32_0 : i32, i32
  }
}

module attributes {stable_mosaic.version = 11 : i64} {
  func.func @_scale_shift_relu_kernel(%arg0: i32, %arg1: memref<2x512xf32, #tpu.memory_space<vmem>>, %arg2: memref<1x512xf32, #tpu.memory_space<vmem>>, %arg3: memref<1x512xf32, #tpu.memory_space<vmem>>, %arg4: memref<2x512xf32, #tpu.memory_space<vmem>>) attributes {dimension_semantics = [#tpu.dimension_semantics<parallel>], iteration_bounds = array<i64: 1>, scalar_prefetch = 0 : i64, scratch_operands = 0 : i64, tpu.core_type = #tpu.core_type<tc>, window_params = [{transform_indices = @transform_0, window_bounds = array<i64: 2, 512>}, {pipeline_mode = #tpu.pipeline_mode<synchronous>, transform_indices = @transform_1, window_bounds = array<i64: 1, 512>}, {pipeline_mode = #tpu.pipeline_mode<synchronous>, transform_indices = @transform_2, window_bounds = array<i64: 1, 512>}, {transform_indices = @transform_3, window_bounds = array<i64: 2, 512>}]} {
    %c0 = arith.constant 0 : index
    %c0_0 = arith.constant 0 : index
    %0 = vector.load %arg1[%c0, %c0_0] : memref<2x512xf32, #tpu.memory_space<vmem>>, vector<2x512xf32>
    %c0_1 = arith.constant 0 : index
    %c0_2 = arith.constant 0 : index
    %1 = vector.load %arg2[%c0_1, %c0_2] : memref<1x512xf32, #tpu.memory_space<vmem>>, vector<1x512xf32>
    %2 = vector.broadcast %1 : vector<1x512xf32> to vector<2x512xf32>
    %3 = arith.mulf %0, %2 : vector<2x512xf32>
    %c0_3 = arith.constant 0 : index
    %c0_4 = arith.constant 0 : index
    %4 = vector.load %arg3[%c0_3, %c0_4] : memref<1x512xf32, #tpu.memory_space<vmem>>, vector<1x512xf32>
    %5 = vector.broadcast %4 : vector<1x512xf32> to vector<2x512xf32>
    %6 = arith.addf %3, %5 : vector<2x512xf32>
    %cst = arith.constant 0.000000e+00 : f32
    %7 = vector.broadcast %cst : f32 to vector<2x512xf32>
    %8 = arith.maximumf %6, %7 : vector<2x512xf32>
    %c0_5 = arith.constant 0 : index
    %c0_6 = arith.constant 0 : index
    %9 = vector.load %arg4[%c0_5, %c0_6] : memref<2x512xf32, #tpu.memory_space<vmem>>, vector<2x512xf32>
    tpu.vector_store %arg4[%c0_5, %c0_6], %8 {strides = array<i32>} : memref<2x512xf32, #tpu.memory_space<vmem>>, vector<2x512xf32>,
    return
  }
  func.func @transform_0(%arg0: i32) -> (i32, i32) {
    %c0_i32 = arith.constant 0 : i32
    %c0_i32_0 = arith.constant 0 : i32
    return %arg0, %c0_i32 : i32, i32
  }
  func.func @transform_1(%arg0: i32) -> (i32, i32) {
    %c0_i32 = arith.constant 0 : i32
    %c0_i32_0 = arith.constant 0 : i32
    %c0_i32_1 = arith.constant 0 : i32
    return %c0_i32, %c0_i32_0 : i32, i32
  }
  func.func @transform_2(%arg0: i32) -> (i32, i32) {
    %c0_i32 = arith.constant 0 : i32
    %c0_i32_0 = arith.constant 0 : i32
    %c0_i32_1 = arith.constant 0 : i32
    return %c0_i32, %c0_i32_0 : i32, i32
  }
  func.func @transform_3(%arg0: i32) -> (i32, i32) {
    %c0_i32 = arith.constant 0 : i32
    %c0_i32_0 = arith.constant 0 : i32
    return %arg0, %c0_i32 : i32, i32
  }
}

module attributes {stable_mosaic.version = 11 : i64} {
  func.func @_conv3x3_stats_kernel(%arg0: i32, %arg1: memref<1x6x6x32xf32, #tpu.memory_space<vmem>>, %arg2: memref<9x32x32xbf16, #tpu.memory_space<vmem>>, %arg3: memref<1x32xf32, #tpu.memory_space<vmem>>, %arg4: memref<1x4x4x32xf32, #tpu.memory_space<vmem>>, %arg5: memref<1x32xf32, #tpu.memory_space<vmem>>, %arg6: memref<1x32xf32, #tpu.memory_space<vmem>>) attributes {dimension_semantics = [#tpu.dimension_semantics<arbitrary>], iteration_bounds = array<i64: 2>, scalar_prefetch = 0 : i64, scratch_operands = 0 : i64, tpu.core_type = #tpu.core_type<tc>, window_params = [{transform_indices = @transform_0, window_bounds = array<i64: 1, 6, 6, 32>}, {pipeline_mode = #tpu.pipeline_mode<synchronous>, transform_indices = @transform_1, window_bounds = array<i64: 9, 32, 32>}, {pipeline_mode = #tpu.pipeline_mode<synchronous>, transform_indices = @transform_2, window_bounds = array<i64: 1, 32>}, {transform_indices = @transform_3, window_bounds = array<i64: 1, 4, 4, 32>}, {pipeline_mode = #tpu.pipeline_mode<synchronous>, transform_indices = @transform_4, window_bounds = array<i64: 1, 32>}, {pipeline_mode = #tpu.pipeline_mode<synchronous>, transform_indices = @transform_5, window_bounds = array<i64: 1, 32>}]} {
    %c0_i32 = arith.constant 0 : i32
    %0 = arith.cmpi eq, %arg0, %c0_i32 : i32
    %1 = arith.extui %0 : i1 to i32
    %c0_i32_0 = arith.constant 0 : i32
    %2 = arith.cmpi ne, %1, %c0_i32_0 : i32
    scf.if %2 {
      %cst_31 = arith.constant 0.000000e+00 : f32
      %31 = vector.broadcast %cst_31 : f32 to vector<1x32xf32>
      %c0_32 = arith.constant 0 : index
      %c0_33 = arith.constant 0 : index
      %32 = vector.load %arg5[%c0_32, %c0_33] : memref<1x32xf32, #tpu.memory_space<vmem>>, vector<1x32xf32>
      tpu.vector_store %arg5[%c0_32, %c0_33], %31 {strides = array<i32>} : memref<1x32xf32, #tpu.memory_space<vmem>>, vector<1x32xf32>,
      %cst_34 = arith.constant 0.000000e+00 : f32
      %33 = vector.broadcast %cst_34 : f32 to vector<1x32xf32>
      %c0_35 = arith.constant 0 : index
      %c0_36 = arith.constant 0 : index
      %34 = vector.load %arg6[%c0_35, %c0_36] : memref<1x32xf32, #tpu.memory_space<vmem>>, vector<1x32xf32>
      tpu.vector_store %arg6[%c0_35, %c0_36], %33 {strides = array<i32>} : memref<1x32xf32, #tpu.memory_space<vmem>>, vector<1x32xf32>,
    } else {
    }
    %c0 = arith.constant 0 : index
    %c0_1 = arith.constant 0 : index
    %3 = vector.load %arg3[%c0, %c0_1] : memref<1x32xf32, #tpu.memory_space<vmem>>, vector<1x32xf32>
    %c0_2 = arith.constant 0 : index
    %c0_3 = arith.constant 0 : index
    %c0_4 = arith.constant 0 : index
    %4 = vector.load %arg2[%c0_2, %c0_3, %c0_4] : memref<9x32x32xbf16, #tpu.memory_space<vmem>>, vector<1x32x32xbf16>
    %5 = vector.shape_cast %4 : vector<1x32x32xbf16> to vector<32x32xbf16>
    %c1 = arith.constant 1 : index
    %c0_5 = arith.constant 0 : index
    %c0_6 = arith.constant 0 : index
    %6 = vector.load %arg2[%c1, %c0_5, %c0_6] : memref<9x32x32xbf16, #tpu.memory_space<vmem>>, vector<1x32x32xbf16>
    %7 = vector.shape_cast %6 : vector<1x32x32xbf16> to vector<32x32xbf16>
    %c2 = arith.constant 2 : index
    %c0_7 = arith.constant 0 : index
    %c0_8 = arith.constant 0 : index
    %8 = vector.load %arg2[%c2, %c0_7, %c0_8] : memref<9x32x32xbf16, #tpu.memory_space<vmem>>, vector<1x32x32xbf16>
    %9 = vector.shape_cast %8 : vector<1x32x32xbf16> to vector<32x32xbf16>
    %c3 = arith.constant 3 : index
    %c0_9 = arith.constant 0 : index
    %c0_10 = arith.constant 0 : index
    %10 = vector.load %arg2[%c3, %c0_9, %c0_10] : memref<9x32x32xbf16, #tpu.memory_space<vmem>>, vector<1x32x32xbf16>
    %11 = vector.shape_cast %10 : vector<1x32x32xbf16> to vector<32x32xbf16>
    %c4 = arith.constant 4 : index
    %c0_11 = arith.constant 0 : index
    %c0_12 = arith.constant 0 : index
    %12 = vector.load %arg2[%c4, %c0_11, %c0_12] : memref<9x32x32xbf16, #tpu.memory_space<vmem>>, vector<1x32x32xbf16>
    %13 = vector.shape_cast %12 : vector<1x32x32xbf16> to vector<32x32xbf16>
    %c5 = arith.constant 5 : index
    %c0_13 = arith.constant 0 : index
    %c0_14 = arith.constant 0 : index
    %14 = vector.load %arg2[%c5, %c0_13, %c0_14] : memref<9x32x32xbf16, #tpu.memory_space<vmem>>, vector<1x32x32xbf16>
    %15 = vector.shape_cast %14 : vector<1x32x32xbf16> to vector<32x32xbf16>
    %c6 = arith.constant 6 : index
    %c0_15 = arith.constant 0 : index
    %c0_16 = arith.constant 0 : index
    %16 = vector.load %arg2[%c6, %c0_15, %c0_16] : memref<9x32x32xbf16, #tpu.memory_space<vmem>>, vector<1x32x32xbf16>
    %17 = vector.shape_cast %16 : vector<1x32x32xbf16> to vector<32x32xbf16>
    %c7 = arith.constant 7 : index
    %c0_17 = arith.constant 0 : index
    %c0_18 = arith.constant 0 : index
    %18 = vector.load %arg2[%c7, %c0_17, %c0_18] : memref<9x32x32xbf16, #tpu.memory_space<vmem>>, vector<1x32x32xbf16>
    %19 = vector.shape_cast %18 : vector<1x32x32xbf16> to vector<32x32xbf16>
    %c8 = arith.constant 8 : index
    %c0_19 = arith.constant 0 : index
    %c0_20 = arith.constant 0 : index
    %20 = vector.load %arg2[%c8, %c0_19, %c0_20] : memref<9x32x32xbf16, #tpu.memory_space<vmem>>, vector<1x32x32xbf16>
    %21 = vector.shape_cast %20 : vector<1x32x32xbf16> to vector<32x32xbf16>
    %cst = arith.constant 0.000000e+00 : f32
    %22 = vector.broadcast %cst : f32 to vector<1x32xf32>
    %c0_i32_21 = arith.constant 0 : i32
    %c4_i32 = arith.constant 4 : i32
    %23 = arith.addi %c0_i32_21, %c4_i32 : i32
    %c1_i32 = arith.constant 1 : i32
    %24:2 = scf.for %arg7 = %c0_i32_21 to %23 step %c1_i32 iter_args(%arg8 = %22, %arg9 = %22) -> (vector<1x32xf32>, vector<1x32xf32>)  : i32 {
      %cst_31 = arith.constant 0.000000e+00 : f32
      %31 = vector.broadcast %cst_31 : f32 to vector<4x32xf32>
      %c0_i32_32 = arith.constant 0 : i32
      %32 = arith.addi %arg7, %c0_i32_32 : i32
      %c0_33 = arith.constant 0 : index
      %33 = arith.index_cast %32 : i32 to index
      %c0_34 = arith.constant 0 : index
      %c0_35 = arith.constant 0 : index
      %34 = vector.load %arg1[%c0_33, %33, %c0_34, %c0_35] : memref<1x6x6x32xf32, #tpu.memory_space<vmem>>, vector<1x1x4x32xf32>
      %35 = vector.shape_cast %34 : vector<1x1x4x32xf32> to vector<4x32xf32>
      %36 = arith.truncf %35 : vector<4x32xf32> to vector<4x32xbf16>
      %cst_36 = arith.constant dense<0.000000e+00> : vector<4x32xf32>
      %37 = tpu.matmul %36, %5, %cst_36 {dimension_numbers = #tpu.dot_dimension_numbers<[1], [0], [0], [1], [0, 0, 1, 1], [], []>} : vector<4x32xbf16>, vector<32x32xbf16>, vector<4x32xf32> -> vector<4x32xf32>
      %38 = arith.addf %31, %37 : vector<4x32xf32>
      %c0_i32_37 = arith.constant 0 : i32
      %39 = arith.addi %arg7, %c0_i32_37 : i32
      %c0_38 = arith.constant 0 : index
      %40 = arith.index_cast %39 : i32 to index
      %c1_39 = arith.constant 1 : index
      %c0_40 = arith.constant 0 : index
      %41 = vector.load %arg1[%c0_38, %40, %c1_39, %c0_40] : memref<1x6x6x32xf32, #tpu.memory_space<vmem>>, vector<1x1x4x32xf32>
      %42 = vector.shape_cast %41 : vector<1x1x4x32xf32> to vector<4x32xf32>
      %43 = arith.truncf %42 : vector<4x32xf32> to vector<4x32xbf16>
      %cst_41 = arith.constant dense<0.000000e+00> : vector<4x32xf32>
      %44 = tpu.matmul %43, %7, %cst_41 {dimension_numbers = #tpu.dot_dimension_numbers<[1], [0], [0], [1], [0, 0, 1, 1], [], []>} : vector<4x32xbf16>, vector<32x32xbf16>, vector<4x32xf32> -> vector<4x32xf32>
      %45 = arith.addf %38, %44 : vector<4x32xf32>
      %c0_i32_42 = arith.constant 0 : i32
      %46 = arith.addi %arg7, %c0_i32_42 : i32
      %c0_43 = arith.constant 0 : index
      %47 = arith.index_cast %46 : i32 to index
      %c2_44 = arith.constant 2 : index
      %c0_45 = arith.constant 0 : index
      %48 = vector.load %arg1[%c0_43, %47, %c2_44, %c0_45] : memref<1x6x6x32xf32, #tpu.memory_space<vmem>>, vector<1x1x4x32xf32>
      %49 = vector.shape_cast %48 : vector<1x1x4x32xf32> to vector<4x32xf32>
      %50 = arith.truncf %49 : vector<4x32xf32> to vector<4x32xbf16>
      %cst_46 = arith.constant dense<0.000000e+00> : vector<4x32xf32>
      %51 = tpu.matmul %50, %9, %cst_46 {dimension_numbers = #tpu.dot_dimension_numbers<[1], [0], [0], [1], [0, 0, 1, 1], [], []>} : vector<4x32xbf16>, vector<32x32xbf16>, vector<4x32xf32> -> vector<4x32xf32>
      %52 = arith.addf %45, %51 : vector<4x32xf32>
      %c1_i32_47 = arith.constant 1 : i32
      %53 = arith.addi %arg7, %c1_i32_47 : i32
      %c0_48 = arith.constant 0 : index
      %54 = arith.index_cast %53 : i32 to index
      %c0_49 = arith.constant 0 : index
      %c0_50 = arith.constant 0 : index
      %55 = vector.load %arg1[%c0_48, %54, %c0_49, %c0_50] : memref<1x6x6x32xf32, #tpu.memory_space<vmem>>, vector<1x1x4x32xf32>
      %56 = vector.shape_cast %55 : vector<1x1x4x32xf32> to vector<4x32xf32>
      %57 = arith.truncf %56 : vector<4x32xf32> to vector<4x32xbf16>
      %cst_51 = arith.constant dense<0.000000e+00> : vector<4x32xf32>
      %58 = tpu.matmul %57, %11, %cst_51 {dimension_numbers = #tpu.dot_dimension_numbers<[1], [0], [0], [1], [0, 0, 1, 1], [], []>} : vector<4x32xbf16>, vector<32x32xbf16>, vector<4x32xf32> -> vector<4x32xf32>
      %59 = arith.addf %52, %58 : vector<4x32xf32>
      %c1_i32_52 = arith.constant 1 : i32
      %60 = arith.addi %arg7, %c1_i32_52 : i32
      %c0_53 = arith.constant 0 : index
      %61 = arith.index_cast %60 : i32 to index
      %c1_54 = arith.constant 1 : index
      %c0_55 = arith.constant 0 : index
      %62 = vector.load %arg1[%c0_53, %61, %c1_54, %c0_55] : memref<1x6x6x32xf32, #tpu.memory_space<vmem>>, vector<1x1x4x32xf32>
      %63 = vector.shape_cast %62 : vector<1x1x4x32xf32> to vector<4x32xf32>
      %64 = arith.truncf %63 : vector<4x32xf32> to vector<4x32xbf16>
      %cst_56 = arith.constant dense<0.000000e+00> : vector<4x32xf32>
      %65 = tpu.matmul %64, %13, %cst_56 {dimension_numbers = #tpu.dot_dimension_numbers<[1], [0], [0], [1], [0, 0, 1, 1], [], []>} : vector<4x32xbf16>, vector<32x32xbf16>, vector<4x32xf32> -> vector<4x32xf32>
      %66 = arith.addf %59, %65 : vector<4x32xf32>
      %c1_i32_57 = arith.constant 1 : i32
      %67 = arith.addi %arg7, %c1_i32_57 : i32
      %c0_58 = arith.constant 0 : index
      %68 = arith.index_cast %67 : i32 to index
      %c2_59 = arith.constant 2 : index
      %c0_60 = arith.constant 0 : index
      %69 = vector.load %arg1[%c0_58, %68, %c2_59, %c0_60] : memref<1x6x6x32xf32, #tpu.memory_space<vmem>>, vector<1x1x4x32xf32>
      %70 = vector.shape_cast %69 : vector<1x1x4x32xf32> to vector<4x32xf32>
      %71 = arith.truncf %70 : vector<4x32xf32> to vector<4x32xbf16>
      %cst_61 = arith.constant dense<0.000000e+00> : vector<4x32xf32>
      %72 = tpu.matmul %71, %15, %cst_61 {dimension_numbers = #tpu.dot_dimension_numbers<[1], [0], [0], [1], [0, 0, 1, 1], [], []>} : vector<4x32xbf16>, vector<32x32xbf16>, vector<4x32xf32> -> vector<4x32xf32>
      %73 = arith.addf %66, %72 : vector<4x32xf32>
      %c2_i32 = arith.constant 2 : i32
      %74 = arith.addi %arg7, %c2_i32 : i32
      %c0_62 = arith.constant 0 : index
      %75 = arith.index_cast %74 : i32 to index
      %c0_63 = arith.constant 0 : index
      %c0_64 = arith.constant 0 : index
      %76 = vector.load %arg1[%c0_62, %75, %c0_63, %c0_64] : memref<1x6x6x32xf32, #tpu.memory_space<vmem>>, vector<1x1x4x32xf32>
      %77 = vector.shape_cast %76 : vector<1x1x4x32xf32> to vector<4x32xf32>
      %78 = arith.truncf %77 : vector<4x32xf32> to vector<4x32xbf16>
      %cst_65 = arith.constant dense<0.000000e+00> : vector<4x32xf32>
      %79 = tpu.matmul %78, %17, %cst_65 {dimension_numbers = #tpu.dot_dimension_numbers<[1], [0], [0], [1], [0, 0, 1, 1], [], []>} : vector<4x32xbf16>, vector<32x32xbf16>, vector<4x32xf32> -> vector<4x32xf32>
      %80 = arith.addf %73, %79 : vector<4x32xf32>
      %c2_i32_66 = arith.constant 2 : i32
      %81 = arith.addi %arg7, %c2_i32_66 : i32
      %c0_67 = arith.constant 0 : index
      %82 = arith.index_cast %81 : i32 to index
      %c1_68 = arith.constant 1 : index
      %c0_69 = arith.constant 0 : index
      %83 = vector.load %arg1[%c0_67, %82, %c1_68, %c0_69] : memref<1x6x6x32xf32, #tpu.memory_space<vmem>>, vector<1x1x4x32xf32>
      %84 = vector.shape_cast %83 : vector<1x1x4x32xf32> to vector<4x32xf32>
      %85 = arith.truncf %84 : vector<4x32xf32> to vector<4x32xbf16>
      %cst_70 = arith.constant dense<0.000000e+00> : vector<4x32xf32>
      %86 = tpu.matmul %85, %19, %cst_70 {dimension_numbers = #tpu.dot_dimension_numbers<[1], [0], [0], [1], [0, 0, 1, 1], [], []>} : vector<4x32xbf16>, vector<32x32xbf16>, vector<4x32xf32> -> vector<4x32xf32>
      %87 = arith.addf %80, %86 : vector<4x32xf32>
      %c2_i32_71 = arith.constant 2 : i32
      %88 = arith.addi %arg7, %c2_i32_71 : i32
      %c0_72 = arith.constant 0 : index
      %89 = arith.index_cast %88 : i32 to index
      %c2_73 = arith.constant 2 : index
      %c0_74 = arith.constant 0 : index
      %90 = vector.load %arg1[%c0_72, %89, %c2_73, %c0_74] : memref<1x6x6x32xf32, #tpu.memory_space<vmem>>, vector<1x1x4x32xf32>
      %91 = vector.shape_cast %90 : vector<1x1x4x32xf32> to vector<4x32xf32>
      %92 = arith.truncf %91 : vector<4x32xf32> to vector<4x32xbf16>
      %cst_75 = arith.constant dense<0.000000e+00> : vector<4x32xf32>
      %93 = tpu.matmul %92, %21, %cst_75 {dimension_numbers = #tpu.dot_dimension_numbers<[1], [0], [0], [1], [0, 0, 1, 1], [], []>} : vector<4x32xbf16>, vector<32x32xbf16>, vector<4x32xf32> -> vector<4x32xf32>
      %94 = arith.addf %87, %93 : vector<4x32xf32>
      %95 = vector.broadcast %3 : vector<1x32xf32> to vector<4x32xf32>
      %96 = arith.addf %94, %95 : vector<4x32xf32>
      %c0_76 = arith.constant 0 : index
      %97 = arith.index_cast %arg7 : i32 to index
      %c0_77 = arith.constant 0 : index
      %c0_78 = arith.constant 0 : index
      %98 = vector.load %arg4[%c0_76, %97, %c0_77, %c0_78] : memref<1x4x4x32xf32, #tpu.memory_space<vmem>>, vector<1x1x4x32xf32>
      %99 = vector.shape_cast %98 : vector<1x1x4x32xf32> to vector<4x32xf32>
      %100 = vector.shape_cast %96 : vector<4x32xf32> to vector<1x1x4x32xf32>
      tpu.vector_store %arg4[%c0_76, %97, %c0_77, %c0_78], %100 {strides = array<i32>} : memref<1x4x4x32xf32, #tpu.memory_space<vmem>>, vector<1x1x4x32xf32>,
      %cst_79 = arith.constant dense<0.000000e+00> : vector<32xf32>
      %101 = vector.multi_reduction <add>, %96, %cst_79 [0] : vector<4x32xf32> to vector<32xf32>
      %102 = vector.shape_cast %101 : vector<32xf32> to vector<1x32xf32>
      %103 = arith.addf %arg8, %102 : vector<1x32xf32>
      %104 = arith.mulf %96, %96 : vector<4x32xf32>
      %cst_80 = arith.constant dense<0.000000e+00> : vector<32xf32>
      %105 = vector.multi_reduction <add>, %104, %cst_80 [0] : vector<4x32xf32> to vector<32xf32>
      %106 = vector.shape_cast %105 : vector<32xf32> to vector<1x32xf32>
      %107 = arith.addf %arg9, %106 : vector<1x32xf32>
      scf.yield %103, %107 : vector<1x32xf32>, vector<1x32xf32>
    }
    %c4_i32_22 = arith.constant 4 : i32
    %c0_23 = arith.constant 0 : index
    %c0_24 = arith.constant 0 : index
    %25 = vector.load %arg5[%c0_23, %c0_24] : memref<1x32xf32, #tpu.memory_space<vmem>>, vector<1x32xf32>
    %26 = arith.addf %25, %24#0 : vector<1x32xf32>
    %c0_25 = arith.constant 0 : index
    %c0_26 = arith.constant 0 : index
    %27 = vector.load %arg5[%c0_25, %c0_26] : memref<1x32xf32, #tpu.memory_space<vmem>>, vector<1x32xf32>
    tpu.vector_store %arg5[%c0_25, %c0_26], %26 {strides = array<i32>} : memref<1x32xf32, #tpu.memory_space<vmem>>, vector<1x32xf32>,
    %c0_27 = arith.constant 0 : index
    %c0_28 = arith.constant 0 : index
    %28 = vector.load %arg6[%c0_27, %c0_28] : memref<1x32xf32, #tpu.memory_space<vmem>>, vector<1x32xf32>
    %29 = arith.addf %28, %24#1 : vector<1x32xf32>
    %c0_29 = arith.constant 0 : index
    %c0_30 = arith.constant 0 : index
    %30 = vector.load %arg6[%c0_29, %c0_30] : memref<1x32xf32, #tpu.memory_space<vmem>>, vector<1x32xf32>
    tpu.vector_store %arg6[%c0_29, %c0_30], %29 {strides = array<i32>} : memref<1x32xf32, #tpu.memory_space<vmem>>, vector<1x32xf32>,
    return
  }
  func.func @transform_0(%arg0: i32) -> (i32, i32, i32, i32) {
    %c0_i32 = arith.constant 0 : i32
    %c0_i32_0 = arith.constant 0 : i32
    %c0_i32_1 = arith.constant 0 : i32
    %c0_i32_2 = arith.constant 0 : i32
    return %arg0, %c0_i32, %c0_i32_0, %c0_i32_1 : i32, i32, i32, i32
  }
  func.func @transform_1(%arg0: i32) -> (i32, i32, i32) {
    %c0_i32 = arith.constant 0 : i32
    %c0_i32_0 = arith.constant 0 : i32
    %c0_i32_1 = arith.constant 0 : i32
    %c0_i32_2 = arith.constant 0 : i32
    return %c0_i32, %c0_i32_0, %c0_i32_1 : i32, i32, i32
  }
  func.func @transform_2(%arg0: i32) -> (i32, i32) {
    %c0_i32 = arith.constant 0 : i32
    %c0_i32_0 = arith.constant 0 : i32
    %c0_i32_1 = arith.constant 0 : i32
    return %c0_i32, %c0_i32_0 : i32, i32
  }
  func.func @transform_3(%arg0: i32) -> (i32, i32, i32, i32) {
    %c0_i32 = arith.constant 0 : i32
    %c0_i32_0 = arith.constant 0 : i32
    %c0_i32_1 = arith.constant 0 : i32
    %c0_i32_2 = arith.constant 0 : i32
    return %arg0, %c0_i32, %c0_i32_0, %c0_i32_1 : i32, i32, i32, i32
  }
  func.func @transform_4(%arg0: i32) -> (i32, i32) {
    %c0_i32 = arith.constant 0 : i32
    %c0_i32_0 = arith.constant 0 : i32
    %c0_i32_1 = arith.constant 0 : i32
    return %c0_i32, %c0_i32_0 : i32, i32
  }
  func.func @transform_5(%arg0: i32) -> (i32, i32) {
    %c0_i32 = arith.constant 0 : i32
    %c0_i32_0 = arith.constant 0 : i32
    %c0_i32_1 = arith.constant 0 : i32
    return %c0_i32, %c0_i32_0 : i32, i32
  }
}

module attributes {stable_mosaic.version = 11 : i64} {
  func.func @_conv_transpose2x2_kernel(%arg0: i32, %arg1: memref<1x4x4x32xf32, #tpu.memory_space<vmem>>, %arg2: memref<2x32x32xbf16, #tpu.memory_space<vmem>>, %arg3: memref<1x32xf32, #tpu.memory_space<vmem>>, %arg4: memref<1x4x2x4x32xf32, #tpu.memory_space<vmem>>) attributes {dimension_semantics = [#tpu.dimension_semantics<parallel>], iteration_bounds = array<i64: 2>, scalar_prefetch = 0 : i64, scratch_operands = 0 : i64, tpu.core_type = #tpu.core_type<tc>, window_params = [{transform_indices = @transform_0, window_bounds = array<i64: 1, 4, 4, 32>}, {pipeline_mode = #tpu.pipeline_mode<synchronous>, transform_indices = @transform_1, window_bounds = array<i64: 2, 32, 32>}, {pipeline_mode = #tpu.pipeline_mode<synchronous>, transform_indices = @transform_2, window_bounds = array<i64: 1, 32>}, {transform_indices = @transform_3, window_bounds = array<i64: 1, 4, 2, 4, 32>}]} {
    %c0 = arith.constant 0 : index
    %c0_0 = arith.constant 0 : index
    %0 = vector.load %arg3[%c0, %c0_0] : memref<1x32xf32, #tpu.memory_space<vmem>>, vector<1x32xf32>
    %c0_1 = arith.constant 0 : index
    %c0_2 = arith.constant 0 : index
    %c0_3 = arith.constant 0 : index
    %1 = vector.load %arg2[%c0_1, %c0_2, %c0_3] : memref<2x32x32xbf16, #tpu.memory_space<vmem>>, vector<1x32x32xbf16>
    %2 = vector.shape_cast %1 : vector<1x32x32xbf16> to vector<32x32xbf16>
    %c1 = arith.constant 1 : index
    %c0_4 = arith.constant 0 : index
    %c0_5 = arith.constant 0 : index
    %3 = vector.load %arg2[%c1, %c0_4, %c0_5] : memref<2x32x32xbf16, #tpu.memory_space<vmem>>, vector<1x32x32xbf16>
    %4 = vector.shape_cast %3 : vector<1x32x32xbf16> to vector<32x32xbf16>
    %c0_i32 = arith.constant 0 : i32
    %c4_i32 = arith.constant 4 : i32
    %5 = arith.addi %c0_i32, %c4_i32 : i32
    %c1_i32 = arith.constant 1 : i32
    scf.for %arg5 = %c0_i32 to %5 step %c1_i32  : i32 {
      %c0_7 = arith.constant 0 : index
      %6 = arith.index_cast %arg5 : i32 to index
      %c0_8 = arith.constant 0 : index
      %c0_9 = arith.constant 0 : index
      %7 = vector.load %arg1[%c0_7, %6, %c0_8, %c0_9] : memref<1x4x4x32xf32, #tpu.memory_space<vmem>>, vector<1x1x4x32xf32>
      %8 = vector.shape_cast %7 : vector<1x1x4x32xf32> to vector<4x32xf32>
      %9 = arith.truncf %8 : vector<4x32xf32> to vector<4x32xbf16>
      %cst = arith.constant dense<0.000000e+00> : vector<4x32xf32>
      %10 = tpu.matmul %9, %2, %cst {dimension_numbers = #tpu.dot_dimension_numbers<[1], [0], [0], [1], [0, 0, 1, 1], [], []>} : vector<4x32xbf16>, vector<32x32xbf16>, vector<4x32xf32> -> vector<4x32xf32>
      %11 = vector.broadcast %0 : vector<1x32xf32> to vector<4x32xf32>
      %12 = arith.addf %10, %11 : vector<4x32xf32>
      %c0_10 = arith.constant 0 : index
      %13 = arith.index_cast %arg5 : i32 to index
      %c0_11 = arith.constant 0 : index
      %c0_12 = arith.constant 0 : index
      %c0_13 = arith.constant 0 : index
      %14 = vector.load %arg4[%c0_10, %13, %c0_11, %c0_12, %c0_13] : memref<1x4x2x4x32xf32, #tpu.memory_space<vmem>>, vector<1x1x1x4x32xf32>
      %15 = vector.shape_cast %14 : vector<1x1x1x4x32xf32> to vector<4x32xf32>
      %16 = vector.shape_cast %12 : vector<4x32xf32> to vector<1x1x1x4x32xf32>
      tpu.vector_store %arg4[%c0_10, %13, %c0_11, %c0_12, %c0_13], %16 {strides = array<i32>} : memref<1x4x2x4x32xf32, #tpu.memory_space<vmem>>, vector<1x1x1x4x32xf32>,
      %cst_14 = arith.constant dense<0.000000e+00> : vector<4x32xf32>
      %17 = tpu.matmul %9, %4, %cst_14 {dimension_numbers = #tpu.dot_dimension_numbers<[1], [0], [0], [1], [0, 0, 1, 1], [], []>} : vector<4x32xbf16>, vector<32x32xbf16>, vector<4x32xf32> -> vector<4x32xf32>
      %18 = vector.broadcast %0 : vector<1x32xf32> to vector<4x32xf32>
      %19 = arith.addf %17, %18 : vector<4x32xf32>
      %c0_15 = arith.constant 0 : index
      %20 = arith.index_cast %arg5 : i32 to index
      %c1_16 = arith.constant 1 : index
      %c0_17 = arith.constant 0 : index
      %c0_18 = arith.constant 0 : index
      %21 = vector.load %arg4[%c0_15, %20, %c1_16, %c0_17, %c0_18] : memref<1x4x2x4x32xf32, #tpu.memory_space<vmem>>, vector<1x1x1x4x32xf32>
      %22 = vector.shape_cast %21 : vector<1x1x1x4x32xf32> to vector<4x32xf32>
      %23 = vector.shape_cast %19 : vector<4x32xf32> to vector<1x1x1x4x32xf32>
      tpu.vector_store %arg4[%c0_15, %20, %c1_16, %c0_17, %c0_18], %23 {strides = array<i32>} : memref<1x4x2x4x32xf32, #tpu.memory_space<vmem>>, vector<1x1x1x4x32xf32>,
    }
    %c4_i32_6 = arith.constant 4 : i32
    return
  }
  func.func @transform_0(%arg0: i32) -> (i32, i32, i32, i32) {
    %c0_i32 = arith.constant 0 : i32
    %c0_i32_0 = arith.constant 0 : i32
    %c0_i32_1 = arith.constant 0 : i32
    %c0_i32_2 = arith.constant 0 : i32
    return %arg0, %c0_i32, %c0_i32_0, %c0_i32_1 : i32, i32, i32, i32
  }
  func.func @transform_1(%arg0: i32) -> (i32, i32, i32) {
    %c0_i32 = arith.constant 0 : i32
    %c0_i32_0 = arith.constant 0 : i32
    %c0_i32_1 = arith.constant 0 : i32
    %c0_i32_2 = arith.constant 0 : i32
    return %c0_i32, %c0_i32_0, %c0_i32_1 : i32, i32, i32
  }
  func.func @transform_2(%arg0: i32) -> (i32, i32) {
    %c0_i32 = arith.constant 0 : i32
    %c0_i32_0 = arith.constant 0 : i32
    %c0_i32_1 = arith.constant 0 : i32
    return %c0_i32, %c0_i32_0 : i32, i32
  }
  func.func @transform_3(%arg0: i32) -> (i32, i32, i32, i32, i32) {
    %c0_i32 = arith.constant 0 : i32
    %c0_i32_0 = arith.constant 0 : i32
    %c0_i32_1 = arith.constant 0 : i32
    %c0_i32_2 = arith.constant 0 : i32
    %c0_i32_3 = arith.constant 0 : i32
    return %arg0, %c0_i32, %c0_i32_0, %c0_i32_1, %c0_i32_2 : i32, i32, i32, i32, i32
  }
}

module attributes {stable_mosaic.version = 11 : i64} {
  func.func @_conv3x3_stats_kernel(%arg0: i32, %arg1: memref<1x10x10x32xf32, #tpu.memory_space<vmem>>, %arg2: memref<9x32x16xbf16, #tpu.memory_space<vmem>>, %arg3: memref<1x16xf32, #tpu.memory_space<vmem>>, %arg4: memref<1x8x8x16xf32, #tpu.memory_space<vmem>>, %arg5: memref<1x16xf32, #tpu.memory_space<vmem>>, %arg6: memref<1x16xf32, #tpu.memory_space<vmem>>) attributes {dimension_semantics = [#tpu.dimension_semantics<arbitrary>], iteration_bounds = array<i64: 2>, scalar_prefetch = 0 : i64, scratch_operands = 0 : i64, tpu.core_type = #tpu.core_type<tc>, window_params = [{transform_indices = @transform_0, window_bounds = array<i64: 1, 10, 10, 32>}, {pipeline_mode = #tpu.pipeline_mode<synchronous>, transform_indices = @transform_1, window_bounds = array<i64: 9, 32, 16>}, {pipeline_mode = #tpu.pipeline_mode<synchronous>, transform_indices = @transform_2, window_bounds = array<i64: 1, 16>}, {transform_indices = @transform_3, window_bounds = array<i64: 1, 8, 8, 16>}, {pipeline_mode = #tpu.pipeline_mode<synchronous>, transform_indices = @transform_4, window_bounds = array<i64: 1, 16>}, {pipeline_mode = #tpu.pipeline_mode<synchronous>, transform_indices = @transform_5, window_bounds = array<i64: 1, 16>}]} {
    %c0_i32 = arith.constant 0 : i32
    %0 = arith.cmpi eq, %arg0, %c0_i32 : i32
    %1 = arith.extui %0 : i1 to i32
    %c0_i32_0 = arith.constant 0 : i32
    %2 = arith.cmpi ne, %1, %c0_i32_0 : i32
    scf.if %2 {
      %cst_31 = arith.constant 0.000000e+00 : f32
      %31 = vector.broadcast %cst_31 : f32 to vector<1x16xf32>
      %c0_32 = arith.constant 0 : index
      %c0_33 = arith.constant 0 : index
      %32 = vector.load %arg5[%c0_32, %c0_33] : memref<1x16xf32, #tpu.memory_space<vmem>>, vector<1x16xf32>
      tpu.vector_store %arg5[%c0_32, %c0_33], %31 {strides = array<i32>} : memref<1x16xf32, #tpu.memory_space<vmem>>, vector<1x16xf32>,
      %cst_34 = arith.constant 0.000000e+00 : f32
      %33 = vector.broadcast %cst_34 : f32 to vector<1x16xf32>
      %c0_35 = arith.constant 0 : index
      %c0_36 = arith.constant 0 : index
      %34 = vector.load %arg6[%c0_35, %c0_36] : memref<1x16xf32, #tpu.memory_space<vmem>>, vector<1x16xf32>
      tpu.vector_store %arg6[%c0_35, %c0_36], %33 {strides = array<i32>} : memref<1x16xf32, #tpu.memory_space<vmem>>, vector<1x16xf32>,
    } else {
    }
    %c0 = arith.constant 0 : index
    %c0_1 = arith.constant 0 : index
    %3 = vector.load %arg3[%c0, %c0_1] : memref<1x16xf32, #tpu.memory_space<vmem>>, vector<1x16xf32>
    %c0_2 = arith.constant 0 : index
    %c0_3 = arith.constant 0 : index
    %c0_4 = arith.constant 0 : index
    %4 = vector.load %arg2[%c0_2, %c0_3, %c0_4] : memref<9x32x16xbf16, #tpu.memory_space<vmem>>, vector<1x32x16xbf16>
    %5 = vector.shape_cast %4 : vector<1x32x16xbf16> to vector<32x16xbf16>
    %c1 = arith.constant 1 : index
    %c0_5 = arith.constant 0 : index
    %c0_6 = arith.constant 0 : index
    %6 = vector.load %arg2[%c1, %c0_5, %c0_6] : memref<9x32x16xbf16, #tpu.memory_space<vmem>>, vector<1x32x16xbf16>
    %7 = vector.shape_cast %6 : vector<1x32x16xbf16> to vector<32x16xbf16>
    %c2 = arith.constant 2 : index
    %c0_7 = arith.constant 0 : index
    %c0_8 = arith.constant 0 : index
    %8 = vector.load %arg2[%c2, %c0_7, %c0_8] : memref<9x32x16xbf16, #tpu.memory_space<vmem>>, vector<1x32x16xbf16>
    %9 = vector.shape_cast %8 : vector<1x32x16xbf16> to vector<32x16xbf16>
    %c3 = arith.constant 3 : index
    %c0_9 = arith.constant 0 : index
    %c0_10 = arith.constant 0 : index
    %10 = vector.load %arg2[%c3, %c0_9, %c0_10] : memref<9x32x16xbf16, #tpu.memory_space<vmem>>, vector<1x32x16xbf16>
    %11 = vector.shape_cast %10 : vector<1x32x16xbf16> to vector<32x16xbf16>
    %c4 = arith.constant 4 : index
    %c0_11 = arith.constant 0 : index
    %c0_12 = arith.constant 0 : index
    %12 = vector.load %arg2[%c4, %c0_11, %c0_12] : memref<9x32x16xbf16, #tpu.memory_space<vmem>>, vector<1x32x16xbf16>
    %13 = vector.shape_cast %12 : vector<1x32x16xbf16> to vector<32x16xbf16>
    %c5 = arith.constant 5 : index
    %c0_13 = arith.constant 0 : index
    %c0_14 = arith.constant 0 : index
    %14 = vector.load %arg2[%c5, %c0_13, %c0_14] : memref<9x32x16xbf16, #tpu.memory_space<vmem>>, vector<1x32x16xbf16>
    %15 = vector.shape_cast %14 : vector<1x32x16xbf16> to vector<32x16xbf16>
    %c6 = arith.constant 6 : index
    %c0_15 = arith.constant 0 : index
    %c0_16 = arith.constant 0 : index
    %16 = vector.load %arg2[%c6, %c0_15, %c0_16] : memref<9x32x16xbf16, #tpu.memory_space<vmem>>, vector<1x32x16xbf16>
    %17 = vector.shape_cast %16 : vector<1x32x16xbf16> to vector<32x16xbf16>
    %c7 = arith.constant 7 : index
    %c0_17 = arith.constant 0 : index
    %c0_18 = arith.constant 0 : index
    %18 = vector.load %arg2[%c7, %c0_17, %c0_18] : memref<9x32x16xbf16, #tpu.memory_space<vmem>>, vector<1x32x16xbf16>
    %19 = vector.shape_cast %18 : vector<1x32x16xbf16> to vector<32x16xbf16>
    %c8 = arith.constant 8 : index
    %c0_19 = arith.constant 0 : index
    %c0_20 = arith.constant 0 : index
    %20 = vector.load %arg2[%c8, %c0_19, %c0_20] : memref<9x32x16xbf16, #tpu.memory_space<vmem>>, vector<1x32x16xbf16>
    %21 = vector.shape_cast %20 : vector<1x32x16xbf16> to vector<32x16xbf16>
    %cst = arith.constant 0.000000e+00 : f32
    %22 = vector.broadcast %cst : f32 to vector<1x16xf32>
    %c0_i32_21 = arith.constant 0 : i32
    %c8_i32 = arith.constant 8 : i32
    %23 = arith.addi %c0_i32_21, %c8_i32 : i32
    %c1_i32 = arith.constant 1 : i32
    %24:2 = scf.for %arg7 = %c0_i32_21 to %23 step %c1_i32 iter_args(%arg8 = %22, %arg9 = %22) -> (vector<1x16xf32>, vector<1x16xf32>)  : i32 {
      %cst_31 = arith.constant 0.000000e+00 : f32
      %31 = vector.broadcast %cst_31 : f32 to vector<8x16xf32>
      %c0_i32_32 = arith.constant 0 : i32
      %32 = arith.addi %arg7, %c0_i32_32 : i32
      %c0_33 = arith.constant 0 : index
      %33 = arith.index_cast %32 : i32 to index
      %c0_34 = arith.constant 0 : index
      %c0_35 = arith.constant 0 : index
      %34 = vector.load %arg1[%c0_33, %33, %c0_34, %c0_35] : memref<1x10x10x32xf32, #tpu.memory_space<vmem>>, vector<1x1x8x32xf32>
      %35 = vector.shape_cast %34 : vector<1x1x8x32xf32> to vector<8x32xf32>
      %36 = arith.truncf %35 : vector<8x32xf32> to vector<8x32xbf16>
      %cst_36 = arith.constant dense<0.000000e+00> : vector<8x16xf32>
      %37 = tpu.matmul %36, %5, %cst_36 {dimension_numbers = #tpu.dot_dimension_numbers<[1], [0], [0], [1], [0, 0, 1, 1], [], []>} : vector<8x32xbf16>, vector<32x16xbf16>, vector<8x16xf32> -> vector<8x16xf32>
      %38 = arith.addf %31, %37 : vector<8x16xf32>
      %c0_i32_37 = arith.constant 0 : i32
      %39 = arith.addi %arg7, %c0_i32_37 : i32
      %c0_38 = arith.constant 0 : index
      %40 = arith.index_cast %39 : i32 to index
      %c1_39 = arith.constant 1 : index
      %c0_40 = arith.constant 0 : index
      %41 = vector.load %arg1[%c0_38, %40, %c1_39, %c0_40] : memref<1x10x10x32xf32, #tpu.memory_space<vmem>>, vector<1x1x8x32xf32>
      %42 = vector.shape_cast %41 : vector<1x1x8x32xf32> to vector<8x32xf32>
      %43 = arith.truncf %42 : vector<8x32xf32> to vector<8x32xbf16>
      %cst_41 = arith.constant dense<0.000000e+00> : vector<8x16xf32>
      %44 = tpu.matmul %43, %7, %cst_41 {dimension_numbers = #tpu.dot_dimension_numbers<[1], [0], [0], [1], [0, 0, 1, 1], [], []>} : vector<8x32xbf16>, vector<32x16xbf16>, vector<8x16xf32> -> vector<8x16xf32>
      %45 = arith.addf %38, %44 : vector<8x16xf32>
      %c0_i32_42 = arith.constant 0 : i32
      %46 = arith.addi %arg7, %c0_i32_42 : i32
      %c0_43 = arith.constant 0 : index
      %47 = arith.index_cast %46 : i32 to index
      %c2_44 = arith.constant 2 : index
      %c0_45 = arith.constant 0 : index
      %48 = vector.load %arg1[%c0_43, %47, %c2_44, %c0_45] : memref<1x10x10x32xf32, #tpu.memory_space<vmem>>, vector<1x1x8x32xf32>
      %49 = vector.shape_cast %48 : vector<1x1x8x32xf32> to vector<8x32xf32>
      %50 = arith.truncf %49 : vector<8x32xf32> to vector<8x32xbf16>
      %cst_46 = arith.constant dense<0.000000e+00> : vector<8x16xf32>
      %51 = tpu.matmul %50, %9, %cst_46 {dimension_numbers = #tpu.dot_dimension_numbers<[1], [0], [0], [1], [0, 0, 1, 1], [], []>} : vector<8x32xbf16>, vector<32x16xbf16>, vector<8x16xf32> -> vector<8x16xf32>
      %52 = arith.addf %45, %51 : vector<8x16xf32>
      %c1_i32_47 = arith.constant 1 : i32
      %53 = arith.addi %arg7, %c1_i32_47 : i32
      %c0_48 = arith.constant 0 : index
      %54 = arith.index_cast %53 : i32 to index
      %c0_49 = arith.constant 0 : index
      %c0_50 = arith.constant 0 : index
      %55 = vector.load %arg1[%c0_48, %54, %c0_49, %c0_50] : memref<1x10x10x32xf32, #tpu.memory_space<vmem>>, vector<1x1x8x32xf32>
      %56 = vector.shape_cast %55 : vector<1x1x8x32xf32> to vector<8x32xf32>
      %57 = arith.truncf %56 : vector<8x32xf32> to vector<8x32xbf16>
      %cst_51 = arith.constant dense<0.000000e+00> : vector<8x16xf32>
      %58 = tpu.matmul %57, %11, %cst_51 {dimension_numbers = #tpu.dot_dimension_numbers<[1], [0], [0], [1], [0, 0, 1, 1], [], []>} : vector<8x32xbf16>, vector<32x16xbf16>, vector<8x16xf32> -> vector<8x16xf32>
      %59 = arith.addf %52, %58 : vector<8x16xf32>
      %c1_i32_52 = arith.constant 1 : i32
      %60 = arith.addi %arg7, %c1_i32_52 : i32
      %c0_53 = arith.constant 0 : index
      %61 = arith.index_cast %60 : i32 to index
      %c1_54 = arith.constant 1 : index
      %c0_55 = arith.constant 0 : index
      %62 = vector.load %arg1[%c0_53, %61, %c1_54, %c0_55] : memref<1x10x10x32xf32, #tpu.memory_space<vmem>>, vector<1x1x8x32xf32>
      %63 = vector.shape_cast %62 : vector<1x1x8x32xf32> to vector<8x32xf32>
      %64 = arith.truncf %63 : vector<8x32xf32> to vector<8x32xbf16>
      %cst_56 = arith.constant dense<0.000000e+00> : vector<8x16xf32>
      %65 = tpu.matmul %64, %13, %cst_56 {dimension_numbers = #tpu.dot_dimension_numbers<[1], [0], [0], [1], [0, 0, 1, 1], [], []>} : vector<8x32xbf16>, vector<32x16xbf16>, vector<8x16xf32> -> vector<8x16xf32>
      %66 = arith.addf %59, %65 : vector<8x16xf32>
      %c1_i32_57 = arith.constant 1 : i32
      %67 = arith.addi %arg7, %c1_i32_57 : i32
      %c0_58 = arith.constant 0 : index
      %68 = arith.index_cast %67 : i32 to index
      %c2_59 = arith.constant 2 : index
      %c0_60 = arith.constant 0 : index
      %69 = vector.load %arg1[%c0_58, %68, %c2_59, %c0_60] : memref<1x10x10x32xf32, #tpu.memory_space<vmem>>, vector<1x1x8x32xf32>
      %70 = vector.shape_cast %69 : vector<1x1x8x32xf32> to vector<8x32xf32>
      %71 = arith.truncf %70 : vector<8x32xf32> to vector<8x32xbf16>
      %cst_61 = arith.constant dense<0.000000e+00> : vector<8x16xf32>
      %72 = tpu.matmul %71, %15, %cst_61 {dimension_numbers = #tpu.dot_dimension_numbers<[1], [0], [0], [1], [0, 0, 1, 1], [], []>} : vector<8x32xbf16>, vector<32x16xbf16>, vector<8x16xf32> -> vector<8x16xf32>
      %73 = arith.addf %66, %72 : vector<8x16xf32>
      %c2_i32 = arith.constant 2 : i32
      %74 = arith.addi %arg7, %c2_i32 : i32
      %c0_62 = arith.constant 0 : index
      %75 = arith.index_cast %74 : i32 to index
      %c0_63 = arith.constant 0 : index
      %c0_64 = arith.constant 0 : index
      %76 = vector.load %arg1[%c0_62, %75, %c0_63, %c0_64] : memref<1x10x10x32xf32, #tpu.memory_space<vmem>>, vector<1x1x8x32xf32>
      %77 = vector.shape_cast %76 : vector<1x1x8x32xf32> to vector<8x32xf32>
      %78 = arith.truncf %77 : vector<8x32xf32> to vector<8x32xbf16>
      %cst_65 = arith.constant dense<0.000000e+00> : vector<8x16xf32>
      %79 = tpu.matmul %78, %17, %cst_65 {dimension_numbers = #tpu.dot_dimension_numbers<[1], [0], [0], [1], [0, 0, 1, 1], [], []>} : vector<8x32xbf16>, vector<32x16xbf16>, vector<8x16xf32> -> vector<8x16xf32>
      %80 = arith.addf %73, %79 : vector<8x16xf32>
      %c2_i32_66 = arith.constant 2 : i32
      %81 = arith.addi %arg7, %c2_i32_66 : i32
      %c0_67 = arith.constant 0 : index
      %82 = arith.index_cast %81 : i32 to index
      %c1_68 = arith.constant 1 : index
      %c0_69 = arith.constant 0 : index
      %83 = vector.load %arg1[%c0_67, %82, %c1_68, %c0_69] : memref<1x10x10x32xf32, #tpu.memory_space<vmem>>, vector<1x1x8x32xf32>
      %84 = vector.shape_cast %83 : vector<1x1x8x32xf32> to vector<8x32xf32>
      %85 = arith.truncf %84 : vector<8x32xf32> to vector<8x32xbf16>
      %cst_70 = arith.constant dense<0.000000e+00> : vector<8x16xf32>
      %86 = tpu.matmul %85, %19, %cst_70 {dimension_numbers = #tpu.dot_dimension_numbers<[1], [0], [0], [1], [0, 0, 1, 1], [], []>} : vector<8x32xbf16>, vector<32x16xbf16>, vector<8x16xf32> -> vector<8x16xf32>
      %87 = arith.addf %80, %86 : vector<8x16xf32>
      %c2_i32_71 = arith.constant 2 : i32
      %88 = arith.addi %arg7, %c2_i32_71 : i32
      %c0_72 = arith.constant 0 : index
      %89 = arith.index_cast %88 : i32 to index
      %c2_73 = arith.constant 2 : index
      %c0_74 = arith.constant 0 : index
      %90 = vector.load %arg1[%c0_72, %89, %c2_73, %c0_74] : memref<1x10x10x32xf32, #tpu.memory_space<vmem>>, vector<1x1x8x32xf32>
      %91 = vector.shape_cast %90 : vector<1x1x8x32xf32> to vector<8x32xf32>
      %92 = arith.truncf %91 : vector<8x32xf32> to vector<8x32xbf16>
      %cst_75 = arith.constant dense<0.000000e+00> : vector<8x16xf32>
      %93 = tpu.matmul %92, %21, %cst_75 {dimension_numbers = #tpu.dot_dimension_numbers<[1], [0], [0], [1], [0, 0, 1, 1], [], []>} : vector<8x32xbf16>, vector<32x16xbf16>, vector<8x16xf32> -> vector<8x16xf32>
      %94 = arith.addf %87, %93 : vector<8x16xf32>
      %95 = vector.broadcast %3 : vector<1x16xf32> to vector<8x16xf32>
      %96 = arith.addf %94, %95 : vector<8x16xf32>
      %c0_76 = arith.constant 0 : index
      %97 = arith.index_cast %arg7 : i32 to index
      %c0_77 = arith.constant 0 : index
      %c0_78 = arith.constant 0 : index
      %98 = vector.load %arg4[%c0_76, %97, %c0_77, %c0_78] : memref<1x8x8x16xf32, #tpu.memory_space<vmem>>, vector<1x1x8x16xf32>
      %99 = vector.shape_cast %98 : vector<1x1x8x16xf32> to vector<8x16xf32>
      %100 = vector.shape_cast %96 : vector<8x16xf32> to vector<1x1x8x16xf32>
      tpu.vector_store %arg4[%c0_76, %97, %c0_77, %c0_78], %100 {strides = array<i32>} : memref<1x8x8x16xf32, #tpu.memory_space<vmem>>, vector<1x1x8x16xf32>,
      %cst_79 = arith.constant dense<0.000000e+00> : vector<16xf32>
      %101 = vector.multi_reduction <add>, %96, %cst_79 [0] : vector<8x16xf32> to vector<16xf32>
      %102 = vector.shape_cast %101 : vector<16xf32> to vector<1x16xf32>
      %103 = arith.addf %arg8, %102 : vector<1x16xf32>
      %104 = arith.mulf %96, %96 : vector<8x16xf32>
      %cst_80 = arith.constant dense<0.000000e+00> : vector<16xf32>
      %105 = vector.multi_reduction <add>, %104, %cst_80 [0] : vector<8x16xf32> to vector<16xf32>
      %106 = vector.shape_cast %105 : vector<16xf32> to vector<1x16xf32>
      %107 = arith.addf %arg9, %106 : vector<1x16xf32>
      scf.yield %103, %107 : vector<1x16xf32>, vector<1x16xf32>
    }
    %c8_i32_22 = arith.constant 8 : i32
    %c0_23 = arith.constant 0 : index
    %c0_24 = arith.constant 0 : index
    %25 = vector.load %arg5[%c0_23, %c0_24] : memref<1x16xf32, #tpu.memory_space<vmem>>, vector<1x16xf32>
    %26 = arith.addf %25, %24#0 : vector<1x16xf32>
    %c0_25 = arith.constant 0 : index
    %c0_26 = arith.constant 0 : index
    %27 = vector.load %arg5[%c0_25, %c0_26] : memref<1x16xf32, #tpu.memory_space<vmem>>, vector<1x16xf32>
    tpu.vector_store %arg5[%c0_25, %c0_26], %26 {strides = array<i32>} : memref<1x16xf32, #tpu.memory_space<vmem>>, vector<1x16xf32>,
    %c0_27 = arith.constant 0 : index
    %c0_28 = arith.constant 0 : index
    %28 = vector.load %arg6[%c0_27, %c0_28] : memref<1x16xf32, #tpu.memory_space<vmem>>, vector<1x16xf32>
    %29 = arith.addf %28, %24#1 : vector<1x16xf32>
    %c0_29 = arith.constant 0 : index
    %c0_30 = arith.constant 0 : index
    %30 = vector.load %arg6[%c0_29, %c0_30] : memref<1x16xf32, #tpu.memory_space<vmem>>, vector<1x16xf32>
    tpu.vector_store %arg6[%c0_29, %c0_30], %29 {strides = array<i32>} : memref<1x16xf32, #tpu.memory_space<vmem>>, vector<1x16xf32>,
    return
  }
  func.func @transform_0(%arg0: i32) -> (i32, i32, i32, i32) {
    %c0_i32 = arith.constant 0 : i32
    %c0_i32_0 = arith.constant 0 : i32
    %c0_i32_1 = arith.constant 0 : i32
    %c0_i32_2 = arith.constant 0 : i32
    return %arg0, %c0_i32, %c0_i32_0, %c0_i32_1 : i32, i32, i32, i32
  }
  func.func @transform_1(%arg0: i32) -> (i32, i32, i32) {
    %c0_i32 = arith.constant 0 : i32
    %c0_i32_0 = arith.constant 0 : i32
    %c0_i32_1 = arith.constant 0 : i32
    %c0_i32_2 = arith.constant 0 : i32
    return %c0_i32, %c0_i32_0, %c0_i32_1 : i32, i32, i32
  }
  func.func @transform_2(%arg0: i32) -> (i32, i32) {
    %c0_i32 = arith.constant 0 : i32
    %c0_i32_0 = arith.constant 0 : i32
    %c0_i32_1 = arith.constant 0 : i32
    return %c0_i32, %c0_i32_0 : i32, i32
  }
  func.func @transform_3(%arg0: i32) -> (i32, i32, i32, i32) {
    %c0_i32 = arith.constant 0 : i32
    %c0_i32_0 = arith.constant 0 : i32
    %c0_i32_1 = arith.constant 0 : i32
    %c0_i32_2 = arith.constant 0 : i32
    return %arg0, %c0_i32, %c0_i32_0, %c0_i32_1 : i32, i32, i32, i32
  }
  func.func @transform_4(%arg0: i32) -> (i32, i32) {
    %c0_i32 = arith.constant 0 : i32
    %c0_i32_0 = arith.constant 0 : i32
    %c0_i32_1 = arith.constant 0 : i32
    return %c0_i32, %c0_i32_0 : i32, i32
  }
  func.func @transform_5(%arg0: i32) -> (i32, i32) {
    %c0_i32 = arith.constant 0 : i32
    %c0_i32_0 = arith.constant 0 : i32
    %c0_i32_1 = arith.constant 0 : i32
    return %c0_i32, %c0_i32_0 : i32, i32
  }
}

module attributes {stable_mosaic.version = 11 : i64} {
  func.func @_conv_transpose2x2_kernel(%arg0: i32, %arg1: memref<1x8x8x16xf32, #tpu.memory_space<vmem>>, %arg2: memref<2x16x16xbf16, #tpu.memory_space<vmem>>, %arg3: memref<1x16xf32, #tpu.memory_space<vmem>>, %arg4: memref<1x8x2x8x16xf32, #tpu.memory_space<vmem>>) attributes {dimension_semantics = [#tpu.dimension_semantics<parallel>], iteration_bounds = array<i64: 2>, scalar_prefetch = 0 : i64, scratch_operands = 0 : i64, tpu.core_type = #tpu.core_type<tc>, window_params = [{transform_indices = @transform_0, window_bounds = array<i64: 1, 8, 8, 16>}, {pipeline_mode = #tpu.pipeline_mode<synchronous>, transform_indices = @transform_1, window_bounds = array<i64: 2, 16, 16>}, {pipeline_mode = #tpu.pipeline_mode<synchronous>, transform_indices = @transform_2, window_bounds = array<i64: 1, 16>}, {transform_indices = @transform_3, window_bounds = array<i64: 1, 8, 2, 8, 16>}]} {
    %c0 = arith.constant 0 : index
    %c0_0 = arith.constant 0 : index
    %0 = vector.load %arg3[%c0, %c0_0] : memref<1x16xf32, #tpu.memory_space<vmem>>, vector<1x16xf32>
    %c0_1 = arith.constant 0 : index
    %c0_2 = arith.constant 0 : index
    %c0_3 = arith.constant 0 : index
    %1 = vector.load %arg2[%c0_1, %c0_2, %c0_3] : memref<2x16x16xbf16, #tpu.memory_space<vmem>>, vector<1x16x16xbf16>
    %2 = vector.shape_cast %1 : vector<1x16x16xbf16> to vector<16x16xbf16>
    %c1 = arith.constant 1 : index
    %c0_4 = arith.constant 0 : index
    %c0_5 = arith.constant 0 : index
    %3 = vector.load %arg2[%c1, %c0_4, %c0_5] : memref<2x16x16xbf16, #tpu.memory_space<vmem>>, vector<1x16x16xbf16>
    %4 = vector.shape_cast %3 : vector<1x16x16xbf16> to vector<16x16xbf16>
    %c0_i32 = arith.constant 0 : i32
    %c8_i32 = arith.constant 8 : i32
    %5 = arith.addi %c0_i32, %c8_i32 : i32
    %c1_i32 = arith.constant 1 : i32
    scf.for %arg5 = %c0_i32 to %5 step %c1_i32  : i32 {
      %c0_7 = arith.constant 0 : index
      %6 = arith.index_cast %arg5 : i32 to index
      %c0_8 = arith.constant 0 : index
      %c0_9 = arith.constant 0 : index
      %7 = vector.load %arg1[%c0_7, %6, %c0_8, %c0_9] : memref<1x8x8x16xf32, #tpu.memory_space<vmem>>, vector<1x1x8x16xf32>
      %8 = vector.shape_cast %7 : vector<1x1x8x16xf32> to vector<8x16xf32>
      %9 = arith.truncf %8 : vector<8x16xf32> to vector<8x16xbf16>
      %cst = arith.constant dense<0.000000e+00> : vector<8x16xf32>
      %10 = tpu.matmul %9, %2, %cst {dimension_numbers = #tpu.dot_dimension_numbers<[1], [0], [0], [1], [0, 0, 1, 1], [], []>} : vector<8x16xbf16>, vector<16x16xbf16>, vector<8x16xf32> -> vector<8x16xf32>
      %11 = vector.broadcast %0 : vector<1x16xf32> to vector<8x16xf32>
      %12 = arith.addf %10, %11 : vector<8x16xf32>
      %c0_10 = arith.constant 0 : index
      %13 = arith.index_cast %arg5 : i32 to index
      %c0_11 = arith.constant 0 : index
      %c0_12 = arith.constant 0 : index
      %c0_13 = arith.constant 0 : index
      %14 = vector.load %arg4[%c0_10, %13, %c0_11, %c0_12, %c0_13] : memref<1x8x2x8x16xf32, #tpu.memory_space<vmem>>, vector<1x1x1x8x16xf32>
      %15 = vector.shape_cast %14 : vector<1x1x1x8x16xf32> to vector<8x16xf32>
      %16 = vector.shape_cast %12 : vector<8x16xf32> to vector<1x1x1x8x16xf32>
      tpu.vector_store %arg4[%c0_10, %13, %c0_11, %c0_12, %c0_13], %16 {strides = array<i32>} : memref<1x8x2x8x16xf32, #tpu.memory_space<vmem>>, vector<1x1x1x8x16xf32>,
      %cst_14 = arith.constant dense<0.000000e+00> : vector<8x16xf32>
      %17 = tpu.matmul %9, %4, %cst_14 {dimension_numbers = #tpu.dot_dimension_numbers<[1], [0], [0], [1], [0, 0, 1, 1], [], []>} : vector<8x16xbf16>, vector<16x16xbf16>, vector<8x16xf32> -> vector<8x16xf32>
      %18 = vector.broadcast %0 : vector<1x16xf32> to vector<8x16xf32>
      %19 = arith.addf %17, %18 : vector<8x16xf32>
      %c0_15 = arith.constant 0 : index
      %20 = arith.index_cast %arg5 : i32 to index
      %c1_16 = arith.constant 1 : index
      %c0_17 = arith.constant 0 : index
      %c0_18 = arith.constant 0 : index
      %21 = vector.load %arg4[%c0_15, %20, %c1_16, %c0_17, %c0_18] : memref<1x8x2x8x16xf32, #tpu.memory_space<vmem>>, vector<1x1x1x8x16xf32>
      %22 = vector.shape_cast %21 : vector<1x1x1x8x16xf32> to vector<8x16xf32>
      %23 = vector.shape_cast %19 : vector<8x16xf32> to vector<1x1x1x8x16xf32>
      tpu.vector_store %arg4[%c0_15, %20, %c1_16, %c0_17, %c0_18], %23 {strides = array<i32>} : memref<1x8x2x8x16xf32, #tpu.memory_space<vmem>>, vector<1x1x1x8x16xf32>,
    }
    %c8_i32_6 = arith.constant 8 : i32
    return
  }
  func.func @transform_0(%arg0: i32) -> (i32, i32, i32, i32) {
    %c0_i32 = arith.constant 0 : i32
    %c0_i32_0 = arith.constant 0 : i32
    %c0_i32_1 = arith.constant 0 : i32
    %c0_i32_2 = arith.constant 0 : i32
    return %arg0, %c0_i32, %c0_i32_0, %c0_i32_1 : i32, i32, i32, i32
  }
  func.func @transform_1(%arg0: i32) -> (i32, i32, i32) {
    %c0_i32 = arith.constant 0 : i32
    %c0_i32_0 = arith.constant 0 : i32
    %c0_i32_1 = arith.constant 0 : i32
    %c0_i32_2 = arith.constant 0 : i32
    return %c0_i32, %c0_i32_0, %c0_i32_1 : i32, i32, i32
  }
  func.func @transform_2(%arg0: i32) -> (i32, i32) {
    %c0_i32 = arith.constant 0 : i32
    %c0_i32_0 = arith.constant 0 : i32
    %c0_i32_1 = arith.constant 0 : i32
    return %c0_i32, %c0_i32_0 : i32, i32
  }
  func.func @transform_3(%arg0: i32) -> (i32, i32, i32, i32, i32) {
    %c0_i32 = arith.constant 0 : i32
    %c0_i32_0 = arith.constant 0 : i32
    %c0_i32_1 = arith.constant 0 : i32
    %c0_i32_2 = arith.constant 0 : i32
    %c0_i32_3 = arith.constant 0 : i32
    return %arg0, %c0_i32, %c0_i32_0, %c0_i32_1, %c0_i32_2 : i32, i32, i32, i32, i32
  }
}

module attributes {stable_mosaic.version = 11 : i64} {
  func.func @_conv3x3_stats_kernel(%arg0: i32, %arg1: memref<1x18x18x16xf32, #tpu.memory_space<vmem>>, %arg2: memref<9x16x8xbf16, #tpu.memory_space<vmem>>, %arg3: memref<1x8xf32, #tpu.memory_space<vmem>>, %arg4: memref<1x16x16x8xf32, #tpu.memory_space<vmem>>, %arg5: memref<1x8xf32, #tpu.memory_space<vmem>>, %arg6: memref<1x8xf32, #tpu.memory_space<vmem>>) attributes {dimension_semantics = [#tpu.dimension_semantics<arbitrary>], iteration_bounds = array<i64: 2>, scalar_prefetch = 0 : i64, scratch_operands = 0 : i64, tpu.core_type = #tpu.core_type<tc>, window_params = [{transform_indices = @transform_0, window_bounds = array<i64: 1, 18, 18, 16>}, {pipeline_mode = #tpu.pipeline_mode<synchronous>, transform_indices = @transform_1, window_bounds = array<i64: 9, 16, 8>}, {pipeline_mode = #tpu.pipeline_mode<synchronous>, transform_indices = @transform_2, window_bounds = array<i64: 1, 8>}, {transform_indices = @transform_3, window_bounds = array<i64: 1, 16, 16, 8>}, {pipeline_mode = #tpu.pipeline_mode<synchronous>, transform_indices = @transform_4, window_bounds = array<i64: 1, 8>}, {pipeline_mode = #tpu.pipeline_mode<synchronous>, transform_indices = @transform_5, window_bounds = array<i64: 1, 8>}]} {
    %c0_i32 = arith.constant 0 : i32
    %0 = arith.cmpi eq, %arg0, %c0_i32 : i32
    %1 = arith.extui %0 : i1 to i32
    %c0_i32_0 = arith.constant 0 : i32
    %2 = arith.cmpi ne, %1, %c0_i32_0 : i32
    scf.if %2 {
      %cst_31 = arith.constant 0.000000e+00 : f32
      %31 = vector.broadcast %cst_31 : f32 to vector<1x8xf32>
      %c0_32 = arith.constant 0 : index
      %c0_33 = arith.constant 0 : index
      %32 = vector.load %arg5[%c0_32, %c0_33] : memref<1x8xf32, #tpu.memory_space<vmem>>, vector<1x8xf32>
      tpu.vector_store %arg5[%c0_32, %c0_33], %31 {strides = array<i32>} : memref<1x8xf32, #tpu.memory_space<vmem>>, vector<1x8xf32>,
      %cst_34 = arith.constant 0.000000e+00 : f32
      %33 = vector.broadcast %cst_34 : f32 to vector<1x8xf32>
      %c0_35 = arith.constant 0 : index
      %c0_36 = arith.constant 0 : index
      %34 = vector.load %arg6[%c0_35, %c0_36] : memref<1x8xf32, #tpu.memory_space<vmem>>, vector<1x8xf32>
      tpu.vector_store %arg6[%c0_35, %c0_36], %33 {strides = array<i32>} : memref<1x8xf32, #tpu.memory_space<vmem>>, vector<1x8xf32>,
    } else {
    }
    %c0 = arith.constant 0 : index
    %c0_1 = arith.constant 0 : index
    %3 = vector.load %arg3[%c0, %c0_1] : memref<1x8xf32, #tpu.memory_space<vmem>>, vector<1x8xf32>
    %c0_2 = arith.constant 0 : index
    %c0_3 = arith.constant 0 : index
    %c0_4 = arith.constant 0 : index
    %4 = vector.load %arg2[%c0_2, %c0_3, %c0_4] : memref<9x16x8xbf16, #tpu.memory_space<vmem>>, vector<1x16x8xbf16>
    %5 = vector.shape_cast %4 : vector<1x16x8xbf16> to vector<16x8xbf16>
    %c1 = arith.constant 1 : index
    %c0_5 = arith.constant 0 : index
    %c0_6 = arith.constant 0 : index
    %6 = vector.load %arg2[%c1, %c0_5, %c0_6] : memref<9x16x8xbf16, #tpu.memory_space<vmem>>, vector<1x16x8xbf16>
    %7 = vector.shape_cast %6 : vector<1x16x8xbf16> to vector<16x8xbf16>
    %c2 = arith.constant 2 : index
    %c0_7 = arith.constant 0 : index
    %c0_8 = arith.constant 0 : index
    %8 = vector.load %arg2[%c2, %c0_7, %c0_8] : memref<9x16x8xbf16, #tpu.memory_space<vmem>>, vector<1x16x8xbf16>
    %9 = vector.shape_cast %8 : vector<1x16x8xbf16> to vector<16x8xbf16>
    %c3 = arith.constant 3 : index
    %c0_9 = arith.constant 0 : index
    %c0_10 = arith.constant 0 : index
    %10 = vector.load %arg2[%c3, %c0_9, %c0_10] : memref<9x16x8xbf16, #tpu.memory_space<vmem>>, vector<1x16x8xbf16>
    %11 = vector.shape_cast %10 : vector<1x16x8xbf16> to vector<16x8xbf16>
    %c4 = arith.constant 4 : index
    %c0_11 = arith.constant 0 : index
    %c0_12 = arith.constant 0 : index
    %12 = vector.load %arg2[%c4, %c0_11, %c0_12] : memref<9x16x8xbf16, #tpu.memory_space<vmem>>, vector<1x16x8xbf16>
    %13 = vector.shape_cast %12 : vector<1x16x8xbf16> to vector<16x8xbf16>
    %c5 = arith.constant 5 : index
    %c0_13 = arith.constant 0 : index
    %c0_14 = arith.constant 0 : index
    %14 = vector.load %arg2[%c5, %c0_13, %c0_14] : memref<9x16x8xbf16, #tpu.memory_space<vmem>>, vector<1x16x8xbf16>
    %15 = vector.shape_cast %14 : vector<1x16x8xbf16> to vector<16x8xbf16>
    %c6 = arith.constant 6 : index
    %c0_15 = arith.constant 0 : index
    %c0_16 = arith.constant 0 : index
    %16 = vector.load %arg2[%c6, %c0_15, %c0_16] : memref<9x16x8xbf16, #tpu.memory_space<vmem>>, vector<1x16x8xbf16>
    %17 = vector.shape_cast %16 : vector<1x16x8xbf16> to vector<16x8xbf16>
    %c7 = arith.constant 7 : index
    %c0_17 = arith.constant 0 : index
    %c0_18 = arith.constant 0 : index
    %18 = vector.load %arg2[%c7, %c0_17, %c0_18] : memref<9x16x8xbf16, #tpu.memory_space<vmem>>, vector<1x16x8xbf16>
    %19 = vector.shape_cast %18 : vector<1x16x8xbf16> to vector<16x8xbf16>
    %c8 = arith.constant 8 : index
    %c0_19 = arith.constant 0 : index
    %c0_20 = arith.constant 0 : index
    %20 = vector.load %arg2[%c8, %c0_19, %c0_20] : memref<9x16x8xbf16, #tpu.memory_space<vmem>>, vector<1x16x8xbf16>
    %21 = vector.shape_cast %20 : vector<1x16x8xbf16> to vector<16x8xbf16>
    %cst = arith.constant 0.000000e+00 : f32
    %22 = vector.broadcast %cst : f32 to vector<1x8xf32>
    %c0_i32_21 = arith.constant 0 : i32
    %c16_i32 = arith.constant 16 : i32
    %23 = arith.addi %c0_i32_21, %c16_i32 : i32
    %c1_i32 = arith.constant 1 : i32
    %24:2 = scf.for %arg7 = %c0_i32_21 to %23 step %c1_i32 iter_args(%arg8 = %22, %arg9 = %22) -> (vector<1x8xf32>, vector<1x8xf32>)  : i32 {
      %cst_31 = arith.constant 0.000000e+00 : f32
      %31 = vector.broadcast %cst_31 : f32 to vector<16x8xf32>
      %c0_i32_32 = arith.constant 0 : i32
      %32 = arith.addi %arg7, %c0_i32_32 : i32
      %c0_33 = arith.constant 0 : index
      %33 = arith.index_cast %32 : i32 to index
      %c0_34 = arith.constant 0 : index
      %c0_35 = arith.constant 0 : index
      %34 = vector.load %arg1[%c0_33, %33, %c0_34, %c0_35] : memref<1x18x18x16xf32, #tpu.memory_space<vmem>>, vector<1x1x16x16xf32>
      %35 = vector.shape_cast %34 : vector<1x1x16x16xf32> to vector<16x16xf32>
      %36 = arith.truncf %35 : vector<16x16xf32> to vector<16x16xbf16>
      %cst_36 = arith.constant dense<0.000000e+00> : vector<16x8xf32>
      %37 = tpu.matmul %36, %5, %cst_36 {dimension_numbers = #tpu.dot_dimension_numbers<[1], [0], [0], [1], [0, 0, 1, 1], [], []>} : vector<16x16xbf16>, vector<16x8xbf16>, vector<16x8xf32> -> vector<16x8xf32>
      %38 = arith.addf %31, %37 : vector<16x8xf32>
      %c0_i32_37 = arith.constant 0 : i32
      %39 = arith.addi %arg7, %c0_i32_37 : i32
      %c0_38 = arith.constant 0 : index
      %40 = arith.index_cast %39 : i32 to index
      %c1_39 = arith.constant 1 : index
      %c0_40 = arith.constant 0 : index
      %41 = vector.load %arg1[%c0_38, %40, %c1_39, %c0_40] : memref<1x18x18x16xf32, #tpu.memory_space<vmem>>, vector<1x1x16x16xf32>
      %42 = vector.shape_cast %41 : vector<1x1x16x16xf32> to vector<16x16xf32>
      %43 = arith.truncf %42 : vector<16x16xf32> to vector<16x16xbf16>
      %cst_41 = arith.constant dense<0.000000e+00> : vector<16x8xf32>
      %44 = tpu.matmul %43, %7, %cst_41 {dimension_numbers = #tpu.dot_dimension_numbers<[1], [0], [0], [1], [0, 0, 1, 1], [], []>} : vector<16x16xbf16>, vector<16x8xbf16>, vector<16x8xf32> -> vector<16x8xf32>
      %45 = arith.addf %38, %44 : vector<16x8xf32>
      %c0_i32_42 = arith.constant 0 : i32
      %46 = arith.addi %arg7, %c0_i32_42 : i32
      %c0_43 = arith.constant 0 : index
      %47 = arith.index_cast %46 : i32 to index
      %c2_44 = arith.constant 2 : index
      %c0_45 = arith.constant 0 : index
      %48 = vector.load %arg1[%c0_43, %47, %c2_44, %c0_45] : memref<1x18x18x16xf32, #tpu.memory_space<vmem>>, vector<1x1x16x16xf32>
      %49 = vector.shape_cast %48 : vector<1x1x16x16xf32> to vector<16x16xf32>
      %50 = arith.truncf %49 : vector<16x16xf32> to vector<16x16xbf16>
      %cst_46 = arith.constant dense<0.000000e+00> : vector<16x8xf32>
      %51 = tpu.matmul %50, %9, %cst_46 {dimension_numbers = #tpu.dot_dimension_numbers<[1], [0], [0], [1], [0, 0, 1, 1], [], []>} : vector<16x16xbf16>, vector<16x8xbf16>, vector<16x8xf32> -> vector<16x8xf32>
      %52 = arith.addf %45, %51 : vector<16x8xf32>
      %c1_i32_47 = arith.constant 1 : i32
      %53 = arith.addi %arg7, %c1_i32_47 : i32
      %c0_48 = arith.constant 0 : index
      %54 = arith.index_cast %53 : i32 to index
      %c0_49 = arith.constant 0 : index
      %c0_50 = arith.constant 0 : index
      %55 = vector.load %arg1[%c0_48, %54, %c0_49, %c0_50] : memref<1x18x18x16xf32, #tpu.memory_space<vmem>>, vector<1x1x16x16xf32>
      %56 = vector.shape_cast %55 : vector<1x1x16x16xf32> to vector<16x16xf32>
      %57 = arith.truncf %56 : vector<16x16xf32> to vector<16x16xbf16>
      %cst_51 = arith.constant dense<0.000000e+00> : vector<16x8xf32>
      %58 = tpu.matmul %57, %11, %cst_51 {dimension_numbers = #tpu.dot_dimension_numbers<[1], [0], [0], [1], [0, 0, 1, 1], [], []>} : vector<16x16xbf16>, vector<16x8xbf16>, vector<16x8xf32> -> vector<16x8xf32>
      %59 = arith.addf %52, %58 : vector<16x8xf32>
      %c1_i32_52 = arith.constant 1 : i32
      %60 = arith.addi %arg7, %c1_i32_52 : i32
      %c0_53 = arith.constant 0 : index
      %61 = arith.index_cast %60 : i32 to index
      %c1_54 = arith.constant 1 : index
      %c0_55 = arith.constant 0 : index
      %62 = vector.load %arg1[%c0_53, %61, %c1_54, %c0_55] : memref<1x18x18x16xf32, #tpu.memory_space<vmem>>, vector<1x1x16x16xf32>
      %63 = vector.shape_cast %62 : vector<1x1x16x16xf32> to vector<16x16xf32>
      %64 = arith.truncf %63 : vector<16x16xf32> to vector<16x16xbf16>
      %cst_56 = arith.constant dense<0.000000e+00> : vector<16x8xf32>
      %65 = tpu.matmul %64, %13, %cst_56 {dimension_numbers = #tpu.dot_dimension_numbers<[1], [0], [0], [1], [0, 0, 1, 1], [], []>} : vector<16x16xbf16>, vector<16x8xbf16>, vector<16x8xf32> -> vector<16x8xf32>
      %66 = arith.addf %59, %65 : vector<16x8xf32>
      %c1_i32_57 = arith.constant 1 : i32
      %67 = arith.addi %arg7, %c1_i32_57 : i32
      %c0_58 = arith.constant 0 : index
      %68 = arith.index_cast %67 : i32 to index
      %c2_59 = arith.constant 2 : index
      %c0_60 = arith.constant 0 : index
      %69 = vector.load %arg1[%c0_58, %68, %c2_59, %c0_60] : memref<1x18x18x16xf32, #tpu.memory_space<vmem>>, vector<1x1x16x16xf32>
      %70 = vector.shape_cast %69 : vector<1x1x16x16xf32> to vector<16x16xf32>
      %71 = arith.truncf %70 : vector<16x16xf32> to vector<16x16xbf16>
      %cst_61 = arith.constant dense<0.000000e+00> : vector<16x8xf32>
      %72 = tpu.matmul %71, %15, %cst_61 {dimension_numbers = #tpu.dot_dimension_numbers<[1], [0], [0], [1], [0, 0, 1, 1], [], []>} : vector<16x16xbf16>, vector<16x8xbf16>, vector<16x8xf32> -> vector<16x8xf32>
      %73 = arith.addf %66, %72 : vector<16x8xf32>
      %c2_i32 = arith.constant 2 : i32
      %74 = arith.addi %arg7, %c2_i32 : i32
      %c0_62 = arith.constant 0 : index
      %75 = arith.index_cast %74 : i32 to index
      %c0_63 = arith.constant 0 : index
      %c0_64 = arith.constant 0 : index
      %76 = vector.load %arg1[%c0_62, %75, %c0_63, %c0_64] : memref<1x18x18x16xf32, #tpu.memory_space<vmem>>, vector<1x1x16x16xf32>
      %77 = vector.shape_cast %76 : vector<1x1x16x16xf32> to vector<16x16xf32>
      %78 = arith.truncf %77 : vector<16x16xf32> to vector<16x16xbf16>
      %cst_65 = arith.constant dense<0.000000e+00> : vector<16x8xf32>
      %79 = tpu.matmul %78, %17, %cst_65 {dimension_numbers = #tpu.dot_dimension_numbers<[1], [0], [0], [1], [0, 0, 1, 1], [], []>} : vector<16x16xbf16>, vector<16x8xbf16>, vector<16x8xf32> -> vector<16x8xf32>
      %80 = arith.addf %73, %79 : vector<16x8xf32>
      %c2_i32_66 = arith.constant 2 : i32
      %81 = arith.addi %arg7, %c2_i32_66 : i32
      %c0_67 = arith.constant 0 : index
      %82 = arith.index_cast %81 : i32 to index
      %c1_68 = arith.constant 1 : index
      %c0_69 = arith.constant 0 : index
      %83 = vector.load %arg1[%c0_67, %82, %c1_68, %c0_69] : memref<1x18x18x16xf32, #tpu.memory_space<vmem>>, vector<1x1x16x16xf32>
      %84 = vector.shape_cast %83 : vector<1x1x16x16xf32> to vector<16x16xf32>
      %85 = arith.truncf %84 : vector<16x16xf32> to vector<16x16xbf16>
      %cst_70 = arith.constant dense<0.000000e+00> : vector<16x8xf32>
      %86 = tpu.matmul %85, %19, %cst_70 {dimension_numbers = #tpu.dot_dimension_numbers<[1], [0], [0], [1], [0, 0, 1, 1], [], []>} : vector<16x16xbf16>, vector<16x8xbf16>, vector<16x8xf32> -> vector<16x8xf32>
      %87 = arith.addf %80, %86 : vector<16x8xf32>
      %c2_i32_71 = arith.constant 2 : i32
      %88 = arith.addi %arg7, %c2_i32_71 : i32
      %c0_72 = arith.constant 0 : index
      %89 = arith.index_cast %88 : i32 to index
      %c2_73 = arith.constant 2 : index
      %c0_74 = arith.constant 0 : index
      %90 = vector.load %arg1[%c0_72, %89, %c2_73, %c0_74] : memref<1x18x18x16xf32, #tpu.memory_space<vmem>>, vector<1x1x16x16xf32>
      %91 = vector.shape_cast %90 : vector<1x1x16x16xf32> to vector<16x16xf32>
      %92 = arith.truncf %91 : vector<16x16xf32> to vector<16x16xbf16>
      %cst_75 = arith.constant dense<0.000000e+00> : vector<16x8xf32>
      %93 = tpu.matmul %92, %21, %cst_75 {dimension_numbers = #tpu.dot_dimension_numbers<[1], [0], [0], [1], [0, 0, 1, 1], [], []>} : vector<16x16xbf16>, vector<16x8xbf16>, vector<16x8xf32> -> vector<16x8xf32>
      %94 = arith.addf %87, %93 : vector<16x8xf32>
      %95 = vector.broadcast %3 : vector<1x8xf32> to vector<16x8xf32>
      %96 = arith.addf %94, %95 : vector<16x8xf32>
      %c0_76 = arith.constant 0 : index
      %97 = arith.index_cast %arg7 : i32 to index
      %c0_77 = arith.constant 0 : index
      %c0_78 = arith.constant 0 : index
      %98 = vector.load %arg4[%c0_76, %97, %c0_77, %c0_78] : memref<1x16x16x8xf32, #tpu.memory_space<vmem>>, vector<1x1x16x8xf32>
      %99 = vector.shape_cast %98 : vector<1x1x16x8xf32> to vector<16x8xf32>
      %100 = vector.shape_cast %96 : vector<16x8xf32> to vector<1x1x16x8xf32>
      tpu.vector_store %arg4[%c0_76, %97, %c0_77, %c0_78], %100 {strides = array<i32>} : memref<1x16x16x8xf32, #tpu.memory_space<vmem>>, vector<1x1x16x8xf32>,
      %cst_79 = arith.constant dense<0.000000e+00> : vector<8xf32>
      %101 = vector.multi_reduction <add>, %96, %cst_79 [0] : vector<16x8xf32> to vector<8xf32>
      %102 = vector.shape_cast %101 : vector<8xf32> to vector<1x8xf32>
      %103 = arith.addf %arg8, %102 : vector<1x8xf32>
      %104 = arith.mulf %96, %96 : vector<16x8xf32>
      %cst_80 = arith.constant dense<0.000000e+00> : vector<8xf32>
      %105 = vector.multi_reduction <add>, %104, %cst_80 [0] : vector<16x8xf32> to vector<8xf32>
      %106 = vector.shape_cast %105 : vector<8xf32> to vector<1x8xf32>
      %107 = arith.addf %arg9, %106 : vector<1x8xf32>
      scf.yield %103, %107 : vector<1x8xf32>, vector<1x8xf32>
    }
    %c16_i32_22 = arith.constant 16 : i32
    %c0_23 = arith.constant 0 : index
    %c0_24 = arith.constant 0 : index
    %25 = vector.load %arg5[%c0_23, %c0_24] : memref<1x8xf32, #tpu.memory_space<vmem>>, vector<1x8xf32>
    %26 = arith.addf %25, %24#0 : vector<1x8xf32>
    %c0_25 = arith.constant 0 : index
    %c0_26 = arith.constant 0 : index
    %27 = vector.load %arg5[%c0_25, %c0_26] : memref<1x8xf32, #tpu.memory_space<vmem>>, vector<1x8xf32>
    tpu.vector_store %arg5[%c0_25, %c0_26], %26 {strides = array<i32>} : memref<1x8xf32, #tpu.memory_space<vmem>>, vector<1x8xf32>,
    %c0_27 = arith.constant 0 : index
    %c0_28 = arith.constant 0 : index
    %28 = vector.load %arg6[%c0_27, %c0_28] : memref<1x8xf32, #tpu.memory_space<vmem>>, vector<1x8xf32>
    %29 = arith.addf %28, %24#1 : vector<1x8xf32>
    %c0_29 = arith.constant 0 : index
    %c0_30 = arith.constant 0 : index
    %30 = vector.load %arg6[%c0_29, %c0_30] : memref<1x8xf32, #tpu.memory_space<vmem>>, vector<1x8xf32>
    tpu.vector_store %arg6[%c0_29, %c0_30], %29 {strides = array<i32>} : memref<1x8xf32, #tpu.memory_space<vmem>>, vector<1x8xf32>,
    return
  }
  func.func @transform_0(%arg0: i32) -> (i32, i32, i32, i32) {
    %c0_i32 = arith.constant 0 : i32
    %c0_i32_0 = arith.constant 0 : i32
    %c0_i32_1 = arith.constant 0 : i32
    %c0_i32_2 = arith.constant 0 : i32
    return %arg0, %c0_i32, %c0_i32_0, %c0_i32_1 : i32, i32, i32, i32
  }
  func.func @transform_1(%arg0: i32) -> (i32, i32, i32) {
    %c0_i32 = arith.constant 0 : i32
    %c0_i32_0 = arith.constant 0 : i32
    %c0_i32_1 = arith.constant 0 : i32
    %c0_i32_2 = arith.constant 0 : i32
    return %c0_i32, %c0_i32_0, %c0_i32_1 : i32, i32, i32
  }
  func.func @transform_2(%arg0: i32) -> (i32, i32) {
    %c0_i32 = arith.constant 0 : i32
    %c0_i32_0 = arith.constant 0 : i32
    %c0_i32_1 = arith.constant 0 : i32
    return %c0_i32, %c0_i32_0 : i32, i32
  }
  func.func @transform_3(%arg0: i32) -> (i32, i32, i32, i32) {
    %c0_i32 = arith.constant 0 : i32
    %c0_i32_0 = arith.constant 0 : i32
    %c0_i32_1 = arith.constant 0 : i32
    %c0_i32_2 = arith.constant 0 : i32
    return %arg0, %c0_i32, %c0_i32_0, %c0_i32_1 : i32, i32, i32, i32
  }
  func.func @transform_4(%arg0: i32) -> (i32, i32) {
    %c0_i32 = arith.constant 0 : i32
    %c0_i32_0 = arith.constant 0 : i32
    %c0_i32_1 = arith.constant 0 : i32
    return %c0_i32, %c0_i32_0 : i32, i32
  }
  func.func @transform_5(%arg0: i32) -> (i32, i32) {
    %c0_i32 = arith.constant 0 : i32
    %c0_i32_0 = arith.constant 0 : i32
    %c0_i32_1 = arith.constant 0 : i32
    return %c0_i32, %c0_i32_0 : i32, i32
  }
}

module attributes {stable_mosaic.version = 11 : i64} {
  func.func @_matmul_bias_kernel(%arg0: i32, %arg1: memref<512x8xf32, #tpu.memory_space<vmem>>, %arg2: memref<8x4xbf16, #tpu.memory_space<vmem>>, %arg3: memref<1x4xf32, #tpu.memory_space<vmem>>, %arg4: memref<512x4xf32, #tpu.memory_space<vmem>>) attributes {dimension_semantics = [#tpu.dimension_semantics<parallel>], iteration_bounds = array<i64: 1>, scalar_prefetch = 0 : i64, scratch_operands = 0 : i64, tpu.core_type = #tpu.core_type<tc>, window_params = [{transform_indices = @transform_0, window_bounds = array<i64: 512, 8>}, {pipeline_mode = #tpu.pipeline_mode<synchronous>, transform_indices = @transform_1, window_bounds = array<i64: 8, 4>}, {pipeline_mode = #tpu.pipeline_mode<synchronous>, transform_indices = @transform_2, window_bounds = array<i64: 1, 4>}, {transform_indices = @transform_3, window_bounds = array<i64: 512, 4>}]} {
    %c0 = arith.constant 0 : index
    %c0_0 = arith.constant 0 : index
    %0 = vector.load %arg1[%c0, %c0_0] : memref<512x8xf32, #tpu.memory_space<vmem>>, vector<512x8xf32>
    %1 = arith.truncf %0 : vector<512x8xf32> to vector<512x8xbf16>
    %c0_1 = arith.constant 0 : index
    %c0_2 = arith.constant 0 : index
    %2 = vector.load %arg2[%c0_1, %c0_2] : memref<8x4xbf16, #tpu.memory_space<vmem>>, vector<8x4xbf16>
    %cst = arith.constant dense<0.000000e+00> : vector<512x4xf32>
    %3 = tpu.matmul %1, %2, %cst {dimension_numbers = #tpu.dot_dimension_numbers<[1], [0], [0], [1], [0, 0, 1, 1], [], []>} : vector<512x8xbf16>, vector<8x4xbf16>, vector<512x4xf32> -> vector<512x4xf32>
    %c0_3 = arith.constant 0 : index
    %c0_4 = arith.constant 0 : index
    %4 = vector.load %arg3[%c0_3, %c0_4] : memref<1x4xf32, #tpu.memory_space<vmem>>, vector<1x4xf32>
    %5 = vector.broadcast %4 : vector<1x4xf32> to vector<512x4xf32>
    %6 = arith.addf %3, %5 : vector<512x4xf32>
    %c0_5 = arith.constant 0 : index
    %c0_6 = arith.constant 0 : index
    %7 = vector.load %arg4[%c0_5, %c0_6] : memref<512x4xf32, #tpu.memory_space<vmem>>, vector<512x4xf32>
    tpu.vector_store %arg4[%c0_5, %c0_6], %6 {strides = array<i32>} : memref<512x4xf32, #tpu.memory_space<vmem>>, vector<512x4xf32>,
    return
  }
  func.func @transform_0(%arg0: i32) -> (i32, i32) {
    %c0_i32 = arith.constant 0 : i32
    %c0_i32_0 = arith.constant 0 : i32
    return %arg0, %c0_i32 : i32, i32
  }
  func.func @transform_1(%arg0: i32) -> (i32, i32) {
    %c0_i32 = arith.constant 0 : i32
    %c0_i32_0 = arith.constant 0 : i32
    %c0_i32_1 = arith.constant 0 : i32
    return %c0_i32, %c0_i32_0 : i32, i32
  }
  func.func @transform_2(%arg0: i32) -> (i32, i32) {
    %c0_i32 = arith.constant 0 : i32
    %c0_i32_0 = arith.constant 0 : i32
    %c0_i32_1 = arith.constant 0 : i32
    return %c0_i32, %c0_i32_0 : i32, i32
  }
  func.func @transform_3(%arg0: i32) -> (i32, i32) {
    %c0_i32 = arith.constant 0 : i32
    %c0_i32_0 = arith.constant 0 : i32
    return %arg0, %c0_i32 : i32, i32
  }
}

</mosaic_0001>

<bundles_post_ra>
// kernel: _lambda_.26
= control target key start
LH: loop header
LB: loop body
LE: loop exit
PB: predicated region body
PF: predicated region fallthrough
CT: control target
= control target key end

     0   :  { %v20_v0 = vlaneseq  ;;  %s132_s1 = inlined_call_operand.vmem [shape: f32[1,512], index: 1, kind: input, shape index: {}]   ;;  %s133_s2 = inlined_call_operand.vmem [shape: f32[1,512], index: 2, kind: input, shape index: {}]   ;;  %s134_s0 = inlined_call_operand.vmem [shape: f32[8,512], index: 0, kind: input, shape index: {}]   ;;  %s135_s3 = inlined_call_operand.vmem [shape: f32[8,512], index: 3, kind: output, shape index: {}]  }
   0x1   :  { %v18_v2 = vld [vmem:[%s132_s1] sm:$0xf]  ;;  %v15_v9 = vld [vmem:[%s134_s0 + $0x8] sm:$0xff]  ;;  %v16_v14 = vld [vmem:[%s134_s0 + $0x10] sm:$0xff] }
   0x2   :  { %v21_v1 = vshrl.u32 %v20_v0, 7  ;;  %v44_v3 = vld [vmem:[%s133_s2] sm:$0xf]  ;;  %v17_v15 = vld [vmem:[%s134_s0 + $0x18] sm:$0xff] }
   0x3   :  { %v14_v8 = vld [vmem:[%s134_s0] sm:$0xff] }
   0x4   :  { %v22_v4 = vsub.s32 0, %v21_v1  ;;  %v26_v5 = vsub.s32 1, %v21_v1  ;;  %v30_v6 = vsub.s32 2, %v21_v1  ;;  %v34_v7 = vsub.s32 3, %v21_v1 }
   0x6   :  { %v23_v10 = vrot.slane %v18_v2, %v22_v4  ;;  %v49_v11 = vrot.slane %v44_v3, %v22_v4  ;;  %v27_v12 = vrot.slane %v18_v2, %v26_v5  ;;  %v53_v13 = vrot.slane %v44_v3, %v26_v5 }
   0x7   :  { %v31_v16 = vrot.slane %v18_v2, %v30_v6  ;;  %v57_v17 = vrot.slane %v44_v3, %v30_v6  ;;  %v35_v18 = vrot.slane %v18_v2, %v34_v7  ;;  %v61_v19 = vrot.slane %v44_v3, %v34_v7 }
   0x8   :  { %v40_v20 = vmul.f32 %v23_v10, %v14_v8  ;;  %v41_v21 = vmul.f32 %v27_v12, %v15_v9 }
   0x9   :  { %v42_v22 = vmul.f32 %v31_v16, %v16_v14  ;;  %v43_v23 = vmul.f32 %v35_v18, %v17_v15 }
   0xa   :  { %v66_v24 = vadd.f32 %v49_v11, %v40_v20  ;;  %v67_v25 = vadd.f32 %v53_v13, %v41_v21 }
   0xb   :  { %v68_v26 = vadd.f32 %v57_v17, %v42_v22  ;;  %v69_v27 = vadd.f32 %v61_v19, %v43_v23 }
   0xc   :  { %v70_v28 = vmax.f32 %v66_v24, 0.0  ;;  %v71_v29 = vmax.f32 %v67_v25, 0.0 }
   0xd   :  { %v72_v30 = vmax.f32 %v68_v26, 0.0  ;;  %v73_v31 = vmax.f32 %v69_v27, 0.0 }
   0xe   :  { %74 = vst [vmem:[%s135_s3] sm:$0xff] %v70_v28  ;;  %75 = vst [vmem:[%s135_s3 + $0x8] sm:$0xff] %v71_v29 }
   0xf   :  { %76 = vst [vmem:[%s135_s3 + $0x10] sm:$0xff] %v72_v30  ;;  %77 = vst [vmem:[%s135_s3 + $0x18] sm:$0xff] %v73_v31 }

// kernel: _lambda_.25
= control target key start
LH: loop header
LB: loop body
LE: loop exit
PB: predicated region body
PF: predicated region fallthrough
CT: control target
= control target key end

     0   :  { %s1074_s18 = smov 0   ;;  %s1267_s0 = inlined_call_operand.vmem [shape: f32[2,18,18,4], index: 0, kind: input, shape index: {}]   ;;  %s1268_s1 = inlined_call_operand.vmem [shape: bf16[9,4,8], index: 1, kind: input, shape index: {}]   ;;  %s1269_s2 = inlined_call_operand.vmem [shape: f32[1,8], index: 2, kind: input, shape index: {}]   ;;  %s1270_s3 = inlined_call_operand.vmem [shape: f32[2,16,16,8], index: 3, kind: output, shape index: {0}]   ;;  %s1271_s4 = inlined_call_operand.vmem [shape: f32[1,8], index: 4, kind: output, shape index: {1}]   ;;  %s1272_s5 = inlined_call_operand.vmem [shape: f32[1,8], index: 5, kind: output, shape index: {2}]  }
   0x1 LB: > { %s858_s19 = sadd.s32 4294967295, %s1027_s18   ;;  %p862_p0 = scmp.ge.s32.totalorder %s1027_s18, 1  ;;  %s1027_s18 = sphi %s1074_s18, %s16_s18  }
   0x2   : > { %p182_p1 = scmp.lt.s32.totalorder %s1027_s18, 3 }
   0x4   : > { %p183_p2 = pnand %p862_p0, %p182_p1 }
   0x5   : > { %p210_p3 = scmp.lt.s32.totalorder (!%p183_p2), %s858_s19, 1  ;;  %p866_p4 = scmp.ne.s32.totalorder (!%p183_p2), %s858_s19, 0 }
   0x6   : > { %186 = sbr.rel (%p183_p2) target bundleno = 303 (0x12f), region = 32 }
   0xd   : > { %s211_s20 = scalar_select %p210_p3, %s858_s19, 1 }
   0xe   : > { %224 = sbr.rel (%p866_p4) target bundleno = 21 (0x15), region = 36  ;;  %vm225_vm0 = vcmask (!%p866_p4), 57344   ;;  %v1041_v0 = vmov (!%p866_p4), 0.0  }
   0xf   : > { %s973_s21 = smul.u32 432, %s211_s20  ;;  %s900_s22 = sshll.u32 %s211_s20, 8  ;;  %226 = vst.msk [vmem:[%s1271_s4] sm:$0x1] (!%p866_p4), %vm225_vm0, %v1041_v0  ;;  %227 = vst.msk [vmem:[%s1272_s5] sm:$0x1] (!%p866_p4), %vm225_vm0, %v1041_v0 }
  0x10   : > { %s1085_s25 = scalar_lea.vmem %s1270_s3, %s900_s22 }
  0x11   : > { %s1090_s28 = scalar_lea.vmem %s1267_s0, %s973_s21 }
  0x15 PF: > { %v1101_v1 = vld [vmem:[%s1269_s2] ss:$0 sm:$0xff]  ;;  %v1111_v3 = vld [vmem:[%s1268_s1 + $0x2] sm:$0x3]  ;;  %v1116_v4 = vld [vmem:[%s1268_s1 + $0x4] sm:$0x3] }
  0x16   : > { %v1106_v2 = vld [vmem:[%s1268_s1] sm:$0x3]  ;;  %v1121_v5 = vld [vmem:[%s1268_s1 + $0x6] sm:$0x3]  ;;  %v1126_v6 = vld [vmem:[%s1268_s1 + $0x8] sm:$0x3] }
  0x17   : > { %v1131_v7 = vld [vmem:[%s1268_s1 + $0xa] sm:$0x3]  ;;  %v1136_v8 = vld [vmem:[%s1268_s1 + $0xc] sm:$0x3]  ;;  %v1141_v9 = vld [vmem:[%s1268_s1 + $0xe] sm:$0x3] }
  0x18   : > { %v1146_v10 = vld [vmem:[%s1268_s1 + $0x10] sm:$0x3]  ;;  %v1148_v11 = vmov 0.0   ;;  %v1150_v12 = vmov 0.0   ;;  %s1152_s6 = smov 0  }
  0x19 LB: >> { %vm266_vm1 = vcmask 1041408   ;;  %v1042_v13 = vmov 0.0   ;;  %s254_s7 = smul.u32 24, %s1039_s6  ;;  %vm1043_vm2 = vmmov 0   ;;  %vm262_vm3 = vcmask 31744   ;;  %s897_s9 = sshll.u32 %s1039_s6, 4  ;;  %s1039_s6 = sphi %s1152_s6, %s251_s6   ;;  %v1035_v12 = vphi %v1150_v12, %v1274_v12   ;;  %v1031_v11 = vphi %v1148_v11, %v1273_v11  }
  0x1a   : >> { %919 = vmatprep.subr.bf16.mxu0 %v1042_v13  ;;  %v268_v14 = vsel %vm266_vm1, %v1111_v3, 0  ;;  %925 = vmatprep.subr.bf16.mxu1 %v1042_v13  ;;  %v315_v15 = vsel %vm266_vm1, %v1106_v2, 0  ;;  %v365_v21 = vsel %vm266_vm1, %v1116_v4, 0  ;;  %v420_v23 = vsel %vm266_vm1, %v1121_v5, 0  ;;  %s737_s10 = scalar_lea.vmem %s1085_s25, %s897_s9  ;;  %s251_s6 = sadd.s32 1, %s1039_s6  }
  0x1b   : >> { %920 = vmatpush3.bf16.msra.mxu0 %v268_v14  ;;  %926 = vmatpush3.bf16.msra.mxu1 %v315_v15  ;;  %s1176_s8 = scalar_lea.vmem %s1090_s28, %s254_s7  ;;  %v472_v30 = vsel %vm266_vm1, %v1126_v6, 0  ;;  %v524_v31 = vsel %vm266_vm1, %v1131_v7, 0  ;;  %v579_v38 = vsel %vm266_vm1, %v1136_v8, 0  ;;  %v631_v39 = vsel %vm266_vm1, %v1141_v9, 0  ;;  %p248_p5 = scmp.ge.s32.totalorder %s251_s6, 16  }
  0x1c   : >> { %921 = vmatprep.mubr.msk.bf16.mxu0 %vm1043_vm2, %v1042_v13  ;;  %927 = vmatprep.mubr.msk.bf16.mxu1 %vm1043_vm2, %v1042_v13  ;;  %v259_v16 = vld [vmem:[%s1176_s8 + $0x1] sm:$0xff]  ;;  %v260_v17 = vld [vmem:[%s1176_s8 + $0x9] sm:$0xff]  ;;  %v878_v26 = vld [vmem:[%s1176_s8 + $0x18] sm:$0xff]  ;;  %v683_v46 = vsel %vm266_vm1, %v1146_v10, 0  ;;  %vm738_vm4 = vcmask 64512   ;;  %vm765_vm5 = vcmask (%p248_p5), 57344  }
  0x1d   : >> { %931 = vmatprep.subr.bf16.mxu0 %v1042_v13  ;;  %937 = vmatprep.subr.bf16.mxu1 %v1042_v13  ;;  %v256_v18 = vld [vmem:[%s1176_s8] sm:$0xff]  ;;  %v261_v19 = vpack.c.bf16 %v260_v17, %v259_v16  ;;  %v257_v20 = vld [vmem:[%s1176_s8 + $0x8] sm:$0xff]  ;;  %v887_v40 = vld [vmem:[%s1176_s8 + $0x30] sm:$0xff] }
  0x1e   : >> { %v258_v22 = vpack.c.bf16 %v257_v20, %v256_v18  ;;  %v358_v24 = vld [vmem:[%s1176_s8 + $0x2] sm:$0xff]  ;;  %v359_v25 = vld [vmem:[%s1176_s8 + $0xa] sm:$0xff]  ;;  %v881_v32 = vld [vmem:[%s1176_s8 + $0x19] sm:$0xff] }
  0x1f   : >> { %922 = vmatmul.mubr.msk.bf16.vlgmr.msra.gmra.mrb[0].mxu0 %vm262_vm3, %v261_v19  ;;  %v879_v27 = vld [vmem:[%s1176_s8 + $0x20] sm:$0xff]  ;;  %v360_v28 = vpack.c.bf16 %v359_v25, %v358_v24  ;;  %v888_v41 = vld [vmem:[%s1176_s8 + $0x38] sm:$0xff] }
  0x20   : >> { %928 = vmatmul.mubr.msk.bf16.vlgmr.msra.gmra.mrb[0].mxu1 %vm262_vm3, %v258_v22  ;;  %932 = vmatpush3.bf16.msra.mxu0 %v365_v21  ;;  %v415_v29 = vpack.c.bf16 %v879_v27, %v878_v26  ;;  %v882_v33 = vld [vmem:[%s1176_s8 + $0x21] sm:$0xff]  ;;  %v890_v42 = vld [vmem:[%s1176_s8 + $0x31] sm:$0xff]  ;;  %v891_v43 = vld [vmem:[%s1176_s8 + $0x39] sm:$0xff]  ;;  %v574_v44 = vpack.c.bf16 %v888_v41, %v887_v40 }
  0x21   : >> { %938 = vmatpush3.bf16.msra.mxu1 %v420_v23  ;;  %933 = vmatprep.mubr.msk.bf16.mxu0 %vm1043_vm2, %v1042_v13  ;;  %v884_v34 = vld [vmem:[%s1176_s8 + $0x1a] sm:$0xff]  ;;  %v885_v35 = vld [vmem:[%s1176_s8 + $0x22] sm:$0xff]  ;;  %v467_v36 = vpack.c.bf16 %v882_v33, %v881_v32  ;;  %v626_v45 = vpack.c.bf16 %v891_v43, %v890_v42  ;;  %v893_v47 = vld [vmem:[%s1176_s8 + $0x32] sm:$0xff] }
  0x22   : >> { %943 = vmatprep.subr.bf16.mxu0 %v1042_v13  ;;  %939 = vmatprep.mubr.msk.bf16.mxu1 %vm1043_vm2, %v1042_v13  ;;  %v519_v37 = vpack.c.bf16 %v885_v35, %v884_v34  ;;  %v894_v48 = vld [vmem:[%s1176_s8 + $0x3a] sm:$0xff] }
  0x23   : >> { %949 = vmatprep.subr.bf16.mxu1 %v1042_v13  ;;  %v678_v49 = vpack.c.bf16 %v894_v48, %v893_v47 }
  0x27   : >> { %934 = vmatmul.mubr.msk.bf16.vlgmr.msra.gmra.mrb[4].mxu0 %vm262_vm3, %v360_v28 }
  0x28   : >> { %944 = vmatpush3.bf16.msra.mxu0 %v472_v30  ;;  %940 = vmatmul.mubr.msk.bf16.vlgmr.msra.gmra.mrb[4].mxu1 %vm262_vm3, %v415_v29 }
  0x29   : >> { %950 = vmatpush3.bf16.msra.mxu1 %v524_v31  ;;  %945 = vmatprep.mubr.msk.bf16.mxu0 %vm1043_vm2, %v1042_v13 }
  0x2a   : >> { %955 = vmatprep.subr.bf16.mxu0 %v1042_v13  ;;  %951 = vmatprep.mubr.msk.bf16.mxu1 %vm1043_vm2, %v1042_v13 }
  0x2b   : >> { %961 = vmatprep.subr.bf16.mxu1 %v1042_v13 }
  0x2f   : >> { %946 = vmatmul.mubr.msk.bf16.vlgmr.msra.gmra.mrb[8].mxu0 %vm262_vm3, %v467_v36 }
  0x30   : >> { %956 = vmatpush3.bf16.msra.mxu0 %v579_v38  ;;  %952 = vmatmul.mubr.msk.bf16.vlgmr.msra.gmra.mrb[8].mxu1 %vm262_vm3, %v519_v37 }
  0x31   : >> { %962 = vmatpush3.bf16.msra.mxu1 %v631_v39  ;;  %957 = vmatprep.mubr.msk.bf16.mxu0 %vm1043_vm2, %v1042_v13 }
  0x32   : >> { %967 = vmatprep.subr.bf16.mxu0 %v1042_v13  ;;  %963 = vmatprep.mubr.msk.bf16.mxu1 %vm1043_vm2, %v1042_v13 }
  0x37   : >> { %958 = vmatmul.mubr.msk.bf16.vlgmr.msra.gmra.mrb[12].mxu0 %vm262_vm3, %v574_v44 }
  0x38   : >> { %968 = vmatpush3.bf16.msra.mxu0 %v683_v46  ;;  %964 = vmatmul.mubr.msk.bf16.vlgmr.msra.gmra.mrb[12].mxu1 %vm262_vm3, %v626_v45 }
  0x39   : >> { %969 = vmatprep.mubr.msk.bf16.mxu0 %vm1043_vm2, %v1042_v13 }
  0x3f   : >> { %970 = vmatmul.mubr.msk.bf16.vlgmr.msra.gmra.mrb[16].mxu0 %vm262_vm3, %v678_v49 }
  0xf2   : >> { %v304_v50 = vpop.f32.mrb[0].mxu0 }
  0xf3   : >> { %v351_v51 = vpop.f32.mrb[0].mxu1  ;;  %v923_v52 = vpop.f32.mrb[1].mxu0 }
  0xf4   : >> { %v352_v53 = vadd.f32 %v351_v51, %v304_v50  ;;  %v929_v54 = vpop.f32.mrb[1].mxu1  ;;  %v307_v55 = vpop.f32.mrb[2].mxu0 }
  0xf5   : >> { %v354_v56 = vpop.f32.mrb[2].mxu1  ;;  %v924_v57 = vpop.f32.mrb[3].mxu0 }
  0xf6   : >> { %v355_v58 = vadd.f32 %v354_v56, %v307_v55  ;;  %v930_v59 = vpop.f32.mrb[3].mxu1 }
  0xfa   : >> { %v401_v60 = vpop.f32.mrb[4].mxu0 }
  0xfb   : >> { %v408_v61 = vadd.f32 %v401_v60, %v352_v53  ;;  %v935_v62 = vpop.f32.mrb[5].mxu0  ;;  %v456_v63 = vpop.f32.mrb[4].mxu1 }
  0xfc   : >> { %v404_v0 = vpop.f32.mrb[6].mxu0  ;;  %v941_v14 = vpop.f32.mrb[5].mxu1 }
  0xfd   : >> { %v409_v13 = vadd.f32 %v404_v0, %v355_v58  ;;  %v463_v15 = vadd.f32 %v456_v63, %v408_v61  ;;  %v936_v16 = vpop.f32.mrb[7].mxu0  ;;  %v459_v17 = vpop.f32.mrb[6].mxu1 }
  0xfe   : >> { %v942_v18 = vpop.f32.mrb[7].mxu1 }
  0xff   : >> { %v464_v19 = vadd.f32 %v459_v17, %v409_v13 }
 0x102   : >> { %v508_v20 = vpop.f32.mrb[8].mxu0 }
 0x103   : >> { %v515_v21 = vadd.f32 %v508_v20, %v463_v15  ;;  %v947_v22 = vpop.f32.mrb[9].mxu0  ;;  %v560_v23 = vpop.f32.mrb[8].mxu1 }
 0x104   : >> { %v511_v24 = vpop.f32.mrb[10].mxu0  ;;  %v953_v25 = vpop.f32.mrb[9].mxu1  ;;  %v763_v22 = vld [vmem:[%s1271_s4] sm:$0x1] (%p248_p5) }
 0x105   : >> { %v516_v26 = vadd.f32 %v511_v24, %v464_v19  ;;  %v567_v27 = vadd.f32 %v560_v23, %v515_v21  ;;  %v948_v28 = vpop.f32.mrb[11].mxu0  ;;  %v563_v29 = vpop.f32.mrb[10].mxu1 }
 0x106   : >> { %v954_v30 = vpop.f32.mrb[11].mxu1 }
 0x107   : >> { %v568_v31 = vadd.f32 %v563_v29, %v516_v26 }
 0x10a   : >> { %v615_v32 = vpop.f32.mrb[12].mxu0 }
 0x10b   : >> { %v622_v33 = vadd.f32 %v615_v32, %v567_v27  ;;  %v959_v34 = vpop.f32.mrb[13].mxu0  ;;  %v667_v35 = vpop.f32.mrb[12].mxu1 }
 0x10c   : >> { %v618_v36 = vpop.f32.mrb[14].mxu0  ;;  %v965_v37 = vpop.f32.mrb[13].mxu1 }
 0x10d   : >> { %v623_v38 = vadd.f32 %v618_v36, %v568_v31  ;;  %v674_v39 = vadd.f32 %v667_v35, %v622_v33  ;;  %v960_v40 = vpop.f32.mrb[15].mxu0  ;;  %v670_v41 = vpop.f32.mrb[14].mxu1 }
 0x10e   : >> { %v966_v42 = vpop.f32.mrb[15].mxu1 }
 0x10f   : >> { %v675_v43 = vadd.f32 %v670_v41, %v623_v38 }
 0x112   : >> { %v719_v44 = vpop.f32.mrb[16].mxu0 }
 0x113   : >> { %v726_v45 = vadd.f32 %v719_v44, %v674_v39  ;;  %v971_v46 = vpop.f32.mrb[17].mxu0 }
 0x114   : >> { %v722_v47 = vpop.f32.mrb[18].mxu0 }
 0x115   : >> { %v734_v48 = vadd.f32 %v1101_v1, %v726_v45  ;;  %v727_v49 = vadd.f32 %v722_v47, %v675_v43  ;;  %v972_v50 = vpop.f32.mrb[19].mxu0 }
 0x117   : >> { %739 = vst.msk [vmem:[%s737_s10] sm:$0xff] %vm738_vm4, %v734_v48  ;;  %v751_v51 = vmul.f32 %v734_v48, %v734_v48  ;;  %v735_v52 = vadd.f32 %v1101_v1, %v727_v49  ;;  %v741_v53 = vsel %vm738_vm4, %v734_v48, 0.0 }
 0x119   : >> { %740 = vst.msk [vmem:[%s737_s10 + $0x8] sm:$0xff] %vm738_vm4, %v735_v52  ;;  %v742_v54 = vsel %vm738_vm4, %v735_v52, 0.0  ;;  %v752_v55 = vmul.f32 %v735_v52, %v735_v52  ;;  %v753_v57 = vsel %vm738_vm4, %v751_v51, 0.0 }
 0x11a   : >> { %v743_v56 = vadd.f32 %v742_v54, %v741_v53 }
 0x11b   : >> { %v754_v58 = vsel %vm738_vm4, %v752_v55, 0.0 }
 0x11c   : >> { %v744_v59 = vrot.slane %v743_v56, 4  ;;  %v755_v60 = vadd.f32 %v754_v58, %v753_v57 }
 0x11e   : >> { %v745_v61 = vadd.f32 %v744_v59, %v743_v56  ;;  %v756_v62 = vrot.slane %v755_v60, 4 }
 0x120   : >> { %v746_v63 = vrot.slane %v745_v61, 2  ;;  %v757_v0 = vadd.f32 %v756_v62, %v755_v60 }
 0x122   : >> { %v747_v14 = vadd.f32 %v746_v63, %v745_v61  ;;  %v758_v13 = vrot.slane %v757_v0, 2 }
 0x124   : >> { %v748_v15 = vrot.slane %v747_v14, 1  ;;  %v759_v16 = vadd.f32 %v758_v13, %v757_v0 }
 0x126   : >> { %v749_v17 = vadd.f32 %v748_v15, %v747_v14  ;;  %v760_v18 = vrot.slane %v759_v16, 1  ;;  %250 = sbr.rel (!%p248_p5) target bundleno = 25 (0x19), region = 101 }
 0x128   : >> { %v750_v19 = vadd.f32 %v1035_v12, %v749_v17   ;;  %v761_v20 = vadd.f32 %v760_v18, %v759_v16 }
 0x12a   : >> { %v762_v21 = vadd.f32 %v1031_v11, %v761_v20   ;;  %v1274_v12 = vmov %v750_v19  ;;  %v764_v23 = vadd.f32 (%p248_p5), %v763_v22, %v750_v19 }
 0x12b   : > { %v767_v12 = vld [vmem:[%s1272_s5] sm:$0x1] (%p248_p5) }
 0x12c   : >> { %v1273_v11 = vmov %v762_v21  ;;  %v768_v24 = vadd.f32 (%p248_p5), %v767_v12, %v762_v21  ;;  %766 = vst.msk [vmem:[%s1271_s4] sm:$0x1] (%p248_p5), %vm765_vm5, %v764_v23 }
 0x12e   : > { %769 = vst.msk [vmem:[%s1272_s5] sm:$0x1] %vm765_vm5, %v768_v24 }
 0x12f PF: > { %s16_s18 = sadd.s32 1, %s1027_s18  }
 0x130   : > { %p13_p6 = scmp.ge.s32.totalorder %s16_s18, 4  }
 0x132   :  { %15 = sbr.rel (!%p13_p6) target bundleno = 1 (0x1), region = 112 }

// kernel: _lambda_.29
= control target key start
LH: loop header
LB: loop body
LE: loop exit
PB: predicated region body
PF: predicated region fallthrough
CT: control target
= control target key end

     0   :  { %s283_s6 = smov 0   ;;  %s303_s0 = inlined_call_operand.vmem [shape: f32[2,16,8,16], index: 0, kind: input, shape index: {}]   ;;  %s304_s1 = inlined_call_operand.vmem [shape: f32[2,8,8,8], index: 1, kind: output, shape index: {}]  }
   0x1 LB: > { %s216_s7 = sadd.s32 4294967295, %s265_s6   ;;  %p220_p0 = scmp.ge.s32.totalorder %s265_s6, 1  ;;  %s265_s6 = sphi %s283_s6, %s11_s6  }
   0x2   : > { %p87_p1 = scmp.lt.s32.totalorder %s265_s6, 3 }
   0x4   : > { %p88_p2 = pnand %p220_p0, %p87_p1 }
   0x5   : > { %p107_p3 = scmp.lt.s32.totalorder (!%p88_p2), %s216_s7, 1  ;;  %s267_s16 = smov (!%p88_p2), 0  }
   0x6   : > { %91 = sbr.rel (%p88_p2) target bundleno = 371 (0x173), region = 24 }
   0xd   : > { %s306_s7 = smov (!%p107_p3, %s216_s7), 1 }
   0xe   : > { %s233_s8 = sshll.u32 %s306_s7, 7  ;;  %s234_s9 = sshll.u32 %s306_s7, 6 }
   0xf   : > { %s294_s12 = scalar_lea.vmem %s303_s0, %s233_s8  ;;  %s116_s15 = scalar_lea.vmem %s304_s1, %s234_s9 }
  0x10 LB: >> { %s235_s17 = sshll.u32 %s269_s16, 4  ;;  %s271_s19 = smov 16   ;;  %vm132_vm0 = vcmask 1047680   ;;  %vm146_vm1 = vcmask 64512   ;;  %s269_s16 = sphi %s267_s16, %s122_s16  }
  0x11   : >> { %s125_s18 = scalar_lea.vmem %s294_s12, %s235_s17  ;;  %s272_s20 = smov 120  }
  0x12   : >> { %v126_v0 = vld [vmem:[%s125_s18] sm:$0xff]  ;;  %v229_v1 = vld [vmem:[%s125_s18 + $0x8] sm:$0xff]  ;;  %s230_s21 = sshll.u32 %s269_s16, 3  ;;  %s122_s16 = sadd.s32 1, %s269_s16  }
  0x13   : >> { %v131_v2 = vmax.f32 %v126_v0, %v229_v1  ;;  %s145_s22 = scalar_lea.vmem %s116_s15, %s230_s21  ;;  %p119_p4 = scmp.ge.s32.totalorder %s122_s16, 8  }
  0x15   : >> { %133 = vrot.lane.b32.xlu0 %v131_v2, %s271_s19 }
  0x87   : >> { %v134_v3 = vpop.permute.xlu0 %133 }
  0x88   : >> { %v135_v4 = vsel %vm132_vm0, %v134_v3, %v131_v2 }
  0x89   : >> { %136 = vrot.lane.b32.xlu0 %v135_v4, %s271_s19 }
  0xfb   : >> { %v137_v5 = vpop.permute.xlu0 %136 }
  0xfc   : >> { %v138_v6 = vsel %vm132_vm0, %v137_v5, %v131_v2 }
  0xfd   : >> { %140 = vrot.lane.b32.xlu1 %v138_v6, %s272_s20 }
 0x16c   : > { %121 = sbr.rel (!%p119_p4) target bundleno = 16 (0x10), region = 64 }
 0x16f   : >> { %v141_v7 = vpop.permute.xlu1 %140 }
 0x170   : >> { %v143_v8 = vmax.f32 %v131_v2, %v141_v7 }
 0x172   : >> { %147 = vst.msk [vmem:[%s145_s22] sm:$0xff] %vm146_vm1, %v143_v8 }
 0x173 PF: > { %s11_s6 = sadd.s32 1, %s265_s6  }
 0x174   : > { %p8_p5 = scmp.ge.s32.totalorder %s11_s6, 4  }
 0x176   :  { %10 = sbr.rel (!%p8_p5) target bundleno = 1 (0x1), region = 75 }

// kernel: _lambda_.27
= control target key start
LH: loop header
LB: loop body
LE: loop exit
PB: predicated region body
PF: predicated region fallthrough
CT: control target
= control target key end

     0   :  { %s1073_s18 = smov 0   ;;  %s1272_s0 = inlined_call_operand.vmem [shape: f32[2,18,18,8], index: 0, kind: input, shape index: {}]   ;;  %s1273_s1 = inlined_call_operand.vmem [shape: bf16[9,8,8], index: 1, kind: input, shape index: {}]   ;;  %s1274_s2 = inlined_call_operand.vmem [shape: f32[1,8], index: 2, kind: input, shape index: {}]   ;;  %s1275_s3 = inlined_call_operand.vmem [shape: f32[2,16,16,8], index: 3, kind: output, shape index: {0}]   ;;  %s1276_s4 = inlined_call_operand.vmem [shape: f32[1,8], index: 4, kind: output, shape index: {1}]   ;;  %s1277_s5 = inlined_call_operand.vmem [shape: f32[1,8], index: 5, kind: output, shape index: {2}]  }
   0x1 LB: > { %s857_s19 = sadd.s32 4294967295, %s1026_s18   ;;  %p861_p0 = scmp.ge.s32.totalorder %s1026_s18, 1  ;;  %s1026_s18 = sphi %s1073_s18, %s16_s18  }
   0x2   : > { %p182_p1 = scmp.lt.s32.totalorder %s1026_s18, 3 }
   0x4   : > { %p183_p2 = pnand %p861_p0, %p182_p1 }
   0x5   : > { %p210_p3 = scmp.lt.s32.totalorder (!%p183_p2), %s857_s19, 1  ;;  %p865_p4 = scmp.ne.s32.totalorder (!%p183_p2), %s857_s19, 0 }
   0x6   : > { %186 = sbr.rel (%p183_p2) target bundleno = 303 (0x12f), region = 32 }
   0xd   : > { %s211_s20 = scalar_select %p210_p3, %s857_s19, 1 }
   0xe   : > { %224 = sbr.rel (%p865_p4) target bundleno = 21 (0x15), region = 36  ;;  %vm225_vm0 = vcmask (!%p865_p4), 57344   ;;  %v1040_v0 = vmov (!%p865_p4), 0.0  }
   0xf   : > { %s972_s21 = smul.u32 432, %s211_s20  ;;  %s899_s22 = sshll.u32 %s211_s20, 8  ;;  %226 = vst.msk [vmem:[%s1276_s4] sm:$0x1] (!%p865_p4), %vm225_vm0, %v1040_v0  ;;  %227 = vst.msk [vmem:[%s1277_s5] sm:$0x1] (!%p865_p4), %vm225_vm0, %v1040_v0 }
  0x10   : > { %s1084_s25 = scalar_lea.vmem %s1275_s3, %s899_s22 }
  0x11   : > { %s1089_s28 = scalar_lea.vmem %s1272_s0, %s972_s21 }
  0x15 PF: > { %v1100_v1 = vld [vmem:[%s1274_s2] ss:$0 sm:$0xff]  ;;  %v1110_v3 = vld [vmem:[%s1273_s1 + $0x4] sm:$0xf]  ;;  %v1115_v4 = vld [vmem:[%s1273_s1 + $0x8] sm:$0xf] }
  0x16   : > { %v1105_v2 = vld [vmem:[%s1273_s1] sm:$0xf]  ;;  %v1120_v5 = vld [vmem:[%s1273_s1 + $0xc] sm:$0xf]  ;;  %v1125_v6 = vld [vmem:[%s1273_s1 + $0x10] sm:$0xf] }
  0x17   : > { %v1130_v7 = vld [vmem:[%s1273_s1 + $0x14] sm:$0xf]  ;;  %v1135_v8 = vld [vmem:[%s1273_s1 + $0x18] sm:$0xf]  ;;  %v1140_v9 = vld [vmem:[%s1273_s1 + $0x1c] sm:$0xf] }
  0x18   : > { %v1145_v10 = vld [vmem:[%s1273_s1 + $0x20] sm:$0xf]  ;;  %v1147_v11 = vmov 0.0   ;;  %v1149_v12 = vmov 0.0   ;;  %s1151_s6 = smov 0  }
  0x19 LB: >> { %vm266_vm1 = vcmask 1043456   ;;  %v1041_v13 = vmov 0.0   ;;  %s254_s7 = smul.u32 24, %s1038_s6  ;;  %vm1042_vm2 = vmmov 0   ;;  %vm262_vm3 = vcmask 64512   ;;  %s896_s9 = sshll.u32 %s1038_s6, 4  ;;  %s1038_s6 = sphi %s1151_s6, %s251_s6   ;;  %v1034_v12 = vphi %v1149_v12, %v1279_v12   ;;  %v1030_v11 = vphi %v1147_v11, %v1278_v11  }
  0x1a   : >> { %918 = vmatprep.subr.bf16.mxu0 %v1041_v13  ;;  %v268_v14 = vsel %vm266_vm1, %v1110_v3, 0  ;;  %924 = vmatprep.subr.bf16.mxu1 %v1041_v13  ;;  %v315_v15 = vsel %vm266_vm1, %v1105_v2, 0  ;;  %v365_v21 = vsel %vm266_vm1, %v1115_v4, 0  ;;  %v420_v23 = vsel %vm266_vm1, %v1120_v5, 0  ;;  %s737_s10 = scalar_lea.vmem %s1084_s25, %s896_s9  ;;  %s251_s6 = sadd.s32 1, %s1038_s6  }
  0x1b   : >> { %919 = vmatpush3.bf16.msra.mxu0 %v268_v14  ;;  %925 = vmatpush3.bf16.msra.mxu1 %v315_v15  ;;  %s1175_s8 = scalar_lea.vmem %s1089_s28, %s254_s7  ;;  %v472_v30 = vsel %vm266_vm1, %v1125_v6, 0  ;;  %v524_v31 = vsel %vm266_vm1, %v1130_v7, 0  ;;  %v579_v38 = vsel %vm266_vm1, %v1135_v8, 0  ;;  %v631_v39 = vsel %vm266_vm1, %v1140_v9, 0  ;;  %p248_p5 = scmp.ge.s32.totalorder %s251_s6, 16  }
  0x1c   : >> { %920 = vmatprep.mubr.msk.bf16.mxu0 %vm1042_vm2, %v1041_v13  ;;  %926 = vmatprep.mubr.msk.bf16.mxu1 %vm1042_vm2, %v1041_v13  ;;  %v259_v16 = vld [vmem:[%s1175_s8 + $0x1] sm:$0xff]  ;;  %v260_v17 = vld [vmem:[%s1175_s8 + $0x9] sm:$0xff]  ;;  %v877_v26 = vld [vmem:[%s1175_s8 + $0x18] sm:$0xff]  ;;  %v683_v46 = vsel %vm266_vm1, %v1145_v10, 0  ;;  %vm764_vm4 = vcmask (%p248_p5), 57344  }
  0x1d   : >> { %930 = vmatprep.subr.bf16.mxu0 %v1041_v13  ;;  %936 = vmatprep.subr.bf16.mxu1 %v1041_v13  ;;  %v256_v18 = vld [vmem:[%s1175_s8] sm:$0xff]  ;;  %v261_v19 = vpack.c.bf16 %v260_v17, %v259_v16  ;;  %v257_v20 = vld [vmem:[%s1175_s8 + $0x8] sm:$0xff]  ;;  %v886_v40 = vld [vmem:[%s1175_s8 + $0x30] sm:$0xff] }
  0x1e   : >> { %v258_v22 = vpack.c.bf16 %v257_v20, %v256_v18  ;;  %v358_v24 = vld [vmem:[%s1175_s8 + $0x2] sm:$0xff]  ;;  %v359_v25 = vld [vmem:[%s1175_s8 + $0xa] sm:$0xff]  ;;  %v880_v32 = vld [vmem:[%s1175_s8 + $0x19] sm:$0xff] }
  0x1f   : >> { %921 = vmatmul.mubr.msk.bf16.vlgmr.msra.gmra.mrb[0].mxu0 %vm262_vm3, %v261_v19  ;;  %v878_v27 = vld [vmem:[%s1175_s8 + $0x20] sm:$0xff]  ;;  %v360_v28 = vpack.c.bf16 %v359_v25, %v358_v24  ;;  %v887_v41 = vld [vmem:[%s1175_s8 + $0x38] sm:$0xff] }
  0x20   : >> { %927 = vmatmul.mubr.msk.bf16.vlgmr.msra.gmra.mrb[0].mxu1 %vm262_vm3, %v258_v22  ;;  %931 = vmatpush3.bf16.msra.mxu0 %v365_v21  ;;  %v415_v29 = vpack.c.bf16 %v878_v27, %v877_v26  ;;  %v881_v33 = vld [vmem:[%s1175_s8 + $0x21] sm:$0xff]  ;;  %v889_v42 = vld [vmem:[%s1175_s8 + $0x31] sm:$0xff]  ;;  %v890_v43 = vld [vmem:[%s1175_s8 + $0x39] sm:$0xff]  ;;  %v574_v44 = vpack.c.bf16 %v887_v41, %v886_v40 }
  0x21   : >> { %937 = vmatpush3.bf16.msra.mxu1 %v420_v23  ;;  %932 = vmatprep.mubr.msk.bf16.mxu0 %vm1042_vm2, %v1041_v13  ;;  %v883_v34 = vld [vmem:[%s1175_s8 + $0x1a] sm:$0xff]  ;;  %v884_v35 = vld [vmem:[%s1175_s8 + $0x22] sm:$0xff]  ;;  %v467_v36 = vpack.c.bf16 %v881_v33, %v880_v32  ;;  %v626_v45 = vpack.c.bf16 %v890_v43, %v889_v42  ;;  %v892_v47 = vld [vmem:[%s1175_s8 + $0x32] sm:$0xff] }
  0x22   : >> { %942 = vmatprep.subr.bf16.mxu0 %v1041_v13  ;;  %938 = vmatprep.mubr.msk.bf16.mxu1 %vm1042_vm2, %v1041_v13  ;;  %v519_v37 = vpack.c.bf16 %v884_v35, %v883_v34  ;;  %v893_v48 = vld [vmem:[%s1175_s8 + $0x3a] sm:$0xff] }
  0x23   : >> { %948 = vmatprep.subr.bf16.mxu1 %v1041_v13  ;;  %v678_v49 = vpack.c.bf16 %v893_v48, %v892_v47 }
  0x27   : >> { %933 = vmatmul.mubr.msk.bf16.vlgmr.msra.gmra.mrb[4].mxu0 %vm262_vm3, %v360_v28 }
  0x28   : >> { %943 = vmatpush3.bf16.msra.mxu0 %v472_v30  ;;  %939 = vmatmul.mubr.msk.bf16.vlgmr.msra.gmra.mrb[4].mxu1 %vm262_vm3, %v415_v29 }
  0x29   : >> { %949 = vmatpush3.bf16.msra.mxu1 %v524_v31  ;;  %944 = vmatprep.mubr.msk.bf16.mxu0 %vm1042_vm2, %v1041_v13 }
  0x2a   : >> { %954 = vmatprep.subr.bf16.mxu0 %v1041_v13  ;;  %950 = vmatprep.mubr.msk.bf16.mxu1 %vm1042_vm2, %v1041_v13 }
  0x2b   : >> { %960 = vmatprep.subr.bf16.mxu1 %v1041_v13 }
  0x2f   : >> { %945 = vmatmul.mubr.msk.bf16.vlgmr.msra.gmra.mrb[8].mxu0 %vm262_vm3, %v467_v36 }
  0x30   : >> { %955 = vmatpush3.bf16.msra.mxu0 %v579_v38  ;;  %951 = vmatmul.mubr.msk.bf16.vlgmr.msra.gmra.mrb[8].mxu1 %vm262_vm3, %v519_v37 }
  0x31   : >> { %961 = vmatpush3.bf16.msra.mxu1 %v631_v39  ;;  %956 = vmatprep.mubr.msk.bf16.mxu0 %vm1042_vm2, %v1041_v13 }
  0x32   : >> { %966 = vmatprep.subr.bf16.mxu0 %v1041_v13  ;;  %962 = vmatprep.mubr.msk.bf16.mxu1 %vm1042_vm2, %v1041_v13 }
  0x37   : >> { %957 = vmatmul.mubr.msk.bf16.vlgmr.msra.gmra.mrb[12].mxu0 %vm262_vm3, %v574_v44 }
  0x38   : >> { %967 = vmatpush3.bf16.msra.mxu0 %v683_v46  ;;  %963 = vmatmul.mubr.msk.bf16.vlgmr.msra.gmra.mrb[12].mxu1 %vm262_vm3, %v626_v45 }
  0x39   : >> { %968 = vmatprep.mubr.msk.bf16.mxu0 %vm1042_vm2, %v1041_v13 }
  0x3f   : >> { %969 = vmatmul.mubr.msk.bf16.vlgmr.msra.gmra.mrb[16].mxu0 %vm262_vm3, %v678_v49 }
  0xf2   : >> { %v304_v50 = vpop.f32.mrb[0].mxu0 }
  0xf3   : >> { %v351_v51 = vpop.f32.mrb[0].mxu1  ;;  %v922_v52 = vpop.f32.mrb[1].mxu0 }
  0xf4   : >> { %v352_v53 = vadd.f32 %v351_v51, %v304_v50  ;;  %v928_v54 = vpop.f32.mrb[1].mxu1  ;;  %v307_v55 = vpop.f32.mrb[2].mxu0 }
  0xf5   : >> { %v354_v56 = vpop.f32.mrb[2].mxu1  ;;  %v923_v57 = vpop.f32.mrb[3].mxu0 }
  0xf6   : >> { %v355_v58 = vadd.f32 %v354_v56, %v307_v55  ;;  %v929_v59 = vpop.f32.mrb[3].mxu1 }
  0xfa   : >> { %v401_v60 = vpop.f32.mrb[4].mxu0 }
  0xfb   : >> { %v408_v61 = vadd.f32 %v401_v60, %v352_v53  ;;  %v934_v62 = vpop.f32.mrb[5].mxu0  ;;  %v456_v63 = vpop.f32.mrb[4].mxu1 }
  0xfc   : >> { %v404_v0 = vpop.f32.mrb[6].mxu0  ;;  %v940_v14 = vpop.f32.mrb[5].mxu1 }
  0xfd   : >> { %v409_v13 = vadd.f32 %v404_v0, %v355_v58  ;;  %v463_v15 = vadd.f32 %v456_v63, %v408_v61  ;;  %v935_v16 = vpop.f32.mrb[7].mxu0  ;;  %v459_v17 = vpop.f32.mrb[6].mxu1 }
  0xfe   : >> { %v941_v18 = vpop.f32.mrb[7].mxu1 }
  0xff   : >> { %v464_v19 = vadd.f32 %v459_v17, %v409_v13 }
 0x102   : >> { %v508_v20 = vpop.f32.mrb[8].mxu0 }
 0x103   : >> { %v515_v21 = vadd.f32 %v508_v20, %v463_v15  ;;  %v946_v22 = vpop.f32.mrb[9].mxu0  ;;  %v560_v23 = vpop.f32.mrb[8].mxu1 }
 0x104   : >> { %v511_v24 = vpop.f32.mrb[10].mxu0  ;;  %v952_v25 = vpop.f32.mrb[9].mxu1  ;;  %v762_v22 = vld [vmem:[%s1276_s4] sm:$0x1] (%p248_p5) }
 0x105   : >> { %v516_v26 = vadd.f32 %v511_v24, %v464_v19  ;;  %v567_v27 = vadd.f32 %v560_v23, %v515_v21  ;;  %v947_v28 = vpop.f32.mrb[11].mxu0  ;;  %v563_v29 = vpop.f32.mrb[10].mxu1 }
 0x106   : >> { %v953_v30 = vpop.f32.mrb[11].mxu1 }
 0x107   : >> { %v568_v31 = vadd.f32 %v563_v29, %v516_v26 }
 0x10a   : >> { %v615_v32 = vpop.f32.mrb[12].mxu0 }
 0x10b   : >> { %v622_v33 = vadd.f32 %v615_v32, %v567_v27  ;;  %v958_v34 = vpop.f32.mrb[13].mxu0  ;;  %v667_v35 = vpop.f32.mrb[12].mxu1 }
 0x10c   : >> { %v618_v36 = vpop.f32.mrb[14].mxu0  ;;  %v964_v37 = vpop.f32.mrb[13].mxu1 }
 0x10d   : >> { %v623_v38 = vadd.f32 %v618_v36, %v568_v31  ;;  %v674_v39 = vadd.f32 %v667_v35, %v622_v33  ;;  %v959_v40 = vpop.f32.mrb[15].mxu0  ;;  %v670_v41 = vpop.f32.mrb[14].mxu1 }
 0x10e   : >> { %v965_v42 = vpop.f32.mrb[15].mxu1 }
 0x10f   : >> { %v675_v43 = vadd.f32 %v670_v41, %v623_v38 }
 0x112   : >> { %v719_v44 = vpop.f32.mrb[16].mxu0 }
 0x113   : >> { %v726_v45 = vadd.f32 %v719_v44, %v674_v39  ;;  %v970_v46 = vpop.f32.mrb[17].mxu0 }
 0x114   : >> { %v722_v47 = vpop.f32.mrb[18].mxu0 }
 0x115   : >> { %v734_v48 = vadd.f32 %v1100_v1, %v726_v45  ;;  %v727_v49 = vadd.f32 %v722_v47, %v675_v43  ;;  %v971_v50 = vpop.f32.mrb[19].mxu0 }
 0x117   : >> { %738 = vst.msk [vmem:[%s737_s10] sm:$0xff] %vm262_vm3, %v734_v48  ;;  %v750_v51 = vmul.f32 %v734_v48, %v734_v48  ;;  %v735_v52 = vadd.f32 %v1100_v1, %v727_v49  ;;  %v740_v53 = vsel %vm262_vm3, %v734_v48, 0.0 }
 0x119   : >> { %739 = vst.msk [vmem:[%s737_s10 + $0x8] sm:$0xff] %vm262_vm3, %v735_v52  ;;  %v741_v54 = vsel %vm262_vm3, %v735_v52, 0.0  ;;  %v751_v55 = vmul.f32 %v735_v52, %v735_v52  ;;  %v752_v57 = vsel %vm262_vm3, %v750_v51, 0.0 }
 0x11a   : >> { %v742_v56 = vadd.f32 %v741_v54, %v740_v53 }
 0x11b   : >> { %v753_v58 = vsel %vm262_vm3, %v751_v55, 0.0 }
 0x11c   : >> { %v743_v59 = vrot.slane %v742_v56, 4  ;;  %v754_v60 = vadd.f32 %v753_v58, %v752_v57 }
 0x11e   : >> { %v744_v61 = vadd.f32 %v743_v59, %v742_v56  ;;  %v755_v62 = vrot.slane %v754_v60, 4 }
 0x120   : >> { %v745_v63 = vrot.slane %v744_v61, 2  ;;  %v756_v0 = vadd.f32 %v755_v62, %v754_v60 }
 0x122   : >> { %v746_v14 = vadd.f32 %v745_v63, %v744_v61  ;;  %v757_v13 = vrot.slane %v756_v0, 2 }
 0x124   : >> { %v747_v15 = vrot.slane %v746_v14, 1  ;;  %v758_v16 = vadd.f32 %v757_v13, %v756_v0 }
 0x126   : >> { %v748_v17 = vadd.f32 %v747_v15, %v746_v14  ;;  %v759_v18 = vrot.slane %v758_v16, 1  ;;  %250 = sbr.rel (!%p248_p5) target bundleno = 25 (0x19), region = 101 }
 0x128   : >> { %v749_v19 = vadd.f32 %v1034_v12, %v748_v17   ;;  %v760_v20 = vadd.f32 %v759_v18, %v758_v16 }
 0x12a   : >> { %v761_v21 = vadd.f32 %v1030_v11, %v760_v20   ;;  %v1279_v12 = vmov %v749_v19  ;;  %v763_v23 = vadd.f32 (%p248_p5), %v762_v22, %v749_v19 }
 0x12b   : > { %v766_v12 = vld [vmem:[%s1277_s5] sm:$0x1] (%p248_p5) }
 0x12c   : >> { %v1278_v11 = vmov %v761_v21  ;;  %v767_v24 = vadd.f32 (%p248_p5), %v766_v12, %v761_v21  ;;  %765 = vst.msk [vmem:[%s1276_s4] sm:$0x1] (%p248_p5), %vm764_vm4, %v763_v23 }
 0x12e   : > { %768 = vst.msk [vmem:[%s1277_s5] sm:$0x1] %vm764_vm4, %v767_v24 }
 0x12f PF: > { %s16_s18 = sadd.s32 1, %s1026_s18  }
 0x130   : > { %p13_p6 = scmp.ge.s32.totalorder %s16_s18, 4  }
 0x132   :  { %15 = sbr.rel (!%p13_p6) target bundleno = 1 (0x1), region = 112 }

// kernel: _lambda_.30
= control target key start
LH: loop header
LB: loop body
LE: loop exit
PB: predicated region body
PF: predicated region fallthrough
CT: control target
= control target key end

     0   :  { %s1039_s18 = smov 0   ;;  %s1222_s0 = inlined_call_operand.vmem [shape: f32[2,10,10,8], index: 0, kind: input, shape index: {}]   ;;  %s1223_s1 = inlined_call_operand.vmem [shape: bf16[9,8,16], index: 1, kind: input, shape index: {}]   ;;  %s1224_s2 = inlined_call_operand.vmem [shape: f32[1,16], index: 2, kind: input, shape index: {}]   ;;  %s1225_s3 = inlined_call_operand.vmem [shape: f32[2,8,8,16], index: 3, kind: output, shape index: {0}]   ;;  %s1226_s4 = inlined_call_operand.vmem [shape: f32[1,16], index: 4, kind: output, shape index: {1}]   ;;  %s1227_s5 = inlined_call_operand.vmem [shape: f32[1,16], index: 5, kind: output, shape index: {2}]  }
   0x1 LB: > { %s826_s19 = sadd.s32 4294967295, %s992_s18   ;;  %p830_p0 = scmp.ge.s32.totalorder %s992_s18, 1  ;;  %s992_s18 = sphi %s1039_s18, %s16_s18  }
   0x2   : > { %p182_p1 = scmp.lt.s32.totalorder %s992_s18, 3 }
   0x4   : > { %p183_p2 = pnand %p830_p0, %p182_p1 }
   0x5   : > { %p210_p3 = scmp.lt.s32.totalorder (!%p183_p2), %s826_s19, 1  ;;  %p834_p4 = scmp.ne.s32.totalorder (!%p183_p2), %s826_s19, 0 }
   0x6   : > { %186 = sbr.rel (%p183_p2) target bundleno = 298 (0x12a), region = 32 }
   0xd   : > { %s211_s20 = scalar_select %p210_p3, %s826_s19, 1 }
   0xe   : > { %224 = sbr.rel (%p834_p4) target bundleno = 21 (0x15), region = 36  ;;  %vm225_vm0 = vcmask (!%p834_p4), 122880   ;;  %v1006_v0 = vmov (!%p834_p4), 0.0  }
   0xf   : > { %s938_s21 = smul.u32 160, %s211_s20  ;;  %s865_s22 = sshll.u32 %s211_s20, 6  ;;  %226 = vst.msk [vmem:[%s1226_s4] sm:$0x1] (!%p834_p4), %vm225_vm0, %v1006_v0  ;;  %227 = vst.msk [vmem:[%s1227_s5] sm:$0x1] (!%p834_p4), %vm225_vm0, %v1006_v0 }
  0x10   : > { %s1050_s25 = scalar_lea.vmem %s1225_s3, %s865_s22 }
  0x11   : > { %s1055_s28 = scalar_lea.vmem %s1222_s0, %s938_s21 }
  0x15 PF: > { %v1066_v1 = vld [vmem:[%s1224_s2] ss:$0 sm:$0xff]  ;;  %v1076_v3 = vld [vmem:[%s1223_s1 + $0x4] sm:$0xf]  ;;  %v1081_v4 = vld [vmem:[%s1223_s1 + $0x8] sm:$0xf] }
  0x16   : > { %v1071_v2 = vld [vmem:[%s1223_s1] sm:$0xf]  ;;  %v1086_v5 = vld [vmem:[%s1223_s1 + $0xc] sm:$0xf]  ;;  %v1091_v6 = vld [vmem:[%s1223_s1 + $0x10] sm:$0xf] }
  0x17   : > { %v1096_v7 = vld [vmem:[%s1223_s1 + $0x14] sm:$0xf]  ;;  %v1101_v8 = vld [vmem:[%s1223_s1 + $0x18] sm:$0xf]  ;;  %v1106_v9 = vld [vmem:[%s1223_s1 + $0x1c] sm:$0xf] }
  0x18   : > { %v1111_v10 = vld [vmem:[%s1223_s1 + $0x20] sm:$0xf]  ;;  %v1113_v11 = vmov 0.0   ;;  %v1115_v12 = vmov 0.0   ;;  %s1117_s6 = smov 0  }
  0x19 LB: >> { %vm264_vm1 = vcmask 1043456   ;;  %v1007_v13 = vmov 0.0   ;;  %s843_s7 = sshll.u32 %s1004_s6, 4  ;;  %vm1008_vm2 = vmmov 0   ;;  %vm260_vm3 = vcmask 64512   ;;  %s862_s9 = sshll.u32 %s1004_s6, 3  ;;  %s1004_s6 = sphi %s1117_s6, %s251_s6   ;;  %v1000_v12 = vphi %v1115_v12, %v1229_v12   ;;  %v996_v11 = vphi %v1113_v11, %v1228_v11  }
  0x1a   : >> { %884 = vmatprep.subr.bf16.mxu0 %v1007_v13  ;;  %v266_v14 = vsel %vm264_vm1, %v1076_v3, 0  ;;  %890 = vmatprep.subr.bf16.mxu1 %v1007_v13  ;;  %v312_v15 = vsel %vm264_vm1, %v1071_v2, 0  ;;  %s1140_s8 = scalar_lea.vmem %s1055_s28, %s843_s7  ;;  %v360_v20 = vsel %vm264_vm1, %v1081_v4, 0  ;;  %v412_v21 = vsel %vm264_vm1, %v1086_v5, 0  ;;  %s711_s10 = scalar_lea.vmem %s1050_s25, %s862_s9 }
  0x1b   : >> { %885 = vmatpush3.bf16.msra.mxu0 %v266_v14  ;;  %891 = vmatpush3.bf16.msra.mxu1 %v312_v15  ;;  %v258_v16 = vld [vmem:[%s1140_s8 + $0x1] sm:$0xff]  ;;  %v848_v23 = vld [vmem:[%s1140_s8 + $0x10] sm:$0xff]  ;;  %v461_v26 = vsel %vm264_vm1, %v1091_v6, 0  ;;  %v510_v27 = vsel %vm264_vm1, %v1096_v7, 0  ;;  %v562_v32 = vsel %vm264_vm1, %v1101_v8, 0  ;;  %v611_v33 = vsel %vm264_vm1, %v1106_v9, 0 }
  0x1c   : >> { %886 = vmatprep.mubr.msk.bf16.mxu0 %vm1008_vm2, %v1007_v13  ;;  %892 = vmatprep.mubr.msk.bf16.mxu1 %vm1008_vm2, %v1007_v13  ;;  %v256_v17 = vld [vmem:[%s1140_s8] sm:$0xff]  ;;  %v259_v18 = vpack.c.bf16 %v258_v16, %v258_v16  ;;  %v407_v25 = vpack.c.bf16 %v848_v23, %v848_v23  ;;  %v850_v28 = vld [vmem:[%s1140_s8 + $0x11] sm:$0xff]  ;;  %v660_v38 = vsel %vm264_vm1, %v1111_v10, 0  ;;  %vm712_vm4 = vcmask 130048   ;;  %s251_s6 = sadd.s32 1, %s1004_s6  }
  0x1d   : >> { %896 = vmatprep.subr.bf16.mxu0 %v1007_v13  ;;  %902 = vmatprep.subr.bf16.mxu1 %v1007_v13  ;;  %v257_v19 = vpack.c.bf16 %v256_v17, %v256_v17  ;;  %v354_v22 = vld [vmem:[%s1140_s8 + $0x2] sm:$0xff]  ;;  %v852_v29 = vld [vmem:[%s1140_s8 + $0x12] sm:$0xff]  ;;  %v456_v30 = vpack.c.bf16 %v850_v28, %v850_v28  ;;  %p248_p5 = scmp.ge.s32.totalorder %s251_s6, 8  }
  0x1e   : >> { %887 = vmatmul.mubr.msk.bf16.vlgmr.msra.gmra.mrb[0].mxu0 %vm260_vm3, %v259_v18  ;;  %v355_v24 = vpack.c.bf16 %v354_v22, %v354_v22  ;;  %v505_v31 = vpack.c.bf16 %v852_v29, %v852_v29  ;;  %v855_v34 = vld [vmem:[%s1140_s8 + $0x20] sm:$0xff]  ;;  %vm733_vm5 = vcmask (%p248_p5), 122880  }
  0x1f   : >> { %893 = vmatmul.mubr.msk.bf16.vlgmr.msra.gmra.mrb[0].mxu1 %vm260_vm3, %v257_v19  ;;  %897 = vmatpush3.bf16.msra.mxu0 %v360_v20  ;;  %v857_v35 = vld [vmem:[%s1140_s8 + $0x21] sm:$0xff]  ;;  %v557_v36 = vpack.c.bf16 %v855_v34, %v855_v34 }
  0x20   : >> { %903 = vmatpush3.bf16.msra.mxu1 %v412_v21  ;;  %898 = vmatprep.mubr.msk.bf16.mxu0 %vm1008_vm2, %v1007_v13  ;;  %v606_v37 = vpack.c.bf16 %v857_v35, %v857_v35  ;;  %v859_v39 = vld [vmem:[%s1140_s8 + $0x22] sm:$0xff] }
  0x21   : >> { %908 = vmatprep.subr.bf16.mxu0 %v1007_v13  ;;  %904 = vmatprep.mubr.msk.bf16.mxu1 %vm1008_vm2, %v1007_v13  ;;  %v655_v40 = vpack.c.bf16 %v859_v39, %v859_v39 }
  0x22   : >> { %914 = vmatprep.subr.bf16.mxu1 %v1007_v13 }
  0x26   : >> { %899 = vmatmul.mubr.msk.bf16.vlgmr.msra.gmra.mrb[4].mxu0 %vm260_vm3, %v355_v24 }
  0x27   : >> { %905 = vmatmul.mubr.msk.bf16.vlgmr.msra.gmra.mrb[4].mxu1 %vm260_vm3, %v407_v25  ;;  %909 = vmatpush3.bf16.msra.mxu0 %v461_v26 }
  0x28   : >> { %915 = vmatpush3.bf16.msra.mxu1 %v510_v27  ;;  %910 = vmatprep.mubr.msk.bf16.mxu0 %vm1008_vm2, %v1007_v13 }
  0x29   : >> { %920 = vmatprep.subr.bf16.mxu0 %v1007_v13  ;;  %916 = vmatprep.mubr.msk.bf16.mxu1 %vm1008_vm2, %v1007_v13 }
  0x2a   : >> { %926 = vmatprep.subr.bf16.mxu1 %v1007_v13 }
  0x2e   : >> { %911 = vmatmul.mubr.msk.bf16.vlgmr.msra.gmra.mrb[8].mxu0 %vm260_vm3, %v456_v30 }
  0x2f   : >> { %917 = vmatmul.mubr.msk.bf16.vlgmr.msra.gmra.mrb[8].mxu1 %vm260_vm3, %v505_v31  ;;  %921 = vmatpush3.bf16.msra.mxu0 %v562_v32 }
  0x30   : >> { %927 = vmatpush3.bf16.msra.mxu1 %v611_v33  ;;  %922 = vmatprep.mubr.msk.bf16.mxu0 %vm1008_vm2, %v1007_v13 }
  0x31   : >> { %932 = vmatprep.subr.bf16.mxu0 %v1007_v13  ;;  %928 = vmatprep.mubr.msk.bf16.mxu1 %vm1008_vm2, %v1007_v13 }
  0x36   : >> { %923 = vmatmul.mubr.msk.bf16.vlgmr.msra.gmra.mrb[12].mxu0 %vm260_vm3, %v557_v36 }
  0x37   : >> { %929 = vmatmul.mubr.msk.bf16.vlgmr.msra.gmra.mrb[12].mxu1 %vm260_vm3, %v606_v37  ;;  %933 = vmatpush3.bf16.msra.mxu0 %v660_v38 }
  0x38   : >> { %934 = vmatprep.mubr.msk.bf16.mxu0 %vm1008_vm2, %v1007_v13 }
  0x3e   : >> { %935 = vmatmul.mubr.msk.bf16.vlgmr.msra.gmra.mrb[16].mxu0 %vm260_vm3, %v655_v40 }
  0xf1   : >> { %v302_v41 = vpop.f32.mrb[0].mxu0 }
  0xf2   : >> { %v348_v42 = vpop.f32.mrb[0].mxu1  ;;  %v888_v44 = vpop.f32.mrb[1].mxu0 }
  0xf3   : >> { %v349_v43 = vadd.f32 %v348_v42, %v302_v41  ;;  %v894_v45 = vpop.f32.mrb[1].mxu1  ;;  %v305_v46 = vpop.f32.mrb[2].mxu0 }
  0xf4   : >> { %v351_v47 = vpop.f32.mrb[2].mxu1  ;;  %v889_v48 = vpop.f32.mrb[3].mxu0 }
  0xf5   : >> { %v895_v49 = vpop.f32.mrb[3].mxu1 }
  0xf9   : >> { %v396_v50 = vpop.f32.mrb[4].mxu0 }
  0xfa   : >> { %v448_v51 = vpop.f32.mrb[4].mxu1  ;;  %v402_v52 = vadd.f32 %v396_v50, %v349_v43  ;;  %v900_v53 = vpop.f32.mrb[5].mxu0 }
  0xfb   : >> { %v906_v54 = vpop.f32.mrb[5].mxu1  ;;  %v399_v55 = vpop.f32.mrb[6].mxu0 }
  0xfc   : >> { %v451_v56 = vpop.f32.mrb[6].mxu1  ;;  %v454_v57 = vadd.f32 %v448_v51, %v402_v52  ;;  %v901_v58 = vpop.f32.mrb[7].mxu0  ;;  %v731_v51 = vld [vmem:[%s1226_s4] sm:$0x1] (%p248_p5) }
  0xfd   : >> { %v907_v59 = vpop.f32.mrb[7].mxu1 }
 0x101   : >> { %v497_v60 = vpop.f32.mrb[8].mxu0 }
 0x102   : >> { %v546_v61 = vpop.f32.mrb[8].mxu1  ;;  %v503_v62 = vadd.f32 %v497_v60, %v454_v57  ;;  %v912_v63 = vpop.f32.mrb[9].mxu0 }
 0x103   : >> { %v918_v0 = vpop.f32.mrb[9].mxu1  ;;  %v500_v13 = vpop.f32.mrb[10].mxu0 }
 0x104   : >> { %v549_v14 = vpop.f32.mrb[10].mxu1  ;;  %v552_v15 = vadd.f32 %v546_v61, %v503_v62  ;;  %v913_v16 = vpop.f32.mrb[11].mxu0 }
 0x105   : >> { %v919_v17 = vpop.f32.mrb[11].mxu1 }
 0x109   : >> { %v598_v18 = vpop.f32.mrb[12].mxu0 }
 0x10a   : >> { %v647_v19 = vpop.f32.mrb[12].mxu1  ;;  %v604_v20 = vadd.f32 %v598_v18, %v552_v15  ;;  %v924_v21 = vpop.f32.mrb[13].mxu0 }
 0x10b   : >> { %v930_v22 = vpop.f32.mrb[13].mxu1  ;;  %v601_v23 = vpop.f32.mrb[14].mxu0 }
 0x10c   : >> { %v650_v24 = vpop.f32.mrb[14].mxu1  ;;  %v653_v25 = vadd.f32 %v647_v19, %v604_v20  ;;  %v925_v26 = vpop.f32.mrb[15].mxu0 }
 0x10d   : >> { %v931_v27 = vpop.f32.mrb[15].mxu1 }
 0x111   : >> { %v696_v28 = vpop.f32.mrb[16].mxu0 }
 0x112   : >> { %v702_v29 = vadd.f32 %v696_v28, %v653_v25  ;;  %v936_v30 = vpop.f32.mrb[17].mxu0 }
 0x113   : >> { %v699_v31 = vpop.f32.mrb[18].mxu0 }
 0x114   : >> { %v709_v32 = vadd.f32 %v1066_v1, %v702_v29  ;;  %v937_v33 = vpop.f32.mrb[19].mxu0 }
 0x116   : >> { %713 = vst.msk [vmem:[%s711_s10] sm:$0xff] %vm712_vm4, %v709_v32  ;;  %v714_v34 = vsel %vm712_vm4, %v709_v32, 0.0  ;;  %v722_v35 = vmul.f32 %v709_v32, %v709_v32 }
 0x117   : >> { %v715_v36 = vrot.slane %v714_v34, 4 }
 0x118   : >> { %v723_v37 = vsel %vm712_vm4, %v722_v35, 0.0 }
 0x119   : >> { %v716_v38 = vadd.f32 %v715_v36, %v714_v34  ;;  %v724_v39 = vrot.slane %v723_v37, 4 }
 0x11b   : >> { %v717_v40 = vrot.slane %v716_v38, 2  ;;  %v725_v41 = vadd.f32 %v724_v39, %v723_v37 }
 0x11d   : >> { %v718_v42 = vadd.f32 %v717_v40, %v716_v38  ;;  %v726_v43 = vrot.slane %v725_v41, 2 }
 0x11f   : >> { %v719_v44 = vrot.slane %v718_v42, 1  ;;  %v727_v45 = vadd.f32 %v726_v43, %v725_v41 }
 0x121   : >> { %v720_v46 = vadd.f32 %v719_v44, %v718_v42  ;;  %v728_v47 = vrot.slane %v727_v45, 1  ;;  %250 = sbr.rel (!%p248_p5) target bundleno = 25 (0x19), region = 101 }
 0x123   : >> { %v721_v48 = vadd.f32 %v1000_v12, %v720_v46   ;;  %v729_v49 = vadd.f32 %v728_v47, %v727_v45 }
 0x125   : >> { %v730_v50 = vadd.f32 %v996_v11, %v729_v49   ;;  %v1229_v12 = vmov %v721_v48  ;;  %v732_v52 = vadd.f32 (%p248_p5), %v731_v51, %v721_v48 }
 0x126   : > { %v735_v12 = vld [vmem:[%s1227_s5] sm:$0x1] (%p248_p5) }
 0x127   : >> { %v1228_v11 = vmov %v730_v50  ;;  %v736_v53 = vadd.f32 (%p248_p5), %v735_v12, %v730_v50  ;;  %734 = vst.msk [vmem:[%s1226_s4] sm:$0x1] (%p248_p5), %vm733_vm5, %v732_v52 }
 0x129   : > { %737 = vst.msk [vmem:[%s1227_s5] sm:$0x1] %vm733_vm5, %v736_v53 }
 0x12a PF: > { %s16_s18 = sadd.s32 1, %s992_s18  }
 0x12b   : > { %p13_p6 = scmp.ge.s32.totalorder %s16_s18, 4  }
 0x12d   :  { %15 = sbr.rel (!%p13_p6) target bundleno = 1 (0x1), region = 112 }

// kernel: _lambda_.31
= control target key start
LH: loop header
LB: loop body
LE: loop exit
PB: predicated region body
PF: predicated region fallthrough
CT: control target
= control target key end

     0   :  { %v18_v0 = vlaneseq  ;;  %s110_s1 = inlined_call_operand.vmem [shape: f32[1,512], index: 1, kind: input, shape index: {}]   ;;  %s111_s2 = inlined_call_operand.vmem [shape: f32[1,512], index: 2, kind: input, shape index: {}]   ;;  %s112_s0 = inlined_call_operand.vmem [shape: f32[4,512], index: 0, kind: input, shape index: {}]   ;;  %s113_s3 = inlined_call_operand.vmem [shape: f32[4,512], index: 3, kind: output, shape index: {}]  }
   0x1   :  { %v16_v2 = vld [vmem:[%s110_s1] sm:$0xf]  ;;  %v15_v19 = vld [vmem:[%s112_s0 + $0x8] sm:$0xff] }
   0x2   :  { %v19_v1 = vshrl.u32 %v18_v0, 7  ;;  %v40_v3 = vld [vmem:[%s111_s2] sm:$0xf] }
   0x3   :  { %v14_v12 = vld [vmem:[%s112_s0] sm:$0xff] }
   0x4   :  { %v20_v4 = vsub.s32 0, %v19_v1  ;;  %v24_v5 = vsub.s32 1, %v19_v1  ;;  %v28_v6 = vsub.s32 2, %v19_v1  ;;  %v32_v7 = vsub.s32 3, %v19_v1 }
   0x6   :  { %v21_v8 = vrot.slane %v16_v2, %v20_v4  ;;  %v25_v9 = vrot.slane %v16_v2, %v24_v5  ;;  %v45_v10 = vrot.slane %v40_v3, %v20_v4  ;;  %v49_v11 = vrot.slane %v40_v3, %v24_v5 }
   0x7   :  { %v29_v13 = vrot.slane %v16_v2, %v28_v6  ;;  %v33_v14 = vrot.slane %v16_v2, %v32_v7  ;;  %v53_v15 = vrot.slane %v40_v3, %v28_v6  ;;  %v57_v16 = vrot.slane %v40_v3, %v32_v7 }
   0x8   :  { %v34_v17 = vcombine.low %v21_v8, %v25_v9  ;;  %v58_v18 = vcombine.low %v45_v10, %v49_v11 }
   0x9   :  { %v35_v20 = vcombine.low %v29_v13, %v33_v14  ;;  %v59_v21 = vcombine.low %v53_v15, %v57_v16 }
   0xa   :  { %v38_v22 = vmul.f32 %v34_v17, %v14_v12 }
   0xb   :  { %v39_v23 = vmul.f32 %v35_v20, %v15_v19 }
   0xc   :  { %v62_v24 = vadd.f32 %v58_v18, %v38_v22 }
   0xd   :  { %v63_v25 = vadd.f32 %v59_v21, %v39_v23 }
   0xe   :  { %v64_v26 = vmax.f32 %v62_v24, 0.0 }
   0xf   :  { %v65_v27 = vmax.f32 %v63_v25, 0.0 }
  0x10   :  { %66 = vst [vmem:[%s113_s3] sm:$0xff] %v64_v26 }
  0x11   :  { %67 = vst [vmem:[%s113_s3 + $0x8] sm:$0xff] %v65_v27 }

// kernel: _lambda_.34
= control target key start
LH: loop header
LB: loop body
LE: loop exit
PB: predicated region body
PF: predicated region fallthrough
CT: control target
= control target key end

     0   :  { %s283_s6 = smov 0   ;;  %s303_s0 = inlined_call_operand.vmem [shape: f32[2,8,4,32], index: 0, kind: input, shape index: {}]   ;;  %s304_s1 = inlined_call_operand.vmem [shape: f32[2,4,4,16], index: 1, kind: output, shape index: {}]  }
   0x1 LB: > { %s216_s7 = sadd.s32 4294967295, %s265_s6   ;;  %p220_p0 = scmp.ge.s32.totalorder %s265_s6, 1  ;;  %s265_s6 = sphi %s283_s6, %s11_s6  }
   0x2   : > { %p87_p1 = scmp.lt.s32.totalorder %s265_s6, 3 }
   0x4   : > { %p88_p2 = pnand %p220_p0, %p87_p1 }
   0x5   : > { %p107_p3 = scmp.lt.s32.totalorder (!%p88_p2), %s216_s7, 1  ;;  %s267_s16 = smov (!%p88_p2), 0  }
   0x6   : > { %91 = sbr.rel (%p88_p2) target bundleno = 371 (0x173), region = 24 }
   0xd   : > { %s306_s7 = smov (!%p107_p3, %s216_s7), 1 }
   0xe   : > { %s233_s8 = sshll.u32 %s306_s7, 5  ;;  %s234_s9 = sshll.u32 %s306_s7, 4 }
   0xf   : > { %s294_s12 = scalar_lea.vmem %s303_s0, %s233_s8  ;;  %s116_s15 = scalar_lea.vmem %s304_s1, %s234_s9 }
  0x10 LB: >> { %s235_s17 = sshll.u32 %s269_s16, 3  ;;  %s271_s19 = smov 32   ;;  %vm132_vm0 = vcmask 1047808   ;;  %vm146_vm1 = vcmask 125952   ;;  %s269_s16 = sphi %s267_s16, %s122_s16  }
  0x11   : >> { %s125_s18 = scalar_lea.vmem %s294_s12, %s235_s17  ;;  %s272_s20 = smov 112  }
  0x12   : >> { %v126_v0 = vld [vmem:[%s125_s18] sm:$0xf]  ;;  %v229_v1 = vld [vmem:[%s125_s18 + $0x4] sm:$0xf]  ;;  %s230_s21 = sshll.u32 %s269_s16, 2  ;;  %s122_s16 = sadd.s32 1, %s269_s16  }
  0x13   : >> { %v131_v2 = vmax.f32 %v126_v0, %v229_v1  ;;  %s145_s22 = scalar_lea.vmem %s116_s15, %s230_s21  ;;  %p119_p4 = scmp.ge.s32.totalorder %s122_s16, 4  }
  0x15   : >> { %133 = vrot.lane.b32.xlu0 %v131_v2, %s271_s19 }
  0x87   : >> { %v134_v3 = vpop.permute.xlu0 %133 }
  0x88   : >> { %v135_v4 = vsel %vm132_vm0, %v134_v3, %v131_v2 }
  0x89   : >> { %136 = vrot.lane.b32.xlu0 %v135_v4, %s271_s19 }
  0xfb   : >> { %v137_v5 = vpop.permute.xlu0 %136 }
  0xfc   : >> { %v138_v6 = vsel %vm132_vm0, %v137_v5, %v131_v2 }
  0xfd   : >> { %140 = vrot.lane.b32.xlu1 %v138_v6, %s272_s20 }
 0x16c   : > { %121 = sbr.rel (!%p119_p4) target bundleno = 16 (0x10), region = 64 }
 0x16f   : >> { %v141_v7 = vpop.permute.xlu1 %140 }
 0x170   : >> { %v143_v8 = vmax.f32 %v131_v2, %v141_v7 }
 0x172   : >> { %147 = vst.msk [vmem:[%s145_s22] sm:$0xf] %vm146_vm1, %v143_v8 }
 0x173 PF: > { %s11_s6 = sadd.s32 1, %s265_s6  }
 0x174   : > { %p8_p5 = scmp.ge.s32.totalorder %s11_s6, 4  }
 0x176   :  { %10 = sbr.rel (!%p8_p5) target bundleno = 1 (0x1), region = 75 }

// kernel: _lambda_.36
= control target key start
LH: loop header
LB: loop body
LE: loop exit
PB: predicated region body
PF: predicated region fallthrough
CT: control target
= control target key end

     0   :  { %v17_v0 = vlaneseq  ;;  %v96_v1 = vmov 1983009808   ;;  %s129_s1 = inlined_call_operand.vmem [shape: f32[1,512], index: 1, kind: input, shape index: {}]   ;;  %s130_s2 = inlined_call_operand.vmem [shape: f32[1,512], index: 2, kind: input, shape index: {}]   ;;  %s131_s0 = inlined_call_operand.vmem [shape: f32[2,512], index: 0, kind: input, shape index: {}]   ;;  %s132_s3 = inlined_call_operand.vmem [shape: f32[2,512], index: 3, kind: output, shape index: {}]  }
   0x1   :  { %v36_v2 = vunpack.c.l.s4 %v96_v1  ;;  %v15_v4 = vld [vmem:[%s129_s1] sm:$0xf] }
   0x2   :  { %v18_v3 = vshrl.u32 %v17_v0, 7  ;;  %v52_v10 = vld [vmem:[%s130_s2] sm:$0xf] }
   0x3   :  { %v37_v5 = vunpack.c.0.s8 %v36_v2  ;;  %v14_v26 = vld [vmem:[%s131_s0] sm:$0xff] }
   0x4   :  { %v19_v6 = vsub.s32 0, %v18_v3  ;;  %v23_v7 = vsub.s32 1, %v18_v3  ;;  %v27_v8 = vsub.s32 2, %v18_v3  ;;  %v31_v9 = vsub.s32 3, %v18_v3 }
   0x5   :  { %v40_v11 = vsub.s32 %v37_v5, %v18_v3 }
   0x6   :  { %v20_v12 = vrot.slane %v15_v4, %v19_v6  ;;  %v24_v13 = vrot.slane %v15_v4, %v23_v7  ;;  %v28_v14 = vrot.slane %v15_v4, %v27_v8  ;;  %v32_v15 = vrot.slane %v15_v4, %v31_v9 }
   0x7   :  { %v57_v16 = vrot.slane %v52_v10, %v19_v6  ;;  %v61_v17 = vrot.slane %v52_v10, %v23_v7  ;;  %v65_v18 = vrot.slane %v52_v10, %v27_v8  ;;  %v69_v19 = vrot.slane %v52_v10, %v31_v9 }
   0x8   :  { %v33_v20 = vcombine.low %v20_v12, %v24_v13  ;;  %v34_v21 = vcombine.low %v28_v14, %v32_v15 }
   0x9   :  { %v70_v22 = vcombine.low %v57_v16, %v61_v17  ;;  %v71_v23 = vcombine.low %v65_v18, %v69_v19 }
   0xa   :  { %v41_v24 = vrot.slane %v33_v20, %v40_v11  ;;  %v48_v25 = vrot.slane %v34_v21, %v40_v11 }
   0xb   :  { %v78_v27 = vrot.slane %v70_v22, %v40_v11  ;;  %v85_v28 = vrot.slane %v71_v23, %v40_v11 }
   0xc   :  { %v49_v29 = vcombine.low %v41_v24, %v48_v25 }
   0xd   :  { %v86_v30 = vcombine.low %v78_v27, %v85_v28 }
   0xe   :  { %v51_v31 = vmul.f32 %v49_v29, %v14_v26 }
  0x10   :  { %v88_v32 = vadd.f32 %v86_v30, %v51_v31 }
  0x12   :  { %v89_v33 = vmax.f32 %v88_v32, 0.0 }
  0x14   :  { %90 = vst [vmem:[%s132_s3] sm:$0xff] %v89_v33 }

// kernel: _lambda_.32
= control target key start
LH: loop header
LB: loop body
LE: loop exit
PB: predicated region body
PF: predicated region fallthrough
CT: control target
= control target key end

     0   :  { %s1090_s18 = smov 0   ;;  %s1303_s0 = inlined_call_operand.vmem [shape: f32[2,10,10,16], index: 0, kind: input, shape index: {}]   ;;  %s1304_s1 = inlined_call_operand.vmem [shape: bf16[9,16,16], index: 1, kind: input, shape index: {}]   ;;  %s1305_s2 = inlined_call_operand.vmem [shape: f32[1,16], index: 2, kind: input, shape index: {}]   ;;  %s1306_s3 = inlined_call_operand.vmem [shape: f32[2,8,8,16], index: 3, kind: output, shape index: {0}]   ;;  %s1307_s4 = inlined_call_operand.vmem [shape: f32[1,16], index: 4, kind: output, shape index: {1}]   ;;  %s1308_s5 = inlined_call_operand.vmem [shape: f32[1,16], index: 5, kind: output, shape index: {2}]  }
   0x1 LB: > { %s860_s19 = sadd.s32 4294967295, %s1043_s18   ;;  %p864_p0 = scmp.ge.s32.totalorder %s1043_s18, 1  ;;  %s1043_s18 = sphi %s1090_s18, %s16_s18  }
   0x2   : > { %p182_p1 = scmp.lt.s32.totalorder %s1043_s18, 3 }
   0x4   : > { %p183_p2 = pnand %p864_p0, %p182_p1 }
   0x5   : > { %p210_p3 = scmp.lt.s32.totalorder (!%p183_p2), %s860_s19, 1  ;;  %p868_p4 = scmp.ne.s32.totalorder (!%p183_p2), %s860_s19, 0 }
   0x6   : > { %186 = sbr.rel (%p183_p2) target bundleno = 301 (0x12d), region = 32 }
   0xd   : > { %s211_s20 = scalar_select %p210_p3, %s860_s19, 1 }
   0xe   : > { %224 = sbr.rel (%p868_p4) target bundleno = 21 (0x15), region = 36  ;;  %vm225_vm0 = vcmask (!%p868_p4), 122880   ;;  %v1057_v0 = vmov (!%p868_p4), 0.0  }
   0xf   : > { %s989_s21 = smul.u32 160, %s211_s20  ;;  %s916_s22 = sshll.u32 %s211_s20, 6  ;;  %226 = vst.msk [vmem:[%s1307_s4] sm:$0x1] (!%p868_p4), %vm225_vm0, %v1057_v0  ;;  %227 = vst.msk [vmem:[%s1308_s5] sm:$0x1] (!%p868_p4), %vm225_vm0, %v1057_v0 }
  0x10   : > { %s1101_s25 = scalar_lea.vmem %s1306_s3, %s916_s22 }
  0x11   : > { %s1106_s28 = scalar_lea.vmem %s1303_s0, %s989_s21 }
  0x15 PF: > { %v1117_v1 = vld [vmem:[%s1305_s2] ss:$0 sm:$0xff]  ;;  %v1127_v3 = vld [vmem:[%s1304_s1 + $0x4] sm:$0xf]  ;;  %v1132_v4 = vld [vmem:[%s1304_s1 + $0x8] sm:$0xf] }
  0x16   : > { %v1122_v2 = vld [vmem:[%s1304_s1] sm:$0xf]  ;;  %v1137_v5 = vld [vmem:[%s1304_s1 + $0xc] sm:$0xf]  ;;  %v1142_v6 = vld [vmem:[%s1304_s1 + $0x10] sm:$0xf] }
  0x17   : > { %v1147_v7 = vld [vmem:[%s1304_s1 + $0x14] sm:$0xf]  ;;  %v1152_v8 = vld [vmem:[%s1304_s1 + $0x18] sm:$0xf]  ;;  %v1157_v9 = vld [vmem:[%s1304_s1 + $0x1c] sm:$0xf] }
  0x18   : > { %v1162_v10 = vld [vmem:[%s1304_s1 + $0x20] sm:$0xf]  ;;  %v1167_v11 = vld [vmem:[%s1304_s1 + $0x24] sm:$0xf]  ;;  %v1172_v12 = vld [vmem:[%s1304_s1 + $0x28] sm:$0xf] }
  0x19   : > { %v1177_v13 = vld [vmem:[%s1304_s1 + $0x2c] sm:$0xf]  ;;  %v1182_v14 = vld [vmem:[%s1304_s1 + $0x30] sm:$0xf]  ;;  %v1187_v15 = vld [vmem:[%s1304_s1 + $0x34] sm:$0xf] }
  0x1a   : > { %v1192_v16 = vld [vmem:[%s1304_s1 + $0x38] sm:$0xf]  ;;  %v1197_v17 = vld [vmem:[%s1304_s1 + $0x3c] sm:$0xf]  ;;  %v1202_v18 = vld [vmem:[%s1304_s1 + $0x40] sm:$0xf] }
  0x1b   : > { %v1207_v19 = vld [vmem:[%s1304_s1 + $0x44] sm:$0xf]  ;;  %v1209_v20 = vmov 0.0   ;;  %v1211_v21 = vmov 0.0   ;;  %s1213_s26 = smov 0  }
  0x1c LB: >> { %v886_v22 = vcombine.low %v1132_v4, %v1137_v5  ;;  %v888_v23 = vcombine.low %v1122_v2, %v1127_v3  ;;  %v1058_v24 = vmov 0.0   ;;  %s885_s27 = sshll.u32 %s1055_s26, 4  ;;  %vm1059_vm1 = vmmov 0   ;;  %s913_s30 = sshll.u32 %s1055_s26, 3  ;;  %s1055_s26 = sphi %s1213_s26, %s260_s26   ;;  %v1051_v21 = vphi %v1211_v21, %v1310_v21   ;;  %v1047_v20 = vphi %v1209_v20, %v1309_v20  }
  0x1d   : >> { %935 = vmatprep.subr.bf16.mxu0 %v1058_v24  ;;  %941 = vmatprep.subr.bf16.mxu1 %v1058_v24  ;;  %s1232_s29 = scalar_lea.vmem %s1106_s28, %s885_s27  ;;  %vm275_vm2 = vcmask 130048   ;;  %v890_v27 = vcombine.low %v1142_v6, %v1147_v7  ;;  %v894_v28 = vcombine.low %v1152_v8, %v1157_v9  ;;  %v897_v35 = vcombine.low %v1162_v10, %v1167_v11  ;;  %s746_s6 = scalar_lea.vmem %s1101_s25, %s913_s30 }
  0x1e   : >> { %936 = vmatpush3.bf16.msra.mxu0 %v886_v22  ;;  %942 = vmatpush3.bf16.msra.mxu1 %v888_v23  ;;  %v267_v25 = vld [vmem:[%s1232_s29 + $0x1] sm:$0xff]  ;;  %v893_v32 = vld [vmem:[%s1232_s29 + $0x10] sm:$0xff]  ;;  %v900_v36 = vcombine.low %v1172_v12, %v1177_v13  ;;  %v904_v41 = vcombine.low %v1182_v14, %v1187_v15  ;;  %v907_v42 = vcombine.low %v1192_v16, %v1197_v17  ;;  %s260_s26 = sadd.s32 1, %s1055_s26  }
  0x1f   : >> { %937 = vmatprep.mubr.msk.bf16.mxu0 %vm1059_vm1, %v1058_v24  ;;  %943 = vmatprep.mubr.msk.bf16.mxu1 %vm1059_vm1, %v1058_v24  ;;  %v265_v26 = vld [vmem:[%s1232_s29] sm:$0xff]  ;;  %v268_v29 = vpack.c.bf16 %v267_v25, %v267_v25  ;;  %v424_v34 = vpack.c.bf16 %v893_v32, %v893_v32  ;;  %v896_v37 = vld [vmem:[%s1232_s29 + $0x11] sm:$0xff]  ;;  %v910_v47 = vcombine.low %v1202_v18, %v1207_v19  ;;  %p257_p5 = scmp.ge.s32.totalorder %s260_s26, 8  }
  0x20   : >> { %947 = vmatprep.subr.bf16.mxu0 %v1058_v24  ;;  %953 = vmatprep.subr.bf16.mxu1 %v1058_v24  ;;  %v266_v30 = vpack.c.bf16 %v265_v26, %v265_v26  ;;  %v368_v31 = vld [vmem:[%s1232_s29 + $0x2] sm:$0xff]  ;;  %v899_v38 = vld [vmem:[%s1232_s29 + $0x12] sm:$0xff]  ;;  %v476_v39 = vpack.c.bf16 %v896_v37, %v896_v37  ;;  %vm767_vm3 = vcmask (%p257_p5), 122880  }
  0x21   : >> { %938 = vmatmul.mubr.msk.bf16.vlgmr.msra.gmra.mrb[0].mxu0 %vm275_vm2, %v268_v29  ;;  %v369_v33 = vpack.c.bf16 %v368_v31, %v368_v31  ;;  %v528_v40 = vpack.c.bf16 %v899_v38, %v899_v38  ;;  %v903_v43 = vld [vmem:[%s1232_s29 + $0x20] sm:$0xff] }
  0x22   : >> { %944 = vmatmul.mubr.msk.bf16.vlgmr.msra.gmra.mrb[0].mxu1 %vm275_vm2, %v266_v30  ;;  %948 = vmatpush3.bf16.msra.mxu0 %v890_v27  ;;  %v906_v44 = vld [vmem:[%s1232_s29 + $0x21] sm:$0xff]  ;;  %v583_v45 = vpack.c.bf16 %v903_v43, %v903_v43 }
  0x23   : >> { %954 = vmatpush3.bf16.msra.mxu1 %v894_v28  ;;  %949 = vmatprep.mubr.msk.bf16.mxu0 %vm1059_vm1, %v1058_v24  ;;  %v635_v46 = vpack.c.bf16 %v906_v44, %v906_v44  ;;  %v909_v48 = vld [vmem:[%s1232_s29 + $0x22] sm:$0xff] }
  0x24   : >> { %959 = vmatprep.subr.bf16.mxu0 %v1058_v24  ;;  %955 = vmatprep.mubr.msk.bf16.mxu1 %vm1059_vm1, %v1058_v24  ;;  %v687_v49 = vpack.c.bf16 %v909_v48, %v909_v48 }
  0x25   : >> { %965 = vmatprep.subr.bf16.mxu1 %v1058_v24 }
  0x29   : >> { %950 = vmatmul.mubr.msk.bf16.vlgmr.msra.gmra.mrb[4].mxu0 %vm275_vm2, %v369_v33 }
  0x2a   : >> { %956 = vmatmul.mubr.msk.bf16.vlgmr.msra.gmra.mrb[4].mxu1 %vm275_vm2, %v424_v34  ;;  %960 = vmatpush3.bf16.msra.mxu0 %v897_v35 }
  0x2b   : >> { %966 = vmatpush3.bf16.msra.mxu1 %v900_v36  ;;  %961 = vmatprep.mubr.msk.bf16.mxu0 %vm1059_vm1, %v1058_v24 }
  0x2c   : >> { %971 = vmatprep.subr.bf16.mxu0 %v1058_v24  ;;  %967 = vmatprep.mubr.msk.bf16.mxu1 %vm1059_vm1, %v1058_v24 }
  0x2d   : >> { %977 = vmatprep.subr.bf16.mxu1 %v1058_v24 }
  0x31   : >> { %962 = vmatmul.mubr.msk.bf16.vlgmr.msra.gmra.mrb[8].mxu0 %vm275_vm2, %v476_v39 }
  0x32   : >> { %968 = vmatmul.mubr.msk.bf16.vlgmr.msra.gmra.mrb[8].mxu1 %vm275_vm2, %v528_v40  ;;  %972 = vmatpush3.bf16.msra.mxu0 %v904_v41 }
  0x33   : >> { %978 = vmatpush3.bf16.msra.mxu1 %v907_v42  ;;  %973 = vmatprep.mubr.msk.bf16.mxu0 %vm1059_vm1, %v1058_v24 }
  0x34   : >> { %983 = vmatprep.subr.bf16.mxu0 %v1058_v24  ;;  %979 = vmatprep.mubr.msk.bf16.mxu1 %vm1059_vm1, %v1058_v24 }
  0x39   : >> { %974 = vmatmul.mubr.msk.bf16.vlgmr.msra.gmra.mrb[12].mxu0 %vm275_vm2, %v583_v45 }
  0x3a   : >> { %980 = vmatmul.mubr.msk.bf16.vlgmr.msra.gmra.mrb[12].mxu1 %vm275_vm2, %v635_v46  ;;  %984 = vmatpush3.bf16.msra.mxu0 %v910_v47 }
  0x3b   : >> { %985 = vmatprep.mubr.msk.bf16.mxu0 %vm1059_vm1, %v1058_v24 }
  0x41   : >> { %986 = vmatmul.mubr.msk.bf16.vlgmr.msra.gmra.mrb[16].mxu0 %vm275_vm2, %v687_v49 }
  0xf4   : >> { %v313_v50 = vpop.f32.mrb[0].mxu0 }
  0xf5   : >> { %v362_v51 = vpop.f32.mrb[0].mxu1  ;;  %v939_v53 = vpop.f32.mrb[1].mxu0 }
  0xf6   : >> { %v363_v52 = vadd.f32 %v362_v51, %v313_v50  ;;  %v945_v54 = vpop.f32.mrb[1].mxu1  ;;  %v316_v55 = vpop.f32.mrb[2].mxu0 }
  0xf7   : >> { %v365_v56 = vpop.f32.mrb[2].mxu1  ;;  %v940_v57 = vpop.f32.mrb[3].mxu0 }
  0xf8   : >> { %v946_v58 = vpop.f32.mrb[3].mxu1 }
  0xfc   : >> { %v413_v59 = vpop.f32.mrb[4].mxu0 }
  0xfd   : >> { %v468_v60 = vpop.f32.mrb[4].mxu1  ;;  %v419_v61 = vadd.f32 %v413_v59, %v363_v52  ;;  %v951_v62 = vpop.f32.mrb[5].mxu0 }
  0xfe   : >> { %v957_v63 = vpop.f32.mrb[5].mxu1  ;;  %v416_v0 = vpop.f32.mrb[6].mxu0 }
  0xff   : >> { %v471_v22 = vpop.f32.mrb[6].mxu1  ;;  %v474_v23 = vadd.f32 %v468_v60, %v419_v61  ;;  %v952_v24 = vpop.f32.mrb[7].mxu0 }
 0x100   : >> { %v958_v25 = vpop.f32.mrb[7].mxu1 }
 0x104   : >> { %v520_v26 = vpop.f32.mrb[8].mxu0 }
 0x105   : >> { %v572_v27 = vpop.f32.mrb[8].mxu1  ;;  %v526_v28 = vadd.f32 %v520_v26, %v474_v23  ;;  %v963_v29 = vpop.f32.mrb[9].mxu0  ;;  %v765_v26 = vld [vmem:[%s1307_s4] sm:$0x1] (%p257_p5) }
 0x106   : >> { %v969_v30 = vpop.f32.mrb[9].mxu1  ;;  %v523_v31 = vpop.f32.mrb[10].mxu0 }
 0x107   : >> { %v575_v32 = vpop.f32.mrb[10].mxu1  ;;  %v578_v33 = vadd.f32 %v572_v27, %v526_v28  ;;  %v964_v34 = vpop.f32.mrb[11].mxu0 }
 0x108   : >> { %v970_v35 = vpop.f32.mrb[11].mxu1 }
 0x10c   : >> { %v627_v36 = vpop.f32.mrb[12].mxu0 }
 0x10d   : >> { %v679_v37 = vpop.f32.mrb[12].mxu1  ;;  %v633_v38 = vadd.f32 %v627_v36, %v578_v33  ;;  %v975_v39 = vpop.f32.mrb[13].mxu0 }
 0x10e   : >> { %v981_v40 = vpop.f32.mrb[13].mxu1  ;;  %v630_v41 = vpop.f32.mrb[14].mxu0 }
 0x10f   : >> { %v682_v42 = vpop.f32.mrb[14].mxu1  ;;  %v685_v43 = vadd.f32 %v679_v37, %v633_v38  ;;  %v976_v44 = vpop.f32.mrb[15].mxu0 }
 0x110   : >> { %v982_v45 = vpop.f32.mrb[15].mxu1 }
 0x114   : >> { %v731_v46 = vpop.f32.mrb[16].mxu0 }
 0x115   : >> { %v737_v47 = vadd.f32 %v731_v46, %v685_v43  ;;  %v987_v48 = vpop.f32.mrb[17].mxu0 }
 0x116   : >> { %v734_v49 = vpop.f32.mrb[18].mxu0 }
 0x117   : >> { %v744_v50 = vadd.f32 %v1117_v1, %v737_v47  ;;  %v988_v51 = vpop.f32.mrb[19].mxu0 }
 0x119   : >> { %747 = vst.msk [vmem:[%s746_s6] sm:$0xff] %vm275_vm2, %v744_v50  ;;  %v748_v52 = vsel %vm275_vm2, %v744_v50, 0.0  ;;  %v756_v53 = vmul.f32 %v744_v50, %v744_v50 }
 0x11a   : >> { %v749_v54 = vrot.slane %v748_v52, 4 }
 0x11b   : >> { %v757_v55 = vsel %vm275_vm2, %v756_v53, 0.0 }
 0x11c   : >> { %v750_v56 = vadd.f32 %v749_v54, %v748_v52  ;;  %v758_v57 = vrot.slane %v757_v55, 4 }
 0x11e   : >> { %v751_v58 = vrot.slane %v750_v56, 2  ;;  %v759_v59 = vadd.f32 %v758_v57, %v757_v55 }
 0x120   : >> { %v752_v60 = vadd.f32 %v751_v58, %v750_v56  ;;  %v760_v61 = vrot.slane %v759_v59, 2 }
 0x122   : >> { %v753_v62 = vrot.slane %v752_v60, 1  ;;  %v761_v63 = vadd.f32 %v760_v61, %v759_v59 }
 0x124   : >> { %v754_v0 = vadd.f32 %v753_v62, %v752_v60  ;;  %v762_v22 = vrot.slane %v761_v63, 1  ;;  %259 = sbr.rel (!%p257_p5) target bundleno = 28 (0x1c), region = 101 }
 0x126   : >> { %v755_v23 = vadd.f32 %v1051_v21, %v754_v0   ;;  %v763_v24 = vadd.f32 %v762_v22, %v761_v63 }
 0x128   : >> { %v764_v25 = vadd.f32 %v1047_v20, %v763_v24   ;;  %v1310_v21 = vmov %v755_v23  ;;  %v766_v27 = vadd.f32 (%p257_p5), %v765_v26, %v755_v23 }
 0x129   : > { %v769_v21 = vld [vmem:[%s1308_s5] sm:$0x1] (%p257_p5) }
 0x12a   : >> { %v1309_v20 = vmov %v764_v25  ;;  %v770_v28 = vadd.f32 (%p257_p5), %v769_v21, %v764_v25  ;;  %768 = vst.msk [vmem:[%s1307_s4] sm:$0x1] (%p257_p5), %vm767_vm3, %v766_v27 }
 0x12c   : > { %771 = vst.msk [vmem:[%s1308_s5] sm:$0x1] %vm767_vm3, %v770_v28 }
 0x12d PF: > { %s16_s18 = sadd.s32 1, %s1043_s18  }
 0x12e   : > { %p13_p6 = scmp.ge.s32.totalorder %s16_s18, 4  }
 0x130   :  { %15 = sbr.rel (!%p13_p6) target bundleno = 1 (0x1), region = 112 }

// kernel: _lambda_.35
= control target key start
LH: loop header
LB: loop body
LE: loop exit
PB: predicated region body
PF: predicated region fallthrough
CT: control target
= control target key end

     0   :  { %s1091_s18 = smov 0   ;;  %s1301_s0 = inlined_call_operand.vmem [shape: f32[2,6,6,16], index: 0, kind: input, shape index: {}]   ;;  %s1302_s1 = inlined_call_operand.vmem [shape: bf16[9,16,32], index: 1, kind: input, shape index: {}]   ;;  %s1303_s2 = inlined_call_operand.vmem [shape: f32[1,32], index: 2, kind: input, shape index: {}]   ;;  %s1304_s3 = inlined_call_operand.vmem [shape: f32[2,4,4,32], index: 3, kind: output, shape index: {0}]   ;;  %s1305_s4 = inlined_call_operand.vmem [shape: f32[1,32], index: 4, kind: output, shape index: {1}]   ;;  %s1306_s5 = inlined_call_operand.vmem [shape: f32[1,32], index: 5, kind: output, shape index: {2}]  }
   0x1 LB: > { %s861_s19 = sadd.s32 4294967295, %s1044_s18   ;;  %p865_p0 = scmp.ge.s32.totalorder %s1044_s18, 1  ;;  %s1044_s18 = sphi %s1091_s18, %s16_s18  }
   0x2   : > { %p182_p1 = scmp.lt.s32.totalorder %s1044_s18, 3 }
   0x4   : > { %p183_p2 = pnand %p865_p0, %p182_p1 }
   0x5   : > { %p210_p3 = scmp.lt.s32.totalorder (!%p183_p2), %s861_s19, 1  ;;  %p869_p4 = scmp.ne.s32.totalorder (!%p183_p2), %s861_s19, 0 }
   0x6   : > { %186 = sbr.rel (%p183_p2) target bundleno = 301 (0x12d), region = 32 }
   0xd   : > { %s211_s20 = scalar_select %p210_p3, %s861_s19, 1 }
   0xe   : > { %224 = sbr.rel (%p869_p4) target bundleno = 21 (0x15), region = 36  ;;  %vm225_vm0 = vcmask (!%p869_p4), 253952   ;;  %v1058_v0 = vmov (!%p869_p4), 0.0  }
   0xf   : > { %s990_s21 = smul.u32 48, %s211_s20  ;;  %s917_s22 = sshll.u32 %s211_s20, 4  ;;  %226 = vst.msk [vmem:[%s1305_s4] sm:$0x1] (!%p869_p4), %vm225_vm0, %v1058_v0  ;;  %227 = vst.msk [vmem:[%s1306_s5] sm:$0x1] (!%p869_p4), %vm225_vm0, %v1058_v0 }
  0x10   : > { %s1102_s25 = scalar_lea.vmem %s1304_s3, %s917_s22 }
  0x11   : > { %s1107_s28 = scalar_lea.vmem %s1301_s0, %s990_s21 }
  0x15 PF: > { %v1118_v1 = vld [vmem:[%s1303_s2] ss:$0 sm:$0xff]  ;;  %v1128_v3 = vld [vmem:[%s1302_s1 + $0x4] sm:$0xf]  ;;  %v1133_v4 = vld [vmem:[%s1302_s1 + $0x8] sm:$0xf] }
  0x16   : > { %v1123_v2 = vld [vmem:[%s1302_s1] sm:$0xf]  ;;  %v1138_v5 = vld [vmem:[%s1302_s1 + $0xc] sm:$0xf]  ;;  %v1143_v6 = vld [vmem:[%s1302_s1 + $0x10] sm:$0xf] }
  0x17   : > { %v1148_v7 = vld [vmem:[%s1302_s1 + $0x14] sm:$0xf]  ;;  %v1153_v8 = vld [vmem:[%s1302_s1 + $0x18] sm:$0xf]  ;;  %v1158_v9 = vld [vmem:[%s1302_s1 + $0x1c] sm:$0xf] }
  0x18   : > { %v1163_v10 = vld [vmem:[%s1302_s1 + $0x20] sm:$0xf]  ;;  %v1168_v11 = vld [vmem:[%s1302_s1 + $0x24] sm:$0xf]  ;;  %v1173_v12 = vld [vmem:[%s1302_s1 + $0x28] sm:$0xf] }
  0x19   : > { %v1178_v13 = vld [vmem:[%s1302_s1 + $0x2c] sm:$0xf]  ;;  %v1183_v14 = vld [vmem:[%s1302_s1 + $0x30] sm:$0xf]  ;;  %v1188_v15 = vld [vmem:[%s1302_s1 + $0x34] sm:$0xf] }
  0x1a   : > { %v1193_v16 = vld [vmem:[%s1302_s1 + $0x38] sm:$0xf]  ;;  %v1198_v17 = vld [vmem:[%s1302_s1 + $0x3c] sm:$0xf]  ;;  %v1203_v18 = vld [vmem:[%s1302_s1 + $0x40] sm:$0xf] }
  0x1b   : > { %v1208_v19 = vld [vmem:[%s1302_s1 + $0x44] sm:$0xf]  ;;  %v1210_v20 = vmov 0.0   ;;  %v1212_v21 = vmov 0.0   ;;  %s1214_s26 = smov 0  }
  0x1c LB: >> { %v887_v22 = vcombine.low %v1133_v4, %v1138_v5  ;;  %v889_v23 = vcombine.low %v1123_v2, %v1128_v3  ;;  %v1059_v24 = vmov 0.0   ;;  %s886_s27 = sshll.u32 %s1056_s26, 3  ;;  %vm1060_vm1 = vmmov 0   ;;  %s914_s30 = sshll.u32 %s1056_s26, 2  ;;  %s1056_s26 = sphi %s1214_s26, %s260_s26   ;;  %v1052_v21 = vphi %v1212_v21, %v1308_v21   ;;  %v1048_v20 = vphi %v1210_v20, %v1307_v20  }
  0x1d   : >> { %936 = vmatprep.subr.bf16.mxu0 %v1059_v24  ;;  %942 = vmatprep.subr.bf16.mxu1 %v1059_v24  ;;  %s1233_s29 = scalar_lea.vmem %s1107_s28, %s886_s27  ;;  %vm275_vm2 = vcmask 130048   ;;  %v891_v27 = vcombine.low %v1143_v6, %v1148_v7  ;;  %v895_v28 = vcombine.low %v1153_v8, %v1158_v9  ;;  %v898_v35 = vcombine.low %v1163_v10, %v1168_v11  ;;  %s746_s6 = scalar_lea.vmem %s1102_s25, %s914_s30 }
  0x1e   : >> { %937 = vmatpush3.bf16.msra.mxu0 %v887_v22  ;;  %943 = vmatpush3.bf16.msra.mxu1 %v889_v23  ;;  %v267_v25 = vld [vmem:[%s1233_s29 + $0x1] sm:$0xf]  ;;  %v894_v32 = vld [vmem:[%s1233_s29 + $0x8] sm:$0xf]  ;;  %v901_v36 = vcombine.low %v1173_v12, %v1178_v13  ;;  %v905_v41 = vcombine.low %v1183_v14, %v1188_v15  ;;  %v908_v42 = vcombine.low %v1193_v16, %v1198_v17  ;;  %v904_v43 = vld [vmem:[%s1233_s29 + $0x10] sm:$0xf] }
  0x1f   : >> { %938 = vmatprep.mubr.msk.bf16.mxu0 %vm1060_vm1, %v1059_v24  ;;  %944 = vmatprep.mubr.msk.bf16.mxu1 %vm1060_vm1, %v1059_v24  ;;  %v265_v26 = vld [vmem:[%s1233_s29] sm:$0xf]  ;;  %v268_v29 = vpack.c.bf16 %v267_v25, %v267_v25  ;;  %v424_v34 = vpack.c.bf16 %v894_v32, %v894_v32  ;;  %v897_v37 = vld [vmem:[%s1233_s29 + $0x9] sm:$0xf]  ;;  %v907_v44 = vld [vmem:[%s1233_s29 + $0x11] sm:$0xf]  ;;  %v583_v45 = vpack.c.bf16 %v904_v43, %v904_v43 }
  0x20   : >> { %948 = vmatprep.subr.bf16.mxu0 %v1059_v24  ;;  %954 = vmatprep.subr.bf16.mxu1 %v1059_v24  ;;  %v266_v30 = vpack.c.bf16 %v265_v26, %v265_v26  ;;  %v368_v31 = vld [vmem:[%s1233_s29 + $0x2] sm:$0xf]  ;;  %v900_v38 = vld [vmem:[%s1233_s29 + $0xa] sm:$0xf]  ;;  %v476_v39 = vpack.c.bf16 %v897_v37, %v897_v37  ;;  %v635_v46 = vpack.c.bf16 %v907_v44, %v907_v44  ;;  %v910_v48 = vld [vmem:[%s1233_s29 + $0x12] sm:$0xf] }
  0x21   : >> { %939 = vmatmul.mubr.msk.bf16.vlgmr.msra.gmra.mrb[0].mxu0 %vm275_vm2, %v268_v29  ;;  %v369_v33 = vpack.c.bf16 %v368_v31, %v368_v31  ;;  %v528_v40 = vpack.c.bf16 %v900_v38, %v900_v38  ;;  %v911_v47 = vcombine.low %v1203_v18, %v1208_v19  ;;  %v687_v49 = vpack.c.bf16 %v910_v48, %v910_v48  ;;  %s260_s26 = sadd.s32 1, %s1056_s26  }
  0x22   : >> { %945 = vmatmul.mubr.msk.bf16.vlgmr.msra.gmra.mrb[0].mxu1 %vm275_vm2, %v266_v30  ;;  %949 = vmatpush3.bf16.msra.mxu0 %v891_v27  ;;  %vm747_vm3 = vcmask 257024   ;;  %p257_p5 = scmp.ge.s32.totalorder %s260_s26, 4  }
  0x23   : >> { %955 = vmatpush3.bf16.msra.mxu1 %v895_v28  ;;  %950 = vmatprep.mubr.msk.bf16.mxu0 %vm1060_vm1, %v1059_v24  ;;  %vm768_vm4 = vcmask (%p257_p5), 253952  }
  0x24   : >> { %960 = vmatprep.subr.bf16.mxu0 %v1059_v24  ;;  %956 = vmatprep.mubr.msk.bf16.mxu1 %vm1060_vm1, %v1059_v24 }
  0x25   : >> { %966 = vmatprep.subr.bf16.mxu1 %v1059_v24 }
  0x29   : >> { %951 = vmatmul.mubr.msk.bf16.vlgmr.msra.gmra.mrb[4].mxu0 %vm275_vm2, %v369_v33 }
  0x2a   : >> { %957 = vmatmul.mubr.msk.bf16.vlgmr.msra.gmra.mrb[4].mxu1 %vm275_vm2, %v424_v34  ;;  %961 = vmatpush3.bf16.msra.mxu0 %v898_v35 }
  0x2b   : >> { %967 = vmatpush3.bf16.msra.mxu1 %v901_v36  ;;  %962 = vmatprep.mubr.msk.bf16.mxu0 %vm1060_vm1, %v1059_v24 }
  0x2c   : >> { %972 = vmatprep.subr.bf16.mxu0 %v1059_v24  ;;  %968 = vmatprep.mubr.msk.bf16.mxu1 %vm1060_vm1, %v1059_v24 }
  0x2d   : >> { %978 = vmatprep.subr.bf16.mxu1 %v1059_v24 }
  0x31   : >> { %963 = vmatmul.mubr.msk.bf16.vlgmr.msra.gmra.mrb[8].mxu0 %vm275_vm2, %v476_v39 }
  0x32   : >> { %969 = vmatmul.mubr.msk.bf16.vlgmr.msra.gmra.mrb[8].mxu1 %vm275_vm2, %v528_v40  ;;  %973 = vmatpush3.bf16.msra.mxu0 %v905_v41 }
  0x33   : >> { %979 = vmatpush3.bf16.msra.mxu1 %v908_v42  ;;  %974 = vmatprep.mubr.msk.bf16.mxu0 %vm1060_vm1, %v1059_v24 }
  0x34   : >> { %984 = vmatprep.subr.bf16.mxu0 %v1059_v24  ;;  %980 = vmatprep.mubr.msk.bf16.mxu1 %vm1060_vm1, %v1059_v24 }
  0x39   : >> { %975 = vmatmul.mubr.msk.bf16.vlgmr.msra.gmra.mrb[12].mxu0 %vm275_vm2, %v583_v45 }
  0x3a   : >> { %981 = vmatmul.mubr.msk.bf16.vlgmr.msra.gmra.mrb[12].mxu1 %vm275_vm2, %v635_v46  ;;  %985 = vmatpush3.bf16.msra.mxu0 %v911_v47 }
  0x3b   : >> { %986 = vmatprep.mubr.msk.bf16.mxu0 %vm1060_vm1, %v1059_v24 }
  0x41   : >> { %987 = vmatmul.mubr.msk.bf16.vlgmr.msra.gmra.mrb[16].mxu0 %vm275_vm2, %v687_v49 }
  0xf4   : >> { %v313_v50 = vpop.f32.mrb[0].mxu0 }
  0xf5   : >> { %v362_v51 = vpop.f32.mrb[0].mxu1  ;;  %v940_v53 = vpop.f32.mrb[1].mxu0 }
  0xf6   : >> { %v363_v52 = vadd.f32 %v362_v51, %v313_v50  ;;  %v946_v54 = vpop.f32.mrb[1].mxu1  ;;  %v316_v55 = vpop.f32.mrb[2].mxu0 }
  0xf7   : >> { %v365_v56 = vpop.f32.mrb[2].mxu1  ;;  %v941_v57 = vpop.f32.mrb[3].mxu0 }
  0xf8   : >> { %v947_v58 = vpop.f32.mrb[3].mxu1 }
  0xfc   : >> { %v413_v59 = vpop.f32.mrb[4].mxu0 }
  0xfd   : >> { %v468_v60 = vpop.f32.mrb[4].mxu1  ;;  %v419_v61 = vadd.f32 %v413_v59, %v363_v52  ;;  %v952_v62 = vpop.f32.mrb[5].mxu0 }
  0xfe   : >> { %v958_v63 = vpop.f32.mrb[5].mxu1  ;;  %v416_v0 = vpop.f32.mrb[6].mxu0 }
  0xff   : >> { %v471_v22 = vpop.f32.mrb[6].mxu1  ;;  %v474_v23 = vadd.f32 %v468_v60, %v419_v61  ;;  %v953_v24 = vpop.f32.mrb[7].mxu0 }
 0x100   : >> { %v959_v25 = vpop.f32.mrb[7].mxu1 }
 0x104   : >> { %v520_v26 = vpop.f32.mrb[8].mxu0 }
 0x105   : >> { %v572_v27 = vpop.f32.mrb[8].mxu1  ;;  %v526_v28 = vadd.f32 %v520_v26, %v474_v23  ;;  %v964_v29 = vpop.f32.mrb[9].mxu0  ;;  %v766_v26 = vld [vmem:[%s1305_s4] sm:$0x1] (%p257_p5) }
 0x106   : >> { %v970_v30 = vpop.f32.mrb[9].mxu1  ;;  %v523_v31 = vpop.f32.mrb[10].mxu0 }
 0x107   : >> { %v575_v32 = vpop.f32.mrb[10].mxu1  ;;  %v578_v33 = vadd.f32 %v572_v27, %v526_v28  ;;  %v965_v34 = vpop.f32.mrb[11].mxu0 }
 0x108   : >> { %v971_v35 = vpop.f32.mrb[11].mxu1 }
 0x10c   : >> { %v627_v36 = vpop.f32.mrb[12].mxu0 }
 0x10d   : >> { %v679_v37 = vpop.f32.mrb[12].mxu1  ;;  %v633_v38 = vadd.f32 %v627_v36, %v578_v33  ;;  %v976_v39 = vpop.f32.mrb[13].mxu0 }
 0x10e   : >> { %v982_v40 = vpop.f32.mrb[13].mxu1  ;;  %v630_v41 = vpop.f32.mrb[14].mxu0 }
 0x10f   : >> { %v682_v42 = vpop.f32.mrb[14].mxu1  ;;  %v685_v43 = vadd.f32 %v679_v37, %v633_v38  ;;  %v977_v44 = vpop.f32.mrb[15].mxu0 }
 0x110   : >> { %v983_v45 = vpop.f32.mrb[15].mxu1 }
 0x114   : >> { %v731_v46 = vpop.f32.mrb[16].mxu0 }
 0x115   : >> { %v737_v47 = vadd.f32 %v731_v46, %v685_v43  ;;  %v988_v48 = vpop.f32.mrb[17].mxu0 }
 0x116   : >> { %v734_v49 = vpop.f32.mrb[18].mxu0 }
 0x117   : >> { %v744_v50 = vadd.f32 %v1118_v1, %v737_v47  ;;  %v989_v51 = vpop.f32.mrb[19].mxu0 }
 0x119   : >> { %748 = vst.msk [vmem:[%s746_s6] sm:$0xf] %vm747_vm3, %v744_v50  ;;  %v749_v52 = vsel %vm747_vm3, %v744_v50, 0.0  ;;  %v757_v53 = vmul.f32 %v744_v50, %v744_v50 }
 0x11a   : >> { %v750_v54 = vrot.slane %v749_v52, 4 }
 0x11b   : >> { %v758_v55 = vsel %vm747_vm3, %v757_v53, 0.0 }
 0x11c   : >> { %v751_v56 = vadd.f32 %v750_v54, %v749_v52  ;;  %v759_v57 = vrot.slane %v758_v55, 4 }
 0x11e   : >> { %v752_v58 = vrot.slane %v751_v56, 2  ;;  %v760_v59 = vadd.f32 %v759_v57, %v758_v55 }
 0x120   : >> { %v753_v60 = vadd.f32 %v752_v58, %v751_v56  ;;  %v761_v61 = vrot.slane %v760_v59, 2 }
 0x122   : >> { %v754_v62 = vrot.slane %v753_v60, 1  ;;  %v762_v63 = vadd.f32 %v761_v61, %v760_v59 }
 0x124   : >> { %v755_v0 = vadd.f32 %v754_v62, %v753_v60  ;;  %v763_v22 = vrot.slane %v762_v63, 1  ;;  %259 = sbr.rel (!%p257_p5) target bundleno = 28 (0x1c), region = 101 }
 0x126   : >> { %v756_v23 = vadd.f32 %v1052_v21, %v755_v0   ;;  %v764_v24 = vadd.f32 %v763_v22, %v762_v63 }
 0x128   : >> { %v765_v25 = vadd.f32 %v1048_v20, %v764_v24   ;;  %v1308_v21 = vmov %v756_v23  ;;  %v767_v27 = vadd.f32 (%p257_p5), %v766_v26, %v756_v23 }
 0x129   : > { %v770_v21 = vld [vmem:[%s1306_s5] sm:$0x1] (%p257_p5) }
 0x12a   : >> { %v1307_v20 = vmov %v765_v25  ;;  %v771_v28 = vadd.f32 (%p257_p5), %v770_v21, %v765_v25  ;;  %769 = vst.msk [vmem:[%s1305_s4] sm:$0x1] (%p257_p5), %vm768_vm4, %v767_v27 }
 0x12c   : > { %772 = vst.msk [vmem:[%s1306_s5] sm:$0x1] %vm768_vm4, %v771_v28 }
 0x12d PF: > { %s16_s18 = sadd.s32 1, %s1044_s18  }
 0x12e   : > { %p13_p6 = scmp.ge.s32.totalorder %s16_s18, 4  }
 0x130   :  { %15 = sbr.rel (!%p13_p6) target bundleno = 1 (0x1), region = 112 }

// kernel: _lambda_.39
= control target key start
LH: loop header
LB: loop body
LE: loop exit
PB: predicated region body
PF: predicated region fallthrough
CT: control target
= control target key end

     0   :  { %s486_s12 = smov 0   ;;  %s546_s0 = inlined_call_operand.vmem [shape: f32[2,4,4,32], index: 0, kind: input, shape index: {}]   ;;  %s547_s1 = inlined_call_operand.vmem [shape: bf16[2,32,32], index: 1, kind: input, shape index: {}]   ;;  %s548_s2 = inlined_call_operand.vmem [shape: f32[1,32], index: 2, kind: input, shape index: {}]   ;;  %s549_s3 = inlined_call_operand.vmem [shape: f32[2,4,2,4,32], index: 3, kind: output, shape index: {}]  }
   0x1 LB: > { %s380_s13 = sadd.s32 4294967295, %s458_s12   ;;  %p384_p0 = scmp.ge.s32.totalorder %s458_s12, 1  ;;  %s458_s12 = sphi %s486_s12, %s13_s12  }
   0x2   : > { %p137_p1 = scmp.lt.s32.totalorder %s458_s12, 3 }
   0x4   : > { %p138_p2 = pnand %p384_p0, %p137_p1 }
   0x5   : > { %p161_p3 = scmp.lt.s32.totalorder (!%p138_p2), %s380_s13, 1  ;;  %v394_v0 = vld [vmem:[%s548_s2] ss:$0 sm:$0xff] (!%p138_p2)  ;;  %v174_v2 = vld [vmem:[%s547_s1 + $0x4] sm:$0xf] (!%p138_p2)  ;;  %s531_s15 = smov (!%p138_p2), 0  }
   0x6   : > { %141 = sbr.rel (%p138_p2) target bundleno = 240 (0xf0), region = 32  ;;  %v173_v1 = vld [vmem:[%s547_s1] sm:$0xf] (!%p138_p2)  ;;  %v175_v3 = vld [vmem:[%s547_s1 + $0x8] sm:$0xf] (!%p138_p2) }
   0x7   : > { %v176_v4 = vld [vmem:[%s547_s1 + $0xc] sm:$0xf] (!%p138_p2)  ;;  %v389_v5 = vld [vmem:[%s547_s1 + $0x10] sm:$0xf] (!%p138_p2)  ;;  %v390_v6 = vld [vmem:[%s547_s1 + $0x14] sm:$0xf] (!%p138_p2) }
   0x8   : > { %v391_v7 = vld [vmem:[%s547_s1 + $0x18] sm:$0xf] (!%p138_p2)  ;;  %v392_v8 = vld [vmem:[%s547_s1 + $0x1c] sm:$0xf] (!%p138_p2) }
   0xd   : > { %s551_s13 = smov (!%p161_p3, %s380_s13), 1 }
   0xe   : > { %s406_s5 = sshll.u32 %s551_s13, 4  ;;  %s407_s6 = sshll.u32 %s551_s13, 5 }
   0xf   : > { %s524_s9 = scalar_lea.vmem %s546_s0, %s406_s5  ;;  %s529_s14 = scalar_lea.vmem %s549_s3, %s407_s6 }
  0x10 LB: >> { %v395_v9 = vcombine.low %v173_v1, %v174_v2  ;;  %v399_v10 = vcombine.low %v389_v5, %v390_v6  ;;  %v464_v11 = vmov 0.0   ;;  %v396_v12 = vcombine.low %v175_v3, %v176_v4  ;;  %s393_s13 = sshll.u32 %s462_s15, 2  ;;  %s398_s17 = sshll.u32 %s462_s15, 3  ;;  %s462_s15 = sphi %s531_s15, %s187_s15  }
  0x11   : >> { %414 = vmatprep.subr.bf16.mxu0 %v464_v11  ;;  %422 = vmatprep.subr.bf16.mxu1 %v464_v11  ;;  %v400_v13 = vcombine.low %v391_v7, %v392_v8  ;;  %s189_s16 = scalar_lea.vmem %s524_s9, %s393_s13  ;;  %vm465_vm0 = vmmov 0   ;;  %vm210_vm1 = vcmask 261120   ;;  %s255_s18 = scalar_lea.vmem %s529_s14, %s398_s17  ;;  %vm256_vm2 = vcmask 257024  }
  0x12   : >> { %415 = vmatpush3.bf16.msra.mxu0 %v395_v9  ;;  %423 = vmatpush3.bf16.msra.mxu1 %v399_v10  ;;  %v190_v14 = vld [vmem:[%s189_s16] sm:$0xf]  ;;  %s187_s15 = sadd.s32 1, %s462_s15  }
  0x13   : >> { %416 = vmatprep.subr.bf16.mxu0 %v464_v11  ;;  %424 = vmatprep.subr.bf16.mxu1 %v464_v11  ;;  %v191_v15 = vpack.c.bf16 %v190_v14, %v190_v14  ;;  %p184_p4 = scmp.ge.s32.totalorder %s187_s15, 4  }
  0x14   : >> { %418 = vmatprep.mubr.msk.bf16.mxu0 %vm465_vm0, %v464_v11  ;;  %426 = vmatprep.mubr.msk.bf16.mxu1 %vm465_vm0, %v464_v11 }
  0x16   : >> { %417 = vmatpush3.bf16.msra.mxu0 %v396_v12  ;;  %425 = vmatpush3.bf16.msra.mxu1 %v400_v13 }
  0x19   : >> { %419 = vmatmul.mubr.msk.bf16.vlgmr.msra.gmra.mrb[0].mxu0 %vm210_vm1, %v191_v15  ;;  %427 = vmatmul.mubr.msk.bf16.vlgmr.msra.gmra.mrb[0].mxu1 %vm210_vm1, %v191_v15 }
  0xe9   : > { %186 = sbr.rel (!%p184_p4) target bundleno = 16 (0x10), region = 73 }
  0xec   : >> { %v248_v16 = vpop.f32.mrb[0].mxu0  ;;  %v304_v17 = vpop.f32.mrb[0].mxu1 }
  0xed   : >> { %v249_v18 = vadd.f32 %v394_v0, %v248_v16  ;;  %v305_v19 = vadd.f32 %v394_v0, %v304_v17  ;;  %v420_v20 = vpop.f32.mrb[1].mxu0  ;;  %v428_v21 = vpop.f32.mrb[1].mxu1 }
  0xee   : >> { %v251_v22 = vpop.f32.mrb[2].mxu0  ;;  %v307_v23 = vpop.f32.mrb[2].mxu1 }
  0xef   : >> { %257 = vst.msk [vmem:[%s255_s18] sm:$0xf] %vm256_vm2, %v249_v18  ;;  %403 = vst.msk [vmem:[%s255_s18 + $0x4] sm:$0xf] %vm256_vm2, %v305_v19  ;;  %v421_v24 = vpop.f32.mrb[3].mxu0  ;;  %v429_v25 = vpop.f32.mrb[3].mxu1 }
  0xf0 PF: > { %s13_s12 = sadd.s32 1, %s458_s12  }
  0xf1   : > { %p10_p5 = scmp.ge.s32.totalorder %s13_s12, 4  }
  0xf3   :  { %12 = sbr.rel (!%p10_p5) target bundleno = 1 (0x1), region = 84 }

// kernel: _lambda_.37
= control target key start
LH: loop header
LB: loop body
LE: loop exit
PB: predicated region body
PF: predicated region fallthrough
CT: control target
= control target key end

     0   :  { %s1215_s18 = smov 0   ;;  %s1560_s0 = inlined_call_operand.vmem [shape: f32[2,6,6,32], index: 0, kind: input, shape index: {}]   ;;  %s1561_s1 = inlined_call_operand.vmem [shape: bf16[9,32,32], index: 1, kind: input, shape index: {}]   ;;  %s1562_s2 = inlined_call_operand.vmem [shape: f32[1,32], index: 2, kind: input, shape index: {}]   ;;  %s1563_s3 = inlined_call_operand.vmem [shape: f32[2,4,4,32], index: 3, kind: output, shape index: {0}]   ;;  %s1564_s4 = inlined_call_operand.vmem [shape: f32[1,32], index: 4, kind: output, shape index: {1}]   ;;  %s1565_s5 = inlined_call_operand.vmem [shape: f32[1,32], index: 5, kind: output, shape index: {2}]  }
   0x1 LB: > { %s933_s19 = sadd.s32 4294967295, %s1168_s18   ;;  %p937_p0 = scmp.ge.s32.totalorder %s1168_s18, 1  ;;  %s1168_s18 = sphi %s1215_s18, %s16_s18  }
   0x2   : > { %p182_p1 = scmp.lt.s32.totalorder %s1168_s18, 3 }
   0x4   : > { %p183_p2 = pnand %p937_p0, %p182_p1 }
   0x5   : > { %p210_p3 = scmp.lt.s32.totalorder (!%p183_p2), %s933_s19, 1  ;;  %p941_p4 = scmp.ne.s32.totalorder (!%p183_p2), %s933_s19, 0 }
   0x6   : > { %186 = sbr.rel (%p183_p2) target bundleno = 311 (0x137), region = 32 }
   0xd   : > { %s211_s20 = scalar_select %p210_p3, %s933_s19, 1 }
   0xe   : > { %224 = sbr.rel (%p941_p4) target bundleno = 21 (0x15), region = 36  ;;  %vm225_vm0 = vcmask (!%p941_p4), 253952   ;;  %v1182_v0 = vmov (!%p941_p4), 0.0  }
   0xf   : > { %s1114_s21 = smul.u32 48, %s211_s20  ;;  %s1014_s22 = sshll.u32 %s211_s20, 4  ;;  %226 = vst.msk [vmem:[%s1564_s4] sm:$0x1] (!%p941_p4), %vm225_vm0, %v1182_v0  ;;  %227 = vst.msk [vmem:[%s1565_s5] sm:$0x1] (!%p941_p4), %vm225_vm0, %v1182_v0 }
  0x10   : > { %s1226_s25 = scalar_lea.vmem %s1563_s3, %s1014_s22 }
  0x11   : > { %s1231_s28 = scalar_lea.vmem %s1560_s0, %s1114_s21 }
  0x15 PF: > { %v1242_v1 = vld [vmem:[%s1562_s2] ss:$0 sm:$0xff]  ;;  %v1252_v3 = vld [vmem:[%s1561_s1 + $0x4] sm:$0xf]  ;;  %v1257_v4 = vld [vmem:[%s1561_s1 + $0x8] sm:$0xf] }
  0x16   : > { %v1247_v2 = vld [vmem:[%s1561_s1] sm:$0xf]  ;;  %v1262_v5 = vld [vmem:[%s1561_s1 + $0xc] sm:$0xf]  ;;  %v1267_v6 = vld [vmem:[%s1561_s1 + $0x10] sm:$0xf] }
  0x17   : > { %v1272_v7 = vld [vmem:[%s1561_s1 + $0x14] sm:$0xf]  ;;  %v1277_v8 = vld [vmem:[%s1561_s1 + $0x18] sm:$0xf]  ;;  %v1282_v9 = vld [vmem:[%s1561_s1 + $0x1c] sm:$0xf] }
  0x18   : > { %v1287_v10 = vld [vmem:[%s1561_s1 + $0x20] sm:$0xf]  ;;  %v1292_v11 = vld [vmem:[%s1561_s1 + $0x24] sm:$0xf]  ;;  %v1297_v12 = vld [vmem:[%s1561_s1 + $0x28] sm:$0xf] }
  0x19   : > { %v1302_v13 = vld [vmem:[%s1561_s1 + $0x2c] sm:$0xf]  ;;  %v1307_v14 = vld [vmem:[%s1561_s1 + $0x30] sm:$0xf]  ;;  %v1312_v15 = vld [vmem:[%s1561_s1 + $0x34] sm:$0xf] }
  0x1a   : > { %v1317_v16 = vld [vmem:[%s1561_s1 + $0x38] sm:$0xf]  ;;  %v1322_v17 = vld [vmem:[%s1561_s1 + $0x3c] sm:$0xf]  ;;  %v1327_v18 = vld [vmem:[%s1561_s1 + $0x40] sm:$0xf] }
  0x1b   : > { %v1332_v19 = vld [vmem:[%s1561_s1 + $0x44] sm:$0xf]  ;;  %v1337_v20 = vld [vmem:[%s1561_s1 + $0x48] sm:$0xf]  ;;  %v1342_v21 = vld [vmem:[%s1561_s1 + $0x4c] sm:$0xf] }
  0x1c   : > { %v1347_v22 = vld [vmem:[%s1561_s1 + $0x50] sm:$0xf]  ;;  %v1352_v23 = vld [vmem:[%s1561_s1 + $0x54] sm:$0xf]  ;;  %v1357_v24 = vld [vmem:[%s1561_s1 + $0x58] sm:$0xf] }
  0x1d   : > { %v1362_v25 = vld [vmem:[%s1561_s1 + $0x5c] sm:$0xf]  ;;  %v1367_v26 = vld [vmem:[%s1561_s1 + $0x60] sm:$0xf]  ;;  %v1372_v27 = vld [vmem:[%s1561_s1 + $0x64] sm:$0xf] }
  0x1e   : > { %v1377_v28 = vld [vmem:[%s1561_s1 + $0x68] sm:$0xf]  ;;  %v1382_v29 = vld [vmem:[%s1561_s1 + $0x6c] sm:$0xf]  ;;  %v1387_v30 = vld [vmem:[%s1561_s1 + $0x70] sm:$0xf] }
  0x1f   : > { %v1392_v31 = vld [vmem:[%s1561_s1 + $0x74] sm:$0xf]  ;;  %v1397_v32 = vld [vmem:[%s1561_s1 + $0x78] sm:$0xf]  ;;  %v1402_v33 = vld [vmem:[%s1561_s1 + $0x7c] sm:$0xf] }
  0x20   : > { %v1407_v34 = vld [vmem:[%s1561_s1 + $0x80] sm:$0xf]  ;;  %v1412_v35 = vld [vmem:[%s1561_s1 + $0x84] sm:$0xf]  ;;  %v1417_v36 = vld [vmem:[%s1561_s1 + $0x88] sm:$0xf] }
  0x21   : > { %v1422_v37 = vld [vmem:[%s1561_s1 + $0x8c] sm:$0xf]  ;;  %v1424_v38 = vmov 0.0   ;;  %v1426_v39 = vmov 0.0   ;;  %s1428_s16 = smov 0  }
  0x22 LB: >> { %v975_v40 = vcombine.low %v1267_v6, %v1272_v7  ;;  %v978_v41 = vcombine.low %v1247_v2, %v1252_v3  ;;  %v1183_v42 = vmov 0.0   ;;  %v976_v43 = vcombine.low %v1277_v8, %v1282_v9  ;;  %s974_s17 = sshll.u32 %s1180_s16, 3  ;;  %s1011_s20 = sshll.u32 %s1180_s16, 2  ;;  %s1180_s16 = sphi %s1428_s16, %s278_s16   ;;  %v1176_v39 = vphi %v1426_v39, %v1567_v39   ;;  %v1172_v38 = vphi %v1424_v38, %v1566_v38  }
  0x23   : >> { %1042 = vmatprep.subr.bf16.mxu0 %v1183_v42  ;;  %1050 = vmatprep.subr.bf16.mxu1 %v1183_v42  ;;  %v979_v44 = vcombine.low %v1257_v4, %v1262_v5  ;;  %s1453_s19 = scalar_lea.vmem %s1231_s28, %s974_s17  ;;  %vm1184_vm1 = vmmov 0   ;;  %vm299_vm2 = vcmask 261120   ;;  %v981_v49 = vcombine.low %v1287_v10, %v1292_v11  ;;  %s818_s21 = scalar_lea.vmem %s1226_s25, %s1011_s20 }
  0x24   : >> { %1043 = vmatpush3.bf16.msra.mxu0 %v975_v40  ;;  %1051 = vmatpush3.bf16.msra.mxu1 %v978_v41  ;;  %v285_v45 = vld [vmem:[%s1453_s19 + $0x1] sm:$0xf]  ;;  %v986_v50 = vcombine.low %v1307_v14, %v1312_v15  ;;  %v982_v51 = vcombine.low %v1297_v12, %v1302_v13  ;;  %v987_v52 = vcombine.low %v1317_v16, %v1322_v17  ;;  %v985_v54 = vld [vmem:[%s1453_s19 + $0x8] sm:$0xf]  ;;  %vm819_vm3 = vcmask 257024   ;;  %s278_s16 = sadd.s32 1, %s1180_s16  }
  0x25   : >> { %1044 = vmatprep.subr.bf16.mxu0 %v1183_v42  ;;  %1052 = vmatprep.subr.bf16.mxu1 %v1183_v42  ;;  %v283_v46 = vld [vmem:[%s1453_s19] sm:$0xf]  ;;  %v286_v47 = vpack.c.bf16 %v285_v45, %v285_v45  ;;  %v460_v56 = vpack.c.bf16 %v985_v54, %v985_v54  ;;  %v990_v57 = vcombine.low %v1327_v18, %v1332_v19  ;;  %v989_v61 = vld [vmem:[%s1453_s19 + $0x9] sm:$0xf]  ;;  %v998_v45 = vld [vmem:[%s1453_s19 + $0x10] sm:$0xf] }
  0x26   : >> { %1046 = vmatprep.mubr.msk.bf16.mxu0 %vm1184_vm1, %v1183_v42  ;;  %1054 = vmatprep.mubr.msk.bf16.mxu1 %vm1184_vm1, %v1183_v42  ;;  %v284_v48 = vpack.c.bf16 %v283_v46, %v283_v46  ;;  %v398_v53 = vld [vmem:[%s1453_s19 + $0x2] sm:$0xf]  ;;  %v994_v58 = vcombine.low %v1347_v22, %v1352_v23  ;;  %v991_v59 = vcombine.low %v1337_v20, %v1342_v21  ;;  %v993_v62 = vld [vmem:[%s1453_s19 + $0xa] sm:$0xf]  ;;  %v1002_v46 = vld [vmem:[%s1453_s19 + $0x11] sm:$0xf] }
  0x27   : >> { %v399_v55 = vpack.c.bf16 %v398_v53, %v398_v53  ;;  %v995_v60 = vcombine.low %v1357_v24, %v1362_v25  ;;  %v518_v63 = vpack.c.bf16 %v989_v61, %v989_v61  ;;  %v576_v0 = vpack.c.bf16 %v993_v62, %v993_v62  ;;  %p275_p5 = scmp.ge.s32.totalorder %s278_s16, 4  }
  0x28   : >> { %1045 = vmatpush3.bf16.msra.mxu0 %v976_v43  ;;  %1053 = vmatpush3.bf16.msra.mxu1 %v979_v44  ;;  %v999_v40 = vcombine.low %v1367_v26, %v1372_v27  ;;  %v1003_v41 = vcombine.low %v1387_v30, %v1392_v31  ;;  %v1000_v43 = vcombine.low %v1377_v28, %v1382_v29  ;;  %vm840_vm4 = vcmask (%p275_p5), 253952  }
  0x29   : >> { %1058 = vmatprep.subr.bf16.mxu0 %v1183_v42  ;;  %1066 = vmatprep.subr.bf16.mxu1 %v1183_v42  ;;  %v1004_v44 = vcombine.low %v1397_v32, %v1402_v33 }
  0x2b   : >> { %1047 = vmatmul.mubr.msk.bf16.vlgmr.msra.gmra.mrb[0].mxu0 %vm299_vm2, %v286_v47  ;;  %1055 = vmatmul.mubr.msk.bf16.vlgmr.msra.gmra.mrb[0].mxu1 %vm299_vm2, %v284_v48  ;;  %v637_v47 = vpack.c.bf16 %v998_v45, %v998_v45  ;;  %v695_v48 = vpack.c.bf16 %v1002_v46, %v1002_v46 }
  0x2c   : >> { %1059 = vmatpush3.bf16.msra.mxu0 %v981_v49  ;;  %1067 = vmatpush3.bf16.msra.mxu1 %v986_v50  ;;  %v1007_v49 = vcombine.low %v1407_v34, %v1412_v35  ;;  %v1008_v50 = vcombine.low %v1417_v36, %v1422_v37 }
  0x2d   : >> { %1060 = vmatprep.subr.bf16.mxu0 %v1183_v42  ;;  %1068 = vmatprep.subr.bf16.mxu1 %v1183_v42 }
  0x2e   : >> { %1062 = vmatprep.mubr.msk.bf16.mxu0 %vm1184_vm1, %v1183_v42  ;;  %1070 = vmatprep.mubr.msk.bf16.mxu1 %vm1184_vm1, %v1183_v42 }
  0x30   : >> { %1061 = vmatpush3.bf16.msra.mxu0 %v982_v51  ;;  %1069 = vmatpush3.bf16.msra.mxu1 %v987_v52  ;;  %v1006_v51 = vld [vmem:[%s1453_s19 + $0x12] sm:$0xf] }
  0x31   : >> { %1074 = vmatprep.subr.bf16.mxu0 %v1183_v42  ;;  %1082 = vmatprep.subr.bf16.mxu1 %v1183_v42  ;;  %v753_v52 = vpack.c.bf16 %v1006_v51, %v1006_v51 }
  0x33   : >> { %1063 = vmatmul.mubr.msk.bf16.vlgmr.msra.gmra.mrb[4].mxu0 %vm299_vm2, %v399_v55  ;;  %1071 = vmatmul.mubr.msk.bf16.vlgmr.msra.gmra.mrb[4].mxu1 %vm299_vm2, %v460_v56 }
  0x34   : >> { %1075 = vmatpush3.bf16.msra.mxu0 %v990_v57  ;;  %1083 = vmatpush3.bf16.msra.mxu1 %v994_v58 }
  0x35   : >> { %1076 = vmatprep.subr.bf16.mxu0 %v1183_v42  ;;  %1084 = vmatprep.subr.bf16.mxu1 %v1183_v42 }
  0x36   : >> { %1078 = vmatprep.mubr.msk.bf16.mxu0 %vm1184_vm1, %v1183_v42  ;;  %1086 = vmatprep.mubr.msk.bf16.mxu1 %vm1184_vm1, %v1183_v42 }
  0x38   : >> { %1077 = vmatpush3.bf16.msra.mxu0 %v991_v59  ;;  %1085 = vmatpush3.bf16.msra.mxu1 %v995_v60 }
  0x39   : >> { %1090 = vmatprep.subr.bf16.mxu0 %v1183_v42  ;;  %1098 = vmatprep.subr.bf16.mxu1 %v1183_v42 }
  0x3b   : >> { %1079 = vmatmul.mubr.msk.bf16.vlgmr.msra.gmra.mrb[8].mxu0 %vm299_vm2, %v518_v63  ;;  %1087 = vmatmul.mubr.msk.bf16.vlgmr.msra.gmra.mrb[8].mxu1 %vm299_vm2, %v576_v0 }
  0x3c   : >> { %1091 = vmatpush3.bf16.msra.mxu0 %v999_v40  ;;  %1099 = vmatpush3.bf16.msra.mxu1 %v1003_v41 }
  0x3d   : >> { %1092 = vmatprep.subr.bf16.mxu0 %v1183_v42  ;;  %1100 = vmatprep.subr.bf16.mxu1 %v1183_v42 }
  0x3e   : >> { %1094 = vmatprep.mubr.msk.bf16.mxu0 %vm1184_vm1, %v1183_v42  ;;  %1102 = vmatprep.mubr.msk.bf16.mxu1 %vm1184_vm1, %v1183_v42 }
  0x40   : >> { %1093 = vmatpush3.bf16.msra.mxu0 %v1000_v43  ;;  %1101 = vmatpush3.bf16.msra.mxu1 %v1004_v44 }
  0x41   : >> { %1106 = vmatprep.subr.bf16.mxu0 %v1183_v42 }
  0x43   : >> { %1095 = vmatmul.mubr.msk.bf16.vlgmr.msra.gmra.mrb[12].mxu0 %vm299_vm2, %v637_v47  ;;  %1103 = vmatmul.mubr.msk.bf16.vlgmr.msra.gmra.mrb[12].mxu1 %vm299_vm2, %v695_v48 }
  0x44   : >> { %1107 = vmatpush3.bf16.msra.mxu0 %v1007_v49  ;;  %1110 = vmatprep.mubr.msk.bf16.mxu0 %vm1184_vm1, %v1183_v42 }
  0x45   : >> { %1108 = vmatprep.subr.bf16.mxu0 %v1183_v42 }
  0x48   : >> { %1109 = vmatpush3.bf16.msra.mxu0 %v1008_v50 }
  0x4b   : >> { %1111 = vmatmul.mubr.msk.bf16.vlgmr.msra.gmra.mrb[16].mxu0 %vm299_vm2, %v753_v52 }
  0xfe   : >> { %v337_v53 = vpop.f32.mrb[0].mxu0  ;;  %v392_v54 = vpop.f32.mrb[0].mxu1 }
  0xff   : >> { %v1048_v55 = vpop.f32.mrb[1].mxu0  ;;  %v393_v56 = vadd.f32 %v392_v54, %v337_v53  ;;  %v1056_v57 = vpop.f32.mrb[1].mxu1 }
 0x100   : >> { %v340_v58 = vpop.f32.mrb[2].mxu0  ;;  %v395_v59 = vpop.f32.mrb[2].mxu1 }
 0x101   : >> { %v1049_v60 = vpop.f32.mrb[3].mxu0  ;;  %v1057_v61 = vpop.f32.mrb[3].mxu1 }
 0x106   : >> { %v449_v62 = vpop.f32.mrb[4].mxu0  ;;  %v510_v63 = vpop.f32.mrb[4].mxu1 }
 0x107   : >> { %v455_v0 = vadd.f32 %v449_v62, %v393_v56  ;;  %v1064_v40 = vpop.f32.mrb[5].mxu0  ;;  %v1072_v41 = vpop.f32.mrb[5].mxu1 }
 0x108   : >> { %v452_v43 = vpop.f32.mrb[6].mxu0  ;;  %v513_v42 = vpop.f32.mrb[6].mxu1 }
 0x109   : >> { %v516_v44 = vadd.f32 %v510_v63, %v455_v0  ;;  %v1065_v45 = vpop.f32.mrb[7].mxu0  ;;  %v1073_v46 = vpop.f32.mrb[7].mxu1 }
 0x10e   : >> { %v568_v47 = vpop.f32.mrb[8].mxu0  ;;  %v626_v48 = vpop.f32.mrb[8].mxu1 }
 0x10f   : >> { %v574_v49 = vadd.f32 %v568_v47, %v516_v44  ;;  %v1080_v50 = vpop.f32.mrb[9].mxu0  ;;  %v1088_v51 = vpop.f32.mrb[9].mxu1 }
 0x110   : >> { %v571_v52 = vpop.f32.mrb[10].mxu0  ;;  %v629_v53 = vpop.f32.mrb[10].mxu1 }
 0x111   : >> { %v632_v54 = vadd.f32 %v626_v48, %v574_v49  ;;  %v1081_v55 = vpop.f32.mrb[11].mxu0  ;;  %v1089_v57 = vpop.f32.mrb[11].mxu1 }
 0x116   : >> { %v687_v56 = vpop.f32.mrb[12].mxu0  ;;  %v745_v58 = vpop.f32.mrb[12].mxu1 }
 0x117   : >> { %v693_v59 = vadd.f32 %v687_v56, %v632_v54  ;;  %v1096_v60 = vpop.f32.mrb[13].mxu0  ;;  %v1104_v61 = vpop.f32.mrb[13].mxu1 }
 0x118   : >> { %v690_v62 = vpop.f32.mrb[14].mxu0  ;;  %v748_v63 = vpop.f32.mrb[14].mxu1 }
 0x119   : >> { %v751_v0 = vadd.f32 %v745_v58, %v693_v59  ;;  %v1097_v40 = vpop.f32.mrb[15].mxu0  ;;  %v1105_v41 = vpop.f32.mrb[15].mxu1 }
 0x11a   : > { %v838_v40 = vld [vmem:[%s1564_s4] sm:$0x1] (%p275_p5) }
 0x11e   : >> { %v803_v43 = vpop.f32.mrb[16].mxu0 }
 0x11f   : >> { %v809_v42 = vadd.f32 %v803_v43, %v751_v0  ;;  %v1112_v44 = vpop.f32.mrb[17].mxu0 }
 0x120   : >> { %v806_v45 = vpop.f32.mrb[18].mxu0 }
 0x121   : >> { %v816_v46 = vadd.f32 %v1242_v1, %v809_v42  ;;  %v1113_v47 = vpop.f32.mrb[19].mxu0 }
 0x123   : >> { %820 = vst.msk [vmem:[%s818_s21] sm:$0xf] %vm819_vm3, %v816_v46  ;;  %v821_v48 = vsel %vm819_vm3, %v816_v46, 0.0  ;;  %v829_v49 = vmul.f32 %v816_v46, %v816_v46 }
 0x124   : >> { %v822_v50 = vrot.slane %v821_v48, 4 }
 0x125   : >> { %v830_v51 = vsel %vm819_vm3, %v829_v49, 0.0 }
 0x126   : >> { %v823_v52 = vadd.f32 %v822_v50, %v821_v48  ;;  %v831_v53 = vrot.slane %v830_v51, 4 }
 0x128   : >> { %v824_v54 = vrot.slane %v823_v52, 2  ;;  %v832_v55 = vadd.f32 %v831_v53, %v830_v51 }
 0x12a   : >> { %v825_v57 = vadd.f32 %v824_v54, %v823_v52  ;;  %v833_v56 = vrot.slane %v832_v55, 2 }
 0x12c   : >> { %v826_v58 = vrot.slane %v825_v57, 1  ;;  %v834_v59 = vadd.f32 %v833_v56, %v832_v55 }
 0x12e   : >> { %v827_v60 = vadd.f32 %v826_v58, %v825_v57  ;;  %v835_v61 = vrot.slane %v834_v59, 1  ;;  %277 = sbr.rel (!%p275_p5) target bundleno = 34 (0x22), region = 101 }
 0x130   : >> { %v828_v62 = vadd.f32 %v1176_v39, %v827_v60   ;;  %v836_v63 = vadd.f32 %v835_v61, %v834_v59 }
 0x132   : >> { %v837_v0 = vadd.f32 %v1172_v38, %v836_v63   ;;  %v1567_v39 = vmov %v828_v62  ;;  %v839_v41 = vadd.f32 (%p275_p5), %v838_v40, %v828_v62 }
 0x133   : > { %v842_v39 = vld [vmem:[%s1565_s5] sm:$0x1] (%p275_p5) }
 0x134   : >> { %v1566_v38 = vmov %v837_v0  ;;  %v843_v43 = vadd.f32 (%p275_p5), %v842_v39, %v837_v0  ;;  %841 = vst.msk [vmem:[%s1564_s4] sm:$0x1] (%p275_p5), %vm840_vm4, %v839_v41 }
 0x136   : > { %844 = vst.msk [vmem:[%s1565_s5] sm:$0x1] %vm840_vm4, %v843_v43 }
 0x137 PF: > { %s16_s18 = sadd.s32 1, %s1168_s18  }
 0x138   : > { %p13_p6 = scmp.ge.s32.totalorder %s16_s18, 4  }
 0x13a   :  { %15 = sbr.rel (!%p13_p6) target bundleno = 1 (0x1), region = 112 }

// kernel: _lambda_.44
= control target key start
LH: loop header
LB: loop body
LE: loop exit
PB: predicated region body
PF: predicated region fallthrough
CT: control target
= control target key end

     0   :  { %s459_s12 = smov 0   ;;  %s507_s0 = inlined_call_operand.vmem [shape: f32[2,8,8,16], index: 0, kind: input, shape index: {}]   ;;  %s508_s1 = inlined_call_operand.vmem [shape: bf16[2,16,16], index: 1, kind: input, shape index: {}]   ;;  %s509_s2 = inlined_call_operand.vmem [shape: f32[1,16], index: 2, kind: input, shape index: {}]   ;;  %s510_s3 = inlined_call_operand.vmem [shape: f32[2,8,2,8,16], index: 3, kind: output, shape index: {}]  }
   0x1 LB: > { %s363_s13 = sadd.s32 4294967295, %s431_s12   ;;  %p367_p0 = scmp.ge.s32.totalorder %s431_s12, 1  ;;  %s431_s12 = sphi %s459_s12, %s13_s12  }
   0x2   : > { %p137_p1 = scmp.lt.s32.totalorder %s431_s12, 3 }
   0x4   : > { %p138_p2 = pnand %p367_p0, %p137_p1 }
   0x5   : > { %p161_p3 = scmp.lt.s32.totalorder (!%p138_p2), %s363_s13, 1  ;;  %v375_v0 = vld [vmem:[%s509_s2] ss:$0 sm:$0xff] (!%p138_p2)  ;;  %v174_v2 = vld [vmem:[%s508_s1 + $0x4] sm:$0xf] (!%p138_p2)  ;;  %s492_s5 = smov (!%p138_p2), 0  }
   0x6   : > { %141 = sbr.rel (%p138_p2) target bundleno = 236 (0xec), region = 32  ;;  %v173_v1 = vld [vmem:[%s508_s1] sm:$0xf] (!%p138_p2)  ;;  %v372_v3 = vld [vmem:[%s508_s1 + $0x8] sm:$0xf] (!%p138_p2) }
   0x7   : > { %v373_v4 = vld [vmem:[%s508_s1 + $0xc] sm:$0xf] (!%p138_p2) }
   0xd   : > { %s512_s13 = smov (!%p161_p3, %s363_s13), 1 }
   0xe   : > { %s385_s24 = sshll.u32 %s512_s13, 6  ;;  %s386_s25 = sshll.u32 %s512_s13, 7 }
   0xf   : > { %s485_s28 = scalar_lea.vmem %s507_s0, %s385_s24  ;;  %s490_s4 = scalar_lea.vmem %s510_s3, %s386_s25 }
  0x10 LB: >> { %v376_v5 = vcombine.low %v173_v1, %v174_v2  ;;  %v379_v6 = vcombine.low %v372_v3, %v373_v4  ;;  %v437_v7 = vmov 0.0   ;;  %s374_s6 = sshll.u32 %s435_s5, 3  ;;  %vm438_vm0 = vmmov 0   ;;  %s378_s8 = sshll.u32 %s435_s5, 4  ;;  %s435_s5 = sphi %s492_s5, %s183_s5  }
  0x11   : >> { %391 = vmatprep.subr.bf16.mxu0 %v437_v7  ;;  %397 = vmatprep.subr.bf16.mxu1 %v437_v7  ;;  %s185_s7 = scalar_lea.vmem %s485_s28, %s374_s6  ;;  %vm200_vm1 = vcmask 130048   ;;  %s245_s9 = scalar_lea.vmem %s490_s4, %s378_s8 }
  0x12   : >> { %392 = vmatpush3.bf16.msra.mxu0 %v376_v5  ;;  %398 = vmatpush3.bf16.msra.mxu1 %v379_v6  ;;  %v186_v8 = vld [vmem:[%s185_s7] sm:$0xff]  ;;  %s183_s5 = sadd.s32 1, %s435_s5  }
  0x13   : >> { %393 = vmatprep.mubr.msk.bf16.mxu0 %vm438_vm0, %v437_v7  ;;  %399 = vmatprep.mubr.msk.bf16.mxu1 %vm438_vm0, %v437_v7  ;;  %v187_v9 = vpack.c.bf16 %v186_v8, %v186_v8  ;;  %p180_p4 = scmp.ge.s32.totalorder %s183_s5, 8  }
  0x15   : >> { %394 = vmatmul.mubr.msk.bf16.vlgmr.msra.gmra.mrb[0].mxu0 %vm200_vm1, %v187_v9  ;;  %400 = vmatmul.mubr.msk.bf16.vlgmr.msra.gmra.mrb[0].mxu1 %vm200_vm1, %v187_v9 }
  0xe5   : > { %182 = sbr.rel (!%p180_p4) target bundleno = 16 (0x10), region = 73 }
  0xe8   : >> { %v238_v10 = vpop.f32.mrb[0].mxu0  ;;  %v287_v11 = vpop.f32.mrb[0].mxu1 }
  0xe9   : >> { %v239_v12 = vadd.f32 %v375_v0, %v238_v10  ;;  %v288_v13 = vadd.f32 %v375_v0, %v287_v11  ;;  %v395_v14 = vpop.f32.mrb[1].mxu0  ;;  %v401_v15 = vpop.f32.mrb[1].mxu1 }
  0xea   : >> { %v241_v16 = vpop.f32.mrb[2].mxu0  ;;  %v290_v17 = vpop.f32.mrb[2].mxu1 }
  0xeb   : >> { %246 = vst.msk [vmem:[%s245_s9] sm:$0xff] %vm200_vm1, %v239_v12  ;;  %382 = vst.msk [vmem:[%s245_s9 + $0x8] sm:$0xff] %vm200_vm1, %v288_v13  ;;  %v396_v18 = vpop.f32.mrb[3].mxu0  ;;  %v402_v19 = vpop.f32.mrb[3].mxu1 }
  0xec PF: > { %s13_s12 = sadd.s32 1, %s431_s12  }
  0xed   : > { %p10_p5 = scmp.ge.s32.totalorder %s13_s12, 4  }
  0xef   :  { %12 = sbr.rel (!%p10_p5) target bundleno = 1 (0x1), region = 84 }

// kernel: _lambda_.40
= control target key start
LH: loop header
LB: loop body
LE: loop exit
PB: predicated region body
PF: predicated region fallthrough
CT: control target
= control target key end

     0   :  { %s1215_s18 = smov 0   ;;  %s1560_s0 = inlined_call_operand.vmem [shape: f32[2,10,10,32], index: 0, kind: input, shape index: {}]   ;;  %s1561_s1 = inlined_call_operand.vmem [shape: bf16[9,32,16], index: 1, kind: input, shape index: {}]   ;;  %s1562_s2 = inlined_call_operand.vmem [shape: f32[1,16], index: 2, kind: input, shape index: {}]   ;;  %s1563_s3 = inlined_call_operand.vmem [shape: f32[2,8,8,16], index: 3, kind: output, shape index: {0}]   ;;  %s1564_s4 = inlined_call_operand.vmem [shape: f32[1,16], index: 4, kind: output, shape index: {1}]   ;;  %s1565_s5 = inlined_call_operand.vmem [shape: f32[1,16], index: 5, kind: output, shape index: {2}]  }
   0x1 LB: > { %s933_s19 = sadd.s32 4294967295, %s1168_s18   ;;  %p937_p0 = scmp.ge.s32.totalorder %s1168_s18, 1  ;;  %s1168_s18 = sphi %s1215_s18, %s16_s18  }
   0x2   : > { %p182_p1 = scmp.lt.s32.totalorder %s1168_s18, 3 }
   0x4   : > { %p183_p2 = pnand %p937_p0, %p182_p1 }
   0x5   : > { %p210_p3 = scmp.lt.s32.totalorder (!%p183_p2), %s933_s19, 1  ;;  %p941_p4 = scmp.ne.s32.totalorder (!%p183_p2), %s933_s19, 0 }
   0x6   : > { %186 = sbr.rel (%p183_p2) target bundleno = 311 (0x137), region = 32 }
   0xd   : > { %s211_s20 = scalar_select %p210_p3, %s933_s19, 1 }
   0xe   : > { %224 = sbr.rel (%p941_p4) target bundleno = 21 (0x15), region = 36  ;;  %vm225_vm0 = vcmask (!%p941_p4), 122880   ;;  %v1182_v0 = vmov (!%p941_p4), 0.0  }
   0xf   : > { %s1114_s21 = smul.u32 160, %s211_s20  ;;  %s1014_s22 = sshll.u32 %s211_s20, 6  ;;  %226 = vst.msk [vmem:[%s1564_s4] sm:$0x1] (!%p941_p4), %vm225_vm0, %v1182_v0  ;;  %227 = vst.msk [vmem:[%s1565_s5] sm:$0x1] (!%p941_p4), %vm225_vm0, %v1182_v0 }
  0x10   : > { %s1226_s25 = scalar_lea.vmem %s1563_s3, %s1014_s22 }
  0x11   : > { %s1231_s28 = scalar_lea.vmem %s1560_s0, %s1114_s21 }
  0x15 PF: > { %v1242_v1 = vld [vmem:[%s1562_s2] ss:$0 sm:$0xff]  ;;  %v1252_v3 = vld [vmem:[%s1561_s1 + $0x4] sm:$0xf]  ;;  %v1257_v4 = vld [vmem:[%s1561_s1 + $0x8] sm:$0xf] }
  0x16   : > { %v1247_v2 = vld [vmem:[%s1561_s1] sm:$0xf]  ;;  %v1262_v5 = vld [vmem:[%s1561_s1 + $0xc] sm:$0xf]  ;;  %v1267_v6 = vld [vmem:[%s1561_s1 + $0x10] sm:$0xf] }
  0x17   : > { %v1272_v7 = vld [vmem:[%s1561_s1 + $0x14] sm:$0xf]  ;;  %v1277_v8 = vld [vmem:[%s1561_s1 + $0x18] sm:$0xf]  ;;  %v1282_v9 = vld [vmem:[%s1561_s1 + $0x1c] sm:$0xf] }
  0x18   : > { %v1287_v10 = vld [vmem:[%s1561_s1 + $0x20] sm:$0xf]  ;;  %v1292_v11 = vld [vmem:[%s1561_s1 + $0x24] sm:$0xf]  ;;  %v1297_v12 = vld [vmem:[%s1561_s1 + $0x28] sm:$0xf] }
  0x19   : > { %v1302_v13 = vld [vmem:[%s1561_s1 + $0x2c] sm:$0xf]  ;;  %v1307_v14 = vld [vmem:[%s1561_s1 + $0x30] sm:$0xf]  ;;  %v1312_v15 = vld [vmem:[%s1561_s1 + $0x34] sm:$0xf] }
  0x1a   : > { %v1317_v16 = vld [vmem:[%s1561_s1 + $0x38] sm:$0xf]  ;;  %v1322_v17 = vld [vmem:[%s1561_s1 + $0x3c] sm:$0xf]  ;;  %v1327_v18 = vld [vmem:[%s1561_s1 + $0x40] sm:$0xf] }
  0x1b   : > { %v1332_v19 = vld [vmem:[%s1561_s1 + $0x44] sm:$0xf]  ;;  %v1337_v20 = vld [vmem:[%s1561_s1 + $0x48] sm:$0xf]  ;;  %v1342_v21 = vld [vmem:[%s1561_s1 + $0x4c] sm:$0xf] }
  0x1c   : > { %v1347_v22 = vld [vmem:[%s1561_s1 + $0x50] sm:$0xf]  ;;  %v1352_v23 = vld [vmem:[%s1561_s1 + $0x54] sm:$0xf]  ;;  %v1357_v24 = vld [vmem:[%s1561_s1 + $0x58] sm:$0xf] }
  0x1d   : > { %v1362_v25 = vld [vmem:[%s1561_s1 + $0x5c] sm:$0xf]  ;;  %v1367_v26 = vld [vmem:[%s1561_s1 + $0x60] sm:$0xf]  ;;  %v1372_v27 = vld [vmem:[%s1561_s1 + $0x64] sm:$0xf] }
  0x1e   : > { %v1377_v28 = vld [vmem:[%s1561_s1 + $0x68] sm:$0xf]  ;;  %v1382_v29 = vld [vmem:[%s1561_s1 + $0x6c] sm:$0xf]  ;;  %v1387_v30 = vld [vmem:[%s1561_s1 + $0x70] sm:$0xf] }
  0x1f   : > { %v1392_v31 = vld [vmem:[%s1561_s1 + $0x74] sm:$0xf]  ;;  %v1397_v32 = vld [vmem:[%s1561_s1 + $0x78] sm:$0xf]  ;;  %v1402_v33 = vld [vmem:[%s1561_s1 + $0x7c] sm:$0xf] }
  0x20   : > { %v1407_v34 = vld [vmem:[%s1561_s1 + $0x80] sm:$0xf]  ;;  %v1412_v35 = vld [vmem:[%s1561_s1 + $0x84] sm:$0xf]  ;;  %v1417_v36 = vld [vmem:[%s1561_s1 + $0x88] sm:$0xf] }
  0x21   : > { %v1422_v37 = vld [vmem:[%s1561_s1 + $0x8c] sm:$0xf]  ;;  %v1424_v38 = vmov 0.0   ;;  %v1426_v39 = vmov 0.0   ;;  %s1428_s16 = smov 0  }
  0x22 LB: >> { %v975_v40 = vcombine.low %v1267_v6, %v1272_v7  ;;  %v978_v41 = vcombine.low %v1247_v2, %v1252_v3  ;;  %v1183_v42 = vmov 0.0   ;;  %v976_v43 = vcombine.low %v1277_v8, %v1282_v9  ;;  %s974_s17 = sshll.u32 %s1180_s16, 4  ;;  %s1011_s20 = sshll.u32 %s1180_s16, 3  ;;  %s1180_s16 = sphi %s1428_s16, %s278_s16   ;;  %v1176_v39 = vphi %v1426_v39, %v1567_v39   ;;  %v1172_v38 = vphi %v1424_v38, %v1566_v38  }
  0x23   : >> { %1042 = vmatprep.subr.bf16.mxu0 %v1183_v42  ;;  %1050 = vmatprep.subr.bf16.mxu1 %v1183_v42  ;;  %v979_v44 = vcombine.low %v1257_v4, %v1262_v5  ;;  %s1453_s19 = scalar_lea.vmem %s1231_s28, %s974_s17  ;;  %vm1184_vm1 = vmmov 0   ;;  %vm299_vm2 = vcmask 261120   ;;  %v981_v49 = vcombine.low %v1287_v10, %v1292_v11  ;;  %s818_s21 = scalar_lea.vmem %s1226_s25, %s1011_s20 }
  0x24   : >> { %1043 = vmatpush3.bf16.msra.mxu0 %v975_v40  ;;  %1051 = vmatpush3.bf16.msra.mxu1 %v978_v41  ;;  %v285_v45 = vld [vmem:[%s1453_s19 + $0x1] sm:$0xff]  ;;  %v986_v50 = vcombine.low %v1307_v14, %v1312_v15  ;;  %v982_v51 = vcombine.low %v1297_v12, %v1302_v13  ;;  %v987_v52 = vcombine.low %v1317_v16, %v1322_v17  ;;  %v985_v54 = vld [vmem:[%s1453_s19 + $0x10] sm:$0xff]  ;;  %vm819_vm3 = vcmask 130048   ;;  %s278_s16 = sadd.s32 1, %s1180_s16  }
  0x25   : >> { %1044 = vmatprep.subr.bf16.mxu0 %v1183_v42  ;;  %1052 = vmatprep.subr.bf16.mxu1 %v1183_v42  ;;  %v283_v46 = vld [vmem:[%s1453_s19] sm:$0xff]  ;;  %v286_v47 = vpack.c.bf16 %v285_v45, %v285_v45  ;;  %v460_v56 = vpack.c.bf16 %v985_v54, %v985_v54  ;;  %v990_v57 = vcombine.low %v1327_v18, %v1332_v19  ;;  %v989_v61 = vld [vmem:[%s1453_s19 + $0x11] sm:$0xff]  ;;  %p275_p5 = scmp.ge.s32.totalorder %s278_s16, 8  }
  0x26   : >> { %1046 = vmatprep.mubr.msk.bf16.mxu0 %vm1184_vm1, %v1183_v42  ;;  %1054 = vmatprep.mubr.msk.bf16.mxu1 %vm1184_vm1, %v1183_v42  ;;  %v284_v48 = vpack.c.bf16 %v283_v46, %v283_v46  ;;  %v398_v53 = vld [vmem:[%s1453_s19 + $0x2] sm:$0xff]  ;;  %v994_v58 = vcombine.low %v1347_v22, %v1352_v23  ;;  %v991_v59 = vcombine.low %v1337_v20, %v1342_v21  ;;  %v993_v62 = vld [vmem:[%s1453_s19 + $0x12] sm:$0xff]  ;;  %vm840_vm4 = vcmask (%p275_p5), 122880  }
  0x27   : >> { %v399_v55 = vpack.c.bf16 %v398_v53, %v398_v53  ;;  %v995_v60 = vcombine.low %v1357_v24, %v1362_v25  ;;  %v518_v63 = vpack.c.bf16 %v989_v61, %v989_v61  ;;  %v576_v0 = vpack.c.bf16 %v993_v62, %v993_v62  ;;  %v998_v45 = vld [vmem:[%s1453_s19 + $0x20] sm:$0xff] }
  0x28   : >> { %1045 = vmatpush3.bf16.msra.mxu0 %v976_v43  ;;  %1053 = vmatpush3.bf16.msra.mxu1 %v979_v44  ;;  %v999_v40 = vcombine.low %v1367_v26, %v1372_v27  ;;  %v1003_v41 = vcombine.low %v1387_v30, %v1392_v31  ;;  %v1000_v43 = vcombine.low %v1377_v28, %v1382_v29  ;;  %v1002_v46 = vld [vmem:[%s1453_s19 + $0x21] sm:$0xff] }
  0x29   : >> { %1058 = vmatprep.subr.bf16.mxu0 %v1183_v42  ;;  %1066 = vmatprep.subr.bf16.mxu1 %v1183_v42  ;;  %v1004_v44 = vcombine.low %v1397_v32, %v1402_v33 }
  0x2b   : >> { %1047 = vmatmul.mubr.msk.bf16.vlgmr.msra.gmra.mrb[0].mxu0 %vm299_vm2, %v286_v47  ;;  %1055 = vmatmul.mubr.msk.bf16.vlgmr.msra.gmra.mrb[0].mxu1 %vm299_vm2, %v284_v48  ;;  %v637_v47 = vpack.c.bf16 %v998_v45, %v998_v45  ;;  %v695_v48 = vpack.c.bf16 %v1002_v46, %v1002_v46 }
  0x2c   : >> { %1059 = vmatpush3.bf16.msra.mxu0 %v981_v49  ;;  %1067 = vmatpush3.bf16.msra.mxu1 %v986_v50  ;;  %v1007_v49 = vcombine.low %v1407_v34, %v1412_v35  ;;  %v1008_v50 = vcombine.low %v1417_v36, %v1422_v37 }
  0x2d   : >> { %1060 = vmatprep.subr.bf16.mxu0 %v1183_v42  ;;  %1068 = vmatprep.subr.bf16.mxu1 %v1183_v42 }
  0x2e   : >> { %1062 = vmatprep.mubr.msk.bf16.mxu0 %vm1184_vm1, %v1183_v42  ;;  %1070 = vmatprep.mubr.msk.bf16.mxu1 %vm1184_vm1, %v1183_v42 }
  0x30   : >> { %1061 = vmatpush3.bf16.msra.mxu0 %v982_v51  ;;  %1069 = vmatpush3.bf16.msra.mxu1 %v987_v52  ;;  %v1006_v51 = vld [vmem:[%s1453_s19 + $0x22] sm:$0xff] }
  0x31   : >> { %1074 = vmatprep.subr.bf16.mxu0 %v1183_v42  ;;  %1082 = vmatprep.subr.bf16.mxu1 %v1183_v42  ;;  %v753_v52 = vpack.c.bf16 %v1006_v51, %v1006_v51 }
  0x33   : >> { %1063 = vmatmul.mubr.msk.bf16.vlgmr.msra.gmra.mrb[4].mxu0 %vm299_vm2, %v399_v55  ;;  %1071 = vmatmul.mubr.msk.bf16.vlgmr.msra.gmra.mrb[4].mxu1 %vm299_vm2, %v460_v56 }
  0x34   : >> { %1075 = vmatpush3.bf16.msra.mxu0 %v990_v57  ;;  %1083 = vmatpush3.bf16.msra.mxu1 %v994_v58 }
  0x35   : >> { %1076 = vmatprep.subr.bf16.mxu0 %v1183_v42  ;;  %1084 = vmatprep.subr.bf16.mxu1 %v1183_v42 }
  0x36   : >> { %1078 = vmatprep.mubr.msk.bf16.mxu0 %vm1184_vm1, %v1183_v42  ;;  %1086 = vmatprep.mubr.msk.bf16.mxu1 %vm1184_vm1, %v1183_v42 }
  0x38   : >> { %1077 = vmatpush3.bf16.msra.mxu0 %v991_v59  ;;  %1085 = vmatpush3.bf16.msra.mxu1 %v995_v60 }
  0x39   : >> { %1090 = vmatprep.subr.bf16.mxu0 %v1183_v42  ;;  %1098 = vmatprep.subr.bf16.mxu1 %v1183_v42 }
  0x3b   : >> { %1079 = vmatmul.mubr.msk.bf16.vlgmr.msra.gmra.mrb[8].mxu0 %vm299_vm2, %v518_v63  ;;  %1087 = vmatmul.mubr.msk.bf16.vlgmr.msra.gmra.mrb[8].mxu1 %vm299_vm2, %v576_v0 }
  0x3c   : >> { %1091 = vmatpush3.bf16.msra.mxu0 %v999_v40  ;;  %1099 = vmatpush3.bf16.msra.mxu1 %v1003_v41 }
  0x3d   : >> { %1092 = vmatprep.subr.bf16.mxu0 %v1183_v42  ;;  %1100 = vmatprep.subr.bf16.mxu1 %v1183_v42 }
  0x3e   : >> { %1094 = vmatprep.mubr.msk.bf16.mxu0 %vm1184_vm1, %v1183_v42  ;;  %1102 = vmatprep.mubr.msk.bf16.mxu1 %vm1184_vm1, %v1183_v42 }
  0x40   : >> { %1093 = vmatpush3.bf16.msra.mxu0 %v1000_v43  ;;  %1101 = vmatpush3.bf16.msra.mxu1 %v1004_v44 }
  0x41   : >> { %1106 = vmatprep.subr.bf16.mxu0 %v1183_v42 }
  0x43   : >> { %1095 = vmatmul.mubr.msk.bf16.vlgmr.msra.gmra.mrb[12].mxu0 %vm299_vm2, %v637_v47  ;;  %1103 = vmatmul.mubr.msk.bf16.vlgmr.msra.gmra.mrb[12].mxu1 %vm299_vm2, %v695_v48 }
  0x44   : >> { %1107 = vmatpush3.bf16.msra.mxu0 %v1007_v49  ;;  %1110 = vmatprep.mubr.msk.bf16.mxu0 %vm1184_vm1, %v1183_v42 }
  0x45   : >> { %1108 = vmatprep.subr.bf16.mxu0 %v1183_v42 }
  0x48   : >> { %1109 = vmatpush3.bf16.msra.mxu0 %v1008_v50 }
  0x4b   : >> { %1111 = vmatmul.mubr.msk.bf16.vlgmr.msra.gmra.mrb[16].mxu0 %vm299_vm2, %v753_v52 }
  0xfe   : >> { %v337_v53 = vpop.f32.mrb[0].mxu0  ;;  %v392_v54 = vpop.f32.mrb[0].mxu1 }
  0xff   : >> { %v1048_v55 = vpop.f32.mrb[1].mxu0  ;;  %v393_v56 = vadd.f32 %v392_v54, %v337_v53  ;;  %v1056_v57 = vpop.f32.mrb[1].mxu1 }
 0x100   : >> { %v340_v58 = vpop.f32.mrb[2].mxu0  ;;  %v395_v59 = vpop.f32.mrb[2].mxu1 }
 0x101   : >> { %v1049_v60 = vpop.f32.mrb[3].mxu0  ;;  %v1057_v61 = vpop.f32.mrb[3].mxu1 }
 0x106   : >> { %v449_v62 = vpop.f32.mrb[4].mxu0  ;;  %v510_v63 = vpop.f32.mrb[4].mxu1 }
 0x107   : >> { %v455_v0 = vadd.f32 %v449_v62, %v393_v56  ;;  %v1064_v40 = vpop.f32.mrb[5].mxu0  ;;  %v1072_v41 = vpop.f32.mrb[5].mxu1 }
 0x108   : >> { %v452_v43 = vpop.f32.mrb[6].mxu0  ;;  %v513_v42 = vpop.f32.mrb[6].mxu1 }
 0x109   : >> { %v516_v44 = vadd.f32 %v510_v63, %v455_v0  ;;  %v1065_v45 = vpop.f32.mrb[7].mxu0  ;;  %v1073_v46 = vpop.f32.mrb[7].mxu1 }
 0x10e   : >> { %v568_v47 = vpop.f32.mrb[8].mxu0  ;;  %v626_v48 = vpop.f32.mrb[8].mxu1 }
 0x10f   : >> { %v574_v49 = vadd.f32 %v568_v47, %v516_v44  ;;  %v1080_v50 = vpop.f32.mrb[9].mxu0  ;;  %v1088_v51 = vpop.f32.mrb[9].mxu1 }
 0x110   : >> { %v571_v52 = vpop.f32.mrb[10].mxu0  ;;  %v629_v53 = vpop.f32.mrb[10].mxu1 }
 0x111   : >> { %v632_v54 = vadd.f32 %v626_v48, %v574_v49  ;;  %v1081_v55 = vpop.f32.mrb[11].mxu0  ;;  %v1089_v57 = vpop.f32.mrb[11].mxu1 }
 0x116   : >> { %v687_v56 = vpop.f32.mrb[12].mxu0  ;;  %v745_v58 = vpop.f32.mrb[12].mxu1 }
 0x117   : >> { %v693_v59 = vadd.f32 %v687_v56, %v632_v54  ;;  %v1096_v60 = vpop.f32.mrb[13].mxu0  ;;  %v1104_v61 = vpop.f32.mrb[13].mxu1 }
 0x118   : >> { %v690_v62 = vpop.f32.mrb[14].mxu0  ;;  %v748_v63 = vpop.f32.mrb[14].mxu1 }
 0x119   : >> { %v751_v0 = vadd.f32 %v745_v58, %v693_v59  ;;  %v1097_v40 = vpop.f32.mrb[15].mxu0  ;;  %v1105_v41 = vpop.f32.mrb[15].mxu1 }
 0x11a   : > { %v838_v40 = vld [vmem:[%s1564_s4] sm:$0x1] (%p275_p5) }
 0x11e   : >> { %v803_v43 = vpop.f32.mrb[16].mxu0 }
 0x11f   : >> { %v809_v42 = vadd.f32 %v803_v43, %v751_v0  ;;  %v1112_v44 = vpop.f32.mrb[17].mxu0 }
 0x120   : >> { %v806_v45 = vpop.f32.mrb[18].mxu0 }
 0x121   : >> { %v816_v46 = vadd.f32 %v1242_v1, %v809_v42  ;;  %v1113_v47 = vpop.f32.mrb[19].mxu0 }
 0x123   : >> { %820 = vst.msk [vmem:[%s818_s21] sm:$0xff] %vm819_vm3, %v816_v46  ;;  %v821_v48 = vsel %vm819_vm3, %v816_v46, 0.0  ;;  %v829_v49 = vmul.f32 %v816_v46, %v816_v46 }
 0x124   : >> { %v822_v50 = vrot.slane %v821_v48, 4 }
 0x125   : >> { %v830_v51 = vsel %vm819_vm3, %v829_v49, 0.0 }
 0x126   : >> { %v823_v52 = vadd.f32 %v822_v50, %v821_v48  ;;  %v831_v53 = vrot.slane %v830_v51, 4 }
 0x128   : >> { %v824_v54 = vrot.slane %v823_v52, 2  ;;  %v832_v55 = vadd.f32 %v831_v53, %v830_v51 }
 0x12a   : >> { %v825_v57 = vadd.f32 %v824_v54, %v823_v52  ;;  %v833_v56 = vrot.slane %v832_v55, 2 }
 0x12c   : >> { %v826_v58 = vrot.slane %v825_v57, 1  ;;  %v834_v59 = vadd.f32 %v833_v56, %v832_v55 }
 0x12e   : >> { %v827_v60 = vadd.f32 %v826_v58, %v825_v57  ;;  %v835_v61 = vrot.slane %v834_v59, 1  ;;  %277 = sbr.rel (!%p275_p5) target bundleno = 34 (0x22), region = 101 }
 0x130   : >> { %v828_v62 = vadd.f32 %v1176_v39, %v827_v60   ;;  %v836_v63 = vadd.f32 %v835_v61, %v834_v59 }
 0x132   : >> { %v837_v0 = vadd.f32 %v1172_v38, %v836_v63   ;;  %v1567_v39 = vmov %v828_v62  ;;  %v839_v41 = vadd.f32 (%p275_p5), %v838_v40, %v828_v62 }
 0x133   : > { %v842_v39 = vld [vmem:[%s1565_s5] sm:$0x1] (%p275_p5) }
 0x134   : >> { %v1566_v38 = vmov %v837_v0  ;;  %v843_v43 = vadd.f32 (%p275_p5), %v842_v39, %v837_v0  ;;  %841 = vst.msk [vmem:[%s1564_s4] sm:$0x1] (%p275_p5), %vm840_vm4, %v839_v41 }
 0x136   : > { %844 = vst.msk [vmem:[%s1565_s5] sm:$0x1] %vm840_vm4, %v843_v43 }
 0x137 PF: > { %s16_s18 = sadd.s32 1, %s1168_s18  }
 0x138   : > { %p13_p6 = scmp.ge.s32.totalorder %s16_s18, 4  }
 0x13a   :  { %15 = sbr.rel (!%p13_p6) target bundleno = 1 (0x1), region = 112 }

// kernel: _lambda_.45
= control target key start
LH: loop header
LB: loop body
LE: loop exit
PB: predicated region body
PF: predicated region fallthrough
CT: control target
= control target key end

     0   :  { %s1126_s18 = smov 0   ;;  %s1364_s0 = inlined_call_operand.vmem [shape: f32[2,18,18,16], index: 0, kind: input, shape index: {}]   ;;  %s1365_s1 = inlined_call_operand.vmem [shape: bf16[9,16,8], index: 1, kind: input, shape index: {}]   ;;  %s1366_s2 = inlined_call_operand.vmem [shape: f32[1,8], index: 2, kind: input, shape index: {}]   ;;  %s1367_s3 = inlined_call_operand.vmem [shape: f32[2,16,16,8], index: 3, kind: output, shape index: {0}]   ;;  %s1368_s4 = inlined_call_operand.vmem [shape: f32[1,8], index: 4, kind: output, shape index: {1}]   ;;  %s1369_s5 = inlined_call_operand.vmem [shape: f32[1,8], index: 5, kind: output, shape index: {2}]  }
   0x1 LB: > { %s893_s19 = sadd.s32 4294967295, %s1079_s18   ;;  %p897_p0 = scmp.ge.s32.totalorder %s1079_s18, 1  ;;  %s1079_s18 = sphi %s1126_s18, %s16_s18  }
   0x2   : > { %p182_p1 = scmp.lt.s32.totalorder %s1079_s18, 3 }
   0x4   : > { %p183_p2 = pnand %p897_p0, %p182_p1 }
   0x5   : > { %p210_p3 = scmp.lt.s32.totalorder (!%p183_p2), %s893_s19, 1  ;;  %p901_p4 = scmp.ne.s32.totalorder (!%p183_p2), %s893_s19, 0 }
   0x6   : > { %186 = sbr.rel (%p183_p2) target bundleno = 306 (0x132), region = 32 }
   0xd   : > { %s211_s20 = scalar_select %p210_p3, %s893_s19, 1 }
   0xe   : > { %224 = sbr.rel (%p901_p4) target bundleno = 21 (0x15), region = 36  ;;  %vm225_vm0 = vcmask (!%p901_p4), 57344   ;;  %v1093_v0 = vmov (!%p901_p4), 0.0  }
   0xf   : > { %s1025_s21 = smul.u32 432, %s211_s20  ;;  %s952_s22 = sshll.u32 %s211_s20, 8  ;;  %226 = vst.msk [vmem:[%s1368_s4] sm:$0x1] (!%p901_p4), %vm225_vm0, %v1093_v0  ;;  %227 = vst.msk [vmem:[%s1369_s5] sm:$0x1] (!%p901_p4), %vm225_vm0, %v1093_v0 }
  0x10   : > { %s1137_s25 = scalar_lea.vmem %s1367_s3, %s952_s22 }
  0x11   : > { %s1142_s28 = scalar_lea.vmem %s1364_s0, %s1025_s21 }
  0x15 PF: > { %v1153_v1 = vld [vmem:[%s1366_s2] ss:$0 sm:$0xff]  ;;  %v1163_v3 = vld [vmem:[%s1365_s1 + $0x4] sm:$0xf]  ;;  %v1168_v4 = vld [vmem:[%s1365_s1 + $0x8] sm:$0xf] }
  0x16   : > { %v1158_v2 = vld [vmem:[%s1365_s1] sm:$0xf]  ;;  %v1173_v5 = vld [vmem:[%s1365_s1 + $0xc] sm:$0xf]  ;;  %v1178_v6 = vld [vmem:[%s1365_s1 + $0x10] sm:$0xf] }
  0x17   : > { %v1183_v7 = vld [vmem:[%s1365_s1 + $0x14] sm:$0xf]  ;;  %v1188_v8 = vld [vmem:[%s1365_s1 + $0x18] sm:$0xf]  ;;  %v1193_v9 = vld [vmem:[%s1365_s1 + $0x1c] sm:$0xf] }
  0x18   : > { %v1198_v10 = vld [vmem:[%s1365_s1 + $0x20] sm:$0xf]  ;;  %v1203_v11 = vld [vmem:[%s1365_s1 + $0x24] sm:$0xf]  ;;  %v1208_v12 = vld [vmem:[%s1365_s1 + $0x28] sm:$0xf] }
  0x19   : > { %v1213_v13 = vld [vmem:[%s1365_s1 + $0x2c] sm:$0xf]  ;;  %v1218_v14 = vld [vmem:[%s1365_s1 + $0x30] sm:$0xf]  ;;  %v1223_v15 = vld [vmem:[%s1365_s1 + $0x34] sm:$0xf] }
  0x1a   : > { %v1228_v16 = vld [vmem:[%s1365_s1 + $0x38] sm:$0xf]  ;;  %v1233_v17 = vld [vmem:[%s1365_s1 + $0x3c] sm:$0xf]  ;;  %v1238_v18 = vld [vmem:[%s1365_s1 + $0x40] sm:$0xf] }
  0x1b   : > { %v1243_v19 = vld [vmem:[%s1365_s1 + $0x44] sm:$0xf]  ;;  %v1245_v20 = vmov 0.0   ;;  %v1247_v21 = vmov 0.0   ;;  %s1249_s26 = smov 0  }
  0x1c LB: >> { %v918_v22 = vcombine.low %v1168_v4, %v1173_v5  ;;  %v920_v23 = vcombine.low %v1158_v2, %v1163_v3  ;;  %v1094_v24 = vmov 0.0   ;;  %s263_s27 = smul.u32 24, %s1091_s26  ;;  %vm1095_vm1 = vmmov 0   ;;  %s949_s30 = sshll.u32 %s1091_s26, 4  ;;  %s1091_s26 = sphi %s1249_s26, %s260_s26   ;;  %v1087_v21 = vphi %v1247_v21, %v1371_v21   ;;  %v1083_v20 = vphi %v1245_v20, %v1370_v20  }
  0x1d   : >> { %971 = vmatprep.subr.bf16.mxu0 %v1094_v24  ;;  %977 = vmatprep.subr.bf16.mxu1 %v1094_v24  ;;  %vm277_vm2 = vcmask 130048   ;;  %v922_v28 = vcombine.low %v1178_v6, %v1183_v7  ;;  %v926_v31 = vcombine.low %v1188_v8, %v1193_v9  ;;  %v930_v38 = vcombine.low %v1198_v10, %v1203_v11  ;;  %s772_s6 = scalar_lea.vmem %s1137_s25, %s949_s30  ;;  %s260_s26 = sadd.s32 1, %s1091_s26  }
  0x1e   : >> { %972 = vmatpush3.bf16.msra.mxu0 %v918_v22  ;;  %978 = vmatpush3.bf16.msra.mxu1 %v920_v23  ;;  %s1273_s29 = scalar_lea.vmem %s1142_s28, %s263_s27  ;;  %v934_v40 = vcombine.low %v1208_v12, %v1213_v13  ;;  %v938_v46 = vcombine.low %v1218_v14, %v1223_v15  ;;  %v942_v48 = vcombine.low %v1228_v16, %v1233_v17  ;;  %vm773_vm3 = vcmask 64512   ;;  %p257_p5 = scmp.ge.s32.totalorder %s260_s26, 16  }
  0x1f   : >> { %973 = vmatprep.mubr.msk.bf16.mxu0 %vm1095_vm1, %v1094_v24  ;;  %979 = vmatprep.mubr.msk.bf16.mxu1 %vm1095_vm1, %v1094_v24  ;;  %v268_v25 = vld [vmem:[%s1273_s29 + $0x1] sm:$0xff]  ;;  %v269_v26 = vld [vmem:[%s1273_s29 + $0x9] sm:$0xff]  ;;  %v924_v35 = vld [vmem:[%s1273_s29 + $0x18] sm:$0xff]  ;;  %v946_v54 = vcombine.low %v1238_v18, %v1243_v19  ;;  %vm800_vm4 = vcmask (%p257_p5), 57344  }
  0x20   : >> { %983 = vmatprep.subr.bf16.mxu0 %v1094_v24  ;;  %989 = vmatprep.subr.bf16.mxu1 %v1094_v24  ;;  %v265_v27 = vld [vmem:[%s1273_s29] sm:$0xff]  ;;  %v270_v29 = vpack.c.bf16 %v269_v26, %v268_v25  ;;  %v266_v30 = vld [vmem:[%s1273_s29 + $0x8] sm:$0xff]  ;;  %v936_v49 = vld [vmem:[%s1273_s29 + $0x30] sm:$0xff] }
  0x21   : >> { %v267_v32 = vpack.c.bf16 %v266_v30, %v265_v27  ;;  %v372_v33 = vld [vmem:[%s1273_s29 + $0x2] sm:$0xff]  ;;  %v373_v34 = vld [vmem:[%s1273_s29 + $0xa] sm:$0xff]  ;;  %v928_v41 = vld [vmem:[%s1273_s29 + $0x19] sm:$0xff] }
  0x22   : >> { %974 = vmatmul.mubr.msk.bf16.vlgmr.msra.gmra.mrb[0].mxu0 %vm277_vm2, %v270_v29  ;;  %v925_v36 = vld [vmem:[%s1273_s29 + $0x20] sm:$0xff]  ;;  %v374_v37 = vpack.c.bf16 %v373_v34, %v372_v33  ;;  %v937_v50 = vld [vmem:[%s1273_s29 + $0x38] sm:$0xff] }
  0x23   : >> { %980 = vmatmul.mubr.msk.bf16.vlgmr.msra.gmra.mrb[0].mxu1 %vm277_vm2, %v267_v32  ;;  %984 = vmatpush3.bf16.msra.mxu0 %v922_v28  ;;  %v432_v39 = vpack.c.bf16 %v925_v36, %v924_v35  ;;  %v929_v42 = vld [vmem:[%s1273_s29 + $0x21] sm:$0xff]  ;;  %v940_v51 = vld [vmem:[%s1273_s29 + $0x31] sm:$0xff]  ;;  %v941_v52 = vld [vmem:[%s1273_s29 + $0x39] sm:$0xff]  ;;  %v600_v53 = vpack.c.bf16 %v937_v50, %v936_v49 }
  0x24   : >> { %990 = vmatpush3.bf16.msra.mxu1 %v926_v31  ;;  %985 = vmatprep.mubr.msk.bf16.mxu0 %vm1095_vm1, %v1094_v24  ;;  %v932_v43 = vld [vmem:[%s1273_s29 + $0x1a] sm:$0xff]  ;;  %v933_v44 = vld [vmem:[%s1273_s29 + $0x22] sm:$0xff]  ;;  %v487_v45 = vpack.c.bf16 %v929_v42, %v928_v41  ;;  %v655_v55 = vpack.c.bf16 %v941_v52, %v940_v51  ;;  %v944_v56 = vld [vmem:[%s1273_s29 + $0x32] sm:$0xff] }
  0x25   : >> { %995 = vmatprep.subr.bf16.mxu0 %v1094_v24  ;;  %991 = vmatprep.mubr.msk.bf16.mxu1 %vm1095_vm1, %v1094_v24  ;;  %v542_v47 = vpack.c.bf16 %v933_v44, %v932_v43  ;;  %v945_v57 = vld [vmem:[%s1273_s29 + $0x3a] sm:$0xff] }
  0x26   : >> { %1001 = vmatprep.subr.bf16.mxu1 %v1094_v24  ;;  %v710_v58 = vpack.c.bf16 %v945_v57, %v944_v56 }
  0x2a   : >> { %986 = vmatmul.mubr.msk.bf16.vlgmr.msra.gmra.mrb[4].mxu0 %vm277_vm2, %v374_v37 }
  0x2b   : >> { %996 = vmatpush3.bf16.msra.mxu0 %v930_v38  ;;  %992 = vmatmul.mubr.msk.bf16.vlgmr.msra.gmra.mrb[4].mxu1 %vm277_vm2, %v432_v39 }
  0x2c   : >> { %1002 = vmatpush3.bf16.msra.mxu1 %v934_v40  ;;  %997 = vmatprep.mubr.msk.bf16.mxu0 %vm1095_vm1, %v1094_v24 }
  0x2d   : >> { %1007 = vmatprep.subr.bf16.mxu0 %v1094_v24  ;;  %1003 = vmatprep.mubr.msk.bf16.mxu1 %vm1095_vm1, %v1094_v24 }
  0x2e   : >> { %1013 = vmatprep.subr.bf16.mxu1 %v1094_v24 }
  0x32   : >> { %998 = vmatmul.mubr.msk.bf16.vlgmr.msra.gmra.mrb[8].mxu0 %vm277_vm2, %v487_v45 }
  0x33   : >> { %1008 = vmatpush3.bf16.msra.mxu0 %v938_v46  ;;  %1004 = vmatmul.mubr.msk.bf16.vlgmr.msra.gmra.mrb[8].mxu1 %vm277_vm2, %v542_v47 }
  0x34   : >> { %1014 = vmatpush3.bf16.msra.mxu1 %v942_v48  ;;  %1009 = vmatprep.mubr.msk.bf16.mxu0 %vm1095_vm1, %v1094_v24 }
  0x35   : >> { %1019 = vmatprep.subr.bf16.mxu0 %v1094_v24  ;;  %1015 = vmatprep.mubr.msk.bf16.mxu1 %vm1095_vm1, %v1094_v24 }
  0x3a   : >> { %1010 = vmatmul.mubr.msk.bf16.vlgmr.msra.gmra.mrb[12].mxu0 %vm277_vm2, %v600_v53 }
  0x3b   : >> { %1020 = vmatpush3.bf16.msra.mxu0 %v946_v54  ;;  %1016 = vmatmul.mubr.msk.bf16.vlgmr.msra.gmra.mrb[12].mxu1 %vm277_vm2, %v655_v55 }
  0x3c   : >> { %1021 = vmatprep.mubr.msk.bf16.mxu0 %vm1095_vm1, %v1094_v24 }
  0x42   : >> { %1022 = vmatmul.mubr.msk.bf16.vlgmr.msra.gmra.mrb[16].mxu0 %vm277_vm2, %v710_v58 }
  0xf5   : >> { %v315_v59 = vpop.f32.mrb[0].mxu0 }
  0xf6   : >> { %v365_v60 = vpop.f32.mrb[0].mxu1  ;;  %v975_v61 = vpop.f32.mrb[1].mxu0 }
  0xf7   : >> { %v366_v62 = vadd.f32 %v365_v60, %v315_v59  ;;  %v981_v63 = vpop.f32.mrb[1].mxu1  ;;  %v318_v0 = vpop.f32.mrb[2].mxu0 }
  0xf8   : >> { %v368_v22 = vpop.f32.mrb[2].mxu1  ;;  %v976_v23 = vpop.f32.mrb[3].mxu0 }
  0xf9   : >> { %v369_v25 = vadd.f32 %v368_v22, %v318_v0  ;;  %v982_v26 = vpop.f32.mrb[3].mxu1 }
  0xfd   : >> { %v418_v27 = vpop.f32.mrb[4].mxu0 }
  0xfe   : >> { %v425_v28 = vadd.f32 %v418_v27, %v366_v62  ;;  %v987_v29 = vpop.f32.mrb[5].mxu0  ;;  %v476_v30 = vpop.f32.mrb[4].mxu1 }
  0xff   : >> { %v421_v31 = vpop.f32.mrb[6].mxu0  ;;  %v993_v32 = vpop.f32.mrb[5].mxu1 }
 0x100   : >> { %v426_v24 = vadd.f32 %v421_v31, %v369_v25  ;;  %v483_v33 = vadd.f32 %v476_v30, %v425_v28  ;;  %v988_v34 = vpop.f32.mrb[7].mxu0  ;;  %v479_v35 = vpop.f32.mrb[6].mxu1 }
 0x101   : >> { %v994_v36 = vpop.f32.mrb[7].mxu1 }
 0x102   : >> { %v484_v37 = vadd.f32 %v479_v35, %v426_v24 }
 0x105   : >> { %v531_v38 = vpop.f32.mrb[8].mxu0 }
 0x106   : >> { %v538_v39 = vadd.f32 %v531_v38, %v483_v33  ;;  %v999_v40 = vpop.f32.mrb[9].mxu0  ;;  %v586_v41 = vpop.f32.mrb[8].mxu1 }
 0x107   : >> { %v534_v42 = vpop.f32.mrb[10].mxu0  ;;  %v1005_v43 = vpop.f32.mrb[9].mxu1 }
 0x108   : >> { %v539_v44 = vadd.f32 %v534_v42, %v484_v37  ;;  %v593_v45 = vadd.f32 %v586_v41, %v538_v39  ;;  %v1000_v46 = vpop.f32.mrb[11].mxu0  ;;  %v589_v47 = vpop.f32.mrb[10].mxu1 }
 0x109   : >> { %v1006_v48 = vpop.f32.mrb[11].mxu1 }
 0x10a   : >> { %v594_v49 = vadd.f32 %v589_v47, %v539_v44 }
 0x10d   : >> { %v644_v50 = vpop.f32.mrb[12].mxu0 }
 0x10e   : >> { %v651_v51 = vadd.f32 %v644_v50, %v593_v45  ;;  %v1011_v52 = vpop.f32.mrb[13].mxu0  ;;  %v699_v53 = vpop.f32.mrb[12].mxu1 }
 0x10f   : >> { %v647_v54 = vpop.f32.mrb[14].mxu0  ;;  %v1017_v55 = vpop.f32.mrb[13].mxu1 }
 0x110   : >> { %v652_v56 = vadd.f32 %v647_v54, %v594_v49  ;;  %v706_v57 = vadd.f32 %v699_v53, %v651_v51  ;;  %v1012_v58 = vpop.f32.mrb[15].mxu0  ;;  %v702_v59 = vpop.f32.mrb[14].mxu1  ;;  %v798_v49 = vld [vmem:[%s1368_s4] sm:$0x1] (%p257_p5) }
 0x111   : >> { %v1018_v60 = vpop.f32.mrb[15].mxu1 }
 0x112   : >> { %v707_v61 = vadd.f32 %v702_v59, %v652_v56 }
 0x115   : >> { %v754_v62 = vpop.f32.mrb[16].mxu0 }
 0x116   : >> { %v761_v63 = vadd.f32 %v754_v62, %v706_v57  ;;  %v1023_v0 = vpop.f32.mrb[17].mxu0 }
 0x117   : >> { %v757_v22 = vpop.f32.mrb[18].mxu0 }
 0x118   : >> { %v769_v23 = vadd.f32 %v1153_v1, %v761_v63  ;;  %v762_v25 = vadd.f32 %v757_v22, %v707_v61  ;;  %v1024_v26 = vpop.f32.mrb[19].mxu0 }
 0x11a   : >> { %774 = vst.msk [vmem:[%s772_s6] sm:$0xff] %vm773_vm3, %v769_v23  ;;  %v786_v27 = vmul.f32 %v769_v23, %v769_v23  ;;  %v770_v28 = vadd.f32 %v1153_v1, %v762_v25  ;;  %v776_v29 = vsel %vm773_vm3, %v769_v23, 0.0 }
 0x11c   : >> { %775 = vst.msk [vmem:[%s772_s6 + $0x8] sm:$0xff] %vm773_vm3, %v770_v28  ;;  %v777_v30 = vsel %vm773_vm3, %v770_v28, 0.0  ;;  %v787_v31 = vmul.f32 %v770_v28, %v770_v28  ;;  %v788_v24 = vsel %vm773_vm3, %v786_v27, 0.0 }
 0x11d   : >> { %v778_v32 = vadd.f32 %v777_v30, %v776_v29 }
 0x11e   : >> { %v789_v33 = vsel %vm773_vm3, %v787_v31, 0.0 }
 0x11f   : >> { %v779_v34 = vrot.slane %v778_v32, 4  ;;  %v790_v35 = vadd.f32 %v789_v33, %v788_v24 }
 0x121   : >> { %v780_v36 = vadd.f32 %v779_v34, %v778_v32  ;;  %v791_v37 = vrot.slane %v790_v35, 4 }
 0x123   : >> { %v781_v38 = vrot.slane %v780_v36, 2  ;;  %v792_v39 = vadd.f32 %v791_v37, %v790_v35 }
 0x125   : >> { %v782_v40 = vadd.f32 %v781_v38, %v780_v36  ;;  %v793_v41 = vrot.slane %v792_v39, 2 }
 0x127   : >> { %v783_v42 = vrot.slane %v782_v40, 1  ;;  %v794_v43 = vadd.f32 %v793_v41, %v792_v39 }
 0x129   : >> { %v784_v44 = vadd.f32 %v783_v42, %v782_v40  ;;  %v795_v45 = vrot.slane %v794_v43, 1  ;;  %259 = sbr.rel (!%p257_p5) target bundleno = 28 (0x1c), region = 101 }
 0x12b   : >> { %v785_v46 = vadd.f32 %v1087_v21, %v784_v44   ;;  %v796_v47 = vadd.f32 %v795_v45, %v794_v43 }
 0x12d   : >> { %v797_v48 = vadd.f32 %v1083_v20, %v796_v47   ;;  %v1371_v21 = vmov %v785_v46  ;;  %v799_v50 = vadd.f32 (%p257_p5), %v798_v49, %v785_v46 }
 0x12e   : > { %v802_v21 = vld [vmem:[%s1369_s5] sm:$0x1] (%p257_p5) }
 0x12f   : >> { %v1370_v20 = vmov %v797_v48  ;;  %v803_v51 = vadd.f32 (%p257_p5), %v802_v21, %v797_v48  ;;  %801 = vst.msk [vmem:[%s1368_s4] sm:$0x1] (%p257_p5), %vm800_vm4, %v799_v50 }
 0x131   : > { %804 = vst.msk [vmem:[%s1369_s5] sm:$0x1] %vm800_vm4, %v803_v51 }
 0x132 PF: > { %s16_s18 = sadd.s32 1, %s1079_s18  }
 0x133   : > { %p13_p6 = scmp.ge.s32.totalorder %s16_s18, 4  }
 0x135   :  { %15 = sbr.rel (!%p13_p6) target bundleno = 1 (0x1), region = 112 }

// kernel: _lambda_.49
= control target key start
LH: loop header
LB: loop body
LE: loop exit
PB: predicated region body
PF: predicated region fallthrough
CT: control target
= control target key end

     0   :  { %vm216_vm0 = vcmask 1043456   ;;  %vm119_vm1 = vcmask 64512   ;;  %vm509_vm2 = vcmask 31744   ;;  %s1286_s1 = inlined_call_operand.vmem [shape: bf16[8,4], index: 1, kind: input, shape index: {}]   ;;  %s1287_s0 = inlined_call_operand.vmem [shape: f32[512,8], index: 0, kind: input, shape index: {}]   ;;  %s1288_s2 = inlined_call_operand.vmem [shape: f32[1,4], index: 2, kind: input, shape index: {}]   ;;  %s1289_s3 = inlined_call_operand.vmem [shape: f32[512,4], index: 3, kind: output, shape index: {}]  }
   0x1   :  { %v111_v0 = vld [vmem:[%s1286_s1] sm:$0xf]  ;;  %v16_v2 = vld [vmem:[%s1287_s0 + $0x8] sm:$0xff]  ;;  %v17_v7 = vld [vmem:[%s1287_s0 + $0x10] sm:$0xff] }
   0x2   :  { %v15_v1 = vld [vmem:[%s1287_s0] sm:$0xff]  ;;  %712 = vmatprep.subr.msk.bf16.mxu0 %vm216_vm0, %v111_v0  ;;  %713 = vmatprep.subr.msk.bf16.mxu1 %vm216_vm0, %v111_v0  ;;  %v218_v3 = vsel %vm216_vm0, %v111_v0, 0  ;;  %v48_v6 = vld [vmem:[%s1287_s0 + $0x108] sm:$0xff]  ;;  %v18_v9 = vld [vmem:[%s1287_s0 + $0x18] sm:$0xff] }
   0x3   :  { %v79_v4 = vpack.c.bf16 %v16_v2, %v15_v1  ;;  %v47_v5 = vld [vmem:[%s1287_s0 + $0x100] sm:$0xff]  ;;  %645 = vmatpush3.bf16.msra.mxu0 %v218_v3  ;;  %711 = vmatpush3.bf16.msra.mxu1 %v218_v3  ;;  %v49_v10 = vld [vmem:[%s1287_s0 + $0x110] sm:$0xff]  ;;  %v50_v11 = vld [vmem:[%s1287_s0 + $0x118] sm:$0xff]  ;;  %v80_v12 = vpack.c.bf16 %v18_v9, %v17_v7 }
   0x4   :  { %v95_v8 = vpack.c.bf16 %v48_v6, %v47_v5  ;;  %v96_v13 = vpack.c.bf16 %v50_v11, %v49_v10  ;;  %v19_v14 = vld [vmem:[%s1287_s0 + $0x20] sm:$0xff]  ;;  %v20_v15 = vld [vmem:[%s1287_s0 + $0x28] sm:$0xff]  ;;  %v21_v20 = vld [vmem:[%s1287_s0 + $0x30] sm:$0xff] }
   0x5   :  { %646 = vmatprep.mubr.msk.bf16.mxu0 %vm119_vm1, %v79_v4  ;;  %v51_v16 = vld [vmem:[%s1287_s0 + $0x120] sm:$0xff]  ;;  %v81_v17 = vpack.c.bf16 %v20_v15, %v19_v14  ;;  %v52_v18 = vld [vmem:[%s1287_s0 + $0x128] sm:$0xff]  ;;  %v22_v21 = vld [vmem:[%s1287_s0 + $0x38] sm:$0xff] }
   0x6   :  { %678 = vmatprep.mubr.msk.bf16.mxu1 %vm119_vm1, %v95_v8  ;;  %647 = vmatmul.mubr.msk.bf16.vlgmr.msra.gmra.mrb[0].mxu0 %vm119_vm1, %v80_v12  ;;  %v97_v19 = vpack.c.bf16 %v52_v18, %v51_v16  ;;  %v53_v22 = vld [vmem:[%s1287_s0 + $0x130] sm:$0xff]  ;;  %v54_v23 = vld [vmem:[%s1287_s0 + $0x138] sm:$0xff]  ;;  %v23_v24 = vld [vmem:[%s1287_s0 + $0x40] sm:$0xff]  ;;  %v82_v28 = vpack.c.bf16 %v22_v21, %v21_v20 }
   0x7   :  { %679 = vmatmul.mubr.msk.bf16.vlgmr.msra.gmra.mrb[0].mxu1 %vm119_vm1, %v96_v13  ;;  %650 = vmatprep.mubr.msk.bf16.mxu0 %vm119_vm1, %v81_v17  ;;  %v24_v25 = vld [vmem:[%s1287_s0 + $0x48] sm:$0xff]  ;;  %v55_v26 = vld [vmem:[%s1287_s0 + $0x140] sm:$0xff]  ;;  %v98_v29 = vpack.c.bf16 %v54_v23, %v53_v22  ;;  %v25_v32 = vld [vmem:[%s1287_s0 + $0x50] sm:$0xff] }
   0x8   :  { %682 = vmatprep.mubr.msk.bf16.mxu1 %vm119_vm1, %v97_v19  ;;  %v56_v27 = vld [vmem:[%s1287_s0 + $0x148] sm:$0xff]  ;;  %v83_v30 = vpack.c.bf16 %v24_v25, %v23_v24  ;;  %v26_v33 = vld [vmem:[%s1287_s0 + $0x58] sm:$0xff]  ;;  %v57_v34 = vld [vmem:[%s1287_s0 + $0x150] sm:$0xff] }
   0x9   :  { %v99_v31 = vpack.c.bf16 %v56_v27, %v55_v26  ;;  %v58_v35 = vld [vmem:[%s1287_s0 + $0x158] sm:$0xff]  ;;  %v27_v36 = vld [vmem:[%s1287_s0 + $0x60] sm:$0xff]  ;;  %v28_v37 = vld [vmem:[%s1287_s0 + $0x68] sm:$0xff]  ;;  %v84_v40 = vpack.c.bf16 %v26_v33, %v25_v32 }
   0xa   :  { %v59_v38 = vld [vmem:[%s1287_s0 + $0x160] sm:$0xff]  ;;  %v60_v39 = vld [vmem:[%s1287_s0 + $0x168] sm:$0xff]  ;;  %v100_v41 = vpack.c.bf16 %v58_v35, %v57_v34  ;;  %v85_v42 = vpack.c.bf16 %v28_v37, %v27_v36  ;;  %v29_v44 = vld [vmem:[%s1287_s0 + $0x70] sm:$0xff] }
   0xb   :  { %v101_v43 = vpack.c.bf16 %v60_v39, %v59_v38  ;;  %v30_v45 = vld [vmem:[%s1287_s0 + $0x78] sm:$0xff]  ;;  %v61_v46 = vld [vmem:[%s1287_s0 + $0x170] sm:$0xff]  ;;  %v31_v48 = vld [vmem:[%s1287_s0 + $0x80] sm:$0xff] }
   0xc   :  { %v62_v47 = vld [vmem:[%s1287_s0 + $0x178] sm:$0xff]  ;;  %v32_v49 = vld [vmem:[%s1287_s0 + $0x88] sm:$0xff]  ;;  %v63_v50 = vld [vmem:[%s1287_s0 + $0x180] sm:$0xff]  ;;  %v86_v52 = vpack.c.bf16 %v30_v45, %v29_v44 }
   0xd   :  { %v64_v51 = vld [vmem:[%s1287_s0 + $0x188] sm:$0xff]  ;;  %v102_v53 = vpack.c.bf16 %v62_v47, %v61_v46  ;;  %v87_v54 = vpack.c.bf16 %v32_v49, %v31_v48  ;;  %v33_v56 = vld [vmem:[%s1287_s0 + $0x90] sm:$0xff]  ;;  %v34_v57 = vld [vmem:[%s1287_s0 + $0x98] sm:$0xff] }
   0xe   :  { %651 = vmatmul.mubr.msk.bf16.gmra.mrb[4].mxu0 %vm119_vm1, %v82_v28  ;;  %v103_v55 = vpack.c.bf16 %v64_v51, %v63_v50  ;;  %v65_v58 = vld [vmem:[%s1287_s0 + $0x190] sm:$0xff]  ;;  %v66_v59 = vld [vmem:[%s1287_s0 + $0x198] sm:$0xff]  ;;  %v35_v60 = vld [vmem:[%s1287_s0 + $0xa0] sm:$0xff]  ;;  %v88_v0 = vpack.c.bf16 %v34_v57, %v33_v56 }
   0xf   :  { %683 = vmatmul.mubr.msk.bf16.gmra.mrb[4].mxu1 %vm119_vm1, %v98_v29  ;;  %654 = vmatprep.mubr.msk.bf16.mxu0 %vm119_vm1, %v83_v30  ;;  %v36_v61 = vld [vmem:[%s1287_s0 + $0xa8] sm:$0xff]  ;;  %v67_v62 = vld [vmem:[%s1287_s0 + $0x1a0] sm:$0xff]  ;;  %v104_v1 = vpack.c.bf16 %v66_v59, %v65_v58  ;;  %v37_v4 = vld [vmem:[%s1287_s0 + $0xb0] sm:$0xff] }
  0x10   :  { %686 = vmatprep.mubr.msk.bf16.mxu1 %vm119_vm1, %v99_v31  ;;  %v68_v63 = vld [vmem:[%s1287_s0 + $0x1a8] sm:$0xff]  ;;  %v89_v2 = vpack.c.bf16 %v36_v61, %v35_v60  ;;  %v38_v5 = vld [vmem:[%s1287_s0 + $0xb8] sm:$0xff]  ;;  %v69_v6 = vld [vmem:[%s1287_s0 + $0x1b0] sm:$0xff] }
  0x11   :  { %v105_v3 = vpack.c.bf16 %v68_v63, %v67_v62  ;;  %v70_v7 = vld [vmem:[%s1287_s0 + $0x1b8] sm:$0xff]  ;;  %v39_v8 = vld [vmem:[%s1287_s0 + $0xc0] sm:$0xff]  ;;  %v40_v9 = vld [vmem:[%s1287_s0 + $0xc8] sm:$0xff]  ;;  %v90_v12 = vpack.c.bf16 %v38_v5, %v37_v4 }
  0x12   :  { %v71_v10 = vld [vmem:[%s1287_s0 + $0x1c0] sm:$0xff]  ;;  %v72_v11 = vld [vmem:[%s1287_s0 + $0x1c8] sm:$0xff]  ;;  %v106_v13 = vpack.c.bf16 %v70_v7, %v69_v6  ;;  %v91_v14 = vpack.c.bf16 %v40_v9, %v39_v8  ;;  %v41_v16 = vld [vmem:[%s1287_s0 + $0xd0] sm:$0xff] }
  0x13   :  { %v107_v15 = vpack.c.bf16 %v72_v11, %v71_v10  ;;  %v42_v17 = vld [vmem:[%s1287_s0 + $0xd8] sm:$0xff]  ;;  %v73_v18 = vld [vmem:[%s1287_s0 + $0x1d0] sm:$0xff]  ;;  %v43_v20 = vld [vmem:[%s1287_s0 + $0xe0] sm:$0xff] }
  0x14   :  { %v74_v19 = vld [vmem:[%s1287_s0 + $0x1d8] sm:$0xff]  ;;  %v44_v21 = vld [vmem:[%s1287_s0 + $0xe8] sm:$0xff]  ;;  %v75_v22 = vld [vmem:[%s1287_s0 + $0x1e0] sm:$0xff]  ;;  %v92_v24 = vpack.c.bf16 %v42_v17, %v41_v16 }
  0x15   :  { %v76_v23 = vld [vmem:[%s1287_s0 + $0x1e8] sm:$0xff]  ;;  %v108_v25 = vpack.c.bf16 %v74_v19, %v73_v18  ;;  %v93_v26 = vpack.c.bf16 %v44_v21, %v43_v20  ;;  %v45_v28 = vld [vmem:[%s1287_s0 + $0xf0] sm:$0xff]  ;;  %v46_v29 = vld [vmem:[%s1287_s0 + $0xf8] sm:$0xff] }
  0x16   :  { %655 = vmatmul.mubr.msk.bf16.gmra.mrb[8].mxu0 %vm119_vm1, %v84_v40  ;;  %v109_v27 = vpack.c.bf16 %v76_v23, %v75_v22  ;;  %v77_v30 = vld [vmem:[%s1287_s0 + $0x1f0] sm:$0xff]  ;;  %v78_v31 = vld [vmem:[%s1287_s0 + $0x1f8] sm:$0xff]  ;;  %v94_v32 = vpack.c.bf16 %v46_v29, %v45_v28  ;;  %v964_v34 = vld [vmem:[%s1288_s2] ss:$0 sm:$0xff] }
  0x17   :  { %687 = vmatmul.mubr.msk.bf16.gmra.mrb[8].mxu1 %vm119_vm1, %v100_v41  ;;  %658 = vmatprep.mubr.msk.bf16.mxu0 %vm119_vm1, %v85_v42  ;;  %v110_v33 = vpack.c.bf16 %v78_v31, %v77_v30 }
  0x18   :  { %690 = vmatprep.mubr.msk.bf16.mxu1 %vm119_vm1, %v101_v43 }
  0x1e   :  { %659 = vmatmul.mubr.msk.bf16.gmra.mrb[12].mxu0 %vm119_vm1, %v86_v52 }
  0x1f   :  { %691 = vmatmul.mubr.msk.bf16.gmra.mrb[12].mxu1 %vm119_vm1, %v102_v53  ;;  %662 = vmatprep.mubr.msk.bf16.mxu0 %vm119_vm1, %v87_v54 }
  0x20   :  { %694 = vmatprep.mubr.msk.bf16.mxu1 %vm119_vm1, %v103_v55 }
  0x26   :  { %663 = vmatmul.mubr.msk.bf16.gmra.mrb[16].mxu0 %vm119_vm1, %v88_v0 }
  0x27   :  { %695 = vmatmul.mubr.msk.bf16.gmra.mrb[16].mxu1 %vm119_vm1, %v104_v1  ;;  %666 = vmatprep.mubr.msk.bf16.mxu0 %vm119_vm1, %v89_v2 }
  0x28   :  { %698 = vmatprep.mubr.msk.bf16.mxu1 %vm119_vm1, %v105_v3 }
  0x2e   :  { %667 = vmatmul.mubr.msk.bf16.gmra.mrb[20].mxu0 %vm119_vm1, %v90_v12 }
  0x2f   :  { %699 = vmatmul.mubr.msk.bf16.gmra.mrb[20].mxu1 %vm119_vm1, %v106_v13  ;;  %670 = vmatprep.mubr.msk.bf16.mxu0 %vm119_vm1, %v91_v14 }
  0x30   :  { %702 = vmatprep.mubr.msk.bf16.mxu1 %vm119_vm1, %v107_v15 }
  0x36   :  { %671 = vmatmul.mubr.msk.bf16.gmra.mrb[24].mxu0 %vm119_vm1, %v92_v24 }
  0x37   :  { %703 = vmatmul.mubr.msk.bf16.gmra.mrb[24].mxu1 %vm119_vm1, %v108_v25  ;;  %674 = vmatprep.mubr.msk.bf16.mxu0 %vm119_vm1, %v93_v26 }
  0x38   :  { %706 = vmatprep.mubr.msk.bf16.mxu1 %vm119_vm1, %v109_v27 }
  0x3e   :  { %675 = vmatmul.mubr.msk.bf16.gmra.mrb[28].mxu0 %vm119_vm1, %v94_v32 }
  0x3f   :  { %707 = vmatmul.mubr.msk.bf16.gmra.mrb[28].mxu1 %vm119_vm1, %v110_v33 }
  0xd9   :  { %v648_v35 = vpop.f32.mrb[0].mxu0 }
  0xda   :  { %v680_v36 = vpop.f32.mrb[0].mxu1  ;;  %v263_v37 = vadd.f32 %v648_v35, %v964_v34  ;;  %v254_v39 = vpop.f32.mrb[1].mxu0 }
  0xdb   :  { %v391_v38 = vadd.f32 %v680_v36, %v964_v34  ;;  %v382_v40 = vpop.f32.mrb[1].mxu1  ;;  %v255_v41 = vadd.f32 %v964_v34, %v254_v39  ;;  %v649_v43 = vpop.f32.mrb[2].mxu0 }
  0xdc   :  { %v383_v42 = vadd.f32 %v964_v34, %v382_v40  ;;  %v681_v44 = vpop.f32.mrb[2].mxu1  ;;  %512 = vst.msk [vmem:[%s1289_s3 + $0x10] sm:$0xff] %vm509_vm2, %v263_v37  ;;  %v266_v45 = vadd.f32 %v649_v43, %v964_v34  ;;  %v257_v47 = vpop.f32.mrb[3].mxu0 }
  0xdd   :  { %544 = vst.msk [vmem:[%s1289_s3 + $0x110] sm:$0xff] %vm509_vm2, %v391_v38  ;;  %v394_v46 = vadd.f32 %v681_v44, %v964_v34  ;;  %v385_v48 = vpop.f32.mrb[3].mxu1  ;;  %510 = vst.msk [vmem:[%s1289_s3] sm:$0xff] %vm509_vm2, %v255_v41  ;;  %v258_v49 = vadd.f32 %v964_v34, %v257_v47 }
  0xde   :  { %542 = vst.msk [vmem:[%s1289_s3 + $0x100] sm:$0xff] %vm509_vm2, %v383_v42  ;;  %v386_v50 = vadd.f32 %v964_v34, %v385_v48  ;;  %513 = vst.msk [vmem:[%s1289_s3 + $0x18] sm:$0xff] %vm509_vm2, %v266_v45 }
  0xdf   :  { %545 = vst.msk [vmem:[%s1289_s3 + $0x118] sm:$0xff] %vm509_vm2, %v394_v46  ;;  %511 = vst.msk [vmem:[%s1289_s3 + $0x8] sm:$0xff] %vm509_vm2, %v258_v49 }
  0xe0   :  { %543 = vst.msk [vmem:[%s1289_s3 + $0x108] sm:$0xff] %vm509_vm2, %v386_v50 }
  0xe1   :  { %v652_v51 = vpop.f32.mrb[4].mxu0 }
  0xe2   :  { %v684_v52 = vpop.f32.mrb[4].mxu1  ;;  %v279_v53 = vadd.f32 %v652_v51, %v964_v34  ;;  %v270_v55 = vpop.f32.mrb[5].mxu0 }
  0xe3   :  { %v407_v54 = vadd.f32 %v684_v52, %v964_v34  ;;  %v398_v56 = vpop.f32.mrb[5].mxu1  ;;  %v271_v57 = vadd.f32 %v964_v34, %v270_v55  ;;  %v653_v59 = vpop.f32.mrb[6].mxu0 }
  0xe4   :  { %v399_v58 = vadd.f32 %v964_v34, %v398_v56  ;;  %v685_v60 = vpop.f32.mrb[6].mxu1  ;;  %516 = vst.msk [vmem:[%s1289_s3 + $0x30] sm:$0xff] %vm509_vm2, %v279_v53  ;;  %v282_v61 = vadd.f32 %v653_v59, %v964_v34  ;;  %v273_v63 = vpop.f32.mrb[7].mxu0 }
  0xe5   :  { %548 = vst.msk [vmem:[%s1289_s3 + $0x130] sm:$0xff] %vm509_vm2, %v407_v54  ;;  %v410_v62 = vadd.f32 %v685_v60, %v964_v34  ;;  %v401_v0 = vpop.f32.mrb[7].mxu1  ;;  %514 = vst.msk [vmem:[%s1289_s3 + $0x20] sm:$0xff] %vm509_vm2, %v271_v57  ;;  %v274_v1 = vadd.f32 %v964_v34, %v273_v63 }
  0xe6   :  { %546 = vst.msk [vmem:[%s1289_s3 + $0x120] sm:$0xff] %vm509_vm2, %v399_v58  ;;  %v402_v2 = vadd.f32 %v964_v34, %v401_v0  ;;  %517 = vst.msk [vmem:[%s1289_s3 + $0x38] sm:$0xff] %vm509_vm2, %v282_v61 }
  0xe7   :  { %549 = vst.msk [vmem:[%s1289_s3 + $0x138] sm:$0xff] %vm509_vm2, %v410_v62  ;;  %515 = vst.msk [vmem:[%s1289_s3 + $0x28] sm:$0xff] %vm509_vm2, %v274_v1 }
  0xe8   :  { %547 = vst.msk [vmem:[%s1289_s3 + $0x128] sm:$0xff] %vm509_vm2, %v402_v2 }
  0xe9   :  { %v656_v3 = vpop.f32.mrb[8].mxu0 }
  0xea   :  { %v688_v4 = vpop.f32.mrb[8].mxu1  ;;  %v295_v5 = vadd.f32 %v656_v3, %v964_v34  ;;  %v286_v7 = vpop.f32.mrb[9].mxu0 }
  0xeb   :  { %v423_v6 = vadd.f32 %v688_v4, %v964_v34  ;;  %v414_v8 = vpop.f32.mrb[9].mxu1  ;;  %v287_v9 = vadd.f32 %v964_v34, %v286_v7  ;;  %v657_v11 = vpop.f32.mrb[10].mxu0 }
  0xec   :  { %v415_v10 = vadd.f32 %v964_v34, %v414_v8  ;;  %v689_v12 = vpop.f32.mrb[10].mxu1  ;;  %520 = vst.msk [vmem:[%s1289_s3 + $0x50] sm:$0xff] %vm509_vm2, %v295_v5  ;;  %v298_v13 = vadd.f32 %v657_v11, %v964_v34  ;;  %v289_v15 = vpop.f32.mrb[11].mxu0 }
  0xed   :  { %552 = vst.msk [vmem:[%s1289_s3 + $0x150] sm:$0xff] %vm509_vm2, %v423_v6  ;;  %v426_v14 = vadd.f32 %v689_v12, %v964_v34  ;;  %v417_v16 = vpop.f32.mrb[11].mxu1  ;;  %518 = vst.msk [vmem:[%s1289_s3 + $0x40] sm:$0xff] %vm509_vm2, %v287_v9  ;;  %v290_v17 = vadd.f32 %v964_v34, %v289_v15 }
  0xee   :  { %550 = vst.msk [vmem:[%s1289_s3 + $0x140] sm:$0xff] %vm509_vm2, %v415_v10  ;;  %v418_v18 = vadd.f32 %v964_v34, %v417_v16  ;;  %521 = vst.msk [vmem:[%s1289_s3 + $0x58] sm:$0xff] %vm509_vm2, %v298_v13 }
  0xef   :  { %553 = vst.msk [vmem:[%s1289_s3 + $0x158] sm:$0xff] %vm509_vm2, %v426_v14  ;;  %519 = vst.msk [vmem:[%s1289_s3 + $0x48] sm:$0xff] %vm509_vm2, %v290_v17 }
  0xf0   :  { %551 = vst.msk [vmem:[%s1289_s3 + $0x148] sm:$0xff] %vm509_vm2, %v418_v18 }
  0xf1   :  { %v660_v19 = vpop.f32.mrb[12].mxu0 }
  0xf2   :  { %v692_v20 = vpop.f32.mrb[12].mxu1  ;;  %v311_v21 = vadd.f32 %v660_v19, %v964_v34  ;;  %v302_v23 = vpop.f32.mrb[13].mxu0 }
  0xf3   :  { %v439_v22 = vadd.f32 %v692_v20, %v964_v34  ;;  %v430_v24 = vpop.f32.mrb[13].mxu1  ;;  %v303_v25 = vadd.f32 %v964_v34, %v302_v23  ;;  %v661_v27 = vpop.f32.mrb[14].mxu0 }
  0xf4   :  { %v431_v26 = vadd.f32 %v964_v34, %v430_v24  ;;  %v693_v28 = vpop.f32.mrb[14].mxu1  ;;  %524 = vst.msk [vmem:[%s1289_s3 + $0x70] sm:$0xff] %vm509_vm2, %v311_v21  ;;  %v314_v29 = vadd.f32 %v661_v27, %v964_v34  ;;  %v305_v31 = vpop.f32.mrb[15].mxu0 }
  0xf5   :  { %556 = vst.msk [vmem:[%s1289_s3 + $0x170] sm:$0xff] %vm509_vm2, %v439_v22  ;;  %v442_v30 = vadd.f32 %v693_v28, %v964_v34  ;;  %v433_v32 = vpop.f32.mrb[15].mxu1  ;;  %522 = vst.msk [vmem:[%s1289_s3 + $0x60] sm:$0xff] %vm509_vm2, %v303_v25  ;;  %v306_v33 = vadd.f32 %v964_v34, %v305_v31 }
  0xf6   :  { %554 = vst.msk [vmem:[%s1289_s3 + $0x160] sm:$0xff] %vm509_vm2, %v431_v26  ;;  %v434_v35 = vadd.f32 %v964_v34, %v433_v32  ;;  %525 = vst.msk [vmem:[%s1289_s3 + $0x78] sm:$0xff] %vm509_vm2, %v314_v29 }
  0xf7   :  { %557 = vst.msk [vmem:[%s1289_s3 + $0x178] sm:$0xff] %vm509_vm2, %v442_v30  ;;  %523 = vst.msk [vmem:[%s1289_s3 + $0x68] sm:$0xff] %vm509_vm2, %v306_v33 }
  0xf8   :  { %555 = vst.msk [vmem:[%s1289_s3 + $0x168] sm:$0xff] %vm509_vm2, %v434_v35 }
  0xf9   :  { %v664_v36 = vpop.f32.mrb[16].mxu0 }
  0xfa   :  { %v696_v37 = vpop.f32.mrb[16].mxu1  ;;  %v327_v38 = vadd.f32 %v664_v36, %v964_v34  ;;  %v318_v40 = vpop.f32.mrb[17].mxu0 }
  0xfb   :  { %v455_v39 = vadd.f32 %v696_v37, %v964_v34  ;;  %v446_v41 = vpop.f32.mrb[17].mxu1  ;;  %v319_v42 = vadd.f32 %v964_v34, %v318_v40  ;;  %v665_v44 = vpop.f32.mrb[18].mxu0 }
  0xfc   :  { %v447_v43 = vadd.f32 %v964_v34, %v446_v41  ;;  %v697_v45 = vpop.f32.mrb[18].mxu1  ;;  %528 = vst.msk [vmem:[%s1289_s3 + $0x90] sm:$0xff] %vm509_vm2, %v327_v38  ;;  %v330_v46 = vadd.f32 %v665_v44, %v964_v34  ;;  %v321_v48 = vpop.f32.mrb[19].mxu0 }
  0xfd   :  { %560 = vst.msk [vmem:[%s1289_s3 + $0x190] sm:$0xff] %vm509_vm2, %v455_v39  ;;  %v458_v47 = vadd.f32 %v697_v45, %v964_v34  ;;  %v449_v49 = vpop.f32.mrb[19].mxu1  ;;  %526 = vst.msk [vmem:[%s1289_s3 + $0x80] sm:$0xff] %vm509_vm2, %v319_v42  ;;  %v322_v50 = vadd.f32 %v964_v34, %v321_v48 }
  0xfe   :  { %558 = vst.msk [vmem:[%s1289_s3 + $0x180] sm:$0xff] %vm509_vm2, %v447_v43  ;;  %v450_v51 = vadd.f32 %v964_v34, %v449_v49  ;;  %529 = vst.msk [vmem:[%s1289_s3 + $0x98] sm:$0xff] %vm509_vm2, %v330_v46 }
  0xff   :  { %561 = vst.msk [vmem:[%s1289_s3 + $0x198] sm:$0xff] %vm509_vm2, %v458_v47  ;;  %527 = vst.msk [vmem:[%s1289_s3 + $0x88] sm:$0xff] %vm509_vm2, %v322_v50 }
 0x100   :  { %559 = vst.msk [vmem:[%s1289_s3 + $0x188] sm:$0xff] %vm509_vm2, %v450_v51 }
 0x101   :  { %v668_v52 = vpop.f32.mrb[20].mxu0 }
 0x102   :  { %v700_v53 = vpop.f32.mrb[20].mxu1  ;;  %v343_v54 = vadd.f32 %v668_v52, %v964_v34  ;;  %v334_v56 = vpop.f32.mrb[21].mxu0 }
 0x103   :  { %v471_v55 = vadd.f32 %v700_v53, %v964_v34  ;;  %v462_v57 = vpop.f32.mrb[21].mxu1  ;;  %v335_v58 = vadd.f32 %v964_v34, %v334_v56  ;;  %v669_v60 = vpop.f32.mrb[22].mxu0 }
 0x104   :  { %v463_v59 = vadd.f32 %v964_v34, %v462_v57  ;;  %v701_v61 = vpop.f32.mrb[22].mxu1  ;;  %532 = vst.msk [vmem:[%s1289_s3 + $0xb0] sm:$0xff] %vm509_vm2, %v343_v54  ;;  %v346_v62 = vadd.f32 %v669_v60, %v964_v34  ;;  %v337_v0 = vpop.f32.mrb[23].mxu0 }
 0x105   :  { %564 = vst.msk [vmem:[%s1289_s3 + $0x1b0] sm:$0xff] %vm509_vm2, %v471_v55  ;;  %v474_v63 = vadd.f32 %v701_v61, %v964_v34  ;;  %v465_v1 = vpop.f32.mrb[23].mxu1  ;;  %530 = vst.msk [vmem:[%s1289_s3 + $0xa0] sm:$0xff] %vm509_vm2, %v335_v58  ;;  %v338_v2 = vadd.f32 %v964_v34, %v337_v0 }
 0x106   :  { %562 = vst.msk [vmem:[%s1289_s3 + $0x1a0] sm:$0xff] %vm509_vm2, %v463_v59  ;;  %v466_v3 = vadd.f32 %v964_v34, %v465_v1  ;;  %533 = vst.msk [vmem:[%s1289_s3 + $0xb8] sm:$0xff] %vm509_vm2, %v346_v62 }
 0x107   :  { %565 = vst.msk [vmem:[%s1289_s3 + $0x1b8] sm:$0xff] %vm509_vm2, %v474_v63  ;;  %531 = vst.msk [vmem:[%s1289_s3 + $0xa8] sm:$0xff] %vm509_vm2, %v338_v2 }
 0x108   :  { %563 = vst.msk [vmem:[%s1289_s3 + $0x1a8] sm:$0xff] %vm509_vm2, %v466_v3 }
 0x109   :  { %v672_v4 = vpop.f32.mrb[24].mxu0 }
 0x10a   :  { %v704_v5 = vpop.f32.mrb[24].mxu1  ;;  %v359_v6 = vadd.f32 %v672_v4, %v964_v34  ;;  %v350_v8 = vpop.f32.mrb[25].mxu0 }
 0x10b   :  { %v487_v7 = vadd.f32 %v704_v5, %v964_v34  ;;  %v478_v9 = vpop.f32.mrb[25].mxu1  ;;  %v351_v10 = vadd.f32 %v964_v34, %v350_v8  ;;  %v673_v12 = vpop.f32.mrb[26].mxu0 }
 0x10c   :  { %v479_v11 = vadd.f32 %v964_v34, %v478_v9  ;;  %v705_v13 = vpop.f32.mrb[26].mxu1  ;;  %536 = vst.msk [vmem:[%s1289_s3 + $0xd0] sm:$0xff] %vm509_vm2, %v359_v6  ;;  %v362_v14 = vadd.f32 %v673_v12, %v964_v34  ;;  %v353_v16 = vpop.f32.mrb[27].mxu0 }
 0x10d   :  { %568 = vst.msk [vmem:[%s1289_s3 + $0x1d0] sm:$0xff] %vm509_vm2, %v487_v7  ;;  %v490_v15 = vadd.f32 %v705_v13, %v964_v34  ;;  %v481_v17 = vpop.f32.mrb[27].mxu1  ;;  %534 = vst.msk [vmem:[%s1289_s3 + $0xc0] sm:$0xff] %vm509_vm2, %v351_v10  ;;  %v354_v18 = vadd.f32 %v964_v34, %v353_v16 }
 0x10e   :  { %566 = vst.msk [vmem:[%s1289_s3 + $0x1c0] sm:$0xff] %vm509_vm2, %v479_v11  ;;  %v482_v19 = vadd.f32 %v964_v34, %v481_v17  ;;  %537 = vst.msk [vmem:[%s1289_s3 + $0xd8] sm:$0xff] %vm509_vm2, %v362_v14 }
 0x10f   :  { %569 = vst.msk [vmem:[%s1289_s3 + $0x1d8] sm:$0xff] %vm509_vm2, %v490_v15  ;;  %535 = vst.msk [vmem:[%s1289_s3 + $0xc8] sm:$0xff] %vm509_vm2, %v354_v18 }
 0x110   :  { %567 = vst.msk [vmem:[%s1289_s3 + $0x1c8] sm:$0xff] %vm509_vm2, %v482_v19 }
 0x111   :  { %v676_v20 = vpop.f32.mrb[28].mxu0 }
 0x112   :  { %v708_v21 = vpop.f32.mrb[28].mxu1  ;;  %v375_v22 = vadd.f32 %v676_v20, %v964_v34  ;;  %v366_v24 = vpop.f32.mrb[29].mxu0 }
 0x113   :  { %v503_v23 = vadd.f32 %v708_v21, %v964_v34  ;;  %v494_v25 = vpop.f32.mrb[29].mxu1  ;;  %v367_v26 = vadd.f32 %v964_v34, %v366_v24  ;;  %v677_v28 = vpop.f32.mrb[30].mxu0 }
 0x114   :  { %v495_v27 = vadd.f32 %v964_v34, %v494_v25  ;;  %v709_v29 = vpop.f32.mrb[30].mxu1  ;;  %540 = vst.msk [vmem:[%s1289_s3 + $0xf0] sm:$0xff] %vm509_vm2, %v375_v22  ;;  %v378_v30 = vadd.f32 %v677_v28, %v964_v34  ;;  %v369_v32 = vpop.f32.mrb[31].mxu0 }
 0x115   :  { %572 = vst.msk [vmem:[%s1289_s3 + $0x1f0] sm:$0xff] %vm509_vm2, %v503_v23  ;;  %v506_v31 = vadd.f32 %v709_v29, %v964_v34  ;;  %v497_v33 = vpop.f32.mrb[31].mxu1  ;;  %538 = vst.msk [vmem:[%s1289_s3 + $0xe0] sm:$0xff] %vm509_vm2, %v367_v26  ;;  %v370_v35 = vadd.f32 %v964_v34, %v369_v32 }
 0x116   :  { %570 = vst.msk [vmem:[%s1289_s3 + $0x1e0] sm:$0xff] %vm509_vm2, %v495_v27  ;;  %v498_v36 = vadd.f32 %v964_v34, %v497_v33  ;;  %541 = vst.msk [vmem:[%s1289_s3 + $0xf8] sm:$0xff] %vm509_vm2, %v378_v30 }
 0x117   :  { %573 = vst.msk [vmem:[%s1289_s3 + $0x1f8] sm:$0xff] %vm509_vm2, %v506_v31  ;;  %539 = vst.msk [vmem:[%s1289_s3 + $0xe8] sm:$0xff] %vm509_vm2, %v370_v35 }
 0x118   :  { %571 = vst.msk [vmem:[%s1289_s3 + $0x1e8] sm:$0xff] %vm509_vm2, %v498_v36 }

</bundles_post_ra>
